<compile_context>
chip_gen: v7x
topology: tpu7x:2x2x1
jax: 0.10.0
libtpu: 0.0.40
codegen_flags: <defaults>
</compile_context>

<pallas_src>
import jax
import jax.numpy as jnp
from jax.experimental import pallas as pl
from jax.experimental.pallas import tpu as pltpu

N = 8      # nodes per graph
H = 32     # hidden_dim
CD = 2     # 2-D coordinates
LANES = 128


def equi_attention_kernel(h_ref, x_ref,
                          wqkv_ref, bqkv_ref,
                          we1_ref, be1_ref,
                          wec_ref, bec_ref,
                          out_ref):
    f32 = jnp.float32
    gb, n, hd = h_ref.shape
    cd = x_ref.shape[-1]

    h3 = h_ref[...].astype(f32)                      # [Gb, N, H]
    x3 = x_ref[...].astype(f32)                      # [Gb, N, 2]

    # ---------------- attention over node features ----------------
    # One [Gb*N, H] @ [H, 3H] MXU matmul for the whole block of graphs.
    h2 = h3.reshape(gb * n, hd)
    qkv = jnp.dot(h2, wqkv_ref[...], preferred_element_type=f32) + bqkv_ref[...]   # [Gb*N, 3H]
    qkv3 = qkv.reshape(gb, n, 3 * hd)
    q = qkv3[:, :, :hd]           # 1/sqrt(H) already folded into Wq/bq in the wrapper
    k = qkv3[:, :, hd:2 * hd]
    v = qkv3[:, :, 2 * hd:]

    # Per-graph (block-diagonal) attention via batched einsums.
    scores = jnp.einsum('gqd,gkd->gqk', q, k, preferred_element_type=f32)           # [Gb, N, N]
    scores = scores - jnp.max(scores, axis=-1, keepdims=True)
    e = jnp.exp(scores)
    denom = jnp.sum(e, axis=-1, keepdims=True)                                      # [Gb, N, 1]
    r = pl.reciprocal(denom, approx=True)            # EUP vrcp (idle slot) ...
    r = r * (2.0 - denom * r)                        # ... + one Newton step for f32 accuracy
    attn = e * r                                                                     # [Gb, N, N]

    agg_h = jnp.einsum('gqk,gkd->gqd', attn, v, preferred_element_type=f32)         # [Gb, N, H]
    h_new = h3 + agg_h

    # ---------------- equivariant coordinate update ----------------
    # xw = x @ We1 via two VPU broadcast-FMAs (avoid a K=2 MXU matmul).
    xw = x3[:, :, 0:1] * we1_ref[0:1, :] + x3[:, :, 1:2] * we1_ref[1:2, :]          # [Gb, N, H]
    # edge[g,i,j,:] = ReLU((x_i - x_j) We1 + b1) = ReLU(xw_i - xw_j + b1)
    edge = jnp.maximum(xw[:, :, None, :] - xw[:, None, :, :] + be1_ref[...], 0.0)   # [Gb,N,N,H]
    # cs[g,i,j] = edge . (We2 @ Wc) + (b2 @ Wc + bc)    (folded edge-MLP tail)
    cs = jnp.sum(edge * wec_ref[...], axis=-1) + bec_ref[...]                       # [Gb, N, N]

    acs = attn * cs                                                                  # [Gb, N, N]
    s = jnp.sum(acs, axis=-1, keepdims=True)                                         # [Gb, N, 1]
    t = jnp.einsum('gij,gjc->gic', acs, x3, preferred_element_type=f32)              # [Gb, N, 2]
    x_new = x3 + x3 * s - t                                                           # [Gb, N, 2]

    # ---------------- lane-dense packed store: [Gb, N, 128] = (h | x | pad) ----------------
    pad_w = out_ref.shape[-1] - hd - cd
    pieces = [h_new, x_new]
    if pad_w > 0:
        pieces.append(jnp.zeros((gb, n, pad_w), f32))
    out_ref[...] = jnp.concatenate(pieces, axis=-1).astype(out_ref.dtype)


def _largest_divisor_leq(n, cap):
    for d in range(min(n, cap), 0, -1):
        if n % d == 0:
            return d
    return 1


def equi_attention_block_batched(h, x, params, *, block_graphs=32):
    """Batched forward over G independent graphs: h [G,N,H], x [G,N,2]."""
    wq, bq, wk, bk, wv, bv, we1, be1, we2, be2, wc, bc = params
    G, n, hd = h.shape
    cd = x.shape[-1]
    assert hd + cd <= LANES

    # --- wrapper-side weight folding (exact algebraic rewrites) ---
    inv_sqrt_h = 1.0 / (hd ** 0.5)
    wqkv = jnp.concatenate([wq * inv_sqrt_h, wk, wv], axis=1)     # [H, 3H]  (scale folded into q)
    bqkv = jnp.concatenate([bq * inv_sqrt_h, bk, bv], axis=1)     # [1, 3H]
    wec = (we2 @ wc).T                                            # [1, H]   We2 @ Wc
    bec = be2 @ wc + bc                                           # [1, 1]   b2 @ Wc + bc

    gb = _largest_divisor_leq(G, block_graphs)
    grid = (G // gb,)

    graph_spec = lambda shape: pl.BlockSpec(shape, lambda g: (g, 0, 0))
    const_spec = lambda arr: pl.BlockSpec(arr.shape, lambda g: (0, 0))  # VMEM-resident weights

    in_specs = [
        graph_spec((gb, n, hd)),      # h
        graph_spec((gb, n, cd)),      # x
        const_spec(wqkv), const_spec(bqkv),
        const_spec(we1), const_spec(be1),
        const_spec(wec), const_spec(bec),
    ]
    out_spec = graph_spec((gb, n, LANES))

    # Per-block VMEM footprint (inputs + packed output + [Gb,N,N,H] edge intermediate)
    # is well under a MiB at these sizes, so no vmem_limit_bytes override is needed
    # even on v7x's smaller VMEM.
    packed = pl.pallas_call(
        equi_attention_kernel,
        out_shape=jax.ShapeDtypeStruct((G, n, LANES), h.dtype),
        grid=grid,
        in_specs=in_specs,
        out_specs=out_spec,
        compiler_params=pltpu.CompilerParams(dimension_semantics=("parallel",)),
    )(h, x, wqkv, bqkv, we1, be1, wec, bec)

    h_out = packed[:, :, :hd]
    x_out = packed[:, :, hd:hd + cd]
    return h_out, x_out


def equi_attention_block(h, x, batch, params):
    """Single-graph forward, signature-compatible with the PyTorch module.
    `batch` is accepted for parity but unused (the PyTorch forward never uses it)."""
    del batch
    h_out, x_out = equi_attention_block_batched(h[None], x[None], params, block_graphs=1)
    return h_out[0], x_out[0]


def init_params(key, hidden_dim):
    """Deterministic torch-nn.Linear-style init; weights returned as [in, out]."""
    def linear(k, fan_in, fan_out):
        k1, k2 = jax.random.split(k)
        bound = 1.0 / (fan_in ** 0.5)
        w = jax.random.uniform(k1, (fan_in, fan_out), jnp.float32, -bound, bound)
        b = jax.random.uniform(k2, (1, fan_out), jnp.float32, -bound, bound)
        return w, b

    keys = jax.random.split(key, 6)
    wq, bq = linear(keys[0], hidden_dim, hidden_dim)    # to_q
    wk, bk = linear(keys[1], hidden_dim, hidden_dim)    # to_k
    wv, bv = linear(keys[2], hidden_dim, hidden_dim)    # to_v
    we1, be1 = linear(keys[3], 2, hidden_dim)           # edge_mlp[0]
    we2, be2 = linear(keys[4], hidden_dim, hidden_dim)  # edge_mlp[2]
    wc, bc = linear(keys[5], hidden_dim, 1)             # coord_mlp
    return (wq, bq, wk, bk, wv, bv, we1, be1, we2, be2, wc, bc)


def equi_attention_reference(h, x, params):
    """Pure-JAX reference mirroring the PyTorch forward (single graph)."""
    wq, bq, wk, bk, wv, bv, we1, be1, we2, be2, wc, bc = params
    rel_x = x[:, None, :] - x[None, :, :]                        # [N, N, 2]
    edge_feat = jnp.maximum(rel_x @ we1 + be1[0], 0.0) @ we2 + be2[0]
    q = h @ wq + bq[0]
    k = h @ wk + bk[0]
    v = h @ wv + bv[0]
    attn = jax.nn.softmax((q[:, None, :] * k[None, :, :]).sum(-1) / (h.shape[-1] ** 0.5), axis=-1)
    agg_h = attn @ v
    delta_x = (edge_feat @ wc + bc[0]) * rel_x                   # [N, N, 2]
    delta_x = jnp.sum(attn[..., None] * delta_x, axis=1)         # [N, 2]
    return h + agg_h, x + delta_x


if __name__ == "__main__":
    key = jax.random.PRNGKey(0)
    kh, kx, kp = jax.random.split(key, 3)

    G = 256   # graphs, batched through the grid (32 graphs per grid step)
    h = jax.random.normal(kh, (G, N, H), jnp.float32)
    x = jax.random.normal(kx, (G, N, CD), jnp.float32)
    params = init_params(kp, H)

    h_out, x_out = equi_attention_block_batched(h, x, params, block_graphs=32)
    jax.block_until_ready((h_out, x_out))

    h_ref, x_ref = jax.vmap(lambda hh, xx: equi_attention_reference(hh, xx, params))(h, x)
    assert jnp.allclose(h_out, h_ref, rtol=1e-4, atol=1e-4), float(jnp.max(jnp.abs(h_out - h_ref)))
    assert jnp.allclose(x_out, x_ref, rtol=1e-4, atol=1e-4), float(jnp.max(jnp.abs(x_out - x_ref)))

    # Single-graph path (module-compatible signature).
    batch = jnp.zeros((N,), jnp.int32)   # unused by the forward pass
    h1, x1 = equi_attention_block(h[0], x[0], batch, params)
    jax.block_until_ready((h1, x1))
    assert jnp.allclose(h1, h_ref[0], rtol=1e-4, atol=1e-4)
    assert jnp.allclose(x1, x_ref[0], rtol=1e-4, atol=1e-4)

    print("KERNEL_OK")
</pallas_src>

<mosaic_0001>
module attributes {stable_mosaic.version = 11 : i64} {
  func.func @equi_attention_kernel(%arg0: i32, %arg1: memref<32x8x32xf32, #tpu.memory_space<vmem>>, %arg2: memref<32x8x2xf32, #tpu.memory_space<vmem>>, %arg3: memref<32x96xf32, #tpu.memory_space<vmem>>, %arg4: memref<1x96xf32, #tpu.memory_space<vmem>>, %arg5: memref<2x32xf32, #tpu.memory_space<vmem>>, %arg6: memref<1x32xf32, #tpu.memory_space<vmem>>, %arg7: memref<1x32xf32, #tpu.memory_space<vmem>>, %arg8: memref<1x1xf32, #tpu.memory_space<vmem>>, %arg9: memref<32x8x128xf32, #tpu.memory_space<vmem>>) attributes {dimension_semantics = [#tpu.dimension_semantics<parallel>], iteration_bounds = array<i64: 8>, scalar_prefetch = 0 : i64, scratch_operands = 0 : i64, tpu.core_type = #tpu.core_type<tc>, window_params = [{transform_indices = @transform_0, window_bounds = array<i64: 32, 8, 32>}, {transform_indices = @transform_1, window_bounds = array<i64: 32, 8, 2>}, {pipeline_mode = #tpu.pipeline_mode<synchronous>, transform_indices = @transform_2, window_bounds = array<i64: 32, 96>}, {pipeline_mode = #tpu.pipeline_mode<synchronous>, transform_indices = @transform_3, window_bounds = array<i64: 1, 96>}, {pipeline_mode = #tpu.pipeline_mode<synchronous>, transform_indices = @transform_4, window_bounds = array<i64: 2, 32>}, {pipeline_mode = #tpu.pipeline_mode<synchronous>, transform_indices = @transform_5, window_bounds = array<i64: 1, 32>}, {pipeline_mode = #tpu.pipeline_mode<synchronous>, transform_indices = @transform_6, window_bounds = array<i64: 1, 32>}, {pipeline_mode = #tpu.pipeline_mode<synchronous>, transform_indices = @transform_7, window_bounds = array<i64: 1, 1>}, {transform_indices = @transform_8, window_bounds = array<i64: 32, 8, 128>}]} {
    %c0 = arith.constant 0 : index
    %c0_0 = arith.constant 0 : index
    %c0_1 = arith.constant 0 : index
    %0 = vector.load %arg1[%c0, %c0_0, %c0_1] : memref<32x8x32xf32, #tpu.memory_space<vmem>>, vector<32x8x32xf32>
    %c0_2 = arith.constant 0 : index
    %c0_3 = arith.constant 0 : index
    %c0_4 = arith.constant 0 : index
    %1 = vector.load %arg2[%c0_2, %c0_3, %c0_4] : memref<32x8x2xf32, #tpu.memory_space<vmem>>, vector<32x8x2xf32>
    %2 = vector.shape_cast %0 : vector<32x8x32xf32> to vector<256x32xf32>
    %c0_5 = arith.constant 0 : index
    %c0_6 = arith.constant 0 : index
    %3 = vector.load %arg3[%c0_5, %c0_6] : memref<32x96xf32, #tpu.memory_space<vmem>>, vector<32x96xf32>
    %cst = arith.constant dense<0.000000e+00> : vector<256x96xf32>
    %4 = tpu.matmul %2, %3, %cst {dimension_numbers = #tpu.dot_dimension_numbers<[1], [0], [0], [1], [0, 0, 1, 1], [], []>} : vector<256x32xf32>, vector<32x96xf32>, vector<256x96xf32> -> vector<256x96xf32>
    %c0_7 = arith.constant 0 : index
    %c0_8 = arith.constant 0 : index
    %5 = vector.load %arg4[%c0_7, %c0_8] : memref<1x96xf32, #tpu.memory_space<vmem>>, vector<1x96xf32>
    %6 = vector.broadcast %5 : vector<1x96xf32> to vector<256x96xf32>
    %7 = arith.addf %4, %6 : vector<256x96xf32>
    %8 = vector.shape_cast %7 : vector<256x96xf32> to vector<32x8x96xf32>
    %9 = vector.extract_strided_slice %8 {offsets = [0, 0, 0], sizes = [32, 8, 32], strides = [1, 1, 1]} : vector<32x8x96xf32> to vector<32x8x32xf32>
    %10 = vector.extract_strided_slice %8 {offsets = [0, 0, 32], sizes = [32, 8, 32], strides = [1, 1, 1]} : vector<32x8x96xf32> to vector<32x8x32xf32>
    %11 = vector.extract_strided_slice %8 {offsets = [0, 0, 64], sizes = [32, 8, 32], strides = [1, 1, 1]} : vector<32x8x96xf32> to vector<32x8x32xf32>
    "tpu.trace_start"() <{level = 10 : i32, message = "gqd,gkd->gqk"}> : () -> ()
    %cst_9 = arith.constant dense<0.000000e+00> : vector<32x8x8xf32>
    %12 = tpu.matmul %9, %10, %cst_9 {dimension_numbers = #tpu.dot_dimension_numbers<[2], [2], [1], [1], [0, 0, 0, 1, 1, 1], [0], [0]>} : vector<32x8x32xf32>, vector<32x8x32xf32>, vector<32x8x8xf32> -> vector<32x8x8xf32>
    "tpu.trace_stop"() : () -> ()
    %cst_10 = arith.constant dense<0xFF800000> : vector<32x8xf32>
    %13 = vector.multi_reduction <maximumf>, %12, %cst_10 [2] : vector<32x8x8xf32> to vector<32x8xf32>
    %14 = vector.shape_cast %13 : vector<32x8xf32> to vector<32x8x1xf32>
    %15 = vector.broadcast %14 : vector<32x8x1xf32> to vector<32x8x8xf32>
    %16 = arith.subf %12, %15 : vector<32x8x8xf32>
    %17 = math.exp %16 : vector<32x8x8xf32>
    %cst_11 = arith.constant dense<0.000000e+00> : vector<32x8xf32>
    %18 = vector.multi_reduction <add>, %17, %cst_11 [2] : vector<32x8x8xf32> to vector<32x8xf32>
    %19 = vector.shape_cast %18 : vector<32x8xf32> to vector<32x8x1xf32>
    %20 = tpu.reciprocal %19 {approx = true} : vector<32x8x1xf32> -> vector<32x8x1xf32>
    %21 = arith.mulf %19, %20 : vector<32x8x1xf32>
    %cst_12 = arith.constant 2.000000e+00 : f32
    %22 = vector.broadcast %cst_12 : f32 to vector<32x8x1xf32>
    %23 = arith.subf %22, %21 : vector<32x8x1xf32>
    %24 = arith.mulf %20, %23 : vector<32x8x1xf32>
    %25 = vector.broadcast %24 : vector<32x8x1xf32> to vector<32x8x8xf32>
    %26 = arith.mulf %17, %25 : vector<32x8x8xf32>
    "tpu.trace_start"() <{level = 10 : i32, message = "gqk,gkd->gqd"}> : () -> ()
    %cst_13 = arith.constant dense<0.000000e+00> : vector<32x8x32xf32>
    %27 = tpu.matmul %26, %11, %cst_13 {dimension_numbers = #tpu.dot_dimension_numbers<[2], [1], [1], [2], [0, 0, 0, 1, 1, 2], [0], [0]>} : vector<32x8x8xf32>, vector<32x8x32xf32>, vector<32x8x32xf32> -> vector<32x8x32xf32>
    "tpu.trace_stop"() : () -> ()
    %28 = arith.addf %0, %27 : vector<32x8x32xf32>
    %29 = vector.extract_strided_slice %1 {offsets = [0, 0, 0], sizes = [32, 8, 1], strides = [1, 1, 1]} : vector<32x8x2xf32> to vector<32x8x1xf32>
    %c0_14 = arith.constant 0 : index
    %c0_15 = arith.constant 0 : index
    %30 = vector.load %arg5[%c0_14, %c0_15] : memref<2x32xf32, #tpu.memory_space<vmem>>, vector<1x32xf32>
    %31 = vector.shape_cast %30 : vector<1x32xf32> to vector<1x1x32xf32>
    %32 = vector.broadcast %29 : vector<32x8x1xf32> to vector<32x8x32xf32>
    %33 = vector.broadcast %31 : vector<1x1x32xf32> to vector<32x8x32xf32>
    %34 = arith.mulf %32, %33 : vector<32x8x32xf32>
    %35 = vector.extract_strided_slice %1 {offsets = [0, 0, 1], sizes = [32, 8, 1], strides = [1, 1, 1]} : vector<32x8x2xf32> to vector<32x8x1xf32>
    %c1 = arith.constant 1 : index
    %c0_16 = arith.constant 0 : index
    %36 = vector.load %arg5[%c1, %c0_16] : memref<2x32xf32, #tpu.memory_space<vmem>>, vector<1x32xf32>
    %37 = vector.shape_cast %36 : vector<1x32xf32> to vector<1x1x32xf32>
    %38 = vector.broadcast %35 : vector<32x8x1xf32> to vector<32x8x32xf32>
    %39 = vector.broadcast %37 : vector<1x1x32xf32> to vector<32x8x32xf32>
    %40 = arith.mulf %38, %39 : vector<32x8x32xf32>
    %41 = arith.addf %34, %40 : vector<32x8x32xf32>
    %42 = vector.shape_cast %41 : vector<32x8x32xf32> to vector<32x8x1x32xf32>
    %43 = vector.shape_cast %41 : vector<32x8x32xf32> to vector<32x1x8x32xf32>
    %44 = vector.broadcast %42 : vector<32x8x1x32xf32> to vector<32x8x8x32xf32>
    %45 = vector.broadcast %43 : vector<32x1x8x32xf32> to vector<32x8x8x32xf32>
    %46 = arith.subf %44, %45 : vector<32x8x8x32xf32>
    %c0_17 = arith.constant 0 : index
    %c0_18 = arith.constant 0 : index
    %47 = vector.load %arg6[%c0_17, %c0_18] : memref<1x32xf32, #tpu.memory_space<vmem>>, vector<1x32xf32>
    %48 = vector.shape_cast %47 : vector<1x32xf32> to vector<1x1x1x32xf32>
    %49 = vector.broadcast %48 : vector<1x1x1x32xf32> to vector<32x8x8x32xf32>
    %50 = arith.addf %46, %49 : vector<32x8x8x32xf32>
    %cst_19 = arith.constant 0.000000e+00 : f32
    %51 = vector.broadcast %cst_19 : f32 to vector<32x8x8x32xf32>
    %52 = arith.maximumf %50, %51 : vector<32x8x8x32xf32>
    %c0_20 = arith.constant 0 : index
    %c0_21 = arith.constant 0 : index
    %53 = vector.load %arg7[%c0_20, %c0_21] : memref<1x32xf32, #tpu.memory_space<vmem>>, vector<1x32xf32>
    %54 = vector.shape_cast %53 : vector<1x32xf32> to vector<1x1x1x32xf32>
    %55 = vector.broadcast %54 : vector<1x1x1x32xf32> to vector<32x8x8x32xf32>
    %56 = arith.mulf %52, %55 : vector<32x8x8x32xf32>
    %cst_22 = arith.constant dense<0.000000e+00> : vector<32x8x8xf32>
    %57 = vector.multi_reduction <add>, %56, %cst_22 [3] : vector<32x8x8x32xf32> to vector<32x8x8xf32>
    %c0_23 = arith.constant 0 : index
    %c0_24 = arith.constant 0 : index
    %58 = vector.load %arg8[%c0_23, %c0_24] : memref<1x1xf32, #tpu.memory_space<vmem>>, vector<1x1xf32>
    %59 = vector.shape_cast %58 : vector<1x1xf32> to vector<1x1x1xf32>
    %60 = vector.broadcast %59 : vector<1x1x1xf32> to vector<32x8x8xf32>
    %61 = arith.addf %57, %60 : vector<32x8x8xf32>
    %62 = arith.mulf %26, %61 : vector<32x8x8xf32>
    %cst_25 = arith.constant dense<0.000000e+00> : vector<32x8xf32>
    %63 = vector.multi_reduction <add>, %62, %cst_25 [2] : vector<32x8x8xf32> to vector<32x8xf32>
    %64 = vector.shape_cast %63 : vector<32x8xf32> to vector<32x8x1xf32>
    "tpu.trace_start"() <{level = 10 : i32, message = "gij,gjc->gic"}> : () -> ()
    %cst_26 = arith.constant dense<0.000000e+00> : vector<32x8x2xf32>
    %65 = tpu.matmul %62, %1, %cst_26 {dimension_numbers = #tpu.dot_dimension_numbers<[2], [1], [1], [2], [0, 0, 0, 1, 1, 2], [0], [0]>} : vector<32x8x8xf32>, vector<32x8x2xf32>, vector<32x8x2xf32> -> vector<32x8x2xf32>
    "tpu.trace_stop"() : () -> ()
    %66 = vector.broadcast %64 : vector<32x8x1xf32> to vector<32x8x2xf32>
    %67 = arith.mulf %1, %66 : vector<32x8x2xf32>
    %68 = arith.addf %1, %67 : vector<32x8x2xf32>
    %69 = arith.subf %68, %65 : vector<32x8x2xf32>
    %cst_27 = arith.constant 0.000000e+00 : f32
    %70 = vector.broadcast %cst_27 : f32 to vector<32x8x94xf32>
    %71 = tpu.concatenate %28, %69, %70 in 2 : vector<32x8x32xf32>, vector<32x8x2xf32>, vector<32x8x94xf32> -> vector<32x8x128xf32>
    %c0_28 = arith.constant 0 : index
    %c0_29 = arith.constant 0 : index
    %c0_30 = arith.constant 0 : index
    %72 = vector.load %arg9[%c0_28, %c0_29, %c0_30] : memref<32x8x128xf32, #tpu.memory_space<vmem>>, vector<32x8x128xf32>
    tpu.vector_store %arg9[%c0_28, %c0_29, %c0_30], %71 {strides = array<i32>} : memref<32x8x128xf32, #tpu.memory_space<vmem>>, vector<32x8x128xf32>,
    return
  }
  func.func @transform_0(%arg0: i32) -> (i32, i32, i32) {
    %c0_i32 = arith.constant 0 : i32
    %c0_i32_0 = arith.constant 0 : i32
    %c0_i32_1 = arith.constant 0 : i32
    return %arg0, %c0_i32, %c0_i32_0 : i32, i32, i32
  }
  func.func @transform_1(%arg0: i32) -> (i32, i32, i32) {
    %c0_i32 = arith.constant 0 : i32
    %c0_i32_0 = arith.constant 0 : i32
    %c0_i32_1 = arith.constant 0 : i32
    return %arg0, %c0_i32, %c0_i32_0 : i32, i32, i32
  }
  func.func @transform_2(%arg0: i32) -> (i32, i32) {
    %c0_i32 = arith.constant 0 : i32
    %c0_i32_0 = arith.constant 0 : i32
    %c0_i32_1 = arith.constant 0 : i32
    return %c0_i32, %c0_i32_0 : i32, i32
  }
  func.func @transform_3(%arg0: i32) -> (i32, i32) {
    %c0_i32 = arith.constant 0 : i32
    %c0_i32_0 = arith.constant 0 : i32
    %c0_i32_1 = arith.constant 0 : i32
    return %c0_i32, %c0_i32_0 : i32, i32
  }
  func.func @transform_4(%arg0: i32) -> (i32, i32) {
    %c0_i32 = arith.constant 0 : i32
    %c0_i32_0 = arith.constant 0 : i32
    %c0_i32_1 = arith.constant 0 : i32
    return %c0_i32, %c0_i32_0 : i32, i32
  }
  func.func @transform_5(%arg0: i32) -> (i32, i32) {
    %c0_i32 = arith.constant 0 : i32
    %c0_i32_0 = arith.constant 0 : i32
    %c0_i32_1 = arith.constant 0 : i32
    return %c0_i32, %c0_i32_0 : i32, i32
  }
  func.func @transform_6(%arg0: i32) -> (i32, i32) {
    %c0_i32 = arith.constant 0 : i32
    %c0_i32_0 = arith.constant 0 : i32
    %c0_i32_1 = arith.constant 0 : i32
    return %c0_i32, %c0_i32_0 : i32, i32
  }
  func.func @transform_7(%arg0: i32) -> (i32, i32) {
    %c0_i32 = arith.constant 0 : i32
    %c0_i32_0 = arith.constant 0 : i32
    %c0_i32_1 = arith.constant 0 : i32
    return %c0_i32, %c0_i32_0 : i32, i32
  }
  func.func @transform_8(%arg0: i32) -> (i32, i32, i32) {
    %c0_i32 = arith.constant 0 : i32
    %c0_i32_0 = arith.constant 0 : i32
    %c0_i32_1 = arith.constant 0 : i32
    return %arg0, %c0_i32, %c0_i32_0 : i32, i32, i32
  }
}

</mosaic_0001>

<bundles_post_ra>
// kernel: tpu_custom_call.1
= control target key start
LH: loop header
LB: loop body
LE: loop exit
PB: predicated region body
PF: predicated region fallthrough
CT: control target
= control target key end

     0   :  { %s23948_s0 = inlined_call_operand.vmem [shape: f32[256,8,32], index: 0, kind: input, shape index: {}]   ;;  %s23949_s1 = inlined_call_operand.vmem [shape: f32[256,8,2], index: 1, kind: input, shape index: {}]   ;;  %s23950_s2 = inlined_call_operand.vmem [shape: f32[32,96], index: 2, kind: input, shape index: {}]   ;;  %s23951_s3 = inlined_call_operand.vmem [shape: f32[1,96], index: 3, kind: input, shape index: {}]   ;;  %s23952_s4 = inlined_call_operand.vmem [shape: f32[2,32], index: 4, kind: input, shape index: {}]   ;;  %s23953_s5 = inlined_call_operand.vmem [shape: f32[1,32], index: 5, kind: input, shape index: {}]   ;;  %s23954_s6 = inlined_call_operand.vmem [shape: f32[1,32], index: 6, kind: input, shape index: {}]   ;;  %s23955_s7 = inlined_call_operand.<no memory space> [shape: f32[1,1], index: 7, kind: input, shape index: {}]   ;;  %s23956_s8 = inlined_call_operand.hbm [shape: f32[256,8,128], index: 8, kind: output, shape index: {}]  }
   0x1   :  { %v13_v0 = vstv %s23955_s7 }
   0x2   :  { %14 = vst [vmem:[#allocation2] sm:$0x1] %v13_v0 }
   0x3   :  { %15 = vsyncpa [#allocation4], 0 }
   0x4   :  { %17 = vsyncpa [#allocation4 + $0x1], 0  ;;  %s17242_s29 = smov 0   ;;  %s17244_s30 = smov 0  }
   0x5   :  { %s17246_s9 = smov 0   ;;  %s17248_s10 = smov 0  }
   0x6 LB: > { %s17263_s7 = sadd.s32 4294967295, %s17181_s10   ;;  %s15869_s11 = sadd.s32 4294967294, %s17181_s10   ;;  %s17181_s10 = sphi %s17248_s10, %s24889_s10   ;;  %s17177_s9 = sphi %s17246_s9, %s24888_s9   ;;  %s17173_s30 = sphi %s17244_s30, %s24887_s30   ;;  %s17169_s29 = sphi %s17242_s29, %s24886_s29  }
   0x7   : > { %s17267_s12 = sadd.s32 1, %s17181_s10   ;;  %s208_s13 = sadd.s32 1, %s17177_s9 }
   0x8   : > { %s205_s14 = ssub.s32 %s17181_s10, %s17267_s12  ;;  %p218_p0 = scmp.ne.s32.totalorder %s17177_s9, %s17173_s30 }
   0x9   : > { %p206_p1 = scmp.eq.s32.totalorder %s205_s14, 0  ;;  %p219_p2 = scmp.eq.s32.totalorder %s17263_s7, 7 }
   0xa   : > { %p224_p3 = scmp.ne.s32.totalorder %s17173_s30, %s17169_s29  ;;  %p225_p4 = scmp.eq.s32.totalorder %s15869_s11, 7 }
   0xb   : > { %s17278_s15 = scalar_select %p206_p1, %s17177_s9, %s208_s13  }
   0xc   : > { %p17280_p5 = por %p219_p2, %p218_p0  ;;  %p17284_p6 = por %p225_p4, %p224_p3 }
   0xd   : > { %p15872_p7 = scmp.ge.s32.totalorder %s17181_s10, 1  ;;  %p279_p8 = scmp.lt.s32.totalorder %s17181_s10, 9 }
   0xf   : > { %p280_p9 = pnand %p15872_p7, %p279_p8 }
  0x11   : > { %283 = sbr.rel (%p280_p9) target bundleno = 1667 (0x683), region = 52 }
  0x18   : > { %v395_v1 = vld [vmem:[%s23950_s2] sm:$0xff]  ;;  %v396_v2 = vld [vmem:[%s23950_s2 + $0x8] sm:$0xff]  ;;  %v397_v3 = vld [vmem:[%s23950_s2 + $0x10] sm:$0xff]  ;;  %s15874_s24 = sshll.u32 %s17263_s7, 5  ;;  %v17183_v5 = vmov 0   ;;  %vm406_vm0 = vcmask 261120  }
  0x19   : > { %v16814_v4 = vpack.c.bf16 %v396_v2, %v395_v1  ;;  %16871 = vset.pattern.permute.xlu0 %v17183_v5  ;;  %v398_v6 = vld [vmem:[%s23950_s2 + $0x18] sm:$0xff]  ;;  %p319_p10 = scmp.lt.s32.totalorder %s15874_s24, 255  ;;  %16872 = vset.pattern.permute.xlu1 %v17183_v5  ;;  %v17184_v61 = vmov 1   ;;  %vm17186_vm1 = vmmov 0   ;;  %s17187_s22 = smov 96   ;;  %vm3192_vm2 = vcmask 64512  }
  0x1a   : > { %v16818_v7 = vpack.c.bf16 %v398_v6, %v397_v3  ;;  %s17188_s23 = smov 64   ;;  %vm12733_vm3 = vcmask 1041409   ;;  %vm12735_vm4 = vcmask 1042434   ;;  %vm12737_vm5 = vcmask 1043459   ;;  %s17191_s14 = smov [#allocation3]  }
  0x1b   : > { %16815 = vmatprep.subr.bf16.mxu0 %v16814_v4  ;;  %s24891_s24 = smov (!%p319_p10, %s15874_s24), 255  ;;  %vm12739_vm6 = vcmask 1044484   ;;  %vm12741_vm7 = vcmask 1045509   ;;  %vm12743_vm8 = vcmask 1046534   ;;  %vm12745_vm9 = vcmask 1047559   ;;  %s17123_s18 = sshll.u32 %s17191_s14, 4  ;;  %s17124_s18 = int_to_ptr.vmem [resolvable:$false] %s17123_s18 }
  0x1c   : > { %16817 = vmatpush3.bf16.msra.mxu0 %v16814_v4  ;;  %s15875_s27 = sshll.u32 %s24891_s24, 3  ;;  %vm15716_vm10 = vcmask 277504   ;;  %s17125_s20 = scalar_lea.vmem %s17124_s18, 8192 }
  0x1d   : > { %16819 = vmatprep.subr.bf16.mxu0 %v16818_v7  ;;  %s17308_s13 = scalar_lea.vmem %s23949_s1, %s15875_s27  ;;  %s17313_s19 = scalar_lea.vmem %s23948_s0, %s15875_s27 }
  0x1e   : > { %v17316_v8 = vld [vmem:[%s17308_s13] sm:$0xff]  ;;  %v332_v10 = vld [vmem:[%s17313_s19 + $0x8] sm:$0xff]  ;;  %v17323_v11 = vld [vmem:[%s17308_s13 + $0x18] sm:$0xff] }
  0x1f   : > { %v331_v9 = vld [vmem:[%s17313_s19] sm:$0xff]  ;;  %6108 = vperm.xlu0 %16871, %v17316_v8   ;;  %v333_v12 = vld [vmem:[%s17313_s19 + $0x10] sm:$0xff]  ;;  %v17327_v13 = vld [vmem:[%s17308_s13 + $0x8] sm:$0xff] }
  0x20   : > { %16821 = vmatpush3.bf16.msra.mxu0 %v16818_v7  ;;  %16286 = vmatprep.mubr.msk.f32.mxu0 %vm406_vm0, %v331_v9  ;;  %v17332_v14 = vld [vmem:[%s17308_s13 + $0x10] sm:$0xff]  ;;  %v334_v15 = vld [vmem:[%s17313_s19 + $0x18] sm:$0xff]  ;;  %v17338_v16 = vld [vmem:[%s17308_s13 + $0x28] sm:$0xff] }
  0x21   : > { %6113 = vperm.xlu1 %16872, %v17327_v13   ;;  %v335_v17 = vld [vmem:[%s17313_s19 + $0x20] sm:$0xff]  ;;  %v336_v19 = vld [vmem:[%s17313_s19 + $0x28] sm:$0xff]  ;;  %v17350_v20 = vld [vmem:[%s17308_s13 + $0x38] sm:$0xff] }
  0x22   : > { %v17344_v18 = vld [vmem:[%s17308_s13 + $0x20] sm:$0xff]  ;;  %v337_v21 = vld [vmem:[%s17313_s19 + $0x30] sm:$0xff]  ;;  %v338_v23 = vld [vmem:[%s17313_s19 + $0x38] sm:$0xff] }
  0x23   : > { %16287 = vmatmul.mubr.msk.f32.vlgmr.msra.gmra.mrb[0].mxu0 %vm406_vm0, %v332_v10  ;;  %6123 = vperm.xlu0 %16871, %v17323_v11   ;;  %v17356_v22 = vld [vmem:[%s17308_s13 + $0x30] sm:$0xff]  ;;  %v17362_v24 = vld [vmem:[%s17308_s13 + $0x48] sm:$0xff]  ;;  %v339_v25 = vld [vmem:[%s17313_s19 + $0x40] sm:$0xff] }
  0x24   : > { %16289 = vmatprep.mubr.msk.f32.mxu0 %vm406_vm0, %v333_v12  ;;  %v17368_v26 = vld [vmem:[%s17308_s13 + $0x40] sm:$0xff]  ;;  %v340_v27 = vld [vmem:[%s17313_s19 + $0x48] sm:$0xff]  ;;  %v17374_v28 = vld [vmem:[%s17308_s13 + $0x58] sm:$0xff] }
  0x25   : > { %6118 = vperm.xlu1 %16872, %v17332_v14   ;;  %v341_v29 = vld [vmem:[%s17313_s19 + $0x50] sm:$0xff]  ;;  %v342_v31 = vld [vmem:[%s17313_s19 + $0x58] sm:$0xff]  ;;  %v17386_v32 = vld [vmem:[%s17308_s13 + $0x68] sm:$0xff] }
  0x26   : > { %v17380_v30 = vld [vmem:[%s17308_s13 + $0x50] sm:$0xff]  ;;  %v343_v33 = vld [vmem:[%s17313_s19 + $0x60] sm:$0xff]  ;;  %v344_v35 = vld [vmem:[%s17313_s19 + $0x68] sm:$0xff] }
  0x27   : > { %16290 = vmatmul.mubr.msk.f32.gmra.mrb[2].mxu0 %vm406_vm0, %v334_v15  ;;  %6133 = vperm.xlu0 %16871, %v17338_v16   ;;  %v17391_v34 = vld [vmem:[%s17308_s13 + $0x60] sm:$0xff]  ;;  %v17398_v36 = vld [vmem:[%s17308_s13 + $0x78] sm:$0xff]  ;;  %v345_v37 = vld [vmem:[%s17313_s19 + $0x70] sm:$0xff] }
  0x28   : > { %16292 = vmatprep.mubr.msk.f32.mxu0 %vm406_vm0, %v335_v17  ;;  %v17403_v38 = vld [vmem:[%s17308_s13 + $0x70] sm:$0xff]  ;;  %v346_v39 = vld [vmem:[%s17313_s19 + $0x78] sm:$0xff]  ;;  %v17410_v40 = vld [vmem:[%s17308_s13 + $0x88] sm:$0xff] }
  0x29   : > { %6128 = vperm.xlu1 %16872, %v17344_v18   ;;  %v347_v41 = vld [vmem:[%s17313_s19 + $0x80] sm:$0xff]  ;;  %v348_v43 = vld [vmem:[%s17313_s19 + $0x88] sm:$0xff]  ;;  %v17422_v44 = vld [vmem:[%s17308_s13 + $0x98] sm:$0xff] }
  0x2a   : > { %v17415_v42 = vld [vmem:[%s17308_s13 + $0x80] sm:$0xff]  ;;  %v349_v45 = vld [vmem:[%s17313_s19 + $0x90] sm:$0xff]  ;;  %v350_v47 = vld [vmem:[%s17313_s19 + $0x98] sm:$0xff] }
  0x2b   : > { %16293 = vmatmul.mubr.msk.f32.gmra.mrb[4].mxu0 %vm406_vm0, %v336_v19  ;;  %6143 = vperm.xlu0 %16871, %v17350_v20   ;;  %v17427_v46 = vld [vmem:[%s17308_s13 + $0x90] sm:$0xff]  ;;  %v17434_v48 = vld [vmem:[%s17308_s13 + $0xa8] sm:$0xff]  ;;  %v351_v49 = vld [vmem:[%s17313_s19 + $0xa0] sm:$0xff] }
  0x2c   : > { %16295 = vmatprep.mubr.msk.f32.mxu0 %vm406_vm0, %v337_v21  ;;  %v17439_v50 = vld [vmem:[%s17308_s13 + $0xa0] sm:$0xff]  ;;  %v352_v51 = vld [vmem:[%s17313_s19 + $0xa8] sm:$0xff]  ;;  %v386_v52 = vld [vmem:[%s17308_s13 + $0xb8] sm:$0xff] }
  0x2d   : > { %6138 = vperm.xlu1 %16872, %v17356_v22   ;;  %v353_v53 = vld [vmem:[%s17313_s19 + $0xb0] sm:$0xff]  ;;  %v354_v55 = vld [vmem:[%s17313_s19 + $0xb8] sm:$0xff]  ;;  %v388_v56 = vld [vmem:[%s17308_s13 + $0xc8] sm:$0xff] }
  0x2e   : > { %v385_v54 = vld [vmem:[%s17308_s13 + $0xb0] sm:$0xff]  ;;  %v355_v57 = vld [vmem:[%s17313_s19 + $0xc0] sm:$0xff]  ;;  %v356_v58 = vld [vmem:[%s17313_s19 + $0xc8] sm:$0xff] }
  0x2f   : > { %16296 = vmatmul.mubr.msk.f32.gmra.mrb[6].mxu0 %vm406_vm0, %v338_v23  ;;  %6153 = vperm.xlu0 %16871, %v17362_v24   ;;  %v390_v59 = vld [vmem:[%s17308_s13 + $0xd8] sm:$0xff]  ;;  %v357_v60 = vld [vmem:[%s17313_s19 + $0xd0] sm:$0xff]  ;;  %v392_v63 = vld [vmem:[%s17308_s13 + $0xe8] sm:$0xff] }
  0x30   : > { %16298 = vmatprep.mubr.msk.f32.mxu0 %vm406_vm0, %v339_v25  ;;  %v358_v62 = vld [vmem:[%s17313_s19 + $0xd8] sm:$0xff]  ;;  %v359_v0 = vld [vmem:[%s17313_s19 + $0xe0] sm:$0xff]  ;;  %v360_v1 = vld [vmem:[%s17313_s19 + $0xe8] sm:$0xff] }
  0x31   : > { %6148 = vperm.xlu1 %16872, %v17368_v26   ;;  %v394_v2 = vld [vmem:[%s17308_s13 + $0xf8] sm:$0xff]  ;;  %v361_v3 = vld [vmem:[%s17313_s19 + $0xf0] sm:$0xff]  ;;  %v387_v6 = vld [vmem:[%s17308_s13 + $0xc0] sm:$0xff] }
  0x32   : > { %v362_v4 = vld [vmem:[%s17313_s19 + $0xf8] sm:$0xff]  ;;  %v389_v7 = vld [vmem:[%s17308_s13 + $0xd0] sm:$0xff] }
  0x33   : > { %16299 = vmatmul.mubr.msk.f32.gmra.mrb[8].mxu0 %vm406_vm0, %v340_v27  ;;  %6163 = vperm.xlu0 %16871, %v17374_v28   ;;  %v393_v9 = vld [vmem:[%s17308_s13 + $0xf0] sm:$0xff] }
  0x34   : > { %16301 = vmatprep.mubr.msk.f32.mxu0 %vm406_vm0, %v341_v29  ;;  %v23957_v29 = vmov 0.0  }
  0x35   : > { %6158 = vperm.xlu1 %16872, %v17380_v30   ;;  %16334 = vmatprep.subr.mxu1 %v23957_v29 }
  0x36   : > { %16419 = vmatprep.subr.mxu0 %v23957_v29  ;;  %16336 = vmatprep.mubr.msk.f32.mxu1 %vm17186_vm1, %v23957_v29 }
  0x37   : > { %16302 = vmatmul.mubr.msk.f32.gmra.mrb[10].mxu0 %vm406_vm0, %v342_v31  ;;  %6173 = vperm.xlu0 %16871, %v17386_v32  }
  0x38   : > { %16304 = vmatprep.mubr.msk.f32.mxu0 %vm406_vm0, %v343_v33 }
  0x39   : > { %6168 = vperm.xlu1 %16872, %v17391_v34  }
  0x3b   : > { %16305 = vmatmul.mubr.msk.f32.gmra.mrb[12].mxu0 %vm406_vm0, %v344_v35  ;;  %6183 = vperm.xlu0 %16871, %v17398_v36  }
  0x3c   : > { %16307 = vmatprep.mubr.msk.f32.mxu0 %vm406_vm0, %v345_v37 }
  0x3d   : > { %6178 = vperm.xlu1 %16872, %v17403_v38  }
  0x3f   : > { %16308 = vmatmul.mubr.msk.f32.gmra.mrb[14].mxu0 %vm406_vm0, %v346_v39  ;;  %6193 = vperm.xlu0 %16871, %v17410_v40  }
  0x40   : > { %16310 = vmatprep.mubr.msk.f32.mxu0 %vm406_vm0, %v347_v41 }
  0x41   : > { %6188 = vperm.xlu1 %16872, %v17415_v42  }
  0x43   : > { %16311 = vmatmul.mubr.msk.f32.gmra.mrb[16].mxu0 %vm406_vm0, %v348_v43  ;;  %6203 = vperm.xlu0 %16871, %v17422_v44  }
  0x44   : > { %16313 = vmatprep.mubr.msk.f32.mxu0 %vm406_vm0, %v349_v45 }
  0x45   : > { %6198 = vperm.xlu1 %16872, %v17427_v46  }
  0x47   : > { %16314 = vmatmul.mubr.msk.f32.gmra.mrb[18].mxu0 %vm406_vm0, %v350_v47  ;;  %6213 = vperm.xlu0 %16871, %v17434_v48  }
  0x48   : > { %16316 = vmatprep.mubr.msk.f32.mxu0 %vm406_vm0, %v351_v49 }
  0x49   : > { %6208 = vperm.xlu1 %16872, %v17439_v50  }
  0x4b   : > { %16317 = vmatmul.mubr.msk.f32.gmra.mrb[20].mxu0 %vm406_vm0, %v352_v51  ;;  %6223 = vperm.xlu0 %16871, %v386_v52  }
  0x4c   : > { %16319 = vmatprep.mubr.msk.f32.mxu0 %vm406_vm0, %v353_v53 }
  0x4d   : > { %6218 = vperm.xlu1 %16872, %v385_v54  }
  0x4f   : > { %16320 = vmatmul.mubr.msk.f32.gmra.mrb[22].mxu0 %vm406_vm0, %v354_v55  ;;  %6233 = vperm.xlu0 %16871, %v388_v56  }
  0x50   : > { %16322 = vmatprep.mubr.msk.f32.mxu0 %vm406_vm0, %v355_v57 }
  0x51   : > { %16873 = vset.pattern.permute.xlu1 %v17184_v61 }
  0x52   : > { %6304 = vperm.xlu1 %16873, %v17316_v8   ;;  %v391_v8 = vld [vmem:[%s17308_s13 + $0xe0] sm:$0xff] }
  0x53   : > { %16323 = vmatmul.mubr.msk.f32.gmra.mrb[24].mxu0 %vm406_vm0, %v356_v58  ;;  %6243 = vperm.xlu0 %16871, %v390_v59  }
  0x54   : > { %16325 = vmatprep.mubr.msk.f32.mxu0 %vm406_vm0, %v357_v60 }
  0x56   : > { %6312 = vperm.xlu1 %16873, %v17332_v14  }
  0x57   : > { %16326 = vmatmul.mubr.msk.f32.gmra.mrb[26].mxu0 %vm406_vm0, %v358_v62  ;;  %6253 = vperm.xlu0 %16871, %v392_v63  }
  0x58   : > { %16328 = vmatprep.mubr.msk.f32.mxu0 %vm406_vm0, %v359_v0 }
  0x5a   : > { %6316 = vperm.xlu1 %16873, %v17323_v11  }
  0x5b   : > { %16329 = vmatmul.mubr.msk.f32.gmra.mrb[28].mxu0 %vm406_vm0, %v360_v1  ;;  %6263 = vperm.xlu0 %16871, %v394_v2  }
  0x5c   : > { %16331 = vmatprep.mubr.msk.f32.mxu0 %vm406_vm0, %v361_v3 }
  0x5e   : > { %6324 = vperm.xlu1 %16873, %v17338_v16  }
  0x5f   : > { %16332 = vmatmul.mubr.msk.f32.gmra.mrb[30].mxu0 %vm406_vm0, %v362_v4  ;;  %16874 = vset.pattern.permute.xlu0 %v17184_v61 }
  0x60   : > { %6308 = vperm.xlu0 %16874, %v17327_v13   ;;  %16421 = vmatprep.mubr.msk.f32.mxu0 %vm17186_vm1, %v23957_v29 }
  0x62   : > { %6332 = vperm.xlu1 %16873, %v17350_v20  }
  0x64   : > { %6320 = vperm.xlu0 %16874, %v17344_v18  }
  0x66   : > { %6340 = vperm.xlu1 %16873, %v17362_v24  }
  0x68   : > { %6328 = vperm.xlu0 %16874, %v17356_v22  }
  0x6a   : > { %6348 = vperm.xlu1 %16873, %v17374_v28  }
  0x6c   : > { %6336 = vperm.xlu0 %16874, %v17368_v26  }
  0x6e   : > { %6356 = vperm.xlu1 %16873, %v17386_v32  }
  0x70   : > { %6344 = vperm.xlu0 %16874, %v17380_v30   ;;  %v17545_v30 = vld [vmem:[%s23951_s3] ss:$0 sm:$0xff] }
  0x72   : > { %6364 = vperm.xlu1 %16873, %v17398_v36  }
  0x74   : > { %6352 = vperm.xlu0 %16874, %v17391_v34  }
  0x76   : > { %6372 = vperm.xlu1 %16873, %v17410_v40  }
  0x78   : > { %6360 = vperm.xlu0 %16874, %v17403_v38  }
  0x7a   : > { %6380 = vperm.xlu1 %16873, %v17422_v44  }
  0x7c   : > { %6368 = vperm.xlu0 %16874, %v17415_v42  }
  0x7e   : > { %6388 = vperm.xlu1 %16873, %v17434_v48  }
  0x80   : > { %6376 = vperm.xlu0 %16874, %v17427_v46  }
  0x82   : > { %6396 = vperm.xlu1 %16873, %v386_v52  }
  0x84   : > { %6384 = vperm.xlu0 %16874, %v17439_v50  }
  0x86   : > { %6404 = vperm.xlu1 %16873, %v388_v56  }
  0x88   : > { %6392 = vperm.xlu0 %16874, %v385_v54  }
  0x8a   : > { %6412 = vperm.xlu1 %16873, %v390_v59  }
  0x8c   : > { %6400 = vperm.xlu0 %16874, %v387_v6  }
  0x8e   : > { %6420 = vperm.xlu1 %16873, %v392_v63  }
  0x90   : > { %6408 = vperm.xlu0 %16874, %v389_v7  }
  0x92   : > { %6428 = vperm.xlu1 %16873, %v394_v2  }
  0x94   : > { %6416 = vperm.xlu0 %16874, %v391_v8  }
  0x96   : > { %16875 = vset.pattern.permute.xlu1 %v17183_v5 }
  0x98   : > { %6424 = vperm.xlu0 %16874, %v393_v9  }
  0x9c   : > { %16876 = vset.pattern.permute.xlu0 %v17183_v5 }
  0x9e   : > { %v17501_v10 = vpop.permute.xlu0 %6108 }
  0xa0   : > { %v17505_v12 = vpop.permute.xlu1 %6113 }
  0xa2   : > { %v17503_v11 = vpop.permute.xlu0 %6123 }
  0xa4   : > { %v17509_v14 = vpop.permute.xlu1 %6118 }
  0xa6   : > { %v17507_v13 = vpop.permute.xlu0 %6133 }
  0xa8   : > { %v17513_v16 = vpop.permute.xlu1 %6128 }
  0xaa   : > { %v17511_v15 = vpop.permute.xlu0 %6143 }
  0xac   : > { %v17517_v18 = vpop.permute.xlu1 %6138 }
  0xae   : > { %v17515_v17 = vpop.permute.xlu0 %6153 }
  0xb0   : > { %v17521_v5 = vpop.permute.xlu1 %6148 }
  0xb2   : > { %v17519_v19 = vpop.permute.xlu0 %6163 }
  0xb4   : > { %v17525_v21 = vpop.permute.xlu1 %6158 }
  0xb6   : > { %v17523_v20 = vpop.permute.xlu0 %6173 }
  0xb8   : > { %v17529_v23 = vpop.permute.xlu1 %6168 }
  0xb9   : > { %24082 = vst [vmem:[#allocation7_spill] sm:$0xff] %v17529_v23 }
  0xba   : > { %v17527_v22 = vpop.permute.xlu0 %6183 }
  0xbb   : > { %24081 = vst [vmem:[#allocation6_spill] sm:$0xff] %v17527_v22 }
  0xbc   : > { %v17533_v25 = vpop.permute.xlu1 %6178 }
  0xbd   : > { %24083 = vst [vmem:[#allocation8_spill] sm:$0xff] %v17533_v25 }
  0xbe   : > { %v17531_v24 = vpop.permute.xlu0 %6193 }
  0xc0   : > { %v17537_v27 = vpop.permute.xlu1 %6188 }
  0xc1   : > { %24084 = vst [vmem:[#allocation9_spill] sm:$0xff] %v17537_v27 }
  0xc2   : > { %v17535_v26 = vpop.permute.xlu0 %6203 }
  0xc4   : > { %v17552_v31 = vpop.permute.xlu1 %6198 }
  0xc6   : > { %v17539_v28 = vpop.permute.xlu0 %6213 }
  0xc7   : > { %24085 = vst [vmem:[#allocation10_spill] sm:$0xff] %v17539_v28 }
  0xc8   : > { %v17569_v40 = vpop.permute.xlu1 %6208 }
  0xc9   : > { %24087 = vst [vmem:[#allocation12_spill] sm:$0xff] %v17569_v40 }
  0xca   : > { %v17554_v33 = vpop.permute.xlu0 %6223 }
  0xcb   : > { %24086 = vst [vmem:[#allocation11_spill] sm:$0xff] %v17554_v33 }
  0xcc   : > { %v17582_v45 = vpop.permute.xlu1 %6218 }
  0xcd   : > { %24089 = vst [vmem:[#allocation14_spill] sm:$0xff] %v17582_v45 }
  0xce   : > { %v17571_v41 = vpop.permute.xlu0 %6233 }
  0xcf   : > { %24088 = vst [vmem:[#allocation13_spill] sm:$0xff] %v17571_v41 }
  0xd1   : > { %v17595_v52 = vpop.permute.xlu1 %6304 }
  0xd2   : > { %v17586_v47 = vpop.permute.xlu0 %6243 }
  0xd3   : > { %24090 = vst [vmem:[#allocation15_spill] sm:$0xff] %v17586_v47 }
  0xd5   : > { %v17611_v58 = vpop.permute.xlu1 %6312 }
  0xd6   : > { %v17597_v53 = vpop.permute.xlu0 %6253 }
  0xd7   : > { %24091 = vst [vmem:[#allocation16_spill] sm:$0xff] %v17597_v53 }
  0xd9   : > { %v17627_v2 = vpop.permute.xlu1 %6316 }
  0xda   : > { %v17615_v60 = vpop.permute.xlu0 %6263 }
  0xdb   : > { %24092 = vst [vmem:[#allocation17_spill] sm:$0xff] %v17615_v60 }
  0xdd   : > { %v17643_v9 = vpop.permute.xlu1 %6324 }
  0xdf   : > { %v17629_v3 = vpop.permute.xlu0 %6308 }
  0xf6   : > { %v16288_v32 = vpop.f32.mrb[0].mxu0 }
  0xf7   : > { %v17557_v34 = vadd.f32 %v16288_v32, %v17545_v30  ;;  %v569_v35 = vpop.f32.mrb[1].mxu0 }
  0xf8   : > { %v17560_v36 = vadd.f32 %v17545_v30, %v569_v35 }
  0xf9   : > { %806 = vrot.lane.b32.xlu0 %v17557_v34, %s17187_s22 }
  0xfa   : > { %v16291_v37 = vpop.f32.mrb[2].mxu0  ;;  %3641 = vrot.lane.b32.xlu1 %v17560_v36, %s17188_s23 }
  0xfb   : > { %v17567_v38 = vadd.f32 %v16291_v37, %v17545_v30  ;;  %v579_v39 = vpop.f32.mrb[3].mxu0  ;;  %v17650_v37 = vpop.permute.xlu0 %6320 }
  0xfc   : > { %v17589_v49 = vadd.f32 %v17545_v30, %v579_v39 }
  0xfd   : > { %3717 = vrot.lane.b32.xlu0 %v17557_v34, %s17188_s23 }
  0xfe   : > { %960 = vrot.lane.b32.xlu1 %v17567_v38, %s17187_s22  ;;  %v16294_v42 = vpop.f32.mrb[4].mxu0 }
  0xff   : > { %v589_v43 = vpop.f32.mrb[5].mxu0  ;;  %v17605_v55 = vadd.f32 %v16294_v42, %v17545_v30 }
 0x100   : > { %v17580_v44 = vadd.f32 %v17545_v30, %v589_v43 }
 0x101   : > { %729 = vrot.lane.b32.xlu0 %v17560_v36, %s17187_s22 }
 0x102   : > { %3869 = vrot.lane.b32.xlu1 %v17567_v38, %s17188_s23  ;;  %v16297_v46 = vpop.f32.mrb[6].mxu0 }
 0x103   : > { %v599_v48 = vpop.f32.mrb[7].mxu0  ;;  %v17623_v63 = vadd.f32 %v16297_v46, %v17545_v30 }
 0x104   : > { %v17602_v54 = vadd.f32 %v17545_v30, %v599_v48 }
 0x105   : > { %1037 = vrot.lane.b32.xlu0 %v17580_v44, %s17187_s22 }
 0x106   : > { %883 = vrot.lane.b32.xlu1 %v17589_v49, %s17187_s22  ;;  %v16300_v50 = vpop.f32.mrb[8].mxu0 }
 0x107   : > { %v609_v51 = vpop.f32.mrb[9].mxu0  ;;  %v17646_v32 = vadd.f32 %v16300_v50, %v17545_v30 }
 0x108   : > { %v17620_v62 = vadd.f32 %v17545_v30, %v609_v51  ;;  %v17665_v51 = vpop.permute.xlu1 %6332 }
 0x109   : > { %3945 = vrot.lane.b32.xlu0 %v17580_v44, %s17188_s23 }
 0x10a   : > { %3793 = vrot.lane.b32.xlu1 %v17589_v49, %s17188_s23  ;;  %v16303_v56 = vpop.f32.mrb[10].mxu0 }
 0x10b   : > { %v619_v57 = vpop.f32.mrb[11].mxu0 }
 0x10c   : > { %v17641_v8 = vadd.f32 %v17545_v30, %v619_v57  ;;  %v17690_v53 = vpop.permute.xlu1 %6340 }
 0x10d   : > { %1191 = vrot.lane.b32.xlu0 %v17602_v54, %s17187_s22 }
 0x10e   : > { %1114 = vrot.lane.b32.xlu1 %v17605_v55, %s17187_s22  ;;  %v16306_v59 = vpop.f32.mrb[12].mxu0 }
 0x10f   : > { %v629_v61 = vpop.f32.mrb[13].mxu0  ;;  %v17708_v41 = vadd.f32 %v16306_v59, %v17545_v30 }
 0x110   : > { %v17715_v28 = vpop.permute.xlu1 %6348 }
 0x111   : > { %4097 = vrot.lane.b32.xlu0 %v17602_v54, %s17188_s23  ;;  %24105 = vst [vmem:[#allocation30_spill] sm:$0xff] %v17708_v41 }
 0x112   : > { %4021 = vrot.lane.b32.xlu1 %v17605_v55, %s17188_s23  ;;  %v16309_v0 = vpop.f32.mrb[14].mxu0 }
 0x113   : > { %v639_v1 = vpop.f32.mrb[15].mxu0  ;;  %v17740_v23 = vadd.f32 %v16309_v0, %v17545_v30 }
 0x114   : > { %v17737_v25 = vpop.permute.xlu1 %6356 }
 0x115   : > { %1345 = vrot.lane.b32.xlu0 %v17620_v62, %s17187_s22  ;;  %24111 = vst [vmem:[#allocation36_spill] sm:$0xff] %v17740_v23 }
 0x116   : > { %1268 = vrot.lane.b32.xlu1 %v17623_v63, %s17187_s22  ;;  %v16312_v4 = vpop.f32.mrb[16].mxu0 }
 0x117   : > { %v17636_v6 = vadd.f32 %v16312_v4, %v17545_v30  ;;  %v649_v7 = vpop.f32.mrb[17].mxu0  ;;  %v17670_v4 = vpop.permute.xlu0 %6328 }
 0x118   : > { %v17756_v0 = vpop.permute.xlu1 %6364 }
 0x119   : > { %24093 = vst [vmem:[#allocation18_spill] sm:$0xff] %v17636_v6  ;;  %4249 = vrot.lane.b32.xlu0 %v17620_v62, %s17188_s23  ;;  %24115 = vst [vmem:[#allocation40_spill] sm:$0xff] %v17756_v0 }
 0x11a   : > { %4173 = vrot.lane.b32.xlu1 %v17623_v63, %s17188_s23  ;;  %v16315_v35 = vpop.f32.mrb[18].mxu0 }
 0x11b   : > { %v17653_v39 = vadd.f32 %v16315_v35, %v17545_v30  ;;  %v659_v42 = vpop.f32.mrb[19].mxu0  ;;  %v17675_v35 = vadd.f32 %v17545_v30, %v629_v61  ;;  %v17694_v61 = vpop.permute.xlu0 %6336 }
 0x11c   : > { %v17656_v43 = vadd.f32 %v17545_v30, %v659_v42  ;;  %v17678_v42 = vadd.f32 %v16303_v56, %v17545_v30 }
 0x11d   : > { %24094 = vst [vmem:[#allocation19_spill] sm:$0xff] %v17653_v39  ;;  %1499 = vrot.lane.b32.xlu0 %v17641_v8, %s17187_s22  ;;  %24098 = vst [vmem:[#allocation23_spill] sm:$0xff] %v17675_v35 }
 0x11e   : > { %24095 = vst [vmem:[#allocation20_spill] sm:$0xff] %v17656_v43  ;;  %1422 = vrot.lane.b32.xlu1 %v17646_v32, %s17187_s22  ;;  %v16318_v46 = vpop.f32.mrb[20].mxu0  ;;  %24099 = vst [vmem:[#allocation24_spill] sm:$0xff] %v17678_v42 }
 0x11f   : > { %v17663_v48 = vadd.f32 %v16318_v46, %v17545_v30  ;;  %v669_v50 = vpop.f32.mrb[21].mxu0  ;;  %v17720_v27 = vpop.permute.xlu0 %6344 }
 0x120   : > { %v17668_v57 = vadd.f32 %v17545_v30, %v669_v50 }
 0x121   : > { %24096 = vst [vmem:[#allocation21_spill] sm:$0xff] %v17663_v48  ;;  %4401 = vrot.lane.b32.xlu0 %v17641_v8, %s17188_s23 }
 0x122   : > { %24097 = vst [vmem:[#allocation22_spill] sm:$0xff] %v17668_v57  ;;  %4325 = vrot.lane.b32.xlu1 %v17646_v32, %s17188_s23  ;;  %v16321_v46 = vpop.f32.mrb[22].mxu0 }
 0x123   : > { %v17683_v29 = vadd.f32 %v16321_v46, %v17545_v30  ;;  %v679_v50 = vpop.f32.mrb[23].mxu0 }
 0x124   : > { %v17686_v60 = vadd.f32 %v17545_v30, %v679_v50  ;;  %v17705_v50 = vadd.f32 %v17545_v30, %v639_v1 }
 0x125   : > { %24100 = vst [vmem:[#allocation25_spill] sm:$0xff] %v17683_v29  ;;  %1653 = vrot.lane.b32.xlu0 %v17675_v35, %s17187_s22 }
 0x126   : > { %24101 = vst [vmem:[#allocation26_spill] sm:$0xff] %v17686_v60  ;;  %1576 = vrot.lane.b32.xlu1 %v17678_v42, %s17187_s22  ;;  %v16324_v56 = vpop.f32.mrb[24].mxu0  ;;  %24104 = vst [vmem:[#allocation29_spill] sm:$0xff] %v17705_v50 }
 0x127   : > { %v17697_v45 = vadd.f32 %v16324_v56, %v17545_v30  ;;  %v689_v46 = vpop.f32.mrb[25].mxu0 }
 0x128   : > { %v17700_v47 = vadd.f32 %v17545_v30, %v689_v46 }
 0x129   : > { %24102 = vst [vmem:[#allocation27_spill] sm:$0xff] %v17697_v45  ;;  %4553 = vrot.lane.b32.xlu0 %v17675_v35, %s17188_s23  ;;  %v17744_v35 = vpop.permute.xlu0 %6352 }
 0x12a   : > { %24103 = vst [vmem:[#allocation28_spill] sm:$0xff] %v17700_v47  ;;  %4477 = vrot.lane.b32.xlu1 %v17678_v42, %s17188_s23  ;;  %v16327_v40 = vpop.f32.mrb[26].mxu0  ;;  %24112 = vst [vmem:[#allocation37_spill] sm:$0xff] %v17744_v35 }
 0x12b   : > { %v17713_v56 = vadd.f32 %v16327_v40, %v17545_v30  ;;  %v699_v33 = vpop.f32.mrb[27].mxu0 }
 0x12c   : > { %v17718_v46 = vadd.f32 %v17545_v30, %v699_v33  ;;  %v17735_v33 = vadd.f32 %v17545_v30, %v649_v7 }
 0x12d   : > { %24106 = vst [vmem:[#allocation31_spill] sm:$0xff] %v17713_v56  ;;  %1807 = vrot.lane.b32.xlu0 %v17705_v50, %s17187_s22  ;;  %v17758_v7 = vpop.permute.xlu0 %6360 }
 0x12e   : > { %24107 = vst [vmem:[#allocation32_spill] sm:$0xff] %v17718_v46  ;;  %1730 = vrot.lane.b32.xlu1 %v17708_v41, %s17187_s22  ;;  %v16330_v59 = vpop.f32.mrb[28].mxu0  ;;  %24110 = vst [vmem:[#allocation35_spill] sm:$0xff] %v17735_v33 }
 0x12f   : > { %v17727_v1 = vadd.f32 %v16330_v59, %v17545_v30  ;;  %v709_v40 = vpop.f32.mrb[29].mxu0  ;;  %24116 = vst [vmem:[#allocation41_spill] sm:$0xff] %v17758_v7 }
 0x130   : > { %v17730_v22 = vadd.f32 %v17545_v30, %v709_v40 }
 0x131   : > { %24108 = vst [vmem:[#allocation33_spill] sm:$0xff] %v17727_v1  ;;  %4705 = vrot.lane.b32.xlu0 %v17705_v50, %s17188_s23 }
 0x132   : > { %24109 = vst [vmem:[#allocation34_spill] sm:$0xff] %v17730_v22  ;;  %4629 = vrot.lane.b32.xlu1 %v17708_v41, %s17188_s23  ;;  %v16333_v59 = vpop.f32.mrb[30].mxu0 }
 0x133   : > { %v17747_v40 = vadd.f32 %v16333_v59, %v17545_v30  ;;  %v719_v42 = vpop.f32.mrb[31].mxu0 }
 0x134   : > { %v17750_v50 = vadd.f32 %v17545_v30, %v719_v42  ;;  %v17766_v30 = vpop.permute.xlu1 %6372  ;;  %v17770_v42 = vpop.permute.xlu0 %6368 }
 0x135   : > { %24113 = vst [vmem:[#allocation38_spill] sm:$0xff] %v17747_v40  ;;  %1961 = vrot.lane.b32.xlu0 %v17735_v33, %s17187_s22  ;;  %24117 = vst [vmem:[#allocation42_spill] sm:$0xff] %v17770_v42 }
 0x136   : > { %24114 = vst [vmem:[#allocation39_spill] sm:$0xff] %v17750_v50  ;;  %1884 = vrot.lane.b32.xlu1 %v17740_v23, %s17187_s22 }
 0x138   : > { %v17776_v59 = vpop.permute.xlu1 %6380  ;;  %v17778_v0 = vpop.permute.xlu0 %6376 }
 0x139   : > { %4857 = vrot.lane.b32.xlu0 %v17735_v33, %s17188_s23  ;;  %24118 = vst [vmem:[#allocation43_spill] sm:$0xff] %v17778_v0 }
 0x13a   : > { %4781 = vrot.lane.b32.xlu1 %v17740_v23, %s17188_s23 }
 0x13c   : > { %v17786_v42 = vpop.permute.xlu1 %6388  ;;  %v17790_v7 = vpop.permute.xlu0 %6384 }
 0x13d   : > { %2115 = vrot.lane.b32.xlu0 %v17656_v43, %s17187_s22  ;;  %24119 = vst [vmem:[#allocation44_spill] sm:$0xff] %v17786_v42  ;;  %24120 = vst [vmem:[#allocation45_spill] sm:$0xff] %v17790_v7 }
 0x13e   : > { %2038 = vrot.lane.b32.xlu1 %v17636_v6, %s17187_s22 }
 0x140   : > { %v17796_v35 = vpop.permute.xlu1 %6396 }
 0x141   : > { %5009 = vrot.lane.b32.xlu0 %v17656_v43, %s17188_s23  ;;  %24121 = vst [vmem:[#allocation46_spill] sm:$0xff] %v17796_v35  ;;  %v17798_v43 = vpop.permute.xlu0 %6392 }
 0x142   : > { %4933 = vrot.lane.b32.xlu1 %v17636_v6, %s17188_s23  ;;  %24122 = vst [vmem:[#allocation47_spill] sm:$0xff] %v17798_v43 }
 0x144   : > { %v17808_v42 = vpop.permute.xlu1 %6404 }
 0x145   : > { %2269 = vrot.lane.b32.xlu0 %v17668_v57, %s17187_s22  ;;  %v17806_v7 = vpop.permute.xlu0 %6400  ;;  %24124 = vst [vmem:[#allocation49_spill] sm:$0xff] %v17808_v42 }
 0x146   : > { %2192 = vrot.lane.b32.xlu1 %v17653_v39, %s17187_s22  ;;  %24123 = vst [vmem:[#allocation48_spill] sm:$0xff] %v17806_v7 }
 0x148   : > { %v17818_v35 = vpop.permute.xlu1 %6412 }
 0x149   : > { %5161 = vrot.lane.b32.xlu0 %v17668_v57, %s17188_s23  ;;  %v17816_v43 = vpop.permute.xlu0 %6408  ;;  %24126 = vst [vmem:[#allocation51_spill] sm:$0xff] %v17818_v35  ;;  %v17840_v35 = vld [vmem:[%s23952_s4 + $0x1] ss:$0 sm:$0xff] }
 0x14a   : > { %5085 = vrot.lane.b32.xlu1 %v17653_v39, %s17188_s23  ;;  %24125 = vst [vmem:[#allocation50_spill] sm:$0xff] %v17816_v43  ;;  %v17835_v43 = vld [vmem:[%s23952_s4] ss:$0 sm:$0xff] }
 0x14c   : > { %v17828_v42 = vpop.permute.xlu1 %6420 }
 0x14d   : > { %2423 = vrot.lane.b32.xlu0 %v17686_v60, %s17187_s22  ;;  %v17826_v7 = vpop.permute.xlu0 %6416  ;;  %24128 = vst [vmem:[#allocation53_spill] sm:$0xff] %v17828_v42  ;;  %v6270_v42 = vmul.f32 %v17835_v43, %v17501_v10 }
 0x14e   : > { %2346 = vrot.lane.b32.xlu1 %v17663_v48, %s17187_s22  ;;  %24127 = vst [vmem:[#allocation52_spill] sm:$0xff] %v17826_v7 }
 0x151   : > { %5313 = vrot.lane.b32.xlu0 %v17686_v60, %s17188_s23 }
 0x152   : > { %5237 = vrot.lane.b32.xlu1 %v17663_v48, %s17188_s23  ;;  %v17852_v48 = vpop.permute.xlu1 %6428 }
 0x153   : > { %24130 = vst [vmem:[#allocation55_spill] sm:$0xff] %v17852_v48 }
 0x155   : > { %2577 = vrot.lane.b32.xlu0 %v17700_v47, %s17187_s22 }
 0x156   : > { %2500 = vrot.lane.b32.xlu1 %v17683_v29, %s17187_s22 }
 0x159   : > { %5465 = vrot.lane.b32.xlu0 %v17700_v47, %s17188_s23  ;;  %v17850_v47 = vpop.permute.xlu0 %6424 }
 0x15a   : > { %5389 = vrot.lane.b32.xlu1 %v17683_v29, %s17188_s23  ;;  %v23970_v29 = vlaneseq  ;;  %24129 = vst [vmem:[#allocation54_spill] sm:$0xff] %v17850_v47 }
 0x15d   : > { %2731 = vrot.lane.b32.xlu0 %v17718_v46, %s17187_s22 }
 0x15e   : > { %2654 = vrot.lane.b32.xlu1 %v17697_v45, %s17187_s22 }
 0x161   : > { %5617 = vrot.lane.b32.xlu0 %v17718_v46, %s17188_s23  ;;  %v17189_v46 = vmov 1966171168  }
 0x162   : > { %5541 = vrot.lane.b32.xlu1 %v17697_v45, %s17188_s23  ;;  %v6533_v7 = vunpack.c.l.s4 %v17189_v46  ;;  %v6435_v45 = vmul.f32 %v17840_v35, %v17595_v52  ;;  %v17857_v46 = vshrl.u32 %v23970_v29, 7 }
 0x164   : > { %v6534_v60 = vunpack.c.0.s8 %v6533_v7  ;;  %24131 = vst [vmem:[#allocation56_spill] sm:$0xff] %v17857_v46  ;;  %v17859_v57 = vadd.f32 %v6435_v45, %v6270_v42 }
 0x165   : > { %2885 = vrot.lane.b32.xlu0 %v17730_v22, %s17187_s22 }
 0x166   : > { %2808 = vrot.lane.b32.xlu1 %v17713_v56, %s17187_s22  ;;  %v17868_v47 = vsub.s32 %v6534_v60, %v17857_v46  ;;  %v6531_v7 = vcombine.high %v17859_v57, %v17859_v57 }
 0x168   : > { %v6538_v42 = vrot.slane %v17859_v57, %v17868_v47  ;;  %v6545_v60 = vrot.slane %v6531_v7, %v17868_v47 }
 0x169   : > { %5769 = vrot.lane.b32.xlu0 %v17730_v22, %s17188_s23  ;;  %v24135_v22 = vmov 0.0  }
 0x16a   : > { %5693 = vrot.lane.b32.xlu1 %v17713_v56, %s17188_s23  ;;  %v6547_v39 = vcombine.high %v6545_v60, %v6545_v60 }
 0x16b   : > { %v807_v10 = vpop.permute.xlu0 %806 }
 0x16c   : > { %v17863_v52 = vpop.permute.xlu1 %3641 }
 0x16d   : > { %24132 = vst [vmem:[#allocation57_spill] sm:$0xff] %v17863_v52  ;;  %3039 = vrot.lane.b32.xlu0 %v17750_v50, %s17187_s22  ;;  %v6546_v52 = vcombine.high %v6538_v42, %v6538_v42 }
 0x16e   : > { %2962 = vrot.lane.b32.xlu1 %v17727_v1, %s17187_s22 }
 0x16f   : > { %v17874_v45 = vpop.permute.xlu0 %3717  ;;  %v6568_v7 = vrot.slane %v6546_v52, %v17868_v47  ;;  %v6575_v52 = vrot.slane %v6547_v39, %v17868_v47  ;;  %v6272_v39 = vmul.f32 %v17835_v43, %v17509_v14  ;;  %v17939_v14 = vmul.f32 %v17835_v43, %v17513_v16 }
 0x170   : > { %24133 = vst [vmem:[#allocation58_spill] sm:$0xff] %v17874_v45  ;;  %v961_v29 = vpop.permute.xlu1 %960  ;;  %v6554_v45 = vrot.slane %v6538_v42, %v17868_v47 }
 0x171   : > { %5921 = vrot.lane.b32.xlu0 %v17750_v50, %s17188_s23  ;;  %v6578_v33 = vcombine.high %v6568_v7, %v6568_v7 }
 0x172   : > { %5845 = vrot.lane.b32.xlu1 %v17727_v1, %s17188_s23  ;;  %v6576_v42 = vcombine.high %v6554_v45, %v6554_v45 }
 0x173   : > { %v730_v48 = vpop.permute.xlu0 %729 }
 0x174   : > { %v17883_v56 = vpop.permute.xlu1 %3869  ;;  %16335 = vmatpush3.xpose.msk.msra.mxu1 %vm406_vm0, %v730_v48  ;;  %v17897_v48 = vsub.s32 0, %v17857_v46 }
 0x175   : > { %24134 = vst [vmem:[#allocation59_spill] sm:$0xff] %v17883_v56  ;;  %16339 = vmatprep.subr.mxu1 %v24135_v22  ;;  %v6271_v56 = vmul.f32 %v17835_v43, %v17505_v12 }
 0x176   : > { %3116 = vrot.lane.b32.xlu1 %v17747_v40, %s17187_s22  ;;  %v8110_v12 = vrot.slane %v6576_v42, %v17897_v48  ;;  %v6579_v42 = vcombine.high %v6575_v52, %v6575_v52  ;;  %s17190_s22 = smov 32  }
 0x177   : > { %16337 = vmatmul.mubr.msk.f32.vlgmr.msra.gmra.mrb[0].mxu1 %vm406_vm0, %v17560_v36  ;;  %v1038_v1 = vpop.permute.xlu0 %1037  ;;  %v6436_v36 = vmul.f32 %v17840_v35, %v17629_v3  ;;  %v17920_v3 = vmul.f32 %v17835_v43, %v17503_v11  ;;  %v17935_v11 = vmul.f32 %v17835_v43, %v17511_v15 }
 0x178   : > { %v884_v50 = vpop.permute.xlu1 %883  ;;  %16340 = vmatpush3.xpose.msk.msra.mxu1 %vm406_vm0, %v807_v10  ;;  %16341 = vmatprep.mubr.msk.f32.mxu1 %vm17186_vm1, %v24135_v22  ;;  %v8102_v10 = vrot.slane %v6554_v45, %v17897_v48  ;;  %v17928_v45 = vmul.f32 %v17835_v43, %v17507_v13  ;;  %v9381_v16 = vsub.f32 %v8110_v12, %v17859_v57 }
 0x179   : > { %16344 = vmatprep.subr.mxu1 %v24135_v22  ;;  %v8130_v12 = vrot.slane %v6579_v42, %v17897_v48  ;;  %v17995_v42 = vmul.f32 %v17835_v43, %v17523_v20 }
 0x17a   : > { %5997 = vrot.lane.b32.xlu1 %v17747_v40, %s17188_s23  ;;  %v17983_v40 = vmul.f32 %v17835_v43, %v17525_v21  ;;  %s315_s23 = sand.u32 1, %s17173_s30  }
 0x17b   : > { %16342 = vmatmul.mubr.msk.f32.vlgmr.msra.gmra.mrb[2].mxu1 %vm406_vm0, %v17557_v34  ;;  %v17910_v46 = vpop.permute.xlu0 %3945  ;;  %v8106_v34 = vrot.slane %v6568_v7, %v17897_v48  ;;  %v17943_v7 = vmul.f32 %v17835_v43, %v17517_v18  ;;  %v8122_v18 = vrot.slane %v6575_v52, %v17897_v48  ;;  %v17975_v52 = vmul.f32 %v17835_v43, %v17519_v19  ;;  %s15873_s24 = sshll.u32 %s315_s23, 8 }
 0x17c   : > { %24136 = vst [vmem:[#allocation60_spill] sm:$0xff] %v17910_v46  ;;  %v17912_v6 = vpop.permute.xlu1 %3793  ;;  %16345 = vmatpush3.xpose.msk.msra.mxu1 %vm406_vm0, %v884_v50  ;;  %16346 = vmatprep.mubr.msk.f32.mxu1 %vm17186_vm1, %v24135_v22  ;;  %v17930_v50 = vadd.f32 %v6436_v36, %v6271_v56  ;;  %v9379_v46 = vsub.f32 %v8102_v10, %v17859_v57  ;;  %s23715_s25 = scalar_lea.vmem [#allocation3], %s15873_s24 }
 0x17d   : > { %24137 = vst [vmem:[#allocation61_spill] sm:$0xff] %v17912_v6  ;;  %16349 = vmatprep.subr.mxu1 %v24135_v22  ;;  %v8114_v56 = vrot.slane %v6578_v33, %v17897_v48  ;;  %v17952_v36 = vmul.f32 %v17835_v43, %v17515_v17  ;;  %v17967_v17 = vld [vmem:[%s23953_s5] ss:$0 sm:$0xff]  ;;  %v6561_v33 = vrot.slane %v6545_v60, %v17868_v47  ;;  %s15795_s26 = sshll.u32 %s23715_s25, 4  ;;  %s23900_s26 = int_to_ptr.vmem [resolvable:$true] %s15795_s26 }
 0x17e   : > { %v6587_v10 = vrot.slane %v17930_v50, %v17868_v47  ;;  %v6580_v6 = vcombine.high %v17930_v50, %v17930_v50  ;;  %v6437_v60 = vmul.f32 %v17840_v35, %v17611_v58  ;;  %v9644_v21 = vadd.f32 %v17967_v17, %v9381_v16  ;;  %p17126_p0 = scmp.lt.s32.totalorder %s23900_s26, %s17124_s18 }
 0x17f   : > { %16347 = vmatmul.mubr.msk.f32.vlgmr.msra.gmra.mrb[4].mxu1 %vm406_vm0, %v17589_v49  ;;  %v17947_v13 = vpop.permute.xlu0 %1191  ;;  %v17961_v49 = vmul.f32 %v17835_v43, %v17521_v5  ;;  %v9642_v5 = vadd.f32 %v17967_v17, %v9379_v46  ;;  %v9382_v19 = vsub.f32 %v8114_v56, %v17859_v57  ;;  %v8118_v46 = vrot.slane %v6561_v33, %v17897_v48 }
 0x180   : > { %v1115_v15 = vpop.permute.xlu1 %1114  ;;  %16350 = vmatpush3.xpose.msk.msra.mxu1 %vm406_vm0, %v961_v29  ;;  %16351 = vmatprep.mubr.msk.f32.mxu1 %vm17186_vm1, %v24135_v22  ;;  %v9380_v29 = vsub.f32 %v8106_v34, %v17859_v57  ;;  %v18006_v58 = vmul.f32 %v17835_v43, %v17531_v24  ;;  %v18010_v56 = vmul.f32 %v17835_v43, %v17535_v26 }
 0x181   : > { %16354 = vmatprep.subr.mxu1 %v24135_v22  ;;  %v9386_v16 = vsub.f32 %v8130_v12, %v17859_v57  ;;  %v18020_v24 = vadd.f32 %v6437_v60, %v6272_v39  ;;  %v9645_v41 = vadd.f32 %v17967_v17, %v9382_v19  ;;  %v6577_v0 = vcombine.high %v6561_v33, %v6561_v33 }
 0x182   : > { %v9643_v20 = vadd.f32 %v17967_v17, %v9380_v29  ;;  %v9383_v29 = vsub.f32 %v8118_v46, %v17859_v57  ;;  %v6442_v12 = vmul.f32 %v17840_v35, %v17665_v51  ;;  %v6439_v46 = vmul.f32 %v17840_v35, %v17650_v37 }
 0x183   : > { %16352 = vmatmul.mubr.msk.f32.vlgmr.msra.gmra.mrb[6].mxu1 %vm406_vm0, %v17567_v38  ;;  %v17989_v34 = vpop.permute.xlu0 %4097  ;;  %v9384_v38 = vsub.f32 %v8122_v18, %v17859_v57  ;;  %v18018_v18 = vrot.slane %v6580_v6, %v17868_v47  ;;  %v6440_v6 = vmul.f32 %v17840_v35, %v17643_v9  ;;  %v9649_v51 = vadd.f32 %v17967_v17, %v9386_v16 }
 0x184   : > { %24138 = vst [vmem:[#allocation62_spill] sm:$0xff] %v17989_v34  ;;  %v17997_v23 = vpop.permute.xlu1 %4021  ;;  %16355 = vmatpush3.xpose.msk.msra.mxu1 %vm406_vm0, %v1038_v1  ;;  %16356 = vmatprep.mubr.msk.f32.mxu1 %vm17186_vm1, %v24135_v22  ;;  %v6595_v1 = vcombine.high %v6587_v10, %v6587_v10  ;;  %v9898_v34 = vmax.f32 %v9642_v5, 0.0  ;;  %v9899_v9 = vmax.f32 %v9643_v20, 0.0  ;;  %v9646_v20 = vadd.f32 %v17967_v17, %v9383_v29 }
 0x185   : > { %24139 = vst [vmem:[#allocation63_spill] sm:$0xff] %v17997_v23  ;;  %16359 = vmatprep.subr.mxu1 %v24135_v22  ;;  %v6438_v23 = vmul.f32 %v17840_v35, %v17627_v2  ;;  %v18030_v2 = vmul.f32 %v17835_v43, %v17552_v31  ;;  %v9647_v39 = vadd.f32 %v17967_v17, %v9384_v38  ;;  %v18044_v31 = vld [vmem:[%s23954_s6] ss:$0 sm:$0xff]  ;;  %v9901_v38 = vmax.f32 %v9645_v41, 0.0 }
 0x186   : > { %v6617_v43 = vrot.slane %v6595_v1, %v17868_v47  ;;  %v10161_v60 = vmul.f32 %v18044_v31, %v9898_v34  ;;  %v6596_v19 = vcombine.high %v18018_v18, %v18018_v18  ;;  %v6603_v41 = vrot.slane %v6587_v10, %v17868_v47 }
 0x187   : > { %16357 = vmatmul.mubr.msk.f32.vlgmr.msra.gmra.mrb[8].mxu1 %vm406_vm0, %v17580_v44  ;;  %v18024_v26 = vpop.permute.xlu0 %1345  ;;  %v9900_v44 = vmax.f32 %v9644_v21, 0.0  ;;  %v18052_v33 = vadd.f32 %v6438_v23, %v17920_v3  ;;  %v8126_v23 = vrot.slane %v6577_v0, %v17897_v48  ;;  %v18067_v3 = vadd.f32 %v6440_v6, %v17928_v45 }
 0x188   : > { %v1269_v5 = vpop.permute.xlu1 %1268  ;;  %16360 = vmatpush3.xpose.msk.msra.mxu1 %vm406_vm0, %v1115_v15  ;;  %16361 = vmatprep.mubr.msk.f32.mxu1 %vm17186_vm1, %v24135_v22  ;;  %v18049_v15 = vrot.slane %v18020_v24, %v17868_v47  ;;  %v9903_v37 = vmax.f32 %v9647_v39, 0.0  ;;  %v18078_v1 = vadd.f32 %v6442_v12, %v17935_v11  ;;  %v10162_v0 = vmul.f32 %v18044_v31, %v9899_v9 }
 0x189   : > { %16364 = vmatprep.subr.mxu1 %v24135_v22  ;;  %v8138_v45 = vrot.slane %v6617_v43, %v17897_v48  ;;  %v6627_v16 = vcombine.high %v6617_v43, %v6617_v43  ;;  %v10417_v29 = vsel %vm406_vm0, %v10161_v60, 0.0  ;;  %v9905_v6 = vmax.f32 %v9649_v51, 0.0 }
 0x18a   : > { %v18088_v10 = vadd.f32 %v6439_v46, %v17939_v14  ;;  %v10164_v39 = vmul.f32 %v18044_v31, %v9901_v38  ;;  %v9902_v12 = vmax.f32 %v9646_v20, 0.0  ;;  %v9385_v9 = vsub.f32 %v8126_v23, %v17859_v57 }
 0x18b   : > { %16362 = vmatmul.mubr.msk.f32.vlgmr.msra.gmra.mrb[10].mxu1 %vm406_vm0, %v17605_v55  ;;  %v18062_v21 = vpop.permute.xlu0 %4249  ;;  %v10163_v55 = vmul.f32 %v18044_v31, %v9900_v44  ;;  %v6624_v44 = vrot.slane %v6596_v19, %v17868_v47  ;;  %v10166_v60 = vmul.f32 %v18044_v31, %v9903_v37  ;;  %v8134_v14 = vrot.slane %v6603_v41, %v17897_v48 }
 0x18c   : > { %24140 = vst [vmem:[#allocation64_spill] sm:$0xff] %v18062_v21  ;;  %v18069_v34 = vpop.permute.xlu1 %4173  ;;  %16365 = vmatpush3.xpose.msk.msra.mxu1 %vm406_vm0, %v17947_v13  ;;  %16366 = vmatprep.mubr.msk.f32.mxu1 %vm17186_vm1, %v24135_v22  ;;  %v6444_v13 = vmul.f32 %v17840_v35, %v17690_v53  ;;  %v6625_v51 = vcombine.high %v6603_v41, %v6603_v41 }
 0x18d   : > { %24141 = vst [vmem:[#allocation65_spill] sm:$0xff] %v18069_v34  ;;  %16369 = vmatprep.subr.mxu1 %v24135_v22  ;;  %v10423_v53 = vsel %vm406_vm0, %v10163_v55, 0.0  ;;  %v9388_v57 = vsub.f32 %v8138_v45, %v17930_v50  ;;  %v8146_v19 = vrot.slane %v6627_v16, %v17897_v48  ;;  %v6441_v46 = vmul.f32 %v17840_v35, %v17670_v4 }
 0x18e   : > { %v18112_v38 = vadd.f32 %v6444_v13, %v17952_v36  ;;  %v10168_v20 = vmul.f32 %v18044_v31, %v9905_v6  ;;  %v6628_v23 = vcombine.high %v6624_v44, %v6624_v44  ;;  %v6446_v55 = vmul.f32 %v17840_v35, %v17715_v28 }
 0x18f   : > { %16367 = vmatmul.mubr.msk.f32.vlgmr.msra.gmra.mrb[12].mxu1 %vm406_vm0, %v17602_v54  ;;  %v18092_v11 = vpop.permute.xlu0 %1499  ;;  %v18104_v54 = vsel %vm406_vm0, %v10162_v0, 0.0  ;;  %v10165_v41 = vmul.f32 %v18044_v31, %v9902_v12  ;;  %v9648_v0 = vadd.f32 %v17967_v17, %v9385_v9  ;;  %v6644_v4 = vcombine.high %v18049_v15, %v18049_v15 }
 0x190   : > { %v1423_v43 = vpop.permute.xlu1 %1422  ;;  %10418 = vadd.xlane.f32.xlu0 %v10417_v29  ;;  %16370 = vmatpush3.xpose.msk.msra.mxu1 %vm406_vm0, %v1269_v5  ;;  %v8154_v5 = vrot.slane %v6624_v44, %v17897_v48  ;;  %v10426_v28 = vsel %vm406_vm0, %v10164_v39, 0.0  ;;  %v9387_v45 = vsub.f32 %v8134_v14, %v17930_v50  ;;  %v6629_v16 = vcombine.high %v18020_v24, %v18020_v24 }
 0x191   : > { %16371 = vmatprep.mubr.msk.f32.mxu1 %vm17186_vm1, %v24135_v22  ;;  %16374 = vmatprep.subr.mxu1 %v24135_v22  ;;  %v10432_v13 = vsel %vm406_vm0, %v10166_v60, 0.0  ;;  %v9651_v29 = vadd.f32 %v17967_v17, %v9388_v57  ;;  %v18142_v44 = vadd.f32 %v6441_v46, %v17943_v7  ;;  %v6443_v39 = vmul.f32 %v17840_v35, %v17694_v61 }
 0x192   : > { %v9392_v6 = vsub.f32 %v8154_v5, %v17930_v50  ;;  %v8162_v12 = vrot.slane %v6628_v23, %v17897_v48  ;;  %v6610_v9 = vrot.slane %v18018_v18, %v17868_v47  ;;  %v6448_v60 = vmul.f32 %v17840_v35, %v17737_v25 }
 0x193   : > { %16372 = vmatmul.mubr.msk.f32.vlgmr.msra.gmra.mrb[14].mxu1 %vm406_vm0, %v17623_v63  ;;  %v18119_v37 = vpop.permute.xlu0 %4401  ;;  %v8142_v63 = vrot.slane %v6625_v51, %v17897_v48  ;;  %v9904_v7 = vmax.f32 %v9648_v0, 0.0  ;;  %v18159_v51 = vrot.slane %v6644_v4, %v17868_v47  ;;  %v10438_v18 = vsel %vm406_vm0, %v10168_v20, 0.0 }
 0x194   : > { %24142 = vst [vmem:[#allocation66_spill] sm:$0xff] %v18119_v37  ;;  %v18125_v36 = vpop.permute.xlu1 %4325  ;;  %10424 = vadd.xlane.f32.xlu0 %v10423_v53  ;;  %16375 = vmatpush3.xpose.msk.msra.mxu1 %vm406_vm0, %v18024_v26  ;;  %v9390_v26 = vsub.f32 %v8146_v19, %v17930_v50  ;;  %v18150_v53 = vadd.f32 %v6446_v55, %v17975_v52  ;;  %v9907_v19 = vmax.f32 %v9651_v29, 0.0 }
 0x195   : > { %24143 = vst [vmem:[#allocation67_spill] sm:$0xff] %v18125_v36  ;;  %16376 = vmatprep.mubr.msk.f32.mxu1 %vm17186_vm1, %v24135_v22  ;;  %16379 = vmatprep.subr.mxu1 %v24135_v22  ;;  %v9650_v52 = vadd.f32 %v17967_v17, %v9387_v45  ;;  %v9389_v57 = vsub.f32 %v8142_v63, %v17930_v50 }
 0x196   : > { %v18166_v25 = vrot.slane %v6629_v16, %v17868_v47  ;;  %v9653_v5 = vadd.f32 %v17967_v17, %v9390_v26  ;;  %v18175_v46 = vadd.f32 %v6443_v39, %v17961_v49  ;;  %v9394_v20 = vsub.f32 %v8162_v12, %v17930_v50 }
 0x197   : > { %16377 = vmatmul.mubr.msk.f32.vlgmr.msra.gmra.mrb[16].mxu1 %vm406_vm0, %v17620_v62  ;;  %v18156_v14 = vpop.permute.xlu0 %1653  ;;  %v10429_v62 = vsel %vm406_vm0, %v10165_v41, 0.0  ;;  %v8150_v23 = vrot.slane %v6610_v9, %v17897_v48  ;;  %v6626_v55 = vcombine.high %v6610_v9, %v6610_v9  ;;  %v6445_v0 = vmul.f32 %v17840_v35, %v17720_v27 }
 0x198   : > { %v1577_v61 = vpop.permute.xlu1 %1576  ;;  %10427 = vadd.xlane.f32.xlu0 %v10426_v28  ;;  %16380 = vmatpush3.xpose.msk.msra.mxu1 %vm406_vm0, %v1423_v43  ;;  %v9655_v43 = vadd.f32 %v17967_v17, %v9392_v6  ;;  %v18182_v4 = vadd.f32 %v6448_v60, %v17995_v42  ;;  %v10167_v28 = vmul.f32 %v18044_v31, %v9904_v7  ;;  %v9906_v27 = vmax.f32 %v9650_v52, 0.0 }
 0x199   : > { %16381 = vmatprep.mubr.msk.f32.mxu1 %vm17186_vm1, %v24135_v22  ;;  %16384 = vmatprep.subr.mxu1 %v24135_v22  ;;  %v6676_v49 = vcombine.high %v18159_v51, %v18159_v51  ;;  %v9652_v42 = vadd.f32 %v17967_v17, %v9389_v57  ;;  %v18198_v63 = vrot.slane %v18049_v15, %v17868_v47 }
 0x19a   : > { %v6452_v16 = vmul.f32 %v17840_v35, %v17766_v30  ;;  %v9911_v29 = vmax.f32 %v9655_v43, 0.0  ;;  %v9657_v15 = vadd.f32 %v17967_v17, %v9394_v20  ;;  %v9391_v26 = vsub.f32 %v8150_v23, %v17930_v50  ;;  %v24146_v23 = vld [vmem:[#allocation24_spill] sm:$0xff] }
 0x19b   : > { %16382 = vmatmul.mubr.msk.f32.vlgmr.msra.gmra.mrb[18].mxu1 %vm406_vm0, %v17646_v32  ;;  %v18186_v41 = vpop.permute.xlu0 %4553  ;;  %v6645_v32 = vcombine.high %v18166_v25, %v18166_v25  ;;  %v8158_v6 = vrot.slane %v6626_v55, %v17897_v48  ;;  %v18214_v30 = vrot.slane %v18052_v33, %v17868_v47  ;;  %v18217_v39 = vadd.f32 %v6445_v0, %v17983_v40 }
 0x19c   : > { %24144 = vst [vmem:[#allocation68_spill] sm:$0xff] %v18186_v41  ;;  %v18191_v45 = vpop.permute.xlu1 %4477  ;;  %10433 = vadd.xlane.f32.xlu0 %v10432_v13  ;;  %16385 = vmatpush3.xpose.msk.msra.mxu1 %vm406_vm0, %v18092_v11  ;;  %v10170_v11 = vmul.f32 %v18044_v31, %v9907_v19  ;;  %v9909_v13 = vmax.f32 %v9653_v5, 0.0  ;;  %v6454_v12 = vmul.f32 %v17840_v35, %v17776_v59  ;;  %v9908_v52 = vmax.f32 %v9652_v42, 0.0 }
 0x19d   : > { %24145 = vst [vmem:[#allocation69_spill] sm:$0xff] %v18191_v45  ;;  %16386 = vmatprep.mubr.msk.f32.mxu1 %vm17186_vm1, %v24135_v22  ;;  %16389 = vmatprep.subr.mxu1 %v24135_v22  ;;  %v8170_v9 = vrot.slane %v18159_v51, %v17897_v48  ;;  %v8178_v60 = vrot.slane %v6676_v49, %v17897_v48  ;;  %v9913_v19 = vmax.f32 %v9657_v15, 0.0 }
 0x19e   : > { %10421 = vadd.xlane.f32.xlu1 %v18104_v54  ;;  %v10169_v40 = vmul.f32 %v18044_v31, %v9906_v27  ;;  %v18231_v57 = vrot.slane %v6645_v32, %v17868_v47  ;;  %v18236_v59 = vadd.f32 %v6452_v16, %v18006_v58  ;;  %v10444_v51 = vsel %vm406_vm0, %v10170_v11, 0.0  ;;  %v24149_v16 = vld [vmem:[#allocation43_spill] sm:$0xff] }
 0x19f   : > { %16387 = vmatmul.mubr.msk.f32.vlgmr.msra.gmra.mrb[20].mxu1 %vm406_vm0, %v17641_v8  ;;  %v18223_v54 = vpop.permute.xlu0 %1807  ;;  %v6674_v8 = vcombine.high %v18198_v63, %v18198_v63  ;;  %v9654_v5 = vadd.f32 %v17967_v17, %v9391_v26  ;;  %v9393_v43 = vsub.f32 %v8158_v6, %v17930_v50  ;;  %v6693_v58 = vcombine.high %v18214_v30, %v18214_v30  ;;  %v24150_v26 = vld [vmem:[#allocation23_spill] sm:$0xff] }
 0x1a0   : > { %v1731_v7 = vpop.permute.xlu1 %1730  ;;  %10439 = vadd.xlane.f32.xlu0 %v10438_v18  ;;  %16390 = vmatpush3.xpose.msk.msra.mxu1 %vm406_vm0, %v1577_v61  ;;  %v10172_v61 = vmul.f32 %v18044_v31, %v9909_v13  ;;  %v10174_v18 = vmul.f32 %v18044_v31, %v9911_v29  ;;  %v18249_v20 = vadd.f32 %v6454_v12, %v18010_v56  ;;  %v10435_v50 = vsel %vm406_vm0, %v10167_v28, 0.0 }
 0x1a1   : > { %16391 = vmatprep.mubr.msk.f32.mxu1 %vm17186_vm1, %v24135_v22  ;;  %16394 = vmatprep.subr.mxu1 %v24135_v22  ;;  %v9396_v0 = vsub.f32 %v8170_v9, %v18020_v24  ;;  %v8166_v49 = vrot.slane %v18198_v63, %v17897_v48  ;;  %v10171_v56 = vmul.f32 %v18044_v31, %v9908_v52  ;;  %v9910_v29 = vmax.f32 %v9654_v5, 0.0 }
 0x1a2   : > { %10430 = vadd.xlane.f32.xlu1 %v10429_v62  ;;  %v9398_v62 = vsub.f32 %v8178_v60, %v18020_v24  ;;  %v8174_v42 = vrot.slane %v6674_v8, %v17897_v48  ;;  %v6677_v32 = vcombine.high %v18231_v57, %v18231_v57  ;;  %v6453_v11 = vmul.f32 %v17840_v35, %v24149_v16 }
 0x1a3   : > { %16392 = vmatmul.mubr.msk.f32.vlgmr.msra.gmra.mrb[22].mxu1 %vm406_vm0, %v24146_v23  ;;  %v18253_v55 = vpop.permute.xlu0 %4705  ;;  %v10450_v63 = vsel %vm406_vm0, %v10172_v61, 0.0  ;;  %v6678_v28 = vcombine.high %v18052_v33, %v18052_v33  ;;  %v10176_v13 = vmul.f32 %v18044_v31, %v9913_v19  ;;  %v9656_v15 = vadd.f32 %v17967_v17, %v9393_v43 }
 0x1a4   : > { %24147 = vst [vmem:[#allocation24_spill] sm:$0xff] %v18253_v55  ;;  %v18259_v27 = vpop.permute.xlu1 %4629  ;;  %10445 = vadd.xlane.f32.xlu0 %v10444_v51  ;;  %16395 = vmatpush3.xpose.msk.msra.mxu1 %vm406_vm0, %v18156_v14  ;;  %v6659_v14 = vrot.slane %v18166_v25, %v17868_v47  ;;  %v18281_v35 = vrot.slane %v6693_v58, %v17868_v47  ;;  %v10441_v8 = vsel %vm406_vm0, %v10169_v40, 0.0  ;;  %v10447_v16 = vsel %vm406_vm0, %v10171_v56, 0.0 }
 0x1a5   : > { %24148 = vst [vmem:[#allocation70_spill] sm:$0xff] %v18259_v27  ;;  %16396 = vmatprep.mubr.msk.f32.mxu1 %vm17186_vm1, %v24135_v22  ;;  %16399 = vmatprep.subr.mxu1 %v24135_v22  ;;  %v9659_v12 = vadd.f32 %v17967_v17, %v9396_v0  ;;  %v9661_v25 = vadd.f32 %v17967_v17, %v9398_v62  ;;  %v9912_v58 = vmax.f32 %v9656_v15, 0.0  ;;  %v24151_v0 = vld [vmem:[#allocation30_spill] sm:$0xff] }
 0x1a6   : > { %10436 = vadd.xlane.f32.xlu1 %v10435_v50  ;;  %v9395_v9 = vsub.f32 %v8166_v49, %v18020_v24  ;;  %v8186_v60 = vrot.slane %v18231_v57, %v17897_v48  ;;  %v9397_v51 = vsub.f32 %v8174_v42, %v18020_v24  ;;  %v8194_v61 = vrot.slane %v6677_v32, %v17897_v48 }
 0x1a7   : > { %16397 = vmatmul.mubr.msk.f32.vlgmr.msra.gmra.mrb[24].mxu1 %vm406_vm0, %v24150_v26  ;;  %v18285_v6 = vpop.permute.xlu0 %1961  ;;  %v8182_v19 = vrot.slane %v6659_v14, %v17897_v48  ;;  %v18298_v5 = vadd.f32 %v6453_v11, %v18030_v2  ;;  %v10456_v57 = vsel %vm406_vm0, %v10174_v18, 0.0  ;;  %v6675_v43 = vcombine.high %v6659_v14, %v6659_v14 }
 0x1a8   : > { %v1885_v52 = vpop.permute.xlu1 %1884  ;;  %10451 = vadd.xlane.f32.xlu0 %v10450_v63  ;;  %16400 = vmatpush3.xpose.msk.msra.mxu1 %vm406_vm0, %v1731_v7  ;;  %v18305_v7 = vrot.slane %v6678_v28, %v17868_v47  ;;  %v10173_v40 = vmul.f32 %v18044_v31, %v9910_v29  ;;  %v6725_v23 = vcombine.high %v18281_v35, %v18281_v35  ;;  %v9915_v18 = vmax.f32 %v9659_v12, 0.0 }
 0x1a9   : > { %16401 = vmatprep.mubr.msk.f32.mxu1 %vm17186_vm1, %v24135_v22  ;;  %16404 = vmatprep.subr.mxu1 %v24135_v22  ;;  %v6701_v2 = vrot.slane %v18214_v30, %v17868_v47  ;;  %v9917_v49 = vmax.f32 %v9661_v25, 0.0  ;;  %v9658_v50 = vadd.f32 %v17967_v17, %v9395_v9  ;;  %v9400_v42 = vsub.f32 %v8186_v60, %v18020_v24  ;;  %v24154_v25 = vld [vmem:[#allocation29_spill] sm:$0xff] }
 0x1aa   : > { %10442 = vadd.xlane.f32.xlu1 %v10441_v8  ;;  %v9660_v30 = vadd.f32 %v17967_v17, %v9397_v51  ;;  %v9402_v11 = vsub.f32 %v8194_v61, %v18020_v24  ;;  %v9399_v63 = vsub.f32 %v8182_v19, %v18020_v24  ;;  %v10462_v14 = vsel %vm406_vm0, %v10176_v13, 0.0 }
 0x1ab   : > { %16402 = vmatmul.mubr.msk.f32.vlgmr.msra.gmra.mrb[26].mxu1 %vm406_vm0, %v24151_v0  ;;  %v18314_v62 = vpop.permute.xlu0 %4857  ;;  %v8202_v28 = vrot.slane %v18281_v35, %v17897_v48  ;;  %v6694_v56 = vcombine.high %v18305_v7, %v18305_v7  ;;  %v10175_v29 = vmul.f32 %v18044_v31, %v9912_v58  ;;  %v8210_v15 = vrot.slane %v6725_v23, %v17897_v48 }
 0x1ac   : > { %24152 = vst [vmem:[#allocation43_spill] sm:$0xff] %v18314_v62  ;;  %v18318_v32 = vpop.permute.xlu1 %4781  ;;  %10457 = vadd.xlane.f32.xlu0 %v10456_v57  ;;  %16405 = vmatpush3.xpose.msk.msra.mxu1 %vm406_vm0, %v18223_v54  ;;  %v8190_v54 = vrot.slane %v6675_v43, %v17897_v48  ;;  %v6723_v26 = vcombine.high %v6701_v2, %v6701_v2  ;;  %v9914_v60 = vmax.f32 %v9658_v50, 0.0  ;;  %v9916_v61 = vmax.f32 %v9660_v30, 0.0 }
 0x1ad   : > { %24153 = vst [vmem:[#allocation23_spill] sm:$0xff] %v18318_v32  ;;  %16406 = vmatprep.mubr.msk.f32.mxu1 %vm17186_vm1, %v24135_v22  ;;  %16409 = vmatprep.subr.mxu1 %v24135_v22  ;;  %v18339_v12 = vrot.slane %v18088_v10, %v17868_v47  ;;  %v10178_v35 = vmul.f32 %v18044_v31, %v9915_v18  ;;  %v10453_v58 = vsel %vm406_vm0, %v10173_v40, 0.0  ;;  %v24155_v40 = vld [vmem:[#allocation36_spill] sm:$0xff] }
 0x1ae   : > { %10448 = vadd.xlane.f32.xlu1 %v10447_v16  ;;  %v10180_v9 = vmul.f32 %v18044_v31, %v9917_v49  ;;  %v9663_v8 = vadd.f32 %v17967_v17, %v9400_v42  ;;  %v9665_v19 = vadd.f32 %v17967_v17, %v9402_v11  ;;  %v9662_v57 = vadd.f32 %v17967_v17, %v9399_v63  ;;  %v24157_v11 = vld [vmem:[#allocation18_spill] sm:$0xff] }
 0x1af   : > { %16407 = vmatmul.mubr.msk.f32.vlgmr.msra.gmra.mrb[28].mxu1 %vm406_vm0, %v24154_v25  ;;  %v2116_v13 = vpop.permute.xlu0 %2115  ;;  %v8198_v43 = vrot.slane %v6701_v2, %v17897_v48  ;;  %v9404_v23 = vsub.f32 %v8202_v28, %v18052_v33  ;;  %v9401_v0 = vsub.f32 %v8190_v54, %v18020_v24  ;;  %v9406_v18 = vsub.f32 %v8210_v15, %v18052_v33 }
 0x1b0   : > { %v2039_v51 = vpop.permute.xlu1 %2038  ;;  %10463 = vadd.xlane.f32.xlu0 %v10462_v14  ;;  %16410 = vmatpush3.xpose.msk.msra.mxu1 %vm406_vm0, %v1885_v52  ;;  %v6722_v52 = vrot.slane %v6694_v56, %v17868_v47  ;;  %v8206_v2 = vrot.slane %v6723_v26, %v17897_v48  ;;  %v6742_v49 = vcombine.high %v18339_v12, %v18339_v12  ;;  %v10468_v42 = vsel %vm406_vm0, %v10178_v35, 0.0 }
 0x1b1   : > { %16420 = vmatpush3.xpose.msk.msra.mxu0 %vm406_vm0, %v2039_v51  ;;  %16411 = vmatprep.mubr.msk.f32.mxu1 %vm17186_vm1, %v24135_v22  ;;  %v10459_v24 = vsel %vm406_vm0, %v10175_v29, 0.0  ;;  %v10177_v16 = vmul.f32 %v18044_v31, %v9914_v60  ;;  %v9919_v30 = vmax.f32 %v9663_v8, 0.0  ;;  %v10474_v14 = vsel %vm406_vm0, %v10180_v9, 0.0 }
 0x1b2   : > { %10454 = vadd.xlane.f32.xlu1 %v10453_v58  ;;  %16414 = vmatprep.subr.mxu1 %v24135_v22  ;;  %v10179_v28 = vmul.f32 %v18044_v31, %v9916_v61  ;;  %v9403_v54 = vsub.f32 %v8198_v43, %v18052_v33  ;;  %v6708_v56 = vrot.slane %v18305_v7, %v17868_v47  ;;  %v9918_v29 = vmax.f32 %v9662_v57, 0.0 }
 0x1b3   : > { %16412 = vmatmul.mubr.msk.f32.vlgmr.msra.gmra.mrb[30].mxu1 %vm406_vm0, %v24155_v40  ;;  %v18364_v50 = vpop.permute.xlu0 %5009  ;;  %16429 = vmatprep.subr.mxu0 %v24135_v22  ;;  %v9667_v15 = vadd.f32 %v17967_v17, %v9404_v23  ;;  %v9664_v26 = vadd.f32 %v17967_v17, %v9401_v0  ;;  %v6726_v25 = vcombine.high %v6722_v52, %v6722_v52  ;;  %v9921_v35 = vmax.f32 %v9665_v19, 0.0  ;;  %v24159_v19 = vld [vmem:[#allocation35_spill] sm:$0xff] }
 0x1b4   : > { %24156 = vst [vmem:[#allocation30_spill] sm:$0xff] %v18364_v50  ;;  %16422 = vmatmul.mubr.msk.f32.vlgmr.msra.gmra.mrb[32].mxu0 %vm406_vm0, %v24157_v11  ;;  %v18372_v63 = vpop.permute.xlu1 %4933  ;;  %10469 = vadd.xlane.f32.xlu0 %v10468_v42  ;;  %v9669_v9 = vadd.f32 %v17967_v17, %v9406_v18  ;;  %v9405_v7 = vsub.f32 %v8206_v2, %v18052_v33  ;;  %v10465_v58 = vsel %vm406_vm0, %v10177_v16, 0.0 }
 0x1b5   : > { %24158 = vst [vmem:[#allocation29_spill] sm:$0xff] %v18372_v63  ;;  %16415 = vmatpush3.xpose.msk.msra.mxu1 %vm406_vm0, %v18285_v6  ;;  %16416 = vmatprep.mubr.msk.f32.mxu1 %vm17186_vm1, %v24135_v22  ;;  %v6764_v60 = vrot.slane %v6742_v49, %v17868_v47  ;;  %v10182_v8 = vmul.f32 %v18044_v31, %v9919_v30  ;;  %v9923_v2 = vmax.f32 %v9667_v15, 0.0  ;;  %v9920_v49 = vmax.f32 %v9664_v26, 0.0 }
 0x1b6   : > { %10460 = vadd.xlane.f32.xlu1 %v10459_v24  ;;  %16424 = vmatprep.subr.mxu1 %v24135_v22  ;;  %v8218_v51 = vrot.slane %v6722_v52, %v17897_v48  ;;  %v8214_v61 = vrot.slane %v6708_v56, %v17897_v48  ;;  %v6727_v57 = vcombine.high %v18088_v10, %v18088_v10  ;;  %v9925_v24 = vmax.f32 %v9669_v9, 0.0 }
 0x1b7   : > { %v2270_v6 = vpop.permute.xlu0 %2269  ;;  %16431 = vmatprep.mubr.msk.f32.mxu0 %vm17186_vm1, %v24135_v22  ;;  %v9666_v23 = vadd.f32 %v17967_v17, %v9403_v54  ;;  %v8234_v0 = vrot.slane %v6764_v60, %v17897_v48  ;;  %v6724_v18 = vcombine.high %v6708_v56, %v6708_v56  ;;  %v10181_v52 = vmul.f32 %v18044_v31, %v9918_v29  ;;  %v24161_v56 = vld [vmem:[#allocation20_spill] sm:$0xff]  ;;  %v24162_v29 = vld [vmem:[#allocation19_spill] sm:$0xff] }
 0x1b8   : > { %16417 = vmatmul.mubr.msk.f32.vlgmr.msra.gmra.mrb[32].mxu1 %vm406_vm0, %v24159_v19  ;;  %v2193_v43 = vpop.permute.xlu1 %2192  ;;  %10475 = vadd.xlane.f32.xlu0 %v10474_v14  ;;  %v8226_v40 = vrot.slane %v6726_v25, %v17897_v48  ;;  %v10184_v42 = vmul.f32 %v18044_v31, %v9921_v35  ;;  %v9668_v16 = vadd.f32 %v17967_v17, %v9405_v7  ;;  %v10480_v26 = vsel %vm406_vm0, %v10182_v8, 0.0 }
 0x1b9   : > { %16425 = vmatpush3.xpose.msk.msra.mxu1 %vm406_vm0, %v2116_v13  ;;  %16430 = vmatpush3.xpose.msk.msra.mxu0 %vm406_vm0, %v2193_v43  ;;  %v6774_v30 = vcombine.high %v6764_v60, %v6764_v60  ;;  %v9408_v11 = vsub.f32 %v8218_v51, %v18052_v33  ;;  %v9407_v14 = vsub.f32 %v8214_v61, %v18052_v33  ;;  %v9922_v25 = vmax.f32 %v9666_v23, 0.0 }
 0x1ba   : > { %10466 = vadd.xlane.f32.xlu1 %v10465_v58  ;;  %16426 = vmatprep.mubr.msk.f32.mxu1 %vm17186_vm1, %v24135_v22  ;;  %v6741_v54 = vrot.slane %v6727_v57, %v17868_v47  ;;  %v9412_v35 = vsub.f32 %v8234_v0, %v18088_v10  ;;  %v8222_v9 = vrot.slane %v6724_v18, %v17897_v48  ;;  %v10471_v7 = vsel %vm406_vm0, %v10179_v28, 0.0  ;;  %v24164_v18 = vld [vmem:[#allocation22_spill] sm:$0xff] }
 0x1bb   : > { %16434 = vmatprep.subr.mxu1 %v24135_v22  ;;  %v18410_v13 = vpop.permute.xlu0 %5161  ;;  %16439 = vmatprep.subr.mxu0 %v24135_v22  ;;  %v10186_v60 = vmul.f32 %v18044_v31, %v9923_v2  ;;  %v10183_v51 = vmul.f32 %v18044_v31, %v9920_v49  ;;  %v9410_v61 = vsub.f32 %v8226_v40, %v18052_v33  ;;  %v9924_v57 = vmax.f32 %v9668_v16, 0.0 }
 0x1bc   : > { %24160 = vst [vmem:[#allocation36_spill] sm:$0xff] %v18410_v13  ;;  %16427 = vmatmul.mubr.msk.f32.vlgmr.msra.gmra.mrb[34].mxu1 %vm406_vm0, %v24161_v56  ;;  %16432 = vmatmul.mubr.msk.f32.vlgmr.msra.gmra.mrb[34].mxu0 %vm406_vm0, %v24162_v29  ;;  %v18420_v15 = vpop.permute.xlu1 %5085  ;;  %v10188_v8 = vmul.f32 %v18044_v31, %v9925_v24  ;;  %v8242_v19 = vrot.slane %v6774_v30, %v17897_v48  ;;  %v10486_v43 = vsel %vm406_vm0, %v10184_v42, 0.0  ;;  %v10477_v24 = vsel %vm406_vm0, %v10181_v52, 0.0 }
 0x1bd   : > { %24163 = vst [vmem:[#allocation18_spill] sm:$0xff] %v18420_v15  ;;  %10481 = vadd.xlane.f32.xlu0 %v10480_v26  ;;  %16435 = vmatpush3.xpose.msk.msra.mxu1 %vm406_vm0, %v2270_v6  ;;  %v6750_v6 = vrot.slane %v18339_v12, %v17868_v47  ;;  %v9671_v58 = vadd.f32 %v17967_v17, %v9408_v11  ;;  %v10483_v26 = vsel %vm406_vm0, %v10183_v51, 0.0 }
 0x1be   : > { %10472 = vadd.xlane.f32.xlu1 %v10471_v7  ;;  %16436 = vmatprep.mubr.msk.f32.mxu1 %vm17186_vm1, %v24135_v22  ;;  %v9670_v23 = vadd.f32 %v17967_v17, %v9407_v14  ;;  %v6743_v0 = vcombine.high %v6741_v54, %v6741_v54  ;;  %v10185_v49 = vmul.f32 %v18044_v31, %v9922_v25  ;;  %v24166_v7 = vld [vmem:[#allocation26_spill] sm:$0xff] }
 0x1bf   : > { %16444 = vmatprep.subr.mxu1 %v24135_v22  ;;  %v2424_v28 = vpop.permute.xlu0 %2423  ;;  %16441 = vmatprep.mubr.msk.f32.mxu0 %vm17186_vm1, %v24135_v22  ;;  %v9675_v12 = vadd.f32 %v17967_v17, %v9412_v35  ;;  %v9409_v40 = vsub.f32 %v8222_v9, %v18052_v33  ;;  %v8230_v42 = vrot.slane %v6750_v6, %v17897_v48  ;;  %v10492_v33 = vsel %vm406_vm0, %v10186_v60, 0.0 }
 0x1c0   : > { %16437 = vmatmul.mubr.msk.f32.vlgmr.msra.gmra.mrb[36].mxu1 %vm406_vm0, %v24164_v18  ;;  %v2347_v2 = vpop.permute.xlu1 %2346  ;;  %v9673_v16 = vadd.f32 %v17967_v17, %v9410_v61  ;;  %v6783_v30 = vrot.slane %v18067_v3, %v17868_v47  ;;  %v7168_v11 = vcombine.high %v18182_v4, %v18182_v4  ;;  %v10187_v14 = vmul.f32 %v18044_v31, %v9924_v57 }
 0x1c1   : > { %10487 = vadd.xlane.f32.xlu0 %v10486_v43  ;;  %16445 = vmatpush3.xpose.msk.msra.mxu1 %vm406_vm0, %v2424_v28  ;;  %v9414_v56 = vsub.f32 %v8242_v19, %v18088_v10  ;;  %v6772_v29 = vcombine.high %v6750_v6, %v6750_v6  ;;  %v9927_v25 = vmax.f32 %v9671_v58, 0.0  ;;  %v9926_v35 = vmax.f32 %v9670_v23, 0.0  ;;  %v24168_v6 = vld [vmem:[#allocation21_spill] sm:$0xff] }
 0x1c2   : > { %16440 = vmatpush3.xpose.msk.msra.mxu0 %vm406_vm0, %v2347_v2  ;;  %10478 = vadd.xlane.f32.xlu1 %v10477_v24  ;;  %v6771_v9 = vrot.slane %v6743_v0, %v17868_v47  ;;  %v10498_v61 = vsel %vm406_vm0, %v10188_v8, 0.0  ;;  %v9931_v57 = vmax.f32 %v9675_v12, 0.0  ;;  %v9672_v19 = vadd.f32 %v17967_v17, %v9409_v40 }
 0x1c3   : > { %16446 = vmatprep.mubr.msk.f32.mxu1 %vm17186_vm1, %v24135_v22  ;;  %v18461_v52 = vpop.permute.xlu0 %5313  ;;  %16454 = vmatprep.subr.mxu1 %v24135_v22  ;;  %v9411_v51 = vsub.f32 %v8230_v42, %v18088_v10  ;;  %v9929_v28 = vmax.f32 %v9673_v16, 0.0  ;;  %v6757_v43 = vrot.slane %v6741_v54, %v17868_v47  ;;  %v6791_v58 = vcombine.high %v6783_v30, %v6783_v30 }
 0x1c4   : > { %24165 = vst [vmem:[#allocation35_spill] sm:$0xff] %v18461_v52  ;;  %16447 = vmatmul.mubr.msk.f32.vlgmr.msra.gmra.mrb[38].mxu1 %vm406_vm0, %v24166_v7  ;;  %v18468_v60 = vpop.permute.xlu1 %5237  ;;  %16449 = vmatprep.subr.mxu0 %v24135_v22  ;;  %v18478_v23 = vrot.slane %v7168_v11, %v17868_v47  ;;  %v10489_v0 = vsel %vm406_vm0, %v10185_v49, 0.0  ;;  %v10495_v8 = vsel %vm406_vm0, %v10187_v14, 0.0  ;;  %v9677_v18 = vadd.f32 %v17967_v17, %v9414_v56 }
 0x1c5   : > { %24167 = vst [vmem:[#allocation20_spill] sm:$0xff] %v18468_v60  ;;  %16442 = vmatmul.mubr.msk.f32.vlgmr.msra.gmra.mrb[36].mxu0 %vm406_vm0, %v24168_v6  ;;  %10493 = vadd.xlane.f32.xlu0 %v10492_v33  ;;  %v8238_v2 = vrot.slane %v6772_v29, %v17897_v48  ;;  %v10190_v54 = vmul.f32 %v18044_v31, %v9927_v25  ;;  %v9928_v29 = vmax.f32 %v9672_v19, 0.0 }
 0x1c6   : > { %10484 = vadd.xlane.f32.xlu1 %v10483_v26  ;;  %16456 = vmatprep.mubr.msk.f32.mxu1 %vm17186_vm1, %v24135_v22  ;;  %v10189_v40 = vmul.f32 %v18044_v31, %v9926_v35  ;;  %v6775_v42 = vcombine.high %v6771_v9, %v6771_v9  ;;  %v8246_v49 = vrot.slane %v6757_v43, %v17897_v48  ;;  %v9933_v35 = vmax.f32 %v9677_v18, 0.0 }
 0x1c7   : > { %v2578_v12 = vpop.permute.xlu0 %2577  ;;  %16451 = vmatprep.mubr.msk.f32.mxu0 %vm17186_vm1, %v24135_v22  ;;  %v10194_v16 = vmul.f32 %v18044_v31, %v9931_v57  ;;  %v9674_v11 = vadd.f32 %v17967_v17, %v9411_v51  ;;  %v8250_v33 = vrot.slane %v6771_v9, %v17897_v48  ;;  %v6776_v14 = vcombine.high %v18067_v3, %v18067_v3 }
 0x1c8   : > { %v2501_v24 = vpop.permute.xlu1 %2500  ;;  %16455 = vmatpush3.xpose.msk.msra.mxu1 %vm406_vm0, %v2578_v12  ;;  %v10192_v56 = vmul.f32 %v18044_v31, %v9929_v28  ;;  %v6813_v26 = vrot.slane %v6791_v58, %v17868_v47  ;;  %v7184_v25 = vcombine.high %v18478_v23, %v18478_v23  ;;  %v9413_v9 = vsub.f32 %v8238_v2, %v18088_v10 }
 0x1c9   : > { %10499 = vadd.xlane.f32.xlu0 %v10498_v61  ;;  %16450 = vmatpush3.xpose.msk.msra.mxu0 %vm406_vm0, %v2501_v24  ;;  %v6773_v7 = vcombine.high %v6757_v43, %v6757_v43  ;;  %v18505_v57 = vrot.slane %v6783_v30, %v17868_v47  ;;  %v24169_v61 = vld [vmem:[#allocation28_spill] sm:$0xff]  ;;  %v10501_v19 = vsel %vm406_vm0, %v10189_v40, 0.0  ;;  %v8258_v6 = vrot.slane %v6775_v42, %v17897_v48 }
 0x1ca   : > { %10490 = vadd.xlane.f32.xlu1 %v10489_v0  ;;  %16464 = vmatprep.subr.mxu1 %v24135_v22  ;;  %v9415_v28 = vsub.f32 %v8246_v49, %v18088_v10  ;;  %v8266_v58 = vrot.slane %v6813_v26, %v17897_v48  ;;  %v24171_v0 = vld [vmem:[#allocation25_spill] sm:$0xff]  ;;  %v10504_v43 = vsel %vm406_vm0, %v10190_v54, 0.0  ;;  %v9930_v18 = vmax.f32 %v9674_v11, 0.0 }
 0x1cb   : > { %16457 = vmatmul.mubr.msk.f32.vlgmr.msra.gmra.mrb[40].mxu1 %vm406_vm0, %v24169_v61  ;;  %v18509_v51 = vpop.permute.xlu0 %5465  ;;  %16459 = vmatprep.subr.mxu0 %v24135_v22  ;;  %v9416_v2 = vsub.f32 %v8250_v33, %v18088_v10  ;;  %v6790_v12 = vrot.slane %v6776_v14, %v17868_v47  ;;  %v10516_v40 = vsel %vm406_vm0, %v10194_v16, 0.0  ;;  %v10191_v42 = vmul.f32 %v18044_v31, %v9928_v29 }
 0x1cc   : > { %24170 = vst [vmem:[#allocation19_spill] sm:$0xff] %v18509_v51  ;;  %16452 = vmatmul.mubr.msk.f32.vlgmr.msra.gmra.mrb[38].mxu0 %vm406_vm0, %v24171_v0  ;;  %v18518_v30 = vpop.permute.xlu1 %5389  ;;  %16466 = vmatprep.mubr.msk.f32.mxu1 %vm17186_vm1, %v24135_v22  ;;  %v6823_v49 = vcombine.high %v6813_v26, %v6813_v26  ;;  %v18530_v24 = vrot.slane %v7184_v25, %v17868_v47  ;;  %v10510_v54 = vsel %vm406_vm0, %v10192_v56, 0.0 }
 0x1cd   : > { %24172 = vst [vmem:[#allocation22_spill] sm:$0xff] %v18518_v30  ;;  %10505 = vadd.xlane.f32.xlu0 %v10504_v43  ;;  %16461 = vmatprep.mubr.msk.f32.mxu0 %vm17186_vm1, %v24135_v22  ;;  %v10196_v11 = vmul.f32 %v18044_v31, %v9933_v35  ;;  %v9676_v33 = vadd.f32 %v17967_v17, %v9413_v9 }
 0x1ce   : > { %10496 = vadd.xlane.f32.xlu1 %v10495_v8  ;;  %v8254_v14 = vrot.slane %v6773_v7, %v17897_v48  ;;  %v9418_v0 = vsub.f32 %v8258_v6, %v18088_v10  ;;  %v9678_v16 = vadd.f32 %v17967_v17, %v9415_v28  ;;  %v9420_v29 = vsub.f32 %v8266_v58, %v18067_v3 }
 0x1cf   : > { %v2732_v61 = vpop.permute.xlu0 %2731  ;;  %v6821_v26 = vcombine.high %v18505_v57, %v18505_v57  ;;  %v10193_v8 = vmul.f32 %v18044_v31, %v9930_v18  ;;  %v9679_v56 = vadd.f32 %v17967_v17, %v9416_v2  ;;  %v6792_v35 = vcombine.high %v6790_v12, %v6790_v12 }
 0x1d0   : > { %v2655_v25 = vpop.permute.xlu1 %2654  ;;  %16465 = vmatpush3.xpose.msk.msra.mxu1 %vm406_vm0, %v2732_v61  ;;  %v6806_v9 = vrot.slane %v6790_v12, %v17868_v47  ;;  %v10507_v7 = vsel %vm406_vm0, %v10191_v42, 0.0  ;;  %v8274_v6 = vrot.slane %v6823_v49, %v17897_v48  ;;  %v8262_v28 = vrot.slane %v18505_v57, %v17897_v48  ;;  %v24173_v42 = vld [vmem:[#allocation32_spill] sm:$0xff] }
 0x1d1   : > { %10511 = vadd.xlane.f32.xlu0 %v10510_v54  ;;  %16460 = vmatpush3.xpose.msk.msra.mxu0 %vm406_vm0, %v2655_v25  ;;  %v7216_v58 = vcombine.high %v18530_v24, %v18530_v24  ;;  %v10522_v43 = vsel %vm406_vm0, %v10196_v11, 0.0  ;;  %v9932_v18 = vmax.f32 %v9676_v33, 0.0  ;;  %v9417_v2 = vsub.f32 %v8254_v14, %v18088_v10  ;;  %v24175_v33 = vld [vmem:[#allocation27_spill] sm:$0xff] }
 0x1d2   : > { %10502 = vadd.xlane.f32.xlu1 %v10501_v19  ;;  %16474 = vmatprep.subr.mxu1 %v24135_v22  ;;  %v6832_v12 = vrot.slane %v18142_v44, %v17868_v47  ;;  %v9681_v57 = vadd.f32 %v17967_v17, %v9418_v0  ;;  %v9934_v19 = vmax.f32 %v9678_v16, 0.0  ;;  %v9683_v54 = vadd.f32 %v17967_v17, %v9420_v29 }
 0x1d3   : > { %16467 = vmatmul.mubr.msk.f32.vlgmr.msra.gmra.mrb[42].mxu1 %vm406_vm0, %v24173_v42  ;;  %v18559_v49 = vpop.permute.xlu0 %5617  ;;  %16469 = vmatprep.subr.mxu0 %v24135_v22  ;;  %v8270_v11 = vrot.slane %v6821_v26, %v17897_v48  ;;  %v9935_v14 = vmax.f32 %v9679_v56, 0.0  ;;  %v6820_v61 = vrot.slane %v6792_v35, %v17868_v47  ;;  %v6822_v25 = vcombine.high %v6806_v9, %v6806_v9 }
 0x1d4   : > { %24174 = vst [vmem:[#allocation26_spill] sm:$0xff] %v18559_v49  ;;  %16462 = vmatmul.mubr.msk.f32.vlgmr.msra.gmra.mrb[40].mxu0 %vm406_vm0, %v24175_v33  ;;  %v18567_v10 = vpop.permute.xlu1 %5541  ;;  %16476 = vmatprep.mubr.msk.f32.mxu1 %vm17186_vm1, %v24135_v22  ;;  %v18573_v42 = vrot.slane %v7216_v58, %v17897_v48  ;;  %v10513_v0 = vsel %vm406_vm0, %v10193_v8, 0.0  ;;  %v9422_v16 = vsub.f32 %v8274_v6, %v18067_v3  ;;  %v9937_v8 = vmax.f32 %v9681_v57, 0.0 }
 0x1d5   : > { %24176 = vst [vmem:[#allocation21_spill] sm:$0xff] %v18567_v10  ;;  %10517 = vadd.xlane.f32.xlu0 %v10516_v40  ;;  %16471 = vmatprep.mubr.msk.f32.mxu0 %vm17186_vm1, %v24135_v22  ;;  %v9419_v29 = vsub.f32 %v8262_v28, %v18067_v3  ;;  %v6825_v26 = vcombine.high %v18142_v44, %v18142_v44 }
 0x1d6   : > { %10508 = vadd.xlane.f32.xlu1 %v10507_v7  ;;  %v10195_v56 = vmul.f32 %v18044_v31, %v9932_v18  ;;  %v9680_v35 = vadd.f32 %v17967_v17, %v9417_v2  ;;  %v8278_v58 = vrot.slane %v6806_v9, %v17897_v48  ;;  %v6840_v40 = vcombine.high %v6832_v12, %v6832_v12  ;;  %v18597_v2 = vld [vmem:[%s23953_s5] ss:$0 sm:$0xff] }
 0x1d7   : > { %v2886_v33 = vpop.permute.xlu0 %2885  ;;  %v10197_v10 = vmul.f32 %v18044_v31, %v9934_v19  ;;  %v8282_v30 = vrot.slane %v6820_v61, %v17897_v48  ;;  %v9421_v6 = vsub.f32 %v8270_v11, %v18067_v3  ;;  %v10198_v7 = vmul.f32 %v18044_v31, %v9935_v14 }
 0x1d8   : > { %v2809_v28 = vpop.permute.xlu1 %2808  ;;  %16475 = vmatpush3.xpose.msk.msra.mxu1 %vm406_vm0, %v2886_v33  ;;  %v6824_v60 = vcombine.high %v6820_v61, %v6820_v61  ;;  %v8286_v18 = vrot.slane %v6822_v25, %v17897_v48  ;;  %v9939_v9 = vmax.f32 %v9683_v54, 0.0  ;;  %v9685_v57 = vadd.f32 %v18597_v2, %v9422_v16  ;;  %v24177_v25 = vld [vmem:[#allocation34_spill] sm:$0xff] }
 0x1d9   : > { %10523 = vadd.xlane.f32.xlu0 %v10522_v43  ;;  %16470 = vmatpush3.xpose.msk.msra.mxu0 %vm406_vm0, %v2809_v28  ;;  %v9682_v19 = vadd.f32 %v18597_v2, %v9419_v29  ;;  %v18602_v11 = vrot.slane %v6825_v26, %v17868_v47  ;;  %v9936_v14 = vmax.f32 %v9680_v35, 0.0  ;;  %v9423_v43 = vsub.f32 %v8278_v58, %v18067_v3  ;;  %v24179_v58 = vld [vmem:[#allocation31_spill] sm:$0xff] }
 0x1da   : > { %10514 = vadd.xlane.f32.xlu1 %v10513_v0  ;;  %16484 = vmatprep.subr.mxu1 %v24135_v22  ;;  %v6862_v54 = vrot.slane %v6840_v40, %v17868_v47  ;;  %v18608_v61 = vrot.slane %v6832_v12, %v17868_v47  ;;  %v10519_v29 = vsel %vm406_vm0, %v10195_v56, 0.0  ;;  %v10200_v0 = vmul.f32 %v18044_v31, %v9937_v8 }
 0x1db   : > { %16477 = vmatmul.mubr.msk.f32.vlgmr.msra.gmra.mrb[44].mxu1 %vm406_vm0, %v24177_v25  ;;  %v18612_v16 = vpop.permute.xlu0 %5769  ;;  %16479 = vmatprep.subr.mxu0 %v24135_v22  ;;  %v9424_v26 = vsub.f32 %v8282_v30, %v18067_v3  ;;  %v9684_v35 = vadd.f32 %v18597_v2, %v9421_v6  ;;  %v10528_v40 = vsel %vm406_vm0, %v10198_v7, 0.0  ;;  %v8290_v56 = vrot.slane %v6824_v60, %v17897_v48 }
 0x1dc   : > { %24178 = vst [vmem:[#allocation28_spill] sm:$0xff] %v18612_v16  ;;  %16472 = vmatmul.mubr.msk.f32.vlgmr.msra.gmra.mrb[42].mxu0 %vm406_vm0, %v24179_v58  ;;  %v18621_v12 = vpop.permute.xlu1 %5693  ;;  %16486 = vmatprep.mubr.msk.f32.mxu1 %vm17186_vm1, %v24135_v22  ;;  %v9425_v33 = vsub.f32 %v8286_v18, %v18067_v3  ;;  %v8294_v8 = vrot.slane %v18608_v61, %v17897_v48  ;;  %v10525_v30 = vsel %vm406_vm0, %v10197_v10, 0.0  ;;  %v9941_v28 = vmax.f32 %v9685_v57, 0.0 }
 0x1dd   : > { %24180 = vst [vmem:[#allocation25_spill] sm:$0xff] %v18621_v12  ;;  %10529 = vadd.xlane.f32.xlu0 %v10528_v40  ;;  %16481 = vmatprep.mubr.msk.f32.mxu0 %vm17186_vm1, %v24135_v22  ;;  %v10202_v6 = vmul.f32 %v18044_v31, %v9939_v9  ;;  %v6841_v7 = vcombine.high %v18602_v11, %v18602_v11  ;;  %v9938_v25 = vmax.f32 %v9682_v19, 0.0  ;;  %v10534_v40 = vsel %vm406_vm0, %v10200_v0, 0.0 }
 0x1de   : > { %10520 = vadd.xlane.f32.xlu1 %v10519_v29  ;;  %v10199_v60 = vmul.f32 %v18044_v31, %v9936_v14  ;;  %v9686_v18 = vadd.f32 %v18597_v2, %v9423_v43  ;;  %v6872_v58 = vcombine.high %v6862_v54, %v6862_v54  ;;  %v9687_v10 = vadd.f32 %v18597_v2, %v9424_v26  ;;  %v18654_v43 = vld [vmem:[%s23954_s6] ss:$0 sm:$0xff] }
 0x1df   : > { %v3040_v17 = vpop.permute.xlu0 %3039  ;;  %v9940_v12 = vmax.f32 %v9684_v35, 0.0  ;;  %v8298_v16 = vrot.slane %v6862_v54, %v17897_v48  ;;  %v9426_v57 = vsub.f32 %v8290_v56, %v18067_v3  ;;  %v9688_v29 = vadd.f32 %v18597_v2, %v9425_v33  ;;  %v24181_v33 = vld [vmem:[#allocation39_spill] sm:$0xff] }
 0x1e0   : > { %v2963_v9 = vpop.permute.xlu1 %2962  ;;  %16485 = vmatpush3.xpose.msk.msra.mxu1 %vm406_vm0, %v3040_v17  ;;  %v9427_v31 = vsub.f32 %v8294_v8, %v18142_v44  ;;  %v18647_v19 = vrot.slane %v18078_v1, %v17868_v47  ;;  %v10540_v14 = vsel %vm406_vm0, %v10202_v6, 0.0  ;;  %v10204_v3 = vmul.f32 %v18654_v43, %v9941_v28  ;;  %v24182_v28 = vld [vmem:[#allocation33_spill] sm:$0xff] }
 0x1e1   : > { %10535 = vadd.xlane.f32.xlu0 %v10534_v40  ;;  %16480 = vmatpush3.xpose.msk.msra.mxu0 %vm406_vm0, %v2963_v9  ;;  %v6869_v17 = vrot.slane %v6841_v7, %v17868_v47  ;;  %v6870_v54 = vcombine.high %v18608_v61, %v18608_v61  ;;  %v10201_v0 = vmul.f32 %v18654_v43, %v9938_v25  ;;  %v9942_v26 = vmax.f32 %v9686_v18, 0.0  ;;  %v24184_v25 = vld [vmem:[#allocation57_spill] sm:$0xff] }
 0x1e2   : > { %10526 = vadd.xlane.f32.xlu1 %v10525_v30  ;;  %16494 = vmatprep.subr.mxu1 %v24135_v22  ;;  %v8306_v35 = vrot.slane %v6872_v58, %v17897_v48  ;;  %v6874_v56 = vcombine.high %v18078_v1, %v18078_v1  ;;  %v9943_v8 = vmax.f32 %v9687_v10, 0.0  ;;  %v10203_v6 = vmul.f32 %v18654_v43, %v9940_v12 }
 0x1e3   : > { %16487 = vmatmul.mubr.msk.f32.vlgmr.msra.gmra.mrb[46].mxu1 %vm406_vm0, %v24181_v33  ;;  %16489 = vmatprep.subr.mxu0 %v24135_v22  ;;  %v9428_v61 = vsub.f32 %v8298_v16, %v18142_v44  ;;  %v8314_v30 = vrot.slane %v6869_v17, %v17897_v48  ;;  %v9689_v18 = vadd.f32 %v18597_v2, %v9426_v57  ;;  %v9944_v58 = vmax.f32 %v9688_v29, 0.0  ;;  %v18898_v15 = vpop.permute.xlu0 %5921 }
 0x1e4   : > { %16482 = vmatmul.mubr.msk.f32.vlgmr.msra.gmra.mrb[44].mxu0 %vm406_vm0, %v24182_v28  ;;  %v18673_v7 = vpop.permute.xlu1 %5845  ;;  %16495 = vmatpush3.msra.mxu1 %v24184_v25  ;;  %v9690_v40 = vadd.f32 %v18597_v2, %v9427_v31  ;;  %v6889_v10 = vcombine.high %v18647_v19, %v18647_v19  ;;  %v10531_v16 = vsel %vm406_vm0, %v10199_v60, 0.0  ;;  %v8302_v12 = vrot.slane %v6870_v54, %v17897_v48 }
 0x1e5   : > { %24183 = vst [vmem:[#allocation32_spill] sm:$0xff] %v18673_v7  ;;  %10541 = vadd.xlane.f32.xlu0 %v10540_v14  ;;  %16491 = vmatprep.mubr.msk.f32.mxu0 %vm17186_vm1, %v24135_v22  ;;  %v6873_v9 = vcombine.high %v6869_v17, %v6869_v17  ;;  %v6855_v33 = vrot.slane %v18602_v11, %v17868_v47  ;;  %v10546_v60 = vsel %vm406_vm0, %v10204_v3, 0.0  ;;  %v9945_v28 = vmax.f32 %v9689_v18, 0.0 }
 0x1e6   : > { %10532 = vadd.xlane.f32.xlu1 %v10531_v16  ;;  %v10205_v57 = vmul.f32 %v18654_v43, %v9942_v26  ;;  %v9430_v29 = vsub.f32 %v8306_v35, %v18142_v44  ;;  %v6888_v31 = vrot.slane %v6874_v56, %v17868_v47  ;;  %16496 = vmatprep.mubr.msk.f32.mxu1 %vm17186_vm1, %v24135_v22  ;;  %v9946_v35 = vmax.f32 %v9690_v40, 0.0 }
 0x1e7   : > { %v10206_v14 = vmul.f32 %v18654_v43, %v9943_v8  ;;  %v9691_v54 = vadd.f32 %v18597_v2, %v9428_v61  ;;  %v9432_v17 = vsub.f32 %v8314_v30, %v18142_v44  ;;  %16504 = vmatprep.subr.mxu1 %v24135_v22  ;;  %v10207_v26 = vmul.f32 %v18654_v43, %v9944_v58 }
 0x1e8   : > { %v3117_v11 = vpop.permute.xlu1 %3116  ;;  %v6911_v56 = vrot.slane %v6889_v10, %v17868_v47  ;;  %v10537_v3 = vsel %vm406_vm0, %v10201_v0, 0.0  ;;  %v9429_v8 = vsub.f32 %v8302_v12, %v18142_v44  ;;  %v8322_v61 = vrot.slane %v6873_v9, %v17897_v48  ;;  %v24185_v9 = vld [vmem:[#allocation38_spill] sm:$0xff]  ;;  %24188 = vst [vmem:[#allocation34_spill] sm:$0xff] %v18898_v15 }
 0x1e9   : > { %10547 = vadd.xlane.f32.xlu0 %v10546_v60  ;;  %16490 = vmatpush3.xpose.msk.msra.mxu0 %vm406_vm0, %v3117_v11  ;;  %v6871_v25 = vcombine.high %v6855_v33, %v6855_v33  ;;  %v10543_v30 = vsel %vm406_vm0, %v10203_v6, 0.0  ;;  %v10549_v18 = vsel %vm406_vm0, %v10205_v57, 0.0  ;;  %v9693_v58 = vadd.f32 %v18597_v2, %v9430_v29  ;;  %v24186_v29 = vld [vmem:[#allocation58_spill] sm:$0xff] }
 0x1ea   : > { %10538 = vadd.xlane.f32.xlu1 %v10537_v3  ;;  %16499 = vmatprep.subr.mxu0 %v24135_v22  ;;  %v6890_v40 = vcombine.high %v6888_v31, %v6888_v31  ;;  %v10552_v10 = vsel %vm406_vm0, %v10206_v14, 0.0  ;;  %v9947_v16 = vmax.f32 %v9691_v54, 0.0  ;;  %v9695_v0 = vadd.f32 %v18597_v2, %v9432_v17 }
 0x1eb   : > { %v6897_v12 = vrot.slane %v18647_v19, %v17868_v47  ;;  %v10208_v60 = vmul.f32 %v18654_v43, %v9945_v28  ;;  %v10209_v6 = vmul.f32 %v18654_v43, %v9946_v35  ;;  %v8310_v57 = vrot.slane %v6855_v33, %v17897_v48 }
 0x1ec   : > { %16492 = vmatmul.mubr.msk.f32.vlgmr.msra.gmra.mrb[46].mxu0 %vm406_vm0, %v24185_v9  ;;  %v6921_v11 = vcombine.high %v6911_v56, %v6911_v56  ;;  %v10555_v14 = vsel %vm406_vm0, %v10207_v26, 0.0  ;;  %v9692_v54 = vadd.f32 %v18597_v2, %v9429_v8  ;;  %v9434_v17 = vsub.f32 %v8322_v61, %v18142_v44  ;;  %v18969_v27 = vpop.permute.xlu1 %5997 }
 0x1ed   : > { %10553 = vadd.xlane.f32.xlu0 %v10552_v10  ;;  %16500 = vmatpush3.msra.mxu0 %v24186_v29  ;;  %v8318_v19 = vrot.slane %v6871_v25, %v17897_v48  ;;  %v9949_v3 = vmax.f32 %v9693_v58, 0.0  ;;  %v8326_v28 = vrot.slane %v6897_v12, %v17897_v48  ;;  %v6918_v35 = vrot.slane %v6890_v40, %v17868_v47 }
 0x1ee   : > { %10544 = vadd.xlane.f32.xlu1 %v10543_v30  ;;  %v6930_v33 = vrot.slane %v18175_v46, %v17868_v47  ;;  %16501 = vmatprep.mubr.msk.f32.mxu0 %vm17186_vm1, %v24135_v22  ;;  %v10210_v26 = vmul.f32 %v18654_v43, %v9947_v16  ;;  %v9951_v10 = vmax.f32 %v9695_v0, 0.0  ;;  %v8330_v8 = vrot.slane %v6911_v56, %v17897_v48 }
 0x1ef   : > { %v6919_v61 = vcombine.high %v6897_v12, %v6897_v12  ;;  %16509 = vmatprep.subr.mxu0 %v24135_v22  ;;  %v10558_v25 = vsel %vm406_vm0, %v10208_v60, 0.0  ;;  %v10561_v30 = vsel %vm406_vm0, %v10209_v6, 0.0  ;;  %v9431_v58 = vsub.f32 %v8310_v57, %v18142_v44  ;;  %24194 = vst [vmem:[#allocation38_spill] sm:$0xff] %v18969_v27 }
 0x1f0   : > { %v8338_v40 = vrot.slane %v6921_v11, %v17897_v48  ;;  %v9948_v9 = vmax.f32 %v9692_v54, 0.0  ;;  %v9697_v29 = vadd.f32 %v18597_v2, %v9434_v17  ;;  %v9433_v16 = vsub.f32 %v8318_v19, %v18142_v44 }
 0x1f1   : > { %10559 = vadd.xlane.f32.xlu0 %v10558_v25  ;;  %v6904_v0 = vrot.slane %v6888_v31, %v17868_v47  ;;  %v10212_v56 = vmul.f32 %v18654_v43, %v9949_v3  ;;  %v9435_v12 = vsub.f32 %v8326_v28, %v18078_v1  ;;  %v6922_v60 = vcombine.high %v6918_v35, %v6918_v35 }
 0x1f2   : > { %10550 = vadd.xlane.f32.xlu1 %v10549_v18  ;;  %v6938_v7 = vcombine.high %v6930_v33, %v6930_v33  ;;  %v10564_v6 = vsel %vm406_vm0, %v10210_v26, 0.0  ;;  %v10214_v57 = vmul.f32 %v18654_v43, %v9951_v10  ;;  %v9436_v11 = vsub.f32 %v8330_v8, %v18078_v1 }
 0x1f3   : > { %v8334_v54 = vrot.slane %v6919_v61, %v17897_v48  ;;  %v9694_v17 = vadd.f32 %v18597_v2, %v9431_v58  ;;  %v9438_v44 = vsub.f32 %v8338_v40, %v18078_v1  ;;  %v8346_v31 = vrot.slane %v6918_v35, %v17897_v48 }
 0x1f4   : > { %v8342_v18 = vrot.slane %v6904_v0, %v17897_v48  ;;  %v10211_v19 = vmul.f32 %v18654_v43, %v9948_v9  ;;  %v9953_v3 = vmax.f32 %v9697_v29, 0.0  ;;  %v9696_v28 = vadd.f32 %v18597_v2, %v9433_v16 }
 0x1f5   : > { %10565 = vadd.xlane.f32.xlu0 %v10564_v6  ;;  %v6920_v26 = vcombine.high %v6904_v0, %v6904_v0  ;;  %v10570_v10 = vsel %vm406_vm0, %v10212_v56, 0.0  ;;  %v9698_v8 = vadd.f32 %v18597_v2, %v9435_v12  ;;  %v8354_v61 = vrot.slane %v6922_v60, %v17897_v48 }
 0x1f6   : > { %10556 = vadd.xlane.f32.xlu1 %v10555_v14  ;;  %v6960_v25 = vrot.slane %v6938_v7, %v17868_v47  ;;  %v10576_v35 = vsel %vm406_vm0, %v10214_v57, 0.0  ;;  %v9699_v58 = vadd.f32 %v18597_v2, %v9436_v11  ;;  %v9437_v40 = vsub.f32 %v8334_v54, %v18078_v1 }
 0x1f7   : > { %v6923_v9 = vcombine.high %v18175_v46, %v18175_v46  ;;  %v9950_v29 = vmax.f32 %v9694_v17, 0.0  ;;  %v9701_v14 = vadd.f32 %v18597_v2, %v9438_v44  ;;  %v9440_v16 = vsub.f32 %v8346_v31, %v18078_v1 }
 0x1f8   : > { %v9439_v0 = vsub.f32 %v8342_v18, %v18078_v1  ;;  %v10567_v56 = vsel %vm406_vm0, %v10211_v19, 0.0  ;;  %v10216_v7 = vmul.f32 %v18654_v43, %v9953_v3  ;;  %v9952_v12 = vmax.f32 %v9696_v28, 0.0 }
 0x1f9   : > { %10571 = vadd.xlane.f32.xlu0 %v10570_v10  ;;  %v8350_v60 = vrot.slane %v6920_v26, %v17897_v48  ;;  %v9954_v6 = vmax.f32 %v9698_v8, 0.0  ;;  %v9442_v57 = vsub.f32 %v8354_v61, %v18078_v1  ;;  %v8362_v11 = vrot.slane %v6960_v25, %v17897_v48 }
 0x1fa   : > { %10562 = vadd.xlane.f32.xlu1 %v10561_v30  ;;  %v6970_v54 = vcombine.high %v6960_v25, %v6960_v25  ;;  %v9955_v17 = vmax.f32 %v9699_v58, 0.0  ;;  %v9700_v44 = vadd.f32 %v18597_v2, %v9437_v40  ;;  %v6946_v31 = vrot.slane %v6930_v33, %v17868_v47 }
 0x1fb   : > { %v6937_v18 = vrot.slane %v6923_v9, %v17868_v47  ;;  %v10213_v19 = vmul.f32 %v18654_v43, %v9950_v29  ;;  %v9957_v3 = vmax.f32 %v9701_v14, 0.0  ;;  %v9703_v28 = vadd.f32 %v18597_v2, %v9440_v16 }
 0x1fc   : > { %v9702_v30 = vadd.f32 %v18597_v2, %v9439_v0  ;;  %v10582_v26 = vsel %vm406_vm0, %v10216_v7, 0.0  ;;  %v10215_v10 = vmul.f32 %v18654_v43, %v9952_v12  ;;  %v9441_v8 = vsub.f32 %v8350_v60, %v18078_v1 }
 0x1fd   : > { %10577 = vadd.xlane.f32.xlu0 %v10576_v35  ;;  %v8358_v61 = vrot.slane %v6946_v31, %v17897_v48  ;;  %v10217_v33 = vmul.f32 %v18654_v43, %v9954_v6  ;;  %v9705_v25 = vadd.f32 %v18597_v2, %v9442_v57  ;;  %v9444_v58 = vsub.f32 %v8362_v11, %v18175_v46 }
 0x1fe   : > { %10568 = vadd.xlane.f32.xlu1 %v10567_v56  ;;  %v8370_v40 = vrot.slane %v6970_v54, %v17897_v48  ;;  %v10218_v9 = vmul.f32 %v18654_v43, %v9955_v17  ;;  %v9956_v35 = vmax.f32 %v9700_v44, 0.0  ;;  %v6939_v29 = vcombine.high %v6937_v18, %v6937_v18 }
 0x1ff   : > { %v6968_v14 = vcombine.high %v6946_v31, %v6946_v31  ;;  %v10573_v16 = vsel %vm406_vm0, %v10213_v19, 0.0  ;;  %v10220_v1 = vmul.f32 %v18654_v43, %v9957_v3  ;;  %v9959_v0 = vmax.f32 %v9703_v28, 0.0 }
 0x200   : > { %v9958_v7 = vmax.f32 %v9702_v30, 0.0  ;;  %v10579_v56 = vsel %vm406_vm0, %v10215_v10, 0.0  ;;  %v9704_v12 = vadd.f32 %v18597_v2, %v9441_v8  ;;  %v9443_v60 = vsub.f32 %v8358_v61, %v18175_v46 }
 0x201   : > { %10583 = vadd.xlane.f32.xlu0 %v10582_v26  ;;  %v6979_v6 = vrot.slane %v18112_v38, %v17868_v47  ;;  %v10585_v57 = vsel %vm406_vm0, %v10217_v33, 0.0  ;;  %v9961_v11 = vmax.f32 %v9705_v25, 0.0  ;;  %v9707_v54 = vadd.f32 %v18597_v2, %v9444_v58 }
 0x202   : > { %10574 = vadd.xlane.f32.xlu1 %v10573_v16  ;;  %v9446_v17 = vsub.f32 %v8370_v40, %v18175_v46  ;;  %v10588_v44 = vsel %vm406_vm0, %v10218_v9, 0.0  ;;  %v10219_v31 = vmul.f32 %v18654_v43, %v9956_v35  ;;  %v6967_v19 = vrot.slane %v6939_v29, %v17868_v47 }
 0x203   : > { %v8366_v3 = vrot.slane %v6968_v14, %v17897_v48  ;;  %v10594_v28 = vsel %vm406_vm0, %v10220_v1, 0.0  ;;  %v10222_v30 = vmul.f32 %v18654_v43, %v9959_v0  ;;  %v10221_v26 = vmul.f32 %v18654_v43, %v9958_v7 }
 0x204   : > { %v6953_v10 = vrot.slane %v6937_v18, %v17868_v47  ;;  %v9960_v8 = vmax.f32 %v9704_v12, 0.0  ;;  %v9706_v61 = vadd.f32 %v18597_v2, %v9443_v60  ;;  %v6987_v33 = vcombine.high %v6979_v6, %v6979_v6 }
 0x205   : > { %10589 = vadd.xlane.f32.xlu0 %v10588_v44  ;;  %v6972_v25 = vcombine.high %v18112_v38, %v18112_v38  ;;  %v10224_v58 = vmul.f32 %v18654_v43, %v9961_v11  ;;  %v9963_v40 = vmax.f32 %v9707_v54, 0.0  ;;  %v9709_v9 = vadd.f32 %v18597_v2, %v9446_v17 }
 0x206   : > { %10580 = vadd.xlane.f32.xlu1 %v10579_v56  ;;  %v7364_v35 = vcombine.high %v18236_v59, %v18236_v59  ;;  %v10591_v29 = vsel %vm406_vm0, %v10219_v31, 0.0  ;;  %v8378_v18 = vrot.slane %v6967_v19, %v17897_v48  ;;  %v9445_v14 = vsub.f32 %v8366_v3, %v18175_v46 }
 0x207   : > { %v6971_v16 = vcombine.high %v6967_v19, %v6967_v19  ;;  %v10600_v1 = vsel %vm406_vm0, %v10222_v30, 0.0  ;;  %v10597_v0 = vsel %vm406_vm0, %v10221_v26, 0.0  ;;  %v8374_v7 = vrot.slane %v6953_v10, %v17897_v48 }
 0x208   : > { %v6969_v56 = vcombine.high %v6953_v10, %v6953_v10  ;;  %v10223_v12 = vmul.f32 %v18654_v43, %v9960_v8  ;;  %v9962_v60 = vmax.f32 %v9706_v61, 0.0  ;;  %v7009_v11 = vrot.slane %v6987_v33, %v17868_v47 }
 0x209   : > { %10595 = vadd.xlane.f32.xlu0 %v10594_v28  ;;  %v18814_v54 = vrot.slane %v6972_v25, %v17868_v47  ;;  %v10606_v17 = vsel %vm406_vm0, %v10224_v58, 0.0  ;;  %v10226_v44 = vmul.f32 %v18654_v43, %v9963_v40  ;;  %v9965_v31 = vmax.f32 %v9709_v9, 0.0 }
 0x20a   : > { %10586 = vadd.xlane.f32.xlu1 %v10585_v57  ;;  %v18819_v19 = vrot.slane %v7364_v35, %v17868_v47  ;;  %v9448_v3 = vsub.f32 %v8378_v18, %v18175_v46  ;;  %v9708_v28 = vadd.f32 %v18597_v2, %v9445_v14  ;;  %v8386_v30 = vrot.slane %v6971_v16, %v17897_v48 }
 0x20b   : > { %v18826_v26 = vrot.slane %v18298_v5, %v17868_v47  ;;  %v9447_v57 = vsub.f32 %v8374_v7, %v18175_v46  ;;  %v8394_v10 = vrot.slane %v7009_v11, %v17897_v48  ;;  %v8382_v8 = vrot.slane %v6969_v56, %v17897_v48 }
 0x20c   : > { %v6995_v61 = vrot.slane %v6979_v6, %v17868_v47  ;;  %v10603_v33 = vsel %vm406_vm0, %v10223_v12, 0.0  ;;  %v10225_v25 = vmul.f32 %v18654_v43, %v9962_v60  ;;  %v7019_v58 = vcombine.high %v7009_v11, %v7009_v11 }
 0x20d   : > { %10601 = vadd.xlane.f32.xlu0 %v10600_v1  ;;  %v6988_v40 = vcombine.high %v18814_v54, %v18814_v54  ;;  %v10228_v9 = vmul.f32 %v18654_v43, %v9965_v31  ;;  %v7380_v18 = vcombine.high %v18819_v19, %v18819_v19  ;;  %v7469_v6 = vrot.slane %v18249_v20, %v17868_v47 }
 0x20e   : > { %10592 = vadd.xlane.f32.xlu1 %v10591_v29  ;;  %v8390_v35 = vrot.slane %v6995_v61, %v17897_v48  ;;  %v9711_v14 = vadd.f32 %v18597_v2, %v9448_v3  ;;  %v9964_v16 = vmax.f32 %v9708_v28, 0.0  ;;  %v9450_v1 = vsub.f32 %v8386_v30, %v18175_v46 }
 0x20f   : > { %v18846_v7 = vrot.slane %v18826_v26, %v17868_v47  ;;  %v9710_v29 = vadd.f32 %v18597_v2, %v9447_v57  ;;  %v9452_v56 = vsub.f32 %v8394_v10, %v18112_v38  ;;  %v9449_v12 = vsub.f32 %v8382_v8, %v18175_v46 }
 0x210   : > { %v18852_v60 = vrot.slane %v7469_v6, %v17868_v47  ;;  %v10612_v11 = vsel %vm406_vm0, %v10226_v44, 0.0  ;;  %v10609_v31 = vsel %vm406_vm0, %v10225_v25, 0.0  ;;  %v8402_v3 = vrot.slane %v7019_v58, %v17897_v48 }
 0x211   : > { %10607 = vadd.xlane.f32.xlu0 %v10606_v17  ;;  %v7016_v28 = vrot.slane %v6988_v40, %v17868_v47  ;;  %v10618_v30 = vsel %vm406_vm0, %v10228_v9, 0.0  ;;  %v9451_v57 = vsub.f32 %v8390_v35, %v18112_v38  ;;  %v18862_v46 = vrot.slane %v18217_v39, %v17868_v47 }
 0x212   : > { %10598 = vadd.xlane.f32.xlu1 %v10597_v0  ;;  %v18865_v10 = vrot.slane %v7380_v18, %v17868_v47  ;;  %v9967_v17 = vmax.f32 %v9711_v14, 0.0  ;;  %v10227_v44 = vmul.f32 %v18654_v43, %v9964_v16  ;;  %v9713_v8 = vadd.f32 %v18597_v2, %v9450_v1 }
 0x213   : > { %v7458_v25 = vcombine.high %v18846_v7, %v18846_v7  ;;  %v9966_v0 = vmax.f32 %v9710_v29, 0.0  ;;  %v9715_v58 = vadd.f32 %v18597_v2, %v9452_v56  ;;  %v9712_v40 = vadd.f32 %v18597_v2, %v9449_v12 }
 0x214   : > { %v7507_v9 = vcombine.high %v18852_v60, %v18852_v60  ;;  %v9454_v35 = vsub.f32 %v8402_v3, %v18112_v38  ;;  %v7017_v18 = vcombine.high %v6995_v61, %v6995_v61  ;;  %v7020_v14 = vcombine.high %v7016_v28, %v7016_v28 }
 0x215   : > { %10613 = vadd.xlane.f32.xlu0 %v10612_v11  ;;  %v18877_v16 = vrot.slane %v7458_v25, %v17897_v48  ;;  %v7036_v1 = vcombine.high %v18862_v46, %v18862_v46  ;;  %v7477_v29 = vcombine.high %v7469_v6, %v7469_v6  ;;  %v7412_v12 = vcombine.high %v18865_v10, %v18865_v10 }
 0x216   : > { %10604 = vadd.xlane.f32.xlu1 %v10603_v33  ;;  %v18882_v56 = vrot.slane %v7507_v9, %v17897_v48  ;;  %v10230_v11 = vmul.f32 %v18654_v43, %v9967_v17  ;;  %v9969_v49 = vmax.f32 %v9713_v8, 0.0  ;;  %v9714_v61 = vadd.f32 %v18597_v2, %v9451_v57 }
 0x217   : > { %v8410_v33 = vrot.slane %v7016_v28, %v17897_v48  ;;  %v7021_v25 = vcombine.high %v18217_v39, %v18217_v39  ;;  %v18896_v9 = vrot.slane %v7412_v12, %v17897_v48  ;;  %v10229_v17 = vmul.f32 %v18654_v43, %v9966_v0 }
 0x218   : > { %v9717_v57 = vadd.f32 %v18597_v2, %v9454_v35  ;;  %v8398_v8 = vrot.slane %v7017_v18, %v17897_v48  ;;  %v7002_v28 = vrot.slane %v18814_v54, %v17868_v47  ;;  %v8418_v3 = vrot.slane %v7020_v14, %v17897_v48 }
 0x219   : > { %24187 = vst [vmem:[#allocation27_spill] sm:$0xff] %v18896_v9  ;;  %10619 = vadd.xlane.f32.xlu0 %v10618_v30  ;;  %v7058_v6 = vrot.slane %v7036_v1, %v17868_v47  ;;  %v18908_v12 = vrot.slane %v7477_v29, %v17868_v47  ;;  %v10615_v0 = vsel %vm406_vm0, %v10227_v44, 0.0  ;;  %v9971_v15 = vmax.f32 %v9715_v58, 0.0 }
 0x21a   : > { %10610 = vadd.xlane.f32.xlu1 %v10609_v31  ;;  %v9968_v35 = vmax.f32 %v9712_v40, 0.0  ;;  %v9970_v51 = vmax.f32 %v9714_v61, 0.0  ;;  %v10624_v18 = vsel %vm406_vm0, %v10230_v11, 0.0  ;;  %v10232_v54 = vmul.f32 %v18654_v43, %v9969_v49 }
 0x21b   : > { %v9456_v31 = vsub.f32 %v8410_v33, %v18112_v38  ;;  %v7035_v14 = vrot.slane %v7021_v25, %v17868_v47  ;;  %v10621_v29 = vsel %vm406_vm0, %v10229_v17, 0.0  ;;  %v9453_v30 = vsub.f32 %v8398_v8, %v18112_v38 }
 0x21c   : > { %v8406_v44 = vrot.slane %v7002_v28, %v17897_v48  ;;  %v7018_v58 = vcombine.high %v7002_v28, %v7002_v28  ;;  %v9973_v40 = vmax.f32 %v9717_v57, 0.0  ;;  %v9458_v11 = vsub.f32 %v8418_v3, %v18112_v38 }
 0x21d   : > { %10625 = vadd.xlane.f32.xlu0 %v10624_v18  ;;  %v18917_v1 = vpop.xlane.xlu0 %10418  ;;  %v7068_v61 = vcombine.high %v7058_v6, %v7058_v6  ;;  %v7509_v49 = vcombine.high %v18908_v12, %v18908_v12  ;;  %v10234_v33 = vmul.f32 %v18654_v43, %v9971_v15  ;;  %v10231_v25 = vmul.f32 %v18654_v43, %v9968_v35 }
 0x21e   : > { %24189 = vst [vmem:[#allocation31_spill] sm:$0xff] %v18917_v1  ;;  %10616 = vadd.xlane.f32.xlu1 %v10615_v0  ;;  %v10233_v18 = vmul.f32 %v18654_v43, %v9970_v51  ;;  %v8426_v17 = vrot.slane %v7058_v6, %v17897_v48  ;;  %v10630_v8 = vsel %vm406_vm0, %v10232_v54, 0.0  ;;  %v9719_v28 = vadd.f32 %v18597_v2, %v9456_v31 }
 0x21f   : > { %v7037_v0 = vcombine.high %v7035_v14, %v7035_v14  ;;  %v18932_v57 = vrot.slane %v7509_v49, %v17897_v48  ;;  %v9716_v63 = vadd.f32 %v18597_v2, %v9453_v30  ;;  %v9455_v15 = vsub.f32 %v8406_v44, %v18112_v38  ;;  %v18949_v30 = vld [vmem:[%s23952_s4] ss:$0 sm:$0xff]  ;;  %v24192_v44 = vld [vmem:[#allocation7_spill] sm:$0xff] }
 0x220   : > { %v8414_v35 = vrot.slane %v7018_v58, %v17897_v48  ;;  %v7044_v51 = vrot.slane %v18862_v46, %v17868_v47  ;;  %v10236_v6 = vmul.f32 %v18654_v43, %v9973_v40  ;;  %v9721_v54 = vadd.f32 %v18597_v2, %v9458_v11 }
 0x221   : > { %24190 = vst [vmem:[#allocation39_spill] sm:$0xff] %v18932_v57  ;;  %10631 = vadd.xlane.f32.xlu0 %v10630_v8  ;;  %v18934_v3 = vpop.xlane.xlu0 %10424  ;;  %v8434_v31 = vrot.slane %v7068_v61, %v17897_v48  ;;  %v6282_v58 = vmul.f32 %v18949_v30, %v24192_v44  ;;  %v10636_v46 = vsel %vm406_vm0, %v10234_v33, 0.0  ;;  %v18957_v40 = vrot.slane %v18150_v53, %v17868_v47  ;;  %v24305_v57 = vld [vmem:[#allocation46_spill] sm:$0xff] }
 0x222   : > { %24191 = vst [vmem:[#allocation33_spill] sm:$0xff] %v18934_v3  ;;  %10622 = vadd.xlane.f32.xlu1 %v10621_v29  ;;  %v9460_v29 = vsub.f32 %v8426_v17, %v18217_v39  ;;  %v10627_v11 = vsel %vm406_vm0, %v10231_v25, 0.0  ;;  %v9975_v61 = vmax.f32 %v9719_v28, 0.0  ;;  %v8422_v8 = vrot.slane %v7044_v51, %v17897_v48 }
 0x223   : > { %v7065_v49 = vrot.slane %v7037_v0, %v17868_v47  ;;  %v9972_v13 = vmax.f32 %v9716_v63, 0.0  ;;  %v9718_v44 = vadd.f32 %v18597_v2, %v9455_v15  ;;  %v9457_v33 = vsub.f32 %v8414_v35, %v18112_v38 }
 0x224   : > { %v7066_v17 = vcombine.high %v7044_v51, %v7044_v51  ;;  %v10642_v50 = vsel %vm406_vm0, %v10236_v6, 0.0  ;;  %v10633_v32 = vsel %vm406_vm0, %v10233_v18, 0.0  ;;  %v9977_v25 = vmax.f32 %v9721_v54, 0.0 }
 0x225   : > { %10637 = vadd.xlane.f32.xlu0 %v10636_v46  ;;  %v18962_v52 = vpop.xlane.xlu0 %10427  ;;  %v9462_v28 = vsub.f32 %v8434_v31, %v18217_v39  ;;  %v9723_v0 = vadd.f32 %v18597_v2, %v9460_v29  ;;  %v8442_v46 = vrot.slane %v7065_v49, %v17897_v48  ;;  %v7051_v63 = vrot.slane %v7035_v14, %v17868_v47 }
 0x226   : > { %24193 = vst [vmem:[#allocation57_spill] sm:$0xff] %v18962_v52  ;;  %10628 = vadd.xlane.f32.xlu1 %v10627_v11  ;;  %v7085_v38 = vcombine.high %v18957_v40, %v18957_v40  ;;  %v10238_v15 = vmul.f32 %v18654_v43, %v9975_v61  ;;  %v9459_v35 = vsub.f32 %v8422_v8, %v18217_v39  ;;  %v9974_v31 = vmax.f32 %v9718_v44, 0.0  ;;  %v18988_v11 = vld [vmem:[%s23952_s4 + $0x1] ss:$0 sm:$0xff]  ;;  %v24196_v61 = vld [vmem:[#allocation37_spill] sm:$0xff] }
 0x227   : > { %v7069_v51 = vcombine.high %v7065_v49, %v7065_v49  ;;  %v7070_v18 = vcombine.high %v18150_v53, %v18150_v53  ;;  %v10235_v54 = vmul.f32 %v18654_v43, %v9972_v13  ;;  %v9720_v29 = vadd.f32 %v18597_v2, %v9457_v33 }
 0x228   : > { %v8430_v14 = vrot.slane %v7066_v17, %v17897_v48  ;;  %v6447_v49 = vmul.f32 %v18988_v11, %v24196_v61  ;;  %v9725_v8 = vadd.f32 %v18597_v2, %v9462_v28  ;;  %v8438_v13 = vrot.slane %v7051_v63, %v17897_v48 }
 0x229   : > { %10643 = vadd.xlane.f32.xlu0 %v10642_v50  ;;  %v18980_v6 = vpop.xlane.xlu0 %10433  ;;  %v10240_v50 = vmul.f32 %v18654_v43, %v9977_v25  ;;  %v9979_v33 = vmax.f32 %v9723_v0, 0.0  ;;  %v9464_v17 = vsub.f32 %v8442_v46, %v18217_v39  ;;  %v7107_v27 = vrot.slane %v7085_v38, %v17868_v47 }
 0x22a   : > { %24195 = vst [vmem:[#allocation58_spill] sm:$0xff] %v18980_v6  ;;  %10634 = vadd.xlane.f32.xlu1 %v10633_v32  ;;  %v7067_v45 = vcombine.high %v7051_v63, %v7051_v63  ;;  %v10648_v62 = vsel %vm406_vm0, %v10238_v15, 0.0  ;;  %v9722_v55 = vadd.f32 %v18597_v2, %v9459_v35  ;;  %v8450_v32 = vrot.slane %v7069_v51, %v17897_v48 }
 0x22b   : > { %v18995_v44 = vpop.xlane.xlu1 %10421  ;;  %v19003_v25 = vrot.slane %v7070_v18, %v17868_v47  ;;  %v10639_v61 = vsel %vm406_vm0, %v10235_v54, 0.0  ;;  %v10237_v0 = vmul.f32 %v18654_v43, %v9974_v31  ;;  %v9976_v46 = vmax.f32 %v9720_v29, 0.0 }
 0x22c   : > { %24197 = vst [vmem:[#allocation7_spill] sm:$0xff] %v18995_v44  ;;  %v9461_v38 = vsub.f32 %v8430_v14, %v18217_v39  ;;  %v19010_v63 = vadd.f32 %v6447_v49, %v6282_v58  ;;  %v10654_v15 = vsel %vm406_vm0, %v10240_v50, 0.0  ;;  %v9981_v35 = vmax.f32 %v9725_v8, 0.0  ;;  %v24267_v44 = vld [vmem:[#allocation42_spill] sm:$0xff] }
 0x22d   : > { %10649 = vadd.xlane.f32.xlu0 %v10648_v62  ;;  %v19005_v28 = vpop.xlane.xlu0 %10439  ;;  %v9463_v51 = vsub.f32 %v8438_v13, %v18217_v39  ;;  %v10242_v62 = vmul.f32 %v18654_v43, %v9979_v33  ;;  %v9727_v41 = vadd.f32 %v18597_v2, %v9464_v17  ;;  %v8446_v54 = vrot.slane %v7067_v45, %v17897_v48 }
 0x22e   : > { %24198 = vst [vmem:[#allocation37_spill] sm:$0xff] %v19005_v28  ;;  %10640 = vadd.xlane.f32.xlu1 %v10639_v61  ;;  %v7117_v31 = vcombine.high %v7107_v27, %v7107_v27  ;;  %v9466_v29 = vsub.f32 %v8450_v32, %v18217_v39  ;;  %v8458_v58 = vrot.slane %v7107_v27, %v17897_v48  ;;  %v10645_v8 = vsel %vm406_vm0, %v10237_v0, 0.0 }
 0x22f   : > { %v19014_v18 = vpop.xlane.xlu1 %10430  ;;  %v7093_v14 = vrot.slane %v18957_v40, %v17868_v47  ;;  %v7086_v49 = vcombine.high %v19003_v25, %v19003_v25  ;;  %v10239_v13 = vmul.f32 %v18654_v43, %v9976_v46  ;;  %v9978_v33 = vmax.f32 %v9722_v55, 0.0 }
 0x230   : > { %24199 = vst [vmem:[#allocation71_spill] sm:$0xff] %v19014_v18  ;;  %v9724_v45 = vadd.f32 %v18597_v2, %v9461_v38  ;;  %v10244_v17 = vmul.f32 %v18654_v43, %v9981_v35  ;;  %v9726_v27 = vadd.f32 %v18597_v2, %v9463_v51  ;;  %v7126_v32 = vrot.slane %v19010_v63, %v17868_v47 }
 0x231   : > { %10655 = vadd.xlane.f32.xlu0 %v10654_v15  ;;  %v19025_v50 = vpop.xlane.xlu0 %10445  ;;  %v8454_v40 = vrot.slane %v7093_v14, %v17897_v48  ;;  %v9983_v15 = vmax.f32 %v9727_v41, 0.0  ;;  %v9465_v0 = vsub.f32 %v8446_v54, %v18217_v39  ;;  %v8466_v46 = vrot.slane %v7117_v31, %v17897_v48 }
 0x232   : > { %24200 = vst [vmem:[#allocation72_spill] sm:$0xff] %v19025_v50  ;;  %10646 = vadd.xlane.f32.xlu1 %v10645_v8  ;;  %v10660_v55 = vsel %vm406_vm0, %v10242_v62, 0.0  ;;  %v9729_v38 = vadd.f32 %v18597_v2, %v9466_v29  ;;  %v9468_v35 = vsub.f32 %v8458_v58, %v18150_v53  ;;  %v7114_v51 = vrot.slane %v7086_v49, %v17868_v47 }
 0x233   : > { %v19035_v61 = vpop.xlane.xlu1 %10436  ;;  %v10651_v36 = vsel %vm406_vm0, %v10239_v13, 0.0  ;;  %v10241_v37 = vmul.f32 %v18654_v43, %v9978_v33  ;;  %v9980_v41 = vmax.f32 %v9724_v45, 0.0  ;;  %v7115_v34 = vcombine.high %v7093_v14, %v7093_v14 }
 0x234   : > { %24201 = vst [vmem:[#allocation73_spill] sm:$0xff] %v19035_v61  ;;  %v10666_v39 = vsel %vm406_vm0, %v10244_v17, 0.0  ;;  %v9982_v54 = vmax.f32 %v9726_v27, 0.0  ;;  %v9467_v62 = vsub.f32 %v8454_v40, %v18150_v53  ;;  %v7134_v31 = vcombine.high %v7126_v32, %v7126_v32 }
 0x235   : > { %10661 = vadd.xlane.f32.xlu0 %v10660_v55  ;;  %v19043_v8 = vpop.xlane.xlu0 %10451  ;;  %v10246_v58 = vmul.f32 %v18654_v43, %v9983_v15  ;;  %v9728_v49 = vadd.f32 %v18597_v2, %v9465_v0  ;;  %v9470_v55 = vsub.f32 %v8466_v46, %v18150_v53  ;;  %v8474_v13 = vrot.slane %v7114_v51, %v17897_v48 }
 0x236   : > { %24202 = vst [vmem:[#allocation74_spill] sm:$0xff] %v19043_v8  ;;  %10652 = vadd.xlane.f32.xlu1 %v10651_v36  ;;  %v9985_v33 = vmax.f32 %v9729_v38, 0.0  ;;  %v9731_v14 = vadd.f32 %v18597_v2, %v9468_v35  ;;  %v7118_v36 = vcombine.high %v7114_v51, %v7114_v51  ;;  %v7119_v45 = vcombine.high %v19010_v63, %v19010_v63 }
 0x237   : > { %v19049_v29 = vpop.xlane.xlu1 %10442  ;;  %v10657_v27 = vsel %vm406_vm0, %v10241_v37, 0.0  ;;  %v10243_v40 = vmul.f32 %v18654_v43, %v9980_v41  ;;  %v8462_v15 = vrot.slane %v7115_v34, %v17897_v48  ;;  %v7100_v0 = vrot.slane %v19003_v25, %v17868_v47 }
 0x238   : > { %24203 = vst [vmem:[#allocation75_spill] sm:$0xff] %v19049_v29  ;;  %v10245_v46 = vmul.f32 %v18654_v43, %v9982_v54  ;;  %v9730_v38 = vadd.f32 %v18597_v2, %v9467_v62  ;;  %v7156_v35 = vrot.slane %v7134_v31, %v17868_v47  ;;  %v9984_v21 = vmax.f32 %v9728_v49, 0.0 }
 0x239   : > { %10667 = vadd.xlane.f32.xlu0 %v10666_v39  ;;  %v19058_v17 = vpop.xlane.xlu0 %10457  ;;  %v10672_v39 = vsel %vm406_vm0, %v10246_v58, 0.0  ;;  %v9733_v37 = vadd.f32 %v18597_v2, %v9470_v55  ;;  %v9472_v41 = vsub.f32 %v8474_v13, %v18150_v53  ;;  %v10248_v34 = vmul.f32 %v18654_v43, %v9985_v33 }
 0x23a   : > { %24204 = vst [vmem:[#allocation76_spill] sm:$0xff] %v19058_v17  ;;  %10658 = vadd.xlane.f32.xlu1 %v10657_v27  ;;  %v9987_v22 = vmax.f32 %v9731_v14, 0.0  ;;  %v8482_v25 = vrot.slane %v7118_v36, %v17897_v48  ;;  %v7133_v54 = vrot.slane %v7119_v45, %v17868_v47  ;;  %v10663_v31 = vsel %vm406_vm0, %v10243_v40, 0.0 }
 0x23b   : > { %v19068_v51 = vpop.xlane.xlu1 %10448  ;;  %v9469_v27 = vsub.f32 %v8462_v15, %v18150_v53  ;;  %v8470_v58 = vrot.slane %v7100_v0, %v17897_v48  ;;  %v7116_v49 = vcombine.high %v7100_v0, %v7100_v0  ;;  %v9986_v55 = vmax.f32 %v9730_v38, 0.0 }
 0x23c   : > { %24205 = vst [vmem:[#allocation77_spill] sm:$0xff] %v19068_v51  ;;  %v8490_v13 = vrot.slane %v7156_v35, %v17897_v48  ;;  %v7166_v33 = vcombine.high %v7156_v35, %v7156_v35  ;;  %v10247_v36 = vmul.f32 %v18654_v43, %v9984_v21  ;;  %v9989_v45 = vmax.f32 %v9733_v37, 0.0 }
 0x23d   : > { %10673 = vadd.xlane.f32.xlu0 %v10672_v39  ;;  %v19076_v62 = vpop.xlane.xlu0 %10463  ;;  %v9735_v39 = vadd.f32 %v18597_v2, %v9472_v41  ;;  %v7142_v28 = vrot.slane %v7126_v32, %v17868_v47  ;;  %v10678_v40 = vsel %vm406_vm0, %v10248_v34, 0.0  ;;  %v10250_v15 = vmul.f32 %v18654_v43, %v9987_v22 }
 0x23e   : > { %24206 = vst [vmem:[#allocation78_spill] sm:$0xff] %v19076_v62  ;;  %10664 = vadd.xlane.f32.xlu1 %v10663_v31  ;;  %v9474_v0 = vsub.f32 %v8482_v25, %v18150_v53  ;;  %v7135_v31 = vcombine.high %v7133_v54, %v7133_v54  ;;  %v10669_v35 = vsel %vm406_vm0, %v10245_v46, 0.0  ;;  %v9732_v61 = vadd.f32 %v18597_v2, %v9469_v27  ;;  %v19107_v27 = vld [vmem:[%s23953_s5] ss:$0 sm:$0xff] }
 0x23f   : > { %v19082_v14 = vpop.xlane.xlu1 %10454  ;;  %v9471_v21 = vsub.f32 %v8470_v58, %v18150_v53  ;;  %v8478_v37 = vrot.slane %v7116_v49, %v17897_v48  ;;  %v10249_v32 = vmul.f32 %v18654_v43, %v9986_v55  ;;  %v9476_v41 = vsub.f32 %v8490_v13, %v19010_v63 }
 0x240   : > { %24207 = vst [vmem:[#allocation79_spill] sm:$0xff] %v19082_v14  ;;  %v8498_v22 = vrot.slane %v7166_v33, %v17897_v48  ;;  %v10675_v25 = vsel %vm406_vm0, %v10247_v36, 0.0  ;;  %v9991_v46 = vmax.f32 %v9735_v39, 0.0  ;;  %v7164_v6 = vcombine.high %v7142_v28, %v7142_v28  ;;  %v24266_v14 = vld [vmem:[#allocation9_spill] sm:$0xff] }
 0x241   : > { %10679 = vadd.xlane.f32.xlu0 %v10678_v40  ;;  %v19090_v38 = vpop.xlane.xlu0 %10469  ;;  %v10252_v40 = vmul.f32 %v18654_v43, %v9989_v45  ;;  %v10684_v2 = vsel %vm406_vm0, %v10250_v15, 0.0  ;;  %v9737_v58 = vadd.f32 %v19107_v27, %v9474_v0  ;;  %v7163_v49 = vrot.slane %v7135_v31, %v17868_v47 }
 0x242   : > { %24208 = vst [vmem:[#allocation80_spill] sm:$0xff] %v19090_v38  ;;  %10670 = vadd.xlane.f32.xlu1 %v10669_v35  ;;  %v19113_v55 = vrot.slane %v18182_v4, %v17868_v47  ;;  %v9988_v33 = vmax.f32 %v9732_v61, 0.0  ;;  %v9734_v36 = vadd.f32 %v19107_v27, %v9471_v21  ;;  %v9473_v45 = vsub.f32 %v8478_v37, %v18150_v53 }
 0x243   : > { %v19099_v34 = vpop.xlane.xlu1 %10460  ;;  %v8486_v39 = vrot.slane %v7142_v28, %v17897_v48  ;;  %v10681_v15 = vsel %vm406_vm0, %v10249_v32, 0.0  ;;  %v9739_v0 = vadd.f32 %v19107_v27, %v9476_v41  ;;  %v9478_v31 = vsub.f32 %v8498_v22, %v19010_v63 }
 0x244   : > { %24209 = vst [vmem:[#allocation81_spill] sm:$0xff] %v19099_v34  ;;  %v8494_v61 = vrot.slane %v7164_v6, %v17897_v48  ;;  %v7149_v21 = vrot.slane %v7133_v54, %v17868_v47  ;;  %v9993_v53 = vmax.f32 %v9737_v58, 0.0  ;;  %v8506_v28 = vrot.slane %v7163_v49, %v17897_v48 }
 0x245   : > { %10685 = vadd.xlane.f32.xlu0 %v10684_v2  ;;  %v19115_v13 = vpop.xlane.xlu0 %10475  ;;  %v10690_v2 = vsel %vm406_vm0, %v10252_v40, 0.0  ;;  %v7167_v37 = vcombine.high %v7163_v49, %v7163_v49  ;;  %v7183_v32 = vcombine.high %v19113_v55, %v19113_v55  ;;  %v10251_v41 = vmul.f32 %v18654_v43, %v9988_v33 }
 0x246   : > { %24210 = vst [vmem:[#allocation82_spill] sm:$0xff] %v19115_v13  ;;  %10676 = vadd.xlane.f32.xlu1 %v10675_v25  ;;  %v10254_v13 = vmul.f32 %v18654_v43, %v9991_v46  ;;  %v9990_v22 = vmax.f32 %v9734_v36, 0.0  ;;  %v9736_v25 = vadd.f32 %v19107_v27, %v9473_v45  ;;  %v9475_v40 = vsub.f32 %v8486_v39, %v19010_v63  ;;  %v19148_v45 = vld [vmem:[%s23954_s6] ss:$0 sm:$0xff] }
 0x247   : > { %v19123_v35 = vpop.xlane.xlu1 %10466  ;;  %v9995_v54 = vmax.f32 %v9739_v0, 0.0  ;;  %v9741_v58 = vadd.f32 %v19107_v27, %v9478_v31  ;;  %v9477_v43 = vsub.f32 %v8494_v61, %v19010_v63  ;;  %v8502_v33 = vrot.slane %v7149_v21, %v17897_v48 }
 0x248   : > { %24211 = vst [vmem:[#allocation83_spill] sm:$0xff] %v19123_v35  ;;  %v7165_v36 = vcombine.high %v7149_v21, %v7149_v21  ;;  %v10256_v39 = vmul.f32 %v19148_v45, %v9993_v53  ;;  %v8514_v0 = vrot.slane %v7167_v37, %v17897_v48  ;;  %v10253_v31 = vmul.f32 %v19148_v45, %v9990_v22 }
 0x249   : > { %10691 = vadd.xlane.f32.xlu0 %v10690_v2  ;;  %v10696_v2 = vsel %vm406_vm0, %v10254_v13, 0.0  ;;  %v10687_v13 = vsel %vm406_vm0, %v10251_v41, 0.0  ;;  %v9992_v61 = vmax.f32 %v9736_v25, 0.0  ;;  %v9738_v21 = vadd.f32 %v19107_v27, %v9475_v40 }
 0x24a   : > { %v19135_v46 = vpop.xlane.xlu0 %10481  ;;  %10682 = vadd.xlane.f32.xlu1 %v10681_v15  ;;  %v19137_v6 = vpop.f32.mrb[0].mxu1  ;;  %v9480_v15 = vsub.f32 %v8506_v28, %v19010_v63  ;;  %v10258_v53 = vmul.f32 %v19148_v45, %v9995_v54  ;;  %v9997_v28 = vmax.f32 %v9741_v58, 0.0  ;;  %v9479_v41 = vsub.f32 %v8502_v33, %v19010_v63 }
 0x24b   : > { %24212 = vst [vmem:[#allocation84_spill] sm:$0xff] %v19135_v46  ;;  %24213 = vst [vmem:[#allocation85_spill] sm:$0xff] %v19137_v6  ;;  %v19140_v49 = vpop.xlane.xlu1 %10472  ;;  %v16338_v18 = vpop.f32.mrb[1].mxu1  ;;  %v8510_v25 = vrot.slane %v7165_v36, %v17897_v48  ;;  %v10702_v40 = vsel %vm406_vm0, %v10256_v39, 0.0  ;;  %v10693_v54 = vsel %vm406_vm0, %v10253_v31, 0.0  ;;  %v10255_v58 = vmul.f32 %v19148_v45, %v9992_v61 }
 0x24c   : > { %24214 = vst [vmem:[#allocation86_spill] sm:$0xff] %v19140_v49  ;;  %v7205_v18 = vrot.slane %v7183_v32, %v17868_v47  ;;  %v9740_v32 = vadd.f32 %v19107_v27, %v9477_v43  ;;  %v7191_v43 = vrot.slane %v19113_v55, %v17868_v47  ;;  %v10260_v39 = vmul.f32 %v19148_v45, %v9997_v28 }
 0x24d   : > { %10697 = vadd.xlane.f32.xlu0 %v10696_v2  ;;  %v9743_v2 = vadd.f32 %v19107_v27, %v9480_v15  ;;  %v9481_v61 = vsub.f32 %v8510_v25, %v19010_v63  ;;  %v10699_v28 = vsel %vm406_vm0, %v10255_v58, 0.0 }
 0x24e   : > { %v19157_v46 = vpop.xlane.xlu0 %10487  ;;  %10688 = vadd.xlane.f32.xlu1 %v10687_v13  ;;  %v19159_v49 = vpop.f32.mrb[2].mxu1  ;;  %v8522_v22 = vrot.slane %v7205_v18, %v17897_v48  ;;  %v9482_v13 = vsub.f32 %v8514_v0, %v19010_v63  ;;  %v10714_v63 = vsel %vm406_vm0, %v10260_v39, 0.0 }
 0x24f   : > { %24215 = vst [vmem:[#allocation87_spill] sm:$0xff] %v19157_v46  ;;  %24216 = vst [vmem:[#allocation88_spill] sm:$0xff] %v19159_v49  ;;  %v19162_v52 = vpop.xlane.xlu1 %10478  ;;  %v16343_v37 = vpop.f32.mrb[3].mxu1  ;;  %v7215_v46 = vcombine.high %v7205_v18, %v7205_v18  ;;  %v9996_v18 = vmax.f32 %v9740_v32, 0.0  ;;  %v9999_v55 = vmax.f32 %v9743_v2, 0.0  ;;  %v8518_v32 = vrot.slane %v7191_v43, %v17897_v48 }
 0x250   : > { %24217 = vst [vmem:[#allocation89_spill] sm:$0xff] %v19162_v52  ;;  %v9994_v37 = vmax.f32 %v9738_v21, 0.0  ;;  %v9484_v31 = vsub.f32 %v8522_v22, %v18182_v4  ;;  %v10708_v21 = vsel %vm406_vm0, %v10258_v53, 0.0  ;;  %v9744_v58 = vadd.f32 %v19107_v27, %v9481_v61 }
 0x251   : > { %10703 = vadd.xlane.f32.xlu0 %v10702_v40  ;;  %v9742_v40 = vadd.f32 %v19107_v27, %v9479_v41 }
 0x252   : > { %v19175_v33 = vpop.xlane.xlu0 %10493  ;;  %10694 = vadd.xlane.f32.xlu1 %v10693_v54  ;;  %v19177_v36 = vpop.f32.mrb[4].mxu1  ;;  %v8530_v54 = vrot.slane %v7215_v46, %v17897_v48  ;;  %v10259_v46 = vmul.f32 %v19148_v45, %v9996_v18 }
 0x253   : > { %24218 = vst [vmem:[#allocation90_spill] sm:$0xff] %v19175_v33  ;;  %24219 = vst [vmem:[#allocation91_spill] sm:$0xff] %v19177_v36  ;;  %v19180_v15 = vpop.xlane.xlu1 %10484  ;;  %v16348_v0 = vpop.f32.mrb[5].mxu1  ;;  %v9745_v33 = vadd.f32 %v19107_v27, %v9482_v13  ;;  %v9998_v2 = vmax.f32 %v9742_v40, 0.0  ;;  %v9747_v13 = vadd.f32 %v19107_v27, %v9484_v31  ;;  %v7198_v40 = vrot.slane %v18478_v23, %v17868_v47 }
 0x254   : > { %24220 = vst [vmem:[#allocation92_spill] sm:$0xff] %v19180_v15  ;;  %v10257_v15 = vmul.f32 %v19148_v45, %v9994_v37  ;;  %v7213_v0 = vcombine.high %v7191_v43, %v7191_v43  ;;  %v10262_v37 = vmul.f32 %v19148_v45, %v9999_v55 }
 0x255   : > { %10709 = vadd.xlane.f32.xlu0 %v10708_v21  ;;  %v10001_v43 = vmax.f32 %v9745_v33, 0.0  ;;  %v9486_v21 = vsub.f32 %v8530_v54, %v18182_v4  ;;  %v10261_v54 = vmul.f32 %v19148_v45, %v9998_v2 }
 0x256   : > { %v19191_v41 = vpop.xlane.xlu0 %10499  ;;  %10700 = vadd.xlane.f32.xlu1 %v10699_v28  ;;  %v19193_v22 = vpop.f32.mrb[6].mxu1  ;;  %v8538_v28 = vrot.slane %v18530_v24, %v17897_v48  ;;  %v10705_v39 = vsel %vm406_vm0, %v10257_v15, 0.0  ;;  %v8526_v18 = vrot.slane %v7213_v0, %v17897_v48  ;;  %v10711_v24 = vsel %vm406_vm0, %v10259_v46, 0.0 }
 0x257   : > { %24221 = vst [vmem:[#allocation93_spill] sm:$0xff] %v19191_v41  ;;  %24222 = vst [vmem:[#allocation94_spill] sm:$0xff] %v19193_v22  ;;  %v19196_v53 = vpop.xlane.xlu1 %10490  ;;  %v16353_v25 = vpop.f32.mrb[7].mxu1  ;;  %v10003_v15 = vmax.f32 %v9747_v13, 0.0  ;;  %v10264_v0 = vmul.f32 %v19148_v45, %v10001_v43  ;;  %v9749_v23 = vadd.f32 %v19107_v27, %v9486_v21  ;;  %v7214_v46 = vcombine.high %v7198_v40, %v7198_v40 }
 0x258   : > { %24223 = vst [vmem:[#allocation95_spill] sm:$0xff] %v19196_v53  ;;  %v9483_v25 = vsub.f32 %v8518_v32, %v18182_v4  ;;  %v10720_v32 = vsel %vm406_vm0, %v10262_v37, 0.0  ;;  %v9485_v41 = vsub.f32 %v8526_v18, %v18182_v4  ;;  %v10717_v37 = vsel %vm406_vm0, %v10261_v54, 0.0 }
 0x259   : > { %10715 = vadd.xlane.f32.xlu0 %v10714_v63  ;;  %v10000_v63 = vmax.f32 %v9744_v58, 0.0  ;;  %v10726_v21 = vsel %vm406_vm0, %v10264_v0, 0.0 }
 0x25a   : > { %v19210_v31 = vpop.xlane.xlu0 %10505  ;;  %10706 = vadd.xlane.f32.xlu1 %v10705_v39  ;;  %v19212_v61 = vpop.f32.mrb[8].mxu1  ;;  %v9746_v39 = vadd.f32 %v19107_v27, %v9483_v25  ;;  %v10005_v25 = vmax.f32 %v9749_v23, 0.0 }
 0x25b   : > { %24224 = vst [vmem:[#allocation96_spill] sm:$0xff] %v19210_v31  ;;  %24225 = vst [vmem:[#allocation97_spill] sm:$0xff] %v19212_v61  ;;  %v19214_v33 = vpop.xlane.xlu1 %10496  ;;  %v16358_v55 = vpop.f32.mrb[9].mxu1  ;;  %v9488_v31 = vsub.f32 %v8538_v28, %v18182_v4  ;;  %v10263_v43 = vmul.f32 %v19148_v45, %v10000_v63  ;;  %v10266_v28 = vmul.f32 %v19148_v45, %v10003_v15 }
 0x25c   : > { %24226 = vst [vmem:[#allocation98_spill] sm:$0xff] %v19214_v33  ;;  %v8534_v55 = vrot.slane %v7198_v40, %v17897_v48  ;;  %v10002_v40 = vmax.f32 %v9746_v39, 0.0  ;;  %v10268_v23 = vmul.f32 %v19148_v45, %v10005_v25 }
 0x25d   : > { %10721 = vadd.xlane.f32.xlu0 %v10720_v32  ;;  %v9751_v18 = vadd.f32 %v19107_v27, %v9488_v31  ;;  %v10732_v15 = vsel %vm406_vm0, %v10266_v28, 0.0  ;;  %v10723_v31 = vsel %vm406_vm0, %v10263_v43, 0.0 }
 0x25e   : > { %v19225_v33 = vpop.xlane.xlu0 %10511  ;;  %10712 = vadd.xlane.f32.xlu1 %v10711_v24  ;;  %v19227_v2 = vpop.f32.mrb[10].mxu1  ;;  %v9748_v24 = vadd.f32 %v19107_v27, %v9485_v41  ;;  %v9487_v32 = vsub.f32 %v8534_v55, %v18182_v4  ;;  %v10265_v41 = vmul.f32 %v19148_v45, %v10002_v40  ;;  %v10738_v43 = vsel %vm406_vm0, %v10268_v23, 0.0 }
 0x25f   : > { %24227 = vst [vmem:[#allocation99_spill] sm:$0xff] %v19225_v33  ;;  %24228 = vst [vmem:[#allocation100_spill] sm:$0xff] %v19227_v2  ;;  %v19229_v13 = vpop.xlane.xlu1 %10502  ;;  %v16363_v58 = vpop.f32.mrb[11].mxu1  ;;  %v8542_v33 = vrot.slane %v7214_v46, %v17897_v48  ;;  %v10007_v39 = vmax.f32 %v9751_v18, 0.0 }
 0x260   : > { %24229 = vst [vmem:[#allocation101_spill] sm:$0xff] %v19229_v13  ;;  %v10004_v55 = vmax.f32 %v9748_v24, 0.0  ;;  %v9750_v46 = vadd.f32 %v19107_v27, %v9487_v32  ;;  %v10729_v18 = vsel %vm406_vm0, %v10265_v41, 0.0  ;;  %v24242_v13 = vld [vmem:[#allocation41_spill] sm:$0xff] }
 0x261   : > { %10727 = vadd.xlane.f32.xlu0 %v10726_v21  ;;  %v10270_v25 = vmul.f32 %v19148_v45, %v10007_v39 }
 0x262   : > { %v19239_v58 = vpop.xlane.xlu0 %10517  ;;  %10718 = vadd.xlane.f32.xlu1 %v10717_v37  ;;  %v19241_v54 = vpop.f32.mrb[12].mxu1  ;;  %v9489_v37 = vsub.f32 %v8542_v33, %v18182_v4  ;;  %v10267_v40 = vmul.f32 %v19148_v45, %v10004_v55  ;;  %v10006_v24 = vmax.f32 %v9750_v46, 0.0 }
 0x263   : > { %24230 = vst [vmem:[#allocation102_spill] sm:$0xff] %v19239_v58  ;;  %24231 = vst [vmem:[#allocation103_spill] sm:$0xff] %v19241_v54  ;;  %v19243_v63 = vpop.xlane.xlu1 %10508  ;;  %v16368_v0 = vpop.f32.mrb[13].mxu1  ;;  %v10744_v23 = vsel %vm406_vm0, %v10270_v25, 0.0  ;;  %v24258_v58 = vld [vmem:[#allocation6_spill] sm:$0xff] }
 0x264   : > { %24232 = vst [vmem:[#allocation104_spill] sm:$0xff] %v19243_v63  ;;  %v9752_v33 = vadd.f32 %v19107_v27, %v9489_v37  ;;  %v10735_v39 = vsel %vm406_vm0, %v10267_v40, 0.0  ;;  %v10269_v41 = vmul.f32 %v19148_v45, %v10006_v24  ;;  %v3193_v40 = vsel %vm3192_vm2, %v19137_v6, -inf }
 0x265   : > { %10733 = vadd.xlane.f32.xlu0 %v10732_v15 }
 0x266   : > { %v19251_v21 = vpop.xlane.xlu0 %10523  ;;  %10724 = vadd.xlane.f32.xlu1 %v10723_v31  ;;  %v19253_v63 = vpop.f32.mrb[14].mxu1  ;;  %v10008_v55 = vmax.f32 %v9752_v33, 0.0  ;;  %v10741_v24 = vsel %vm406_vm0, %v10269_v41, 0.0 }
 0x267   : > { %24233 = vst [vmem:[#allocation105_spill] sm:$0xff] %v19251_v21  ;;  %24234 = vst [vmem:[#allocation106_spill] sm:$0xff] %v19253_v63  ;;  %v19255_v0 = vpop.xlane.xlu1 %10514  ;;  %v16373_v28 = vpop.f32.mrb[15].mxu1  ;;  %v3214_v21 = vsel %vm3192_vm2, %v19253_v63, -inf }
 0x268   : > { %24235 = vst [vmem:[#allocation107_spill] sm:$0xff] %v19255_v0  ;;  %v10271_v33 = vmul.f32 %v19148_v45, %v10008_v55  ;;  %v24259_v0 = vld [vmem:[#allocation40_spill] sm:$0xff] }
 0x269   : > { %10739 = vadd.xlane.f32.xlu0 %v10738_v43  ;;  %v24241_v43 = vld [vmem:[#allocation8_spill] sm:$0xff] }
 0x26a   : > { %v19262_v32 = vpop.xlane.xlu0 %10529  ;;  %10730 = vadd.xlane.f32.xlu1 %v10729_v18  ;;  %v19264_v15 = vpop.f32.mrb[16].mxu1  ;;  %v6284_v18 = vmul.f32 %v18949_v30, %v24241_v43 }
 0x26b   : > { %24236 = vst [vmem:[#allocation108_spill] sm:$0xff] %v19262_v32  ;;  %24237 = vst [vmem:[#allocation109_spill] sm:$0xff] %v19264_v15  ;;  %v19266_v31 = vpop.xlane.xlu1 %10520  ;;  %v16378_v28 = vpop.f32.mrb[17].mxu1 }
 0x26c   : > { %24238 = vst [vmem:[#allocation110_spill] sm:$0xff] %v19266_v31  ;;  %v6449_v28 = vmul.f32 %v18988_v11, %v24242_v13 }
 0x26d   : > { %10745 = vadd.xlane.f32.xlu0 %v10744_v23 }
 0x26e   : > { %v19271_v46 = vpop.xlane.xlu0 %10535  ;;  %10736 = vadd.xlane.f32.xlu1 %v10735_v39  ;;  %v19273_v37 = vpop.f32.mrb[18].mxu1  ;;  %v19289_v43 = vadd.f32 %v6449_v28, %v6284_v18  ;;  %v3202_v28 = vsel %vm3192_vm2, %v19193_v22, -inf }
 0x26f   : > { %24239 = vst [vmem:[#allocation111_spill] sm:$0xff] %v19271_v46  ;;  %24240 = vst [vmem:[#allocation112_spill] sm:$0xff] %v19273_v37  ;;  %v19279_v32 = vpop.xlane.xlu1 %10526  ;;  %v16383_v25 = vpop.f32.mrb[19].mxu1 }
 0x270   : > { %24243 = vst [vmem:[#allocation8_spill] sm:$0xff] %v19279_v32  ;;  %v3199_v25 = vsel %vm3192_vm2, %v19177_v36, -inf  ;;  %v19304_v18 = vrot.slane %v19289_v43, %v17868_v47 }
 0x271   : > { %3194 = vmax.xlane.f32.xlu0 %v3193_v40  ;;  %v10747_v40 = vsel %vm406_vm0, %v10271_v33, 0.0 }
 0x272   : > { %v19285_v23 = vpop.xlane.xlu0 %10541  ;;  %10742 = vadd.xlane.f32.xlu1 %v10741_v24  ;;  %v19287_v39 = vpop.f32.mrb[20].mxu1 }
 0x273   : > { %24244 = vst [vmem:[#allocation41_spill] sm:$0xff] %v19285_v23  ;;  %24245 = vst [vmem:[#allocation113_spill] sm:$0xff] %v19287_v39  ;;  %v19291_v46 = vpop.xlane.xlu1 %10532  ;;  %v16388_v13 = vpop.f32.mrb[21].mxu1  ;;  %v3208_v23 = vsel %vm3192_vm2, %v19227_v2, -inf  ;;  %v19535_v2 = vld [vmem:[%s23952_s4 + $0x1] ss:$0 sm:$0xff] }
 0x274   : > { %24246 = vst [vmem:[#allocation114_spill] sm:$0xff] %v19291_v46  ;;  %v3196_v13 = vsel %vm3192_vm2, %v19159_v49, -inf }
 0x275   : > { %3200 = vmax.xlane.f32.xlu0 %v3199_v25 }
 0x276   : > { %v19296_v32 = vpop.xlane.xlu0 %10547  ;;  %10748 = vadd.xlane.f32.xlu1 %v10747_v40  ;;  %v19298_v41 = vpop.f32.mrb[22].mxu1 }
 0x277   : > { %24247 = vst [vmem:[#allocation115_spill] sm:$0xff] %v19296_v32  ;;  %24248 = vst [vmem:[#allocation116_spill] sm:$0xff] %v19298_v41  ;;  %v19300_v55 = vpop.xlane.xlu1 %10538  ;;  %v16393_v24 = vpop.f32.mrb[23].mxu1 }
 0x278   : > { %24249 = vst [vmem:[#allocation117_spill] sm:$0xff] %v19300_v55  ;;  %v7240_v24 = vrot.slane %v19304_v18, %v17868_v47  ;;  %v3205_v55 = vsel %vm3192_vm2, %v19212_v61, -inf }
 0x279   : > { %3203 = vmax.xlane.f32.xlu0 %v3202_v28  ;;  %v7217_v28 = vcombine.high %v19289_v43, %v19289_v43 }
 0x27a   : > { %v19310_v33 = vpop.xlane.xlu0 %10553  ;;  %3197 = vmax.xlane.f32.xlu1 %v3196_v13  ;;  %v19312_v25 = vpop.f32.mrb[24].mxu1  ;;  %v7262_v46 = vcombine.high %v7240_v24, %v7240_v24  ;;  %v8550_v31 = vrot.slane %v7240_v24, %v17897_v48  ;;  %v3217_v24 = vsel %vm3192_vm2, %v19264_v15, -inf }
 0x27b   : > { %24250 = vst [vmem:[#allocation118_spill] sm:$0xff] %v19310_v33  ;;  %24251 = vst [vmem:[#allocation119_spill] sm:$0xff] %v19312_v25  ;;  %v19314_v40 = vpop.xlane.xlu1 %10544  ;;  %v16398_v32 = vpop.f32.mrb[25].mxu1  ;;  %v19333_v53 = vrot.slane %v7217_v28, %v17868_v47  ;;  %v6285_v28 = vmul.f32 %v18949_v30, %v24258_v58 }
 0x27c   : > { %24252 = vst [vmem:[#allocation120_spill] sm:$0xff] %v19314_v40  ;;  %v8558_v52 = vrot.slane %v7262_v46, %v17897_v48 }
 0x27d   : > { %3209 = vmax.xlane.f32.xlu0 %v3208_v23  ;;  %v3211_v23 = vsel %vm3192_vm2, %v19241_v54, -inf  ;;  %v7247_v38 = vrot.slane %v19333_v53, %v17868_v47 }
 0x27e   : > { %v19324_v33 = vpop.xlane.xlu0 %10559  ;;  %3206 = vmax.xlane.f32.xlu1 %v3205_v55  ;;  %v19326_v13 = vpop.f32.mrb[26].mxu1  ;;  %v9493_v58 = vsub.f32 %v8558_v52, %v19289_v43 }
 0x27f   : > { %24253 = vst [vmem:[#allocation121_spill] sm:$0xff] %v19324_v33  ;;  %v19328_v40 = vpop.xlane.xlu1 %10550  ;;  %v16403_v32 = vpop.f32.mrb[27].mxu1  ;;  %v7263_v17 = vcombine.high %v7247_v38, %v7247_v38 }
 0x280   : > { %24254 = vst [vmem:[#allocation122_spill] sm:$0xff] %v19328_v40 }
 0x281   : > { %3215 = vmax.xlane.f32.xlu0 %v3214_v21  ;;  %v6450_v21 = vmul.f32 %v18988_v11, %v24259_v0 }
 0x282   : > { %v19338_v33 = vpop.xlane.xlu0 %10565  ;;  %3212 = vmax.xlane.f32.xlu1 %v3211_v23  ;;  %v19340_v55 = vpop.f32.mrb[28].mxu1  ;;  %v9491_v23 = vsub.f32 %v8550_v31, %v19289_v43  ;;  %v8566_v31 = vrot.slane %v7247_v38, %v17897_v48  ;;  %v3229_v38 = vsel %vm3192_vm2, %v19312_v25, -inf }
 0x283   : > { %24255 = vst [vmem:[#allocation123_spill] sm:$0xff] %v19338_v33  ;;  %24256 = vst [vmem:[#allocation124_spill] sm:$0xff] %v19340_v55  ;;  %v19342_v40 = vpop.xlane.xlu1 %10556  ;;  %v16408_v32 = vpop.f32.mrb[29].mxu1  ;;  %v19363_v0 = vadd.f32 %v6450_v21, %v6285_v28  ;;  %v9756_v28 = vadd.f32 %v19107_v27, %v9493_v58  ;;  %v6451_v58 = vmul.f32 %v18988_v11, %v24267_v44  ;;  %v3235_v44 = vsel %vm3192_vm2, %v19340_v55, -inf }
 0x284   : > { %24257 = vst [vmem:[#allocation125_spill] sm:$0xff] %v19342_v40  ;;  %v9495_v21 = vsub.f32 %v8566_v31, %v19289_v43 }
 0x285   : > { %v19375_v52 = vrot.slane %v19363_v0, %v17868_v47  ;;  %v10012_v1 = vmax.f32 %v9756_v28, 0.0  ;;  %v7266_v8 = vcombine.high %v19363_v0, %v19363_v0 }
 0x286   : > { %v19354_v33 = vpop.xlane.xlu0 %10571  ;;  %3218 = vmax.xlane.f32.xlu1 %v3217_v24  ;;  %v19356_v32 = vpop.f32.mrb[30].mxu1  ;;  %v3223_v24 = vsel %vm3192_vm2, %v19287_v39, -inf  ;;  %v24297_v39 = vld [vmem:[#allocation15_spill] sm:$0xff] }
 0x287   : > { %24260 = vst [vmem:[#allocation6_spill] sm:$0xff] %v19354_v33  ;;  %v19358_v46 = vpop.f32.mrb[32].mxu0  ;;  %v19360_v40 = vpop.xlane.xlu1 %10562  ;;  %v9754_v33 = vadd.f32 %v19107_v27, %v9491_v23  ;;  %v7289_v23 = vrot.slane %v19375_v52, %v17868_v47 }
 0x288   : > { %24261 = vst [vmem:[#allocation40_spill] sm:$0xff] %v19358_v46  ;;  %24262 = vst [vmem:[#allocation126_spill] sm:$0xff] %v19360_v40  ;;  %v16413_v35 = vpop.f32.mrb[31].mxu1  ;;  %v16423_v62 = vpop.f32.mrb[33].mxu0  ;;  %v3244_v34 = vsel %vm3192_vm2, %v19358_v46, -inf }
 0x289   : > { %3245 = vmax.xlane.f32.xlu0 %v3244_v34 }
 0x28a   : > { %v19371_v3 = vpop.xlane.xlu0 %10577  ;;  %3224 = vmax.xlane.f32.xlu1 %v3223_v24  ;;  %v10010_v24 = vmax.f32 %v9754_v33, 0.0 }
 0x28b   : > { %24263 = vst [vmem:[#allocation127_spill] sm:$0xff] %v19371_v3  ;;  %v19377_v62 = vpop.f32.mrb[32].mxu1  ;;  %v19379_v35 = vpop.xlane.xlu1 %10568  ;;  %v8574_v3 = vrot.slane %v7263_v17, %v17897_v48 }
 0x28c   : > { %24264 = vst [vmem:[#allocation128_spill] sm:$0xff] %v19379_v35  ;;  %v16418_v34 = vpop.f32.mrb[33].mxu1  ;;  %v6286_v35 = vmul.f32 %v18949_v30, %v24266_v14  ;;  %v8582_v30 = vrot.slane %v7289_v23, %v17897_v48  ;;  %v7311_v14 = vcombine.high %v7289_v23, %v7289_v23  ;;  %v10273_v28 = vmul.f32 %v19148_v45, %v10010_v24 }
 0x28d   : > { %v9497_v51 = vsub.f32 %v8574_v3, %v19289_v43  ;;  %v19418_v23 = vrot.slane %v7266_v8, %v17868_v47  ;;  %v3220_v24 = vsel %vm3192_vm2, %v19273_v37, -inf }
 0x28e   : > { %v19388_v40 = vpop.xlane.xlu0 %10583  ;;  %3230 = vmax.xlane.f32.xlu1 %v3229_v38  ;;  %v9499_v3 = vsub.f32 %v8582_v30, %v19363_v0 }
 0x28f   : > { %24265 = vst [vmem:[#allocation129_spill] sm:$0xff] %v19388_v40  ;;  %v19394_v34 = vpop.f32.mrb[34].mxu1  ;;  %v19396_v31 = vpop.f32.mrb[34].mxu0  ;;  %v9758_v40 = vadd.f32 %v19107_v27, %v9495_v21  ;;  %v10275_v21 = vmul.f32 %v19148_v45, %v10012_v1  ;;  %v7296_v1 = vrot.slane %v19418_v23, %v17868_v47 }
 0x290   : > { %24268 = vst [vmem:[#allocation9_spill] sm:$0xff] %v19396_v31  ;;  %v19400_v33 = vpop.xlane.xlu1 %10574  ;;  %v16428_v17 = vpop.f32.mrb[35].mxu1  ;;  %v3250_v38 = vsel %vm3192_vm2, %v19396_v31, -inf }
 0x291   : > { %24269 = vst [vmem:[#allocation42_spill] sm:$0xff] %v19400_v33  ;;  %v16433_v11 = vpop.f32.mrb[35].mxu0  ;;  %3251 = vmax.xlane.f32.xlu0 %v3250_v38  ;;  %v19412_v17 = vadd.f32 %v6451_v58, %v6286_v35  ;;  %v10014_v29 = vmax.f32 %v9758_v40, 0.0  ;;  %v10753_v35 = vsel %vm406_vm0, %v10273_v28, 0.0  ;;  %v9760_v58 = vadd.f32 %v19107_v27, %v9497_v51 }
 0x292   : > { %v19410_v50 = vpop.xlane.xlu0 %10589  ;;  %3236 = vmax.xlane.f32.xlu1 %v3235_v44  ;;  %v8590_v44 = vrot.slane %v7311_v14, %v17897_v48  ;;  %v9762_v28 = vadd.f32 %v19107_v27, %v9499_v3  ;;  %v8598_v37 = vrot.slane %v7296_v1, %v17897_v48  ;;  %v7312_v55 = vcombine.high %v7296_v1, %v7296_v1 }
 0x293   : > { %24270 = vst [vmem:[#allocation130_spill] sm:$0xff] %v19410_v50  ;;  %v19414_v33 = vpop.f32.mrb[36].mxu1  ;;  %v10759_v50 = vsel %vm406_vm0, %v10275_v21, 0.0  ;;  %v10277_v14 = vmul.f32 %v19148_v45, %v10014_v29  ;;  %v10016_v21 = vmax.f32 %v9760_v58, 0.0  ;;  %v7315_v29 = vcombine.high %v19412_v17, %v19412_v17 }
 0x294   : > { %24271 = vst [vmem:[#allocation131_spill] sm:$0xff] %v19414_v33  ;;  %v19420_v38 = vpop.xlane.xlu1 %10580  ;;  %v16438_v11 = vpop.f32.mrb[37].mxu1  ;;  %v9501_v51 = vsub.f32 %v8590_v44, %v19363_v0  ;;  %v10018_v44 = vmax.f32 %v9762_v28, 0.0  ;;  %v8606_v1 = vrot.slane %v7312_v55, %v17897_v48 }
 0x295   : > { %24272 = vst [vmem:[#allocation132_spill] sm:$0xff] %v19420_v38  ;;  %3221 = vmax.xlane.f32.xlu0 %v3220_v24  ;;  %v19444_v24 = vrot.slane %v19412_v17, %v17868_v47  ;;  %v10765_v58 = vsel %vm406_vm0, %v10277_v14, 0.0 }
 0x296   : > { %v19430_v8 = vpop.xlane.xlu0 %10595  ;;  %10754 = vadd.xlane.f32.xlu1 %v10753_v35 }
 0x297   : > { %24273 = vst [vmem:[#allocation133_spill] sm:$0xff] %v19430_v8  ;;  %v19432_v11 = vpop.f32.mrb[38].mxu1 }
 0x298   : > { %24274 = vst [vmem:[#allocation134_spill] sm:$0xff] %v19432_v11  ;;  %v19435_v40 = vpop.f32.mrb[36].mxu0  ;;  %v19437_v30 = vpop.xlane.xlu1 %10586 }
 0x299   : > { %24275 = vst [vmem:[#allocation135_spill] sm:$0xff] %v19435_v40  ;;  %24276 = vst [vmem:[#allocation136_spill] sm:$0xff] %v19437_v30  ;;  %v16448_v8 = vpop.f32.mrb[39].mxu1  ;;  %v16443_v35 = vpop.f32.mrb[37].mxu0  ;;  %v3256_v38 = vsel %vm3192_vm2, %v19435_v40, -inf  ;;  %v10279_v40 = vmul.f32 %v19148_v45, %v10016_v21 }
 0x29a   : > { %3257 = vmax.xlane.f32.xlu0 %v3256_v38  ;;  %v19449_v30 = vpop.xlane.xlu0 %10601  ;;  %10760 = vadd.xlane.f32.xlu1 %v10759_v50  ;;  %v9764_v8 = vadd.f32 %v19107_v27, %v9501_v51  ;;  %v7338_v35 = vrot.slane %v19444_v24, %v17868_v47  ;;  %v9503_v38 = vsub.f32 %v8598_v37, %v19363_v0 }
 0x29b   : > { %24277 = vst [vmem:[#allocation137_spill] sm:$0xff] %v19449_v30  ;;  %v19469_v51 = vrot.slane %v7315_v29, %v17868_v47  ;;  %v10281_v37 = vmul.f32 %v19148_v45, %v10018_v44  ;;  %v9505_v29 = vsub.f32 %v8606_v1, %v19363_v0 }
 0x29c   : > { %v19453_v3 = vpop.xlane.xlu1 %10592  ;;  %v8614_v55 = vrot.slane %v7338_v35, %v17897_v48  ;;  %v10020_v25 = vmax.f32 %v9764_v8, 0.0 }
 0x29d   : > { %24278 = vst [vmem:[#allocation138_spill] sm:$0xff] %v19453_v3  ;;  %v10777_v8 = vsel %vm406_vm0, %v10281_v37, 0.0 }
 0x29e   : > { %v19462_v50 = vpop.xlane.xlu0 %10607  ;;  %10766 = vadd.xlane.f32.xlu1 %v10765_v58  ;;  %v19464_v30 = vpop.f32.mrb[40].mxu1  ;;  %v10771_v58 = vsel %vm406_vm0, %v10279_v40, 0.0  ;;  %v9507_v44 = vsub.f32 %v8614_v55, %v19412_v17  ;;  %v7345_v40 = vrot.slane %v19469_v51, %v17868_v47 }
 0x29f   : > { %24279 = vst [vmem:[#allocation139_spill] sm:$0xff] %v19462_v50  ;;  %24280 = vst [vmem:[#allocation140_spill] sm:$0xff] %v19464_v30  ;;  %v19466_v3 = vpop.f32.mrb[38].mxu0  ;;  %v16458_v28 = vpop.f32.mrb[41].mxu1  ;;  %v7360_v50 = vcombine.high %v7338_v35, %v7338_v35 }
 0x2a0   : > { %24281 = vst [vmem:[#allocation141_spill] sm:$0xff] %v19466_v3  ;;  %v19471_v31 = vpop.xlane.xlu1 %10598  ;;  %v16453_v14 = vpop.f32.mrb[39].mxu0  ;;  %v3262_v21 = vsel %vm3192_vm2, %v19466_v3, -inf  ;;  %v9766_v28 = vadd.f32 %v19107_v27, %v9503_v38  ;;  %v10283_v38 = vmul.f32 %v19148_v45, %v10020_v25  ;;  %v9770_v37 = vadd.f32 %v19107_v27, %v9507_v44 }
 0x2a1   : > { %24282 = vst [vmem:[#allocation142_spill] sm:$0xff] %v19471_v31  ;;  %3263 = vmax.xlane.f32.xlu0 %v3262_v21  ;;  %v3226_v31 = vsel %vm3192_vm2, %v19298_v41, -inf  ;;  %v8622_v35 = vrot.slane %v7360_v50, %v17897_v48  ;;  %v9768_v21 = vadd.f32 %v19107_v27, %v9505_v29  ;;  %v7361_v3 = vcombine.high %v7345_v40, %v7345_v40 }
 0x2a2   : > { %v19480_v46 = vpop.xlane.xlu0 %10613  ;;  %10772 = vadd.xlane.f32.xlu1 %v10771_v58  ;;  %v10022_v1 = vmax.f32 %v9766_v28, 0.0  ;;  %v8630_v28 = vrot.slane %v7345_v40, %v17897_v48  ;;  %v10783_v29 = vsel %vm406_vm0, %v10283_v38, 0.0  ;;  %v17011_v40 = vld [vmem:[%s23952_s4] ss:$0 sm:$0xff] }
 0x2a3   : > { %24283 = vst [vmem:[#allocation143_spill] sm:$0xff] %v19480_v46  ;;  %v9509_v25 = vsub.f32 %v8622_v35, %v19412_v17  ;;  %v8638_v38 = vrot.slane %v7361_v3, %v17897_v48  ;;  %v6297_v63 = vmul.f32 %v17011_v40, %v24297_v39 }
 0x2a4   : > { %v19482_v14 = vpop.xlane.xlu1 %10604  ;;  %v9511_v44 = vsub.f32 %v8630_v28, %v19412_v17 }
 0x2a5   : > { %24284 = vst [vmem:[#allocation144_spill] sm:$0xff] %v19482_v14  ;;  %3227 = vmax.xlane.f32.xlu0 %v3226_v31  ;;  %v9513_v6 = vsub.f32 %v8638_v38, %v19412_v17 }
 0x2a6   : > { %v19493_v58 = vpop.xlane.xlu0 %10619  ;;  %10778 = vadd.xlane.f32.xlu1 %v10777_v8  ;;  %v19495_v14 = vpop.f32.mrb[42].mxu1  ;;  %v10285_v8 = vmul.f32 %v19148_v45, %v10022_v1  ;;  %v7232_v1 = vcombine.high %v19304_v18, %v19304_v18  ;;  %v24298_v18 = vld [vmem:[#allocation14_spill] sm:$0xff]  ;;  %v9774_v61 = vadd.f32 %v19107_v27, %v9511_v44  ;;  %v7233_v44 = vcombine.high %v19333_v53, %v19333_v53 }
 0x2a7   : > { %24285 = vst [vmem:[#allocation145_spill] sm:$0xff] %v19493_v58  ;;  %24286 = vst [vmem:[#allocation146_spill] sm:$0xff] %v19495_v14  ;;  %v19497_v46 = vpop.f32.mrb[40].mxu0  ;;  %v16468_v55 = vpop.f32.mrb[43].mxu1  ;;  %v10024_v58 = vmax.f32 %v9768_v21, 0.0  ;;  %v24291_v21 = vld [vmem:[#allocation10_spill] sm:$0xff]  ;;  %v6292_v15 = vmul.f32 %v17011_v40, %v24298_v18  ;;  %v7281_v53 = vcombine.high %v19375_v52, %v19375_v52  ;;  %v7282_v52 = vcombine.high %v19418_v23, %v19418_v23 }
 0x2a8   : > { %24287 = vst [vmem:[#allocation147_spill] sm:$0xff] %v19497_v46  ;;  %v19499_v50 = vpop.xlane.xlu1 %10610  ;;  %v16463_v41 = vpop.f32.mrb[41].mxu0  ;;  %v3268_v31 = vsel %vm3192_vm2, %v19497_v46, -inf  ;;  %v9772_v46 = vadd.f32 %v19107_v27, %v9509_v25  ;;  %v10789_v35 = vsel %vm406_vm0, %v10285_v8, 0.0  ;;  %v24293_v25 = vld [vmem:[#allocation12_spill] sm:$0xff] }
 0x2a9   : > { %24288 = vst [vmem:[#allocation148_spill] sm:$0xff] %v19499_v50  ;;  %3269 = vmax.xlane.f32.xlu0 %v3268_v31  ;;  %v10026_v50 = vmax.f32 %v9770_v37, 0.0  ;;  %v10287_v31 = vmul.f32 %v19148_v45, %v10024_v58  ;;  %v24292_v37 = vld [vmem:[#allocation11_spill] sm:$0xff]  ;;  %v24296_v58 = vld [vmem:[#allocation13_spill] sm:$0xff] }
 0x2aa   : > { %v19508_v55 = vpop.xlane.xlu0 %10625  ;;  %10784 = vadd.xlane.f32.xlu1 %v10783_v29  ;;  %v6291_v29 = vmul.f32 %v17011_v40, %v24291_v21  ;;  %v6295_v3 = vmul.f32 %v17011_v40, %v24296_v58  ;;  %v24299_v21 = vld [vmem:[#allocation44_spill] sm:$0xff] }
 0x2ab   : > { %24289 = vst [vmem:[#allocation149_spill] sm:$0xff] %v19508_v55  ;;  %v6293_v55 = vmul.f32 %v17011_v40, %v24292_v37  ;;  %v6456_v37 = vmul.f32 %v19535_v2, %v24299_v21  ;;  %v10289_v18 = vmul.f32 %v19148_v45, %v10026_v50  ;;  %v10795_v36 = vsel %vm406_vm0, %v10287_v31, 0.0  ;;  %v24307_v31 = vld [vmem:[#allocation47_spill] sm:$0xff] }
 0x2ac   : > { %v19510_v41 = vpop.xlane.xlu1 %10616  ;;  %v10028_v21 = vmax.f32 %v9772_v46, 0.0  ;;  %v6457_v38 = vmul.f32 %v19535_v2, %v24307_v31 }
 0x2ad   : > { %24290 = vst [vmem:[#allocation150_spill] sm:$0xff] %v19510_v41  ;;  %v6290_v41 = vmul.f32 %v17011_v40, %v24293_v25  ;;  %v19564_v46 = vadd.f32 %v6456_v37, %v6291_v29  ;;  %v9776_v37 = vadd.f32 %v19107_v27, %v9513_v6 }
 0x2ae   : > { %v19525_v28 = vpop.xlane.xlu0 %10631  ;;  %10790 = vadd.xlane.f32.xlu1 %v10789_v35  ;;  %v19527_v8 = vpop.f32.mrb[44].mxu1  ;;  %v24301_v35 = vld [vmem:[#allocation16_spill] sm:$0xff]  ;;  %v10291_v29 = vmul.f32 %v19148_v45, %v10028_v21  ;;  %v19593_v21 = vadd.f32 %v6457_v38, %v6292_v15 }
 0x2af   : > { %24294 = vst [vmem:[#allocation10_spill] sm:$0xff] %v19525_v28  ;;  %24295 = vst [vmem:[#allocation11_spill] sm:$0xff] %v19527_v8  ;;  %v19539_v25 = vpop.f32.mrb[42].mxu0  ;;  %v16478_v28 = vpop.f32.mrb[45].mxu1  ;;  %v19542_v54 = vmul.f32 %v17011_v40, %v24301_v35  ;;  %v24303_v35 = vld [vmem:[#allocation17_spill] sm:$0xff]  ;;  %v10032_v38 = vmax.f32 %v9776_v37, 0.0 }
 0x2b0   : > { %24300 = vst [vmem:[#allocation12_spill] sm:$0xff] %v19539_v25  ;;  %v19544_v22 = vpop.xlane.xlu1 %10622  ;;  %v16473_v58 = vpop.f32.mrb[43].mxu0  ;;  %v3274_v39 = vsel %vm3192_vm2, %v19539_v25, -inf  ;;  %v7254_v28 = vrot.slane %v7232_v1, %v17868_v47  ;;  %v19554_v49 = vmul.f32 %v17011_v40, %v24303_v35  ;;  %v6458_v25 = vmul.f32 %v19535_v2, %v24305_v57  ;;  %v24308_v1 = vld [vmem:[#allocation49_spill] sm:$0xff] }
 0x2b1   : > { %24302 = vst [vmem:[#allocation13_spill] sm:$0xff] %v19544_v22  ;;  %3275 = vmax.xlane.f32.xlu0 %v3274_v39  ;;  %v24304_v22 = vld [vmem:[#allocation45_spill] sm:$0xff]  ;;  %v6460_v40 = vmul.f32 %v19535_v2, %v24308_v1  ;;  %v24309_v39 = vld [vmem:[#allocation51_spill] sm:$0xff]  ;;  %v3232_v57 = vsel %vm3192_vm2, %v19326_v13, -inf }
 0x2b2   : > { %v6455_v58 = vmul.f32 %v19535_v2, %v24304_v22  ;;  %v19560_v50 = vpop.xlane.xlu0 %10637  ;;  %10796 = vadd.xlane.f32.xlu1 %v10795_v36  ;;  %v6462_v22 = vmul.f32 %v19535_v2, %v24309_v39  ;;  %v10801_v36 = vsel %vm406_vm0, %v10289_v18, 0.0  ;;  %v8554_v31 = vrot.slane %v7254_v28, %v17897_v48 }
 0x2b3   : > { %24306 = vst [vmem:[#allocation15_spill] sm:$0xff] %v19560_v50  ;;  %v10030_v50 = vmax.f32 %v9774_v61, 0.0  ;;  %v7264_v1 = vcombine.high %v7254_v28, %v7254_v28  ;;  %v7261_v61 = vrot.slane %v7233_v44, %v17868_v47  ;;  %v19595_v6 = vadd.f32 %v6460_v40, %v6295_v3  ;;  %v24313_v28 = vld [vmem:[#allocation53_spill] sm:$0xff] }
 0x2b4   : > { %v19572_v35 = vpop.xlane.xlu1 %10628  ;;  %v19582_v39 = vadd.f32 %v6455_v58, %v6290_v41  ;;  %v6464_v58 = vmul.f32 %v19535_v2, %v24313_v28  ;;  %v10807_v3 = vsel %vm406_vm0, %v10291_v29, 0.0  ;;  %v9492_v40 = vsub.f32 %v8554_v31, %v19289_v43 }
 0x2b5   : > { %24310 = vst [vmem:[#allocation14_spill] sm:$0xff] %v19572_v35  ;;  %3233 = vmax.xlane.f32.xlu0 %v3232_v57  ;;  %v19584_v35 = vadd.f32 %v6458_v25, %v6293_v55  ;;  %v19597_v57 = vadd.f32 %v6462_v22, %v6297_v63  ;;  %v7330_v25 = vcombine.high %v19444_v24, %v19444_v24  ;;  %v24315_v22 = vld [vmem:[#allocation55_spill] sm:$0xff]  ;;  %v24316_v28 = vlaneseq }
 0x2b6   : > { %v19586_v9 = vpop.xlane.xlu0 %10643  ;;  %10802 = vadd.xlane.f32.xlu1 %v10801_v36  ;;  %v19588_v18 = vpop.f32.mrb[46].mxu1  ;;  %v10293_v23 = vmul.f32 %v19148_v45, %v10030_v50  ;;  %v7303_v63 = vrot.slane %v7281_v53, %v17868_v47  ;;  %v8562_v24 = vrot.slane %v7264_v1, %v17897_v48  ;;  %v7310_v50 = vrot.slane %v7282_v52, %v17868_v47  ;;  %v24318_v53 = vld [vmem:[#allocation48_spill] sm:$0xff] }
 0x2b7   : > { %24311 = vst [vmem:[#allocation44_spill] sm:$0xff] %v19586_v9  ;;  %24312 = vst [vmem:[#allocation16_spill] sm:$0xff] %v19588_v18  ;;  %v19599_v41 = vpop.f32.mrb[44].mxu0  ;;  %v16488_v55 = vpop.f32.mrb[47].mxu1  ;;  %v24320_v29 = vsub.f32 %v18573_v42, %v18182_v4  ;;  %v8570_v31 = vrot.slane %v7261_v61, %v17897_v48  ;;  %v7352_v1 = vrot.slane %v7330_v25, %v17868_v47 }
 0x2b8   : > { %v19605_v36 = vpop.xlane.xlu1 %10634  ;;  %v16483_v44 = vpop.f32.mrb[45].mxu0  ;;  %v3280_v15 = vsel %vm3192_vm2, %v19599_v41, -inf  ;;  %v6466_v55 = vmul.f32 %v19535_v2, %v24315_v22  ;;  %v19631_v22 = vadd.f32 %v6464_v58, %v19542_v54  ;;  %v10813_v4 = vsel %vm406_vm0, %v10293_v23, 0.0  ;;  %v24326_v58 = vld [vmem:[#allocation56_spill] sm:$0xff] }
 0x2b9   : > { %24314 = vst [vmem:[#allocation17_spill] sm:$0xff] %v19605_v36  ;;  %3281 = vmax.xlane.f32.xlu0 %v3280_v15  ;;  %v11708_v44 = vand.u32 127, %v24316_v28  ;;  %v7265_v36 = vcombine.high %v7261_v61, %v7261_v61  ;;  %v19622_v15 = vmul.f32 %v19535_v2, %v24318_v53  ;;  %v9753_v37 = vadd.f32 %v19107_v27, %v24320_v29 }
 0x2ba   : > { %v19617_v9 = vpop.xlane.xlu0 %10649  ;;  %10808 = vadd.xlane.f32.xlu1 %v10807_v3  ;;  %24321 = vst [vmem:[#allocation47_spill] sm:$0xff] %v19631_v22  ;;  %v24322_v3 = vld [vmem:[#allocation50_spill] sm:$0xff]  ;;  %v8586_v53 = vrot.slane %v7303_v63, %v17897_v48  ;;  %v10295_v42 = vmul.f32 %v19148_v45, %v10032_v38  ;;  %v9755_v61 = vadd.f32 %v19107_v27, %v9492_v40 }
 0x2bb   : > { %24317 = vst [vmem:[#allocation45_spill] sm:$0xff] %v19617_v9  ;;  %24319 = vst [vmem:[#allocation46_spill] sm:$0xff] %v19622_v15  ;;  %v19635_v28 = vmul.f32 %v19535_v2, %v24322_v3  ;;  %v7313_v9 = vcombine.high %v7303_v63, %v7303_v63  ;;  %v9494_v25 = vsub.f32 %v8562_v24, %v19289_v43  ;;  %v10009_v23 = vmax.f32 %v9753_v37, 0.0 }
 0x2bc   : > { %v19637_v52 = vpop.xlane.xlu1 %10640  ;;  %v19645_v54 = vadd.f32 %v6466_v55, %v19554_v49  ;;  %v19648_v29 = vsub.s32 %v11708_v44, %v24326_v58  ;;  %v7314_v63 = vcombine.high %v7310_v50, %v7310_v50  ;;  %v9496_v38 = vsub.f32 %v8570_v31, %v19289_v43  ;;  %v24329_v49 = vld [vmem:[#allocation52_spill] sm:$0xff] }
 0x2bd   : > { %24323 = vst [vmem:[#allocation49_spill] sm:$0xff] %v19635_v28  ;;  %24324 = vst [vmem:[#allocation51_spill] sm:$0xff] %v19637_v52  ;;  %v8578_v52 = vrot.slane %v7265_v36, %v17897_v48  ;;  %v7362_v40 = vcombine.high %v7352_v1, %v7352_v1  ;;  %v7331_v24 = vcombine.high %v19469_v51, %v19469_v51  ;;  %v10819_v31 = vsel %vm406_vm0, %v10295_v42, 0.0 }
 0x2be   : > { %24325 = vst [vmem:[#allocation53_spill] sm:$0xff] %v19645_v54  ;;  %24327 = vst [vmem:[#allocation55_spill] sm:$0xff] %v19648_v29  ;;  %v19650_v3 = vpop.xlane.xlu0 %10655  ;;  %10814 = vadd.xlane.f32.xlu1 %v10813_v4  ;;  %v19660_v55 = vmul.f32 %v19535_v2, %v24329_v49  ;;  %v9500_v4 = vsub.f32 %v8586_v53, %v19363_v0  ;;  %v8594_v37 = vrot.slane %v7313_v9, %v17897_v48  ;;  %v24332_v49 = vld [vmem:[#allocation54_spill] sm:$0xff] }
 0x2bf   : > { %24328 = vst [vmem:[#allocation48_spill] sm:$0xff] %v19650_v3  ;;  %v19653_v28 = vpop.f32.mrb[46].mxu0  ;;  %v10011_v3 = vmax.f32 %v9755_v61, 0.0  ;;  %v9757_v51 = vadd.f32 %v19107_v27, %v9494_v25  ;;  %v8602_v15 = vrot.slane %v7310_v50, %v17897_v48  ;;  %v8610_v53 = vrot.slane %v7314_v63, %v17897_v48 }
 0x2c0   : > { %24330 = vst [vmem:[#allocation50_spill] sm:$0xff] %v19660_v55  ;;  %v19662_v44 = vpop.xlane.xlu1 %10646  ;;  %v16493_v58 = vpop.f32.mrb[47].mxu0  ;;  %v3286_v36 = vsel %vm3192_vm2, %v19653_v28, -inf  ;;  %v19673_v55 = vmul.f32 %v19535_v2, %v24332_v49  ;;  %v8618_v9 = vrot.slane %v7352_v1, %v17897_v48  ;;  %v10272_v42 = vmul.f32 %v19148_v45, %v10009_v23 }
 0x2c1   : > { %24331 = vst [vmem:[#allocation56_spill] sm:$0xff] %v19662_v44  ;;  %3287 = vmax.xlane.f32.xlu0 %v3286_v36  ;;  %v9498_v44 = vsub.f32 %v8578_v52, %v19289_v43  ;;  %v9759_v61 = vadd.f32 %v19107_v27, %v9496_v38  ;;  %v8626_v25 = vrot.slane %v7362_v40, %v17897_v48  ;;  %v3238_v2 = vsel %vm3192_vm2, %v19356_v32, -inf }
 0x2c2   : > { %24333 = vst [vmem:[#allocation52_spill] sm:$0xff] %v19673_v55  ;;  %v19675_v58 = vpop.xlane.xlu0 %10661  ;;  %10820 = vadd.xlane.f32.xlu1 %v10819_v31  ;;  %v7359_v50 = vrot.slane %v7331_v24, %v17868_v47  ;;  %v9763_v31 = vadd.f32 %v19107_v27, %v9500_v4  ;;  %v9502_v43 = vsub.f32 %v8594_v37, %v19363_v0  ;;  %v3241_v52 = vsel %vm3192_vm2, %v19377_v62, -inf  ;;  %v19701_v27 = vld [vmem:[%s23953_s5] ss:$0 sm:$0xff] }
 0x2c3   : > { %24334 = vst [vmem:[#allocation54_spill] sm:$0xff] %v19675_v58  ;;  %v7371_v1 = vrot.slane %v18236_v59, %v17868_v47  ;;  %v10274_v63 = vmul.f32 %v19148_v45, %v10011_v3  ;;  %v10013_v23 = vmax.f32 %v9757_v51, 0.0  ;;  %v9504_v38 = vsub.f32 %v8602_v15, %v19363_v0 }
 0x2c4   : > { %v19684_v36 = vpop.xlane.xlu1 %10652  ;;  %v9761_v24 = vadd.f32 %v19701_v27, %v9498_v44  ;;  %v9506_v4 = vsub.f32 %v8610_v53, %v19363_v0  ;;  %v9508_v37 = vsub.f32 %v8618_v9, %v19412_v17  ;;  %v10750_v3 = vsel %vm406_vm0, %v10272_v42, 0.0 }
 0x2c5   : > { %24335 = vst [vmem:[#allocation151_spill] sm:$0xff] %v19684_v36  ;;  %3239 = vmax.xlane.f32.xlu0 %v3238_v2  ;;  %v7387_v49 = vrot.slane %v7371_v1, %v17868_v47  ;;  %v10015_v51 = vmax.f32 %v9759_v61, 0.0  ;;  %v9510_v15 = vsub.f32 %v8626_v25, %v19412_v17  ;;  %v8634_v2 = vrot.slane %v7359_v50, %v17897_v48 }
 0x2c6   : > { %v19696_v40 = vpop.xlane.xlu0 %10667  ;;  %3242 = vmax.xlane.f32.xlu1 %v3241_v52  ;;  %v9765_v36 = vadd.f32 %v19701_v27, %v9502_v43  ;;  %v7379_v58 = vcombine.high %v7371_v1, %v7371_v1  ;;  %v3247_v0 = vsel %vm3192_vm2, %v19394_v34, -inf  ;;  %v10276_v53 = vmul.f32 %v19148_v45, %v10013_v23 }
 0x2c7   : > { %24336 = vst [vmem:[#allocation152_spill] sm:$0xff] %v19696_v40  ;;  %v7363_v40 = vcombine.high %v7359_v50, %v7359_v50  ;;  %v8646_v44 = vrot.slane %v7387_v49, %v17897_v48  ;;  %v10019_v9 = vmax.f32 %v9763_v31, 0.0  ;;  %v9767_v42 = vadd.f32 %v19701_v27, %v9504_v38 }
 0x2c8   : > { %v19710_v52 = vpop.xlane.xlu1 %10658  ;;  %v10756_v25 = vsel %vm406_vm0, %v10274_v63, 0.0  ;;  %v9769_v50 = vadd.f32 %v19701_v27, %v9506_v4  ;;  %v9771_v43 = vadd.f32 %v19701_v27, %v9508_v37  ;;  %v10278_v1 = vmul.f32 %v19148_v45, %v10015_v51 }
 0x2c9   : > { %24337 = vst [vmem:[#allocation153_spill] sm:$0xff] %v19710_v52  ;;  %10751 = vadd.xlane.f32.xlu0 %v10750_v3  ;;  %v10017_v52 = vmax.f32 %v9761_v24, 0.0  ;;  %v9773_v3 = vadd.f32 %v19701_v27, %v9510_v15  ;;  %v9512_v55 = vsub.f32 %v8634_v2, %v19412_v17  ;;  %v7409_v23 = vcombine.high %v7387_v49, %v7387_v49 }
 0x2ca   : > { %v19718_v61 = vpop.xlane.xlu0 %10673  ;;  %3248 = vmax.xlane.f32.xlu1 %v3247_v0  ;;  %v10021_v38 = vmax.f32 %v9765_v36, 0.0  ;;  %v9515_v0 = vsub.f32 %v8646_v44, %v18236_v59  ;;  %v7401_v63 = vrot.slane %v7379_v58, %v17868_v47  ;;  %v3253_v24 = vsel %vm3192_vm2, %v19414_v33, -inf  ;;  %v19740_v36 = vld [vmem:[%s23954_s6] ss:$0 sm:$0xff] }
 0x2cb   : > { %24338 = vst [vmem:[#allocation154_spill] sm:$0xff] %v19718_v61  ;;  %v8642_v61 = vrot.slane %v7363_v40, %v17897_v48  ;;  %v10762_v4 = vsel %vm406_vm0, %v10276_v53, 0.0  ;;  %v10282_v37 = vmul.f32 %v19148_v45, %v10019_v9  ;;  %v10023_v51 = vmax.f32 %v9767_v42, 0.0 }
 0x2cc   : > { %v19726_v31 = vpop.xlane.xlu1 %10664  ;;  %v10280_v40 = vmul.f32 %v19740_v36, %v10017_v52  ;;  %v10025_v58 = vmax.f32 %v9769_v50, 0.0  ;;  %v10027_v49 = vmax.f32 %v9771_v43, 0.0  ;;  %v8650_v2 = vrot.slane %v7401_v63, %v17897_v48 }
 0x2cd   : > { %24339 = vst [vmem:[#allocation155_spill] sm:$0xff] %v19726_v31  ;;  %10757 = vadd.xlane.f32.xlu0 %v10756_v25  ;;  %v10768_v44 = vsel %vm406_vm0, %v10278_v1, 0.0  ;;  %v10029_v53 = vmax.f32 %v9773_v3, 0.0  ;;  %v9775_v45 = vadd.f32 %v19701_v27, %v9512_v55  ;;  %v8654_v9 = vrot.slane %v7409_v23, %v17897_v48 }
 0x2ce   : > { %v19735_v15 = vpop.xlane.xlu0 %10679  ;;  %3254 = vmax.xlane.f32.xlu1 %v3253_v24  ;;  %v10284_v25 = vmul.f32 %v19740_v36, %v10021_v38  ;;  %v9514_v24 = vsub.f32 %v8642_v61, %v19412_v17  ;;  %v7411_v52 = vcombine.high %v7401_v63, %v7401_v63  ;;  %v3259_v50 = vsel %vm3192_vm2, %v19432_v11, -inf }
 0x2cf   : > { %24340 = vst [vmem:[#allocation156_spill] sm:$0xff] %v19735_v15  ;;  %v9778_v15 = vadd.f32 %v19701_v27, %v9515_v0  ;;  %v10780_v43 = vsel %vm406_vm0, %v10282_v37, 0.0  ;;  %v10286_v1 = vmul.f32 %v19740_v36, %v10023_v51  ;;  %v7428_v55 = vcombine.high %v18826_v26, %v18826_v26 }
 0x2d0   : > { %v19747_v42 = vpop.xlane.xlu1 %10670  ;;  %v10774_v23 = vsel %vm406_vm0, %v10280_v40, 0.0  ;;  %v10288_v17 = vmul.f32 %v19740_v36, %v10025_v58  ;;  %v10290_v61 = vmul.f32 %v19740_v36, %v10027_v49  ;;  %v9516_v38 = vsub.f32 %v8650_v2, %v18236_v59 }
 0x2d1   : > { %24341 = vst [vmem:[#allocation157_spill] sm:$0xff] %v19747_v42  ;;  %10763 = vadd.xlane.f32.xlu0 %v10762_v4  ;;  %v10292_v0 = vmul.f32 %v19740_v36, %v10029_v53  ;;  %v10031_v63 = vmax.f32 %v9775_v45, 0.0  ;;  %v9517_v4 = vsub.f32 %v8654_v9, %v18236_v59  ;;  %v7394_v37 = vrot.slane %v18819_v19, %v17868_v47 }
 0x2d2   : > { %v19758_v3 = vpop.xlane.xlu0 %10685  ;;  %3260 = vmax.xlane.f32.xlu1 %v3259_v50  ;;  %v19771_v51 = vsel %vm406_vm0, %v10284_v25, 0.0  ;;  %v9777_v40 = vadd.f32 %v19701_v27, %v9514_v24  ;;  %v10034_v58 = vmax.f32 %v9778_v15, 0.0  ;;  %v8658_v49 = vrot.slane %v7411_v52, %v17897_v48 }
 0x2d3   : > { %24342 = vst [vmem:[#allocation158_spill] sm:$0xff] %v19758_v3  ;;  %v3265_v2 = vsel %vm3192_vm2, %v19464_v30, -inf  ;;  %v19778_v53 = vsel %vm406_vm0, %v10286_v1, 0.0  ;;  %v8666_v19 = vrot.slane %v18865_v10, %v17897_v48  ;;  %v7450_v45 = vrot.slane %v7428_v55, %v17868_v47 }
 0x2d4   : > { %v19768_v26 = vpop.xlane.xlu1 %10676  ;;  %v19786_v25 = vsel %vm406_vm0, %v10288_v17, 0.0  ;;  %v19789_v15 = vsel %vm406_vm0, %v10290_v61, 0.0  ;;  %v7413_v24 = vcombine.high %v18298_v5, %v18298_v5  ;;  %v19795_v52 = vsel %vm406_vm0, %v10292_v0, 0.0 }
 0x2d5   : > { %24343 = vst [vmem:[#allocation159_spill] sm:$0xff] %v19768_v26  ;;  %10769 = vadd.xlane.f32.xlu0 %v10768_v44  ;;  %v9779_v44 = vadd.f32 %v19701_v27, %v9516_v38  ;;  %v10294_v10 = vmul.f32 %v19740_v36, %v10031_v63  ;;  %v9780_v50 = vadd.f32 %v19701_v27, %v9517_v4  ;;  %v10033_v17 = vmax.f32 %v9777_v40, 0.0 }
 0x2d6   : > { %v19783_v9 = vpop.xlane.xlu0 %10691  ;;  %3266 = vmax.xlane.f32.xlu1 %v3265_v2  ;;  %v7410_v1 = vcombine.high %v7394_v37, %v7394_v37  ;;  %v10297_v2 = vmul.f32 %v19740_v36, %v10034_v58  ;;  %v9518_v61 = vsub.f32 %v8658_v49, %v18236_v59  ;;  %v8678_v38 = vrot.slane %v18846_v7, %v17897_v48 }
 0x2d7   : > { %24344 = vst [vmem:[#allocation160_spill] sm:$0xff] %v19783_v9  ;;  %v3271_v0 = vsel %vm3192_vm2, %v19495_v14, -inf  ;;  %v9520_v9 = vsub.f32 %v8666_v19, %v18236_v59  ;;  %v8682_v63 = vrot.slane %v7450_v45, %v17897_v48  ;;  %v8710_v4 = vrot.slane %v18852_v60, %v17897_v48 }
 0x2d8   : > { %v19799_v55 = vpop.xlane.xlu1 %10682  ;;  %v10035_v40 = vmax.f32 %v9779_v44, 0.0  ;;  %v8662_v58 = vrot.slane %v7394_v37, %v17897_v48  ;;  %v7460_v49 = vcombine.high %v7450_v45, %v7450_v45  ;;  %v7427_v7 = vrot.slane %v7413_v24, %v17868_v47 }
 0x2d9   : > { %24345 = vst [vmem:[#allocation161_spill] sm:$0xff] %v19799_v55  ;;  %10775 = vadd.xlane.f32.xlu0 %v10774_v23  ;;  %v19816_v23 = vsel %vm406_vm0, %v10294_v10, 0.0  ;;  %v10036_v55 = vmax.f32 %v9780_v50, 0.0  ;;  %v8714_v19 = vrot.slane %v18908_v12, %v17897_v48  ;;  %v8670_v26 = vrot.slane %v7410_v1, %v17897_v48 }
 0x2da   : > { %v19811_v3 = vpop.xlane.xlu0 %10697  ;;  %3272 = vmax.xlane.f32.xlu1 %v3271_v0  ;;  %v10296_v60 = vmul.f32 %v19740_v36, %v10033_v17  ;;  %v9781_v44 = vadd.f32 %v19701_v27, %v9518_v61  ;;  %v9523_v37 = vsub.f32 %v8678_v38, %v18298_v5  ;;  %v19828_v45 = vrot.slane %v19582_v39, %v17868_v47 }
 0x2db   : > { %24346 = vst [vmem:[#allocation162_spill] sm:$0xff] %v19811_v3  ;;  %v3277_v24 = vsel %vm3192_vm2, %v19527_v8, -inf  ;;  %v9783_v12 = vadd.f32 %v19701_v27, %v9520_v9  ;;  %v9524_v10 = vsub.f32 %v8682_v63, %v18298_v5  ;;  %v9531_v50 = vsub.f32 %v8710_v4, %v18249_v20 }
 0x2dc   : > { %v19821_v42 = vpop.xlane.xlu1 %10688  ;;  %v19838_v17 = vsel %vm406_vm0, %v10297_v2, 0.0  ;;  %v9519_v61 = vsub.f32 %v8662_v58, %v18236_v59  ;;  %v8690_v38 = vrot.slane %v7460_v49, %v17897_v48  ;;  %v10298_v0 = vmul.f32 %v19740_v36, %v10035_v40 }
 0x2dd   : > { %24347 = vst [vmem:[#allocation163_spill] sm:$0xff] %v19821_v42  ;;  %10781 = vadd.xlane.f32.xlu0 %v10780_v43  ;;  %v7443_v43 = vrot.slane %v7427_v7, %v17868_v47  ;;  %v9532_v9 = vsub.f32 %v8714_v19, %v18249_v20  ;;  %v9521_v63 = vsub.f32 %v8670_v26, %v18236_v59  ;;  %v3283_v40 = vsel %vm3192_vm2, %v19588_v18, -inf }
 0x2de   : > { %v19835_v1 = vpop.xlane.xlu0 %10703  ;;  %3278 = vmax.xlane.f32.xlu1 %v3277_v24  ;;  %v7429_v3 = vcombine.high %v7427_v7, %v7427_v7  ;;  %v10299_v24 = vmul.f32 %v19740_v36, %v10036_v55  ;;  %v9786_v2 = vadd.f32 %v19701_v27, %v9523_v37  ;;  %v19852_v58 = vrot.slane %v19828_v45, %v17868_v47 }
 0x2df   : > { %24348 = vst [vmem:[#allocation164_spill] sm:$0xff] %v19835_v1  ;;  %v10037_v1 = vmax.f32 %v9781_v44, 0.0  ;;  %v10039_v49 = vmax.f32 %v9783_v12, 0.0  ;;  %v9787_v26 = vadd.f32 %v19701_v27, %v9524_v10  ;;  %v9794_v7 = vadd.f32 %v19701_v27, %v9531_v50 }
 0x2e0   : > { %v19846_v4 = vpop.xlane.xlu1 %10694  ;;  %v19862_v55 = vsel %vm406_vm0, %v10296_v60, 0.0  ;;  %v9782_v44 = vadd.f32 %v19701_v27, %v9519_v61  ;;  %v9526_v37 = vsub.f32 %v8690_v38, %v18298_v5  ;;  %v9784_v12 = vadd.f32 %v19701_v27, %v9521_v63 }
 0x2e1   : > { %24349 = vst [vmem:[#allocation165_spill] sm:$0xff] %v19846_v4  ;;  %10787 = vadd.xlane.f32.xlu0 %v19771_v51  ;;  %v8694_v51 = vrot.slane %v7443_v43, %v17897_v48  ;;  %v9795_v4 = vadd.f32 %v19701_v27, %v9532_v9  ;;  %v19870_v10 = vrot.slane %v7429_v3, %v17868_v47  ;;  %v10042_v60 = vmax.f32 %v9786_v2, 0.0 }
 0x2e2   : > { %v19859_v19 = vpop.xlane.xlu0 %10709  ;;  %3284 = vmax.xlane.f32.xlu1 %v3283_v40  ;;  %v7459_v50 = vcombine.high %v7443_v43, %v7443_v43  ;;  %v19875_v40 = vsel %vm406_vm0, %v10298_v0, 0.0  ;;  %v8742_v61 = vrot.slane %v19852_v58, %v17897_v48  ;;  %v19881_v38 = vrot.slane %v19564_v46, %v17868_v47 }
 0x2e3   : > { %24350 = vst [vmem:[#allocation166_spill] sm:$0xff] %v19859_v19  ;;  %v10300_v9 = vmul.f32 %v19740_v36, %v10037_v1  ;;  %v10302_v3 = vmul.f32 %v19740_v36, %v10039_v49  ;;  %v10043_v43 = vmax.f32 %v9787_v26, 0.0  ;;  %v10050_v63 = vmax.f32 %v9794_v7, 0.0 }
 0x2e4   : > { %v19872_v42 = vpop.xlane.xlu1 %10700  ;;  %v10038_v0 = vmax.f32 %v9782_v44, 0.0  ;;  %v9789_v2 = vadd.f32 %v19701_v27, %v9526_v37  ;;  %v9527_v19 = vsub.f32 %v8694_v51, %v18298_v5  ;;  %v19892_v31 = vrot.slane %v19881_v38, %v17868_v47 }
 0x2e5   : > { %24351 = vst [vmem:[#allocation167_spill] sm:$0xff] %v19872_v42  ;;  %10793 = vadd.xlane.f32.xlu0 %v19778_v53  ;;  %v10051_v29 = vmax.f32 %v9795_v4, 0.0  ;;  %v10040_v18 = vmax.f32 %v9784_v12, 0.0  ;;  %v8698_v53 = vrot.slane %v19870_v10, %v17897_v48  ;;  %v8702_v1 = vrot.slane %v7459_v50, %v17897_v48 }
 0x2e6   : > { %v19886_v42 = vpop.xlane.xlu0 %10715  ;;  %v19900_v26 = vsel %vm406_vm0, %v10299_v24, 0.0  ;;  %v10305_v7 = vmul.f32 %v19740_v36, %v10042_v60  ;;  %v9539_v44 = vsub.f32 %v8742_v61, %v19582_v39  ;;  %v8774_v37 = vrot.slane %v19892_v31, %v17897_v48 }
 0x2e7   : > { %24352 = vst [vmem:[#allocation168_spill] sm:$0xff] %v19886_v42  ;;  %v19908_v4 = vsel %vm406_vm0, %v10300_v9, 0.0  ;;  %v10306_v51 = vmul.f32 %v19740_v36, %v10043_v43  ;;  %v10313_v12 = vmul.f32 %v19740_v36, %v10050_v63  ;;  %v7462_v24 = vcombine.high %v18249_v20, %v18249_v20 }
 0x2e8   : > { %v19897_v49 = vpop.xlane.xlu1 %10706  ;;  %v19917_v60 = vsel %vm406_vm0, %v10302_v3, 0.0  ;;  %v10301_v61 = vmul.f32 %v19740_v36, %v10038_v0  ;;  %v10045_v42 = vmax.f32 %v9789_v2, 0.0  ;;  %v10314_v9 = vmul.f32 %v19740_v36, %v10051_v29 }
 0x2e9   : > { %24353 = vst [vmem:[#allocation169_spill] sm:$0xff] %v19897_v49  ;;  %10799 = vadd.xlane.f32.xlu0 %v19786_v25  ;;  %v9790_v25 = vadd.f32 %v19701_v27, %v9527_v19  ;;  %v10303_v49 = vmul.f32 %v19740_v36, %v10040_v18  ;;  %v9528_v43 = vsub.f32 %v8698_v53, %v18298_v5  ;;  %v19936_v18 = vsel %vm406_vm0, %v10306_v51, 0.0 }
 0x2ea   : > { %v19914_v50 = vpop.xlane.xlu0 %10721  ;;  %v9529_v63 = vsub.f32 %v8702_v1, %v18298_v5  ;;  %v9802_v3 = vadd.f32 %v19701_v27, %v9539_v44  ;;  %v9547_v0 = vsub.f32 %v8774_v37, %v19564_v46  ;;  %v7526_v19 = vcombine.high %v19828_v45, %v19828_v45 }
 0x2eb   : > { %24354 = vst [vmem:[#allocation170_spill] sm:$0xff] %v19914_v50  ;;  %v19928_v50 = vsel %vm406_vm0, %v10305_v7, 0.0  ;;  %v19939_v29 = vsel %vm406_vm0, %v10313_v12, 0.0  ;;  %v7476_v2 = vrot.slane %v7462_v24, %v17868_v47  ;;  %v7556_v53 = vcombine.high %v19852_v58, %v19852_v58 }
 0x2ec   : > { %v19925_v54 = vpop.xlane.xlu1 %10712  ;;  %v19947_v7 = vsel %vm406_vm0, %v10301_v61, 0.0  ;;  %v10308_v45 = vmul.f32 %v19740_v36, %v10045_v42  ;;  %v10046_v44 = vmax.f32 %v9790_v25, 0.0  ;;  %v19953_v37 = vsel %vm406_vm0, %v10314_v9, 0.0 }
 0x2ed   : > { %24355 = vst [vmem:[#allocation171_spill] sm:$0xff] %v19925_v54  ;;  %10805 = vadd.xlane.f32.xlu0 %v19789_v15  ;;  %v7461_v15 = vcombine.high %v19870_v10, %v19870_v10  ;;  %v19956_v51 = vsel %vm406_vm0, %v10303_v49, 0.0  ;;  %v9791_v12 = vadd.f32 %v19701_v27, %v9528_v43  ;;  %v9792_v58 = vadd.f32 %v19701_v27, %v9529_v63 }
 0x2ee   : > { %v19944_v1 = vpop.xlane.xlu0 %10727  ;;  %v10058_v61 = vmax.f32 %v9802_v3, 0.0  ;;  %v9810_v42 = vadd.f32 %v19701_v27, %v9547_v0  ;;  %v7548_v25 = vrot.slane %v7526_v19, %v17868_v47  ;;  %v7575_v10 = vcombine.high %v19881_v38, %v19881_v38 }
 0x2ef   : > { %24356 = vst [vmem:[#allocation172_spill] sm:$0xff] %v19944_v1  ;;  %v19968_v49 = vrot.slane %v7476_v2, %v17868_v47  ;;  %v8750_v9 = vrot.slane %v7556_v53, %v17897_v48  ;;  %v7478_v43 = vcombine.high %v7476_v2, %v7476_v2  ;;  %v7511_v63 = vcombine.high %v19582_v39, %v19582_v39 }
 0x2f0   : > { %v19960_v24 = vpop.xlane.xlu1 %10718  ;;  %v19976_v3 = vsel %vm406_vm0, %v10308_v45, 0.0  ;;  %v10309_v0 = vmul.f32 %v19740_v36, %v10046_v44  ;;  %v24359_v38 = vsub.f32 %v18877_v16, %v18298_v5  ;;  %v8706_v19 = vrot.slane %v7461_v15, %v17897_v48 }
 0x2f1   : > { %24357 = vst [vmem:[#allocation173_spill] sm:$0xff] %v19960_v24  ;;  %10811 = vadd.xlane.f32.xlu0 %v19795_v52  ;;  %v17015_v24 = vld [vmem:[%s17308_s13 + $0xc0] sm:$0xff]  ;;  %v10047_v2 = vmax.f32 %v9791_v12, 0.0  ;;  %v10048_v53 = vmax.f32 %v9792_v58, 0.0  ;;  %v24360_v54 = vsub.f32 %v18882_v56, %v18249_v20  ;;  %v8726_v45 = vrot.slane %v19968_v49, %v17897_v48 }
 0x2f2   : > { %v19973_v1 = vpop.xlane.xlu0 %10733  ;;  %v9788_v52 = vadd.f32 %v19701_v27, %v24359_v38  ;;  %v10321_v16 = vmul.f32 %v19740_v36, %v10058_v61  ;;  %v8746_v38 = vrot.slane %v7548_v25, %v17897_v48  ;;  %v7558_v15 = vcombine.high %v7548_v25, %v7548_v25 }
 0x2f3   : > { %24358 = vst [vmem:[#allocation174_spill] sm:$0xff] %v19973_v1  ;;  %6228 = vperm.xlu1 %16875, %v17015_v24   ;;  %v9796_v1 = vadd.f32 %v19701_v27, %v24360_v54  ;;  %v19996_v24 = vrot.slane %v7575_v10, %v17868_v47  ;;  %v10066_v12 = vmax.f32 %v9810_v42, 0.0  ;;  %v9541_v56 = vsub.f32 %v8750_v9, %v19582_v39 }
 0x2f4   : > { %v19991_v44 = vpop.xlane.xlu1 %10724  ;;  %v20001_v54 = vrot.slane %v7478_v43, %v17868_v47  ;;  %v7525_v58 = vrot.slane %v7511_v63, %v17868_v47  ;;  %v20007_v61 = vsel %vm406_vm0, %v10309_v0, 0.0  ;;  %v9530_v25 = vsub.f32 %v8706_v19, %v18298_v5 }
 0x2f5   : > { %24361 = vst [vmem:[#allocation175_spill] sm:$0xff] %v19991_v44  ;;  %10817 = vadd.xlane.f32.xlu0 %v19816_v23  ;;  %v10044_v44 = vmax.f32 %v9788_v52, 0.0  ;;  %v8778_v10 = vrot.slane %v19996_v24, %v17897_v48  ;;  %v17016_v23 = vld [vmem:[%s17308_s13 + $0xd0] sm:$0xff]  ;;  %v10311_v42 = vmul.f32 %v19740_v36, %v10048_v53  ;;  %v10052_v9 = vmax.f32 %v9796_v1, 0.0 }
 0x2f6   : > { %v20004_v8 = vpop.xlane.xlu0 %10739  ;;  %v9535_v43 = vsub.f32 %v8726_v45, %v18249_v20  ;;  %v8730_v63 = vrot.slane %v20001_v54, %v17897_v48  ;;  %v10310_v0 = vmul.f32 %v19740_v36, %v10047_v2  ;;  %v24364_v52 = vld [vmem:[#allocation27_spill] sm:$0xff]  ;;  %v8754_v53 = vrot.slane %v7558_v15, %v17897_v48 }
 0x2f7   : > { %24362 = vst [vmem:[#allocation176_spill] sm:$0xff] %v20004_v8  ;;  %6238 = vperm.xlu1 %16875, %v17016_v23   ;;  %v24365_v5 = vsub.f32 %v24364_v52, %v18236_v59  ;;  %v9540_v23 = vsub.f32 %v8746_v38, %v19582_v39  ;;  %v20028_v1 = vsel %vm406_vm0, %v10321_v16, 0.0  ;;  %v24366_v45 = vld [vmem:[#allocation39_spill] sm:$0xff]  ;;  %v9804_v2 = vadd.f32 %v19701_v27, %v9541_v56 }
 0x2f8   : > { %v20017_v8 = vpop.xlane.xlu1 %10730  ;;  %v24367_v14 = vsub.f32 %v24366_v45, %v18249_v20  ;;  %v20036_v59 = vrot.slane %v7525_v58, %v17868_v47  ;;  %v10329_v38 = vmul.f32 %v19740_v36, %v10066_v12  ;;  %v9793_v15 = vadd.f32 %v19701_v27, %v9530_v25 }
 0x2f9   : > { %24363 = vst [vmem:[#allocation177_spill] sm:$0xff] %v20017_v8  ;;  %v9785_v19 = vadd.f32 %v19701_v27, %v24365_v5  ;;  %10823 = vadd.xlane.f32.xlu0 %v19862_v55  ;;  %v9548_v55 = vsub.f32 %v8778_v10, %v19564_v46  ;;  %v7508_v16 = vcombine.high %v19968_v49, %v19968_v49  ;;  %v17017_v5 = vld [vmem:[%s17308_s13 + $0xe0] sm:$0xff]  ;;  %v10060_v11 = vmax.f32 %v9804_v2, 0.0 }
 0x2fa   : > { %v9797_v8 = vadd.f32 %v19701_v27, %v24367_v14  ;;  %v20038_v52 = vpop.xlane.xlu0 %10745  ;;  %v20047_v14 = vsel %vm406_vm0, %v10311_v42, 0.0  ;;  %v10307_v56 = vmul.f32 %v19740_v36, %v10044_v44  ;;  %v9798_v45 = vadd.f32 %v19701_v27, %v9535_v43 }
 0x2fb   : > { %24368 = vst [vmem:[#allocation27_spill] sm:$0xff] %v20038_v52  ;;  %6248 = vperm.xlu1 %16875, %v17017_v5   ;;  %24369 = vst [vmem:[#allocation39_spill] sm:$0xff] %v20047_v14  ;;  %v9536_v52 = vsub.f32 %v8730_v63, %v18249_v20  ;;  %v10041_v25 = vmax.f32 %v9785_v19, 0.0  ;;  %v9803_v10 = vadd.f32 %v19701_v27, %v9540_v23  ;;  %v20063_v63 = vsel %vm406_vm0, %v10310_v0, 0.0  ;;  %v16011_v0 = vld [vmem:[#allocation2] ss:$0 sm:$0xff] }
 0x2fc   : > { %v20052_v12 = vpop.xlane.xlu1 %10736  ;;  %v9542_v30 = vsub.f32 %v8754_v53, %v19582_v39  ;;  %v7527_v49 = vcombine.high %v7525_v58, %v7525_v58  ;;  %v10315_v42 = vmul.f32 %v19740_v36, %v10052_v9  ;;  %v10053_v5 = vmax.f32 %v9797_v8, 0.0  ;;  %v17018_v58 = vld [vmem:[%s17308_s13 + $0xf0] sm:$0xff] }
 0x2fd   : > { %24370 = vst [vmem:[#allocation178_spill] sm:$0xff] %v20052_v12  ;;  %10826 = vadd.xlane.f32.xlu0 %v19838_v17  ;;  %v8758_v44 = vrot.slane %v20036_v59, %v17897_v48  ;;  %v10049_v19 = vmax.f32 %v9793_v15, 0.0  ;;  %v9811_v23 = vadd.f32 %v19701_v27, %v9548_v55  ;;  %v8734_v53 = vrot.slane %v7508_v16, %v17897_v48 }
 0x2fe   : > { %v20060_v43 = vpop.xlane.xlu0 %3194  ;;  %v20069_v17 = vsel %vm406_vm0, %v10329_v38, 0.0  ;;  %v20072_v8 = vsel %vm406_vm0, %v10307_v56, 0.0  ;;  %v10054_v9 = vmax.f32 %v9798_v45, 0.0  ;;  %v9799_v2 = vadd.f32 %v19701_v27, %v9536_v52 }
 0x2ff   : > { %6258 = vperm.xlu1 %16875, %v17018_v58   ;;  %24371 = vst [vmem:[#allocation179_spill] sm:$0xff] %v20069_v17  ;;  %24372 = vst [vmem:[#allocation180_spill] sm:$0xff] %v20072_v8  ;;  %v10304_v15 = vmul.f32 %v19740_v36, %v10041_v25  ;;  %v10059_v14 = vmax.f32 %v9803_v10, 0.0  ;;  %v9805_v55 = vadd.f32 %v19701_v27, %v9542_v30  ;;  %v10067_v25 = vmax.f32 %v9811_v23, 0.0 }
 0x300   : > { %v20075_v12 = vpop.xlane.xlu1 %10742  ;;  %v20080_v16 = vrot.slane %v7527_v49, %v17868_v47  ;;  %v10316_v38 = vmul.f32 %v19740_v36, %v10053_v5  ;;  %v10323_v56 = vmul.f32 %v19740_v36, %v10060_v11  ;;  %v9543_v45 = vsub.f32 %v8758_v44, %v19582_v39 }
 0x301   : > { %24373 = vst [vmem:[#allocation181_spill] sm:$0xff] %v20075_v12  ;;  %10829 = vadd.xlane.f32.xlu0 %v19875_v40  ;;  %v7605_v52 = vcombine.high %v19892_v31, %v19892_v31  ;;  %v10312_v58 = vmul.f32 %v19740_v36, %v10049_v19  ;;  %v9537_v10 = vsub.f32 %v8734_v53, %v18249_v20  ;;  %v20095_v40 = vsel %vm406_vm0, %v10315_v42, 0.0 }
 0x302   : > { %v20092_v30 = vrot.slane %v19593_v21, %v17868_v47  ;;  %24374 = vst [vmem:[#allocation182_spill] sm:$0xff] %v20095_v40  ;;  %v10317_v11 = vmul.f32 %v19740_v36, %v10054_v9  ;;  %v10055_v49 = vmax.f32 %v9799_v2, 0.0  ;;  %v7510_v5 = vcombine.high %v20001_v54, %v20001_v54  ;;  %v20100_v31 = vpop.xlane.xlu0 %3200 }
 0x303   : > { %11192 = vperm.xlu1 %16875, %v16011_v0   ;;  %v20105_v19 = vsel %vm406_vm0, %v10304_v15, 0.0  ;;  %v10322_v23 = vmul.f32 %v19740_v36, %v10059_v14  ;;  %v10061_v53 = vmax.f32 %v9805_v55, 0.0  ;;  %v8762_v42 = vrot.slane %v20080_v16, %v17897_v48 }
 0x304   : > { %v20102_v44 = vpop.xlane.xlu1 %10748  ;;  %24376 = vst [vmem:[#allocation184_spill] sm:$0xff] %v20105_v19  ;;  %v20112_v9 = vsel %vm406_vm0, %v10316_v38, 0.0  ;;  %v20115_v54 = vsel %vm406_vm0, %v10323_v56, 0.0  ;;  %v9806_v2 = vadd.f32 %v19701_v27, %v9543_v45  ;;  %v8782_v0 = vrot.slane %v7605_v52, %v17897_v48 }
 0x305   : > { %24375 = vst [vmem:[#allocation183_spill] sm:$0xff] %v20102_v44  ;;  %10832 = vadd.xlane.f32.xlu0 %v19900_v26  ;;  %24377 = vst [vmem:[#allocation185_spill] sm:$0xff] %v20112_v9  ;;  %v20120_v15 = vsel %vm406_vm0, %v10312_v58, 0.0  ;;  %v10330_v14 = vmul.f32 %v19740_v36, %v10067_v25  ;;  %v9800_v55 = vadd.f32 %v19701_v27, %v9537_v10  ;;  %v20127_v38 = vsel %vm406_vm0, %v10317_v11, 0.0  ;;  %v24382_v11 = vld [vmem:[#allocation88_spill] sm:$0xff] }
 0x306   : > { %24378 = vst [vmem:[#allocation186_spill] sm:$0xff] %v20115_v54  ;;  %24379 = vst [vmem:[#allocation187_spill] sm:$0xff] %v20120_v15  ;;  %v7632_v26 = vrot.slane %v20092_v30, %v17868_v47  ;;  %v10318_v56 = vmul.f32 %v19740_v36, %v10055_v49  ;;  %v8738_v44 = vrot.slane %v7510_v5, %v17897_v48  ;;  %v20134_v58 = vsel %vm406_vm0, %v10322_v23, 0.0  ;;  %v20147_v23 = vpop.xlane.xlu0 %3203 }
 0x307   : > { %24380 = vst [vmem:[#allocation188_spill] sm:$0xff] %v20127_v38  ;;  %v7607_v45 = vcombine.high %v19996_v24, %v19996_v24  ;;  %24381 = vst [vmem:[#allocation189_spill] sm:$0xff] %v20134_v58  ;;  %v10324_v25 = vmul.f32 %v19740_v36, %v10061_v53  ;;  %v9544_v10 = vsub.f32 %v8762_v42, %v19582_v39  ;;  %v10062_v49 = vmax.f32 %v9806_v2, 0.0 }
 0x308   : > { %v3198_v52 = vpop.xlane.xlu1 %3197  ;;  %v20140_v12 = vrot.slane %v19584_v35, %v17868_v47  ;;  %v9549_v5 = vsub.f32 %v8782_v0, %v19564_v46  ;;  %v7560_v24 = vcombine.high %v19564_v46, %v19564_v46  ;;  %v10056_v58 = vmax.f32 %v9800_v55, 0.0 }
 0x309   : > { %v3290_v15 = vsub.f32 %v24382_v11, %v3198_v52  ;;  %10835 = vadd.xlane.f32.xlu0 %v19908_v4  ;;  %v8806_v53 = vrot.slane %v7632_v26, %v17897_v48  ;;  %v7557_v52 = vcombine.high %v20036_v59, %v20036_v59  ;;  %v9538_v4 = vsub.f32 %v8738_v44, %v18249_v20 }
 0x30a   : > { %v20152_v42 = vrot.slane %v20140_v12, %v17868_v47  ;;  %v8786_v2 = vrot.slane %v7607_v45, %v17897_v48  ;;  %v7654_v0 = vcombine.high %v7632_v26, %v7632_v26  ;;  %v20161_v38 = vsel %vm406_vm0, %v10318_v56, 0.0 }
 0x30b   : > { %v3323_v11 = vmul.f32 1.442695, %v3290_v15  ;;  %24383 = vst [vmem:[#allocation88_spill] sm:$0xff] %v20161_v38  ;;  %v20164_v55 = vsel %vm406_vm0, %v10330_v14, 0.0  ;;  %v9807_v9 = vadd.f32 %v19701_v27, %v9544_v10  ;;  %v7559_v19 = vcombine.high %v20080_v16, %v20080_v16 }
 0x30c   : > { %v20158_v54 = vpop.xlane.xlu1 %3206  ;;  %24384 = vst [vmem:[#allocation190_spill] sm:$0xff] %v20164_v55  ;;  %v10325_v59 = vmul.f32 %v19740_v36, %v10062_v49  ;;  %v8838_v20 = vrot.slane %v20152_v42, %v17897_v48  ;;  %v7574_v44 = vrot.slane %v7560_v24, %v17868_v47  ;;  %v20174_v15 = vsel %vm406_vm0, %v10324_v25, 0.0 }
 0x30d   : > { %16877 = vpow2.f32 %v3323_v11  ;;  %24385 = vst [vmem:[#allocation191_spill] sm:$0xff] %v20174_v15  ;;  %v9812_v26 = vadd.f32 %v19701_v27, %v9549_v5  ;;  %v9555_v14 = vsub.f32 %v8806_v53, %v19593_v21  ;;  %v8766_v56 = vrot.slane %v7557_v52, %v17897_v48  ;;  %v20183_v11 = vpop.xlane.xlu0 %3209 }
 0x30e   : > { %v10319_v45 = vmul.f32 %v19740_v36, %v10056_v58  ;;  %v9801_v16 = vadd.f32 %v19701_v27, %v9538_v4  ;;  %v9550_v10 = vsub.f32 %v8786_v2, %v19564_v46  ;;  %v8814_v49 = vrot.slane %v7654_v0, %v17897_v48  ;;  %v24386_v58 = vld [vmem:[#allocation85_spill] sm:$0xff] }
 0x30f   : > { %v10063_v25 = vmax.f32 %v9807_v9, 0.0  ;;  %v20188_v55 = vrot.slane %v7574_v44, %v17868_v47  ;;  %v8770_v5 = vrot.slane %v7559_v19, %v17897_v48  ;;  %v7624_v53 = vcombine.high %v20092_v30, %v20092_v30 }
 0x310   : > { %v20185_v24 = vpop.xlane.xlu1 %3212  ;;  %v3289_v52 = vsub.f32 %v24386_v58, %v20060_v43  ;;  %v20196_v4 = vsel %vm406_vm0, %v10325_v59, 0.0  ;;  %v9563_v2 = vsub.f32 %v8838_v20, %v19584_v35  ;;  %v7576_v0 = vcombine.high %v7574_v44, %v7574_v44 }
 0x311   : > { %24387 = vst [vmem:[#allocation85_spill] sm:$0xff] %v20196_v4  ;;  %v10068_v15 = vmax.f32 %v9812_v26, 0.0  ;;  %v9818_v9 = vadd.f32 %v19701_v27, %v9555_v14  ;;  %v9545_v38 = vsub.f32 %v8766_v56, %v19582_v39  ;;  %v8790_v19 = vrot.slane %v20188_v55, %v17897_v48 }
 0x312   : > { %v20204_v40 = vsel %vm406_vm0, %v10319_v45, 0.0  ;;  %v10057_v30 = vmax.f32 %v9801_v16, 0.0  ;;  %v9813_v43 = vadd.f32 %v19701_v27, %v9550_v10  ;;  %v9557_v59 = vsub.f32 %v8814_v49, %v19593_v21  ;;  %v24389_v45 = vld [vmem:[#allocation91_spill] sm:$0xff]  ;;  %v20221_v49 = vpop.xlane.xlu0 %3215 }
 0x313   : > { %24388 = vst [vmem:[#allocation192_spill] sm:$0xff] %v20204_v40  ;;  %v10326_v20 = vmul.f32 %v19740_v36, %v10063_v25  ;;  %v9546_v44 = vsub.f32 %v8770_v5, %v19582_v39  ;;  %v7646_v26 = vrot.slane %v7624_v53, %v17868_v47  ;;  %v7673_v14 = vcombine.high %v20140_v12, %v20140_v12 }
 0x314   : > { %v20208_v58 = vpop.xlane.xlu1 %3218  ;;  %v3321_v56 = vmul.f32 1.442695, %v3289_v52  ;;  %v3291_v40 = vsub.f32 %v24389_v45, %v20100_v31  ;;  %v9826_v16 = vadd.f32 %v19701_v27, %v9563_v2  ;;  %v20219_v10 = vrot.slane %v7576_v0, %v17868_v47 }
 0x315   : > { %v10331_v25 = vmul.f32 %v19740_v36, %v10068_v15  ;;  %v10074_v4 = vmax.f32 %v9818_v9, 0.0  ;;  %v9808_v39 = vadd.f32 %v19701_v27, %v9545_v38  ;;  %v9551_v5 = vsub.f32 %v8790_v19, %v19564_v46 }
 0x316   : > { %v10320_v12 = vmul.f32 %v19740_v36, %v10057_v30  ;;  %v9820_v31 = vadd.f32 %v19701_v27, %v9557_v59  ;;  %v8794_v52 = vrot.slane %v20219_v10, %v17897_v48  ;;  %v7609_v2 = vcombine.high %v19593_v21, %v19593_v21  ;;  %v20242_v8 = vpop.xlane.xlu0 %3245 }
 0x317   : > { %v20226_v53 = vpop.eup %16877  ;;  %v9809_v38 = vadd.f32 %v19701_v27, %v9546_v44  ;;  %v7656_v9 = vcombine.high %v7646_v26, %v7646_v26  ;;  %v20240_v19 = vrot.slane %v7673_v14, %v17868_v47  ;;  %16879 = vpow2.f32 %v3321_v56 }
 0x318   : > { %24390 = vst [vmem:[#allocation91_spill] sm:$0xff] %v20226_v53  ;;  %v20234_v0 = vpop.xlane.xlu1 %3224  ;;  %v3388_v15 = vsel %vm3192_vm2, %v20226_v53, 0.0  ;;  %v3325_v30 = vmul.f32 1.442695, %v3291_v40  ;;  %v10082_v59 = vmax.f32 %v9826_v16, 0.0  ;;  %v10069_v45 = vmax.f32 %v9813_v43, 0.0 }
 0x319   : > { %3389 = vadd.xlane.f32.xlu0 %v3388_v15  ;;  %v10064_v33 = vmax.f32 %v9808_v39, 0.0  ;;  %v9814_v17 = vadd.f32 %v19701_v27, %v9551_v5  ;;  %v8810_v22 = vrot.slane %v7646_v26, %v17897_v48  ;;  %v8842_v53 = vrot.slane %v20240_v19, %v17897_v48 }
 0x31a   : > { %v20249_v44 = vsel %vm406_vm0, %v10326_v20, 0.0  ;;  %v20252_v14 = vsel %vm406_vm0, %v10331_v25, 0.0  ;;  %v10076_v40 = vmax.f32 %v9820_v31, 0.0  ;;  %v9552_v56 = vsub.f32 %v8794_v52, %v19564_v46  ;;  %v24392_v20 = vld [vmem:[#allocation97_spill] sm:$0xff] }
 0x31b   : > { %24391 = vst [vmem:[#allocation193_spill] sm:$0xff] %v20252_v14  ;;  %v10337_v16 = vmul.f32 %v19740_v36, %v10074_v4  ;;  %v10065_v39 = vmax.f32 %v9809_v38, 0.0  ;;  %v8818_v5 = vrot.slane %v7656_v9, %v17897_v48  ;;  %v20260_v26 = vrot.slane %v7609_v2, %v17868_v47 }
 0x31c   : > { %v20255_v43 = vpop.xlane.xlu1 %3230  ;;  %16881 = vpow2.f32 %v3325_v30  ;;  %v3293_v15 = vsub.f32 %v24392_v20, %v20158_v54  ;;  %v10345_v25 = vmul.f32 %v19740_v36, %v10082_v59  ;;  %v10332_v31 = vmul.f32 %v19740_v36, %v10069_v45  ;;  %v24393_v30 = vld [vmem:[#allocation94_spill] sm:$0xff] }
 0x31d   : > { %10841 = vadd.xlane.f32.xlu0 %v19917_v60  ;;  %v10327_v4 = vmul.f32 %v19740_v36, %v10064_v33  ;;  %v10070_v38 = vmax.f32 %v9814_v17, 0.0  ;;  %v9556_v9 = vsub.f32 %v8810_v22, %v19593_v21  ;;  %v9564_v2 = vsub.f32 %v8842_v53, %v19584_v35  ;;  %v24394_v53 = vld [vmem:[#allocation103_spill] sm:$0xff] }
 0x31e   : > { %v20267_v52 = vpop.xlane.xlu0 %3251  ;;  %v3292_v14 = vsub.f32 %v24393_v30, %v20147_v23  ;;  %v20275_v54 = vsel %vm406_vm0, %v10320_v12, 0.0  ;;  %v10339_v60 = vmul.f32 %v19740_v36, %v10076_v40  ;;  %v9815_v59 = vadd.f32 %v19701_v27, %v9552_v56 }
 0x31f   : > { %v20282_v20 = vsel %vm406_vm0, %v10337_v16, 0.0  ;;  %v10328_v33 = vmul.f32 %v19740_v36, %v10065_v39  ;;  %v9558_v22 = vsub.f32 %v8818_v5, %v19593_v21  ;;  %v20288_v17 = vrot.slane %v20260_v26, %v17868_v47 }
 0x320   : > { %v20279_v45 = vpop.xlane.xlu1 %3236  ;;  %v3329_v23 = vmul.f32 1.442695, %v3293_v15  ;;  %v3295_v12 = vsub.f32 %v24394_v53, %v20185_v24  ;;  %v20294_v40 = vsel %vm406_vm0, %v10345_v25, 0.0  ;;  %v20297_v56 = vsel %vm406_vm0, %v10332_v31, 0.0 }
 0x321   : > { %10850 = vadd.xlane.f32.xlu0 %v19928_v50  ;;  %24395 = vst [vmem:[#allocation97_spill] sm:$0xff] %v20297_v56  ;;  %v20300_v16 = vsel %vm406_vm0, %v10327_v4, 0.0  ;;  %v10333_v39 = vmul.f32 %v19740_v36, %v10070_v38  ;;  %v9819_v5 = vadd.f32 %v19701_v27, %v9556_v9  ;;  %v9827_v15 = vadd.f32 %v19701_v27, %v9564_v2  ;;  %v20305_v30 = vpop.eup %16879  ;;  %v24397_v50 = vld [vmem:[#allocation100_spill] sm:$0xff] }
 0x322   : > { %24396 = vst [vmem:[#allocation94_spill] sm:$0xff] %v20305_v30  ;;  %v3327_v24 = vmul.f32 1.442695, %v3292_v14  ;;  %v3294_v53 = vsub.f32 %v24397_v50, %v20183_v11  ;;  %v20310_v25 = vsel %vm406_vm0, %v10339_v60, 0.0  ;;  %v10071_v31 = vmax.f32 %v9815_v59, 0.0  ;;  %v20312_v56 = vpop.xlane.xlu0 %3221  ;;  %v24401_v60 = vld [vmem:[#allocation109_spill] sm:$0xff] }
 0x323   : > { %24398 = vst [vmem:[#allocation103_spill] sm:$0xff] %v20310_v25  ;;  %v20317_v38 = vsel %vm406_vm0, %v10328_v33, 0.0  ;;  %v9821_v9 = vadd.f32 %v19701_v27, %v9558_v22  ;;  %v8822_v2 = vrot.slane %v20288_v17, %v17897_v48  ;;  %v7606_v14 = vcombine.high %v20188_v55, %v20188_v55 }
 0x324   : > { %v20314_v4 = vpop.xlane.xlu1 %10754  ;;  %24400 = vst [vmem:[#allocation194_spill] sm:$0xff] %v20317_v38  ;;  %16883 = vpow2.f32 %v3329_v23  ;;  %v3333_v11 = vmul.f32 1.442695, %v3295_v12  ;;  %v3297_v59 = vsub.f32 %v24401_v60, %v20208_v58  ;;  %v7625_v50 = vcombine.high %v20260_v26, %v20260_v26  ;;  %v24403_v23 = vld [vmem:[#allocation106_spill] sm:$0xff] }
 0x325   : > { %24399 = vst [vmem:[#allocation100_spill] sm:$0xff] %v20314_v4  ;;  %10853 = vadd.xlane.f32.xlu0 %v19936_v18  ;;  %v3385_v33 = vsel %vm3192_vm2, %v20305_v30, 0.0  ;;  %v10075_v22 = vmax.f32 %v9819_v5, 0.0  ;;  %v10083_v4 = vmax.f32 %v9827_v15, 0.0  ;;  %v7703_v38 = vcombine.high %v20152_v42, %v20152_v42 }
 0x326   : > { %v20333_v25 = vpop.eup %16881  ;;  %16885 = vpow2.f32 %v3327_v24  ;;  %v3331_v55 = vmul.f32 1.442695, %v3294_v53  ;;  %v3296_v58 = vsub.f32 %v24403_v23, %v20221_v49  ;;  %v10334_v18 = vmul.f32 %v19740_v36, %v10071_v31  ;;  %v24405_v24 = vld [vmem:[#allocation113_spill] sm:$0xff] }
 0x327   : > { %24402 = vst [vmem:[#allocation109_spill] sm:$0xff] %v20333_v25  ;;  %3386 = vadd.xlane.f32.xlu1 %v3385_v33  ;;  %v20341_v26 = vsel %vm406_vm0, %v10333_v39, 0.0  ;;  %v10077_v5 = vmax.f32 %v9821_v9, 0.0  ;;  %v9559_v15 = vsub.f32 %v8822_v2, %v19593_v21  ;;  %v8798_v42 = vrot.slane %v7606_v14, %v17897_v48  ;;  %v20351_v31 = vpop.xlane.xlu0 %3257 }
 0x328   : > { %v20338_v12 = vpop.xlane.xlu1 %10760  ;;  %16887 = vpow2.f32 %v3333_v11  ;;  %v3337_v60 = vmul.f32 1.442695, %v3297_v59  ;;  %v3299_v53 = vsub.f32 %v24405_v24, %v20234_v0  ;;  %v20349_v49 = vrot.slane %v7625_v50, %v17868_v47  ;;  %v24406_v0 = vld [vmem:[#allocation40_spill] sm:$0xff] }
 0x329   : > { %24404 = vst [vmem:[#allocation106_spill] sm:$0xff] %v20338_v12  ;;  %10874 = vadd.xlane.f32.xlu0 %v19939_v29  ;;  %v3391_v39 = vsel %vm3192_vm2, %v20333_v25, 0.0  ;;  %v10338_v9 = vmul.f32 %v19740_v36, %v10075_v22  ;;  %v10346_v2 = vmul.f32 %v19740_v36, %v10083_v4  ;;  %v8846_v14 = vrot.slane %v7703_v38, %v17897_v48 }
 0x32a   : > { %16889 = vpow2.f32 %v3331_v55  ;;  %v3335_v11 = vmul.f32 1.442695, %v3296_v58  ;;  %v3306_v59 = vsub.f32 %v24406_v0, %v20242_v8  ;;  %v20361_v29 = vsel %vm406_vm0, %v10334_v18, 0.0  ;;  %v24408_v55 = vld [vmem:[#allocation119_spill] sm:$0xff] }
 0x32b   : > { %3392 = vadd.xlane.f32.xlu1 %v3391_v39  ;;  %v10340_v33 = vmul.f32 %v19740_v36, %v10077_v5  ;;  %v9822_v23 = vadd.f32 %v19701_v27, %v9559_v15  ;;  %v9553_v22 = vsub.f32 %v8798_v42, %v19564_v46  ;;  %v7608_v4 = vcombine.high %v20219_v10, %v20219_v10  ;;  %v24410_v42 = vld [vmem:[#allocation9_spill] sm:$0xff] }
 0x32c   : > { %v20363_v50 = vpop.xlane.xlu1 %10766  ;;  %16891 = vpow2.f32 %v3337_v60  ;;  %v3341_v38 = vmul.f32 1.442695, %v3299_v53  ;;  %v3301_v8 = vsub.f32 %v24408_v55, %v20255_v43  ;;  %v8826_v58 = vrot.slane %v20349_v49, %v17897_v48 }
 0x32d   : > { %24407 = vst [vmem:[#allocation113_spill] sm:$0xff] %v20363_v50  ;;  %10877 = vadd.xlane.f32.xlu0 %v19953_v37  ;;  %v20378_v5 = vsel %vm406_vm0, %v10338_v9, 0.0  ;;  %v20381_v27 = vsel %vm406_vm0, %v10346_v2, 0.0  ;;  %v9565_v10 = vsub.f32 %v8846_v14, %v19584_v35  ;;  %v20386_v15 = vrot.slane %v19595_v6, %v17868_v47  ;;  %v20403_v2 = vld [vmem:[%s23953_s5] ss:$0 sm:$0xff] }
 0x32e   : > { %v20375_v18 = vpop.xlane.xlu0 %3263  ;;  %v20388_v43 = vpop.eup %16883  ;;  %16893 = vpow2.f32 %v3335_v11  ;;  %v3355_v37 = vmul.f32 1.442695, %v3306_v59  ;;  %v3308_v60 = vsub.f32 %v24410_v42, %v20267_v52  ;;  %v7705_v24 = vcombine.high %v20240_v19, %v20240_v19  ;;  %v24413_v19 = vld [vmem:[#allocation124_spill] sm:$0xff] }
 0x32f   : > { %24409 = vst [vmem:[#allocation40_spill] sm:$0xff] %v20388_v43  ;;  %10838 = vadd.xlane.f32.xlu1 %v19947_v7  ;;  %v20398_v39 = vsel %vm406_vm0, %v10340_v33, 0.0  ;;  %v10078_v9 = vmax.f32 %v9822_v23, 0.0  ;;  %v9816_v14 = vadd.f32 %v20403_v2, %v9553_v22  ;;  %v8802_v52 = vrot.slane %v7608_v4, %v17897_v48 }
 0x330   : > { %v20395_v53 = vpop.xlane.xlu1 %10772  ;;  %v20407_v11 = vpop.eup %16885  ;;  %16895 = vpow2.f32 %v3341_v38  ;;  %v3345_v7 = vmul.f32 1.442695, %v3301_v8  ;;  %v3303_v0 = vsub.f32 %v24413_v19, %v20279_v45  ;;  %v9560_v59 = vsub.f32 %v8826_v58, %v19593_v21 }
 0x331   : > { %24411 = vst [vmem:[#allocation119_spill] sm:$0xff] %v20395_v53  ;;  %24412 = vst [vmem:[#allocation9_spill] sm:$0xff] %v20407_v11  ;;  %10844 = vadd.xlane.f32.xlu0 %v19956_v51  ;;  %v3397_v33 = vsel %vm3192_vm2, %v20388_v43, 0.0  ;;  %v9828_v23 = vadd.f32 %v20403_v2, %v9565_v10  ;;  %v20418_v22 = vrot.slane %v20386_v15, %v17868_v47  ;;  %16897 = vpow2.f32 %v3355_v37  ;;  %v24415_v51 = vld [vmem:[#allocation112_spill] sm:$0xff] }
 0x332   : > { %v7658_v4 = vcombine.high %v19584_v35, %v19584_v35  ;;  %v20422_v38 = vpop.eup %16887  ;;  %v3359_v45 = vmul.f32 1.442695, %v3308_v60  ;;  %v3298_v55 = vsub.f32 %v24415_v51, %v20312_v56  ;;  %v8850_v8 = vrot.slane %v7705_v24, %v17897_v48  ;;  %v20427_v58 = vpop.xlane.xlu0 %3227 }
 0x333   : > { %24414 = vst [vmem:[#allocation124_spill] sm:$0xff] %v20422_v38  ;;  %3398 = vadd.xlane.f32.xlu1 %v3397_v33  ;;  %v3394_v42 = vsel %vm3192_vm2, %v20407_v11, 0.0  ;;  %v10341_v19 = vmul.f32 %v19740_v36, %v10078_v9  ;;  %v10072_v53 = vmax.f32 %v9816_v14, 0.0  ;;  %v9554_v50 = vsub.f32 %v8802_v52, %v19564_v46  ;;  %v24419_v52 = vld [vmem:[#allocation135_spill] sm:$0xff] }
 0x334   : > { %v20429_v10 = vpop.xlane.xlu1 %10778  ;;  %v20435_v37 = vpop.eup %16889  ;;  %16899 = vpow2.f32 %v3345_v7  ;;  %v3349_v60 = vmul.f32 1.442695, %v3303_v0  ;;  %v9823_v56 = vadd.f32 %v20403_v2, %v9560_v59  ;;  %v8902_v24 = vrot.slane %v20418_v22, %v17897_v48 }
 0x335   : > { %24416 = vst [vmem:[#allocation112_spill] sm:$0xff] %v20429_v10  ;;  %24417 = vst [vmem:[#allocation195_spill] sm:$0xff] %v20435_v37  ;;  %3395 = vadd.xlane.f32.xlu0 %v3394_v42  ;;  %v3403_v33 = vsel %vm3192_vm2, %v20422_v38, 0.0  ;;  %v10084_v51 = vmax.f32 %v9828_v23, 0.0  ;;  %v7655_v36 = vcombine.high %v20288_v17, %v20288_v17  ;;  %v7672_v9 = vrot.slane %v7658_v4, %v17868_v47  ;;  %v20460_v17 = vld [vmem:[%s23954_s6] ss:$0 sm:$0xff] }
 0x336   : > { %v20445_v46 = vpop.eup %16891  ;;  %16901 = vpow2.f32 %v3359_v45  ;;  %v3339_v14 = vmul.f32 1.442695, %v3298_v55  ;;  %v3310_v7 = vsub.f32 %v24419_v52, %v20351_v31  ;;  %v9566_v0 = vsub.f32 %v8850_v8, %v19584_v35 }
 0x337   : > { %24418 = vst [vmem:[#allocation196_spill] sm:$0xff] %v20445_v46  ;;  %3404 = vadd.xlane.f32.xlu1 %v3403_v33  ;;  %v3400_v23 = vsel %vm3192_vm2, %v20435_v37, 0.0  ;;  %v20455_v42 = vsel %vm406_vm0, %v10341_v19, 0.0  ;;  %v10335_v4 = vmul.f32 %v20460_v17, %v10072_v53  ;;  %v9817_v31 = vadd.f32 %v20403_v2, %v9554_v50  ;;  %v20469_v33 = vpop.xlane.xlu0 %3269 }
 0x338   : > { %v20450_v59 = vpop.xlane.xlu1 %10784  ;;  %v20464_v45 = vpop.eup %16893  ;;  %16903 = vpow2.f32 %v3349_v60  ;;  %v10079_v55 = vmax.f32 %v9823_v56, 0.0  ;;  %v9579_v8 = vsub.f32 %v8902_v24, %v19595_v6  ;;  %v7657_v19 = vcombine.high %v20349_v49, %v20349_v49  ;;  %v24423_v56 = vld [vmem:[#allocation141_spill] sm:$0xff] }
 0x339   : > { %24420 = vst [vmem:[#allocation135_spill] sm:$0xff] %v20450_v59  ;;  %24421 = vst [vmem:[#allocation197_spill] sm:$0xff] %v20464_v45  ;;  %3401 = vadd.xlane.f32.xlu0 %v3400_v23  ;;  %v3409_v52 = vsel %vm3192_vm2, %v20445_v46, 0.0  ;;  %v10347_v59 = vmul.f32 %v20460_v17, %v10084_v51  ;;  %v8830_v53 = vrot.slane %v7655_v36, %v17897_v48  ;;  %16905 = vpow2.f32 %v3339_v14 }
 0x33a   : > { %v7674_v50 = vcombine.high %v7672_v9, %v7672_v9  ;;  %v20475_v10 = vpop.eup %16895  ;;  %v3363_v60 = vmul.f32 1.442695, %v3310_v7  ;;  %v3312_v24 = vsub.f32 %v24423_v56, %v20375_v18  ;;  %v7771_v49 = vcombine.high %v20386_v15, %v20386_v15 }
 0x33b   : > { %24422 = vst [vmem:[#allocation198_spill] sm:$0xff] %v20475_v10  ;;  %3410 = vadd.xlane.f32.xlu1 %v3409_v52  ;;  %v3406_v12 = vsel %vm3192_vm2, %v20464_v45, 0.0  ;;  %v20486_v51 = vsel %vm406_vm0, %v10335_v4, 0.0  ;;  %v9829_v36 = vadd.f32 %v20403_v2, %v9566_v0  ;;  %v7688_v14 = vrot.slane %v7672_v9, %v17868_v47  ;;  %v20490_v7 = vpop.eup %16897 }
 0x33c   : > { %v20481_v23 = vpop.xlane.xlu1 %10790  ;;  %24425 = vst [vmem:[#allocation199_spill] sm:$0xff] %v20490_v7  ;;  %v10342_v18 = vmul.f32 %v20460_v17, %v10079_v55  ;;  %v10073_v52 = vmax.f32 %v9817_v31, 0.0  ;;  %v9842_v15 = vadd.f32 %v20403_v2, %v9579_v8  ;;  %v8834_v56 = vrot.slane %v7657_v19, %v17897_v48  ;;  %v24427_v31 = vld [vmem:[#allocation116_spill] sm:$0xff] }
 0x33d   : > { %24424 = vst [vmem:[#allocation141_spill] sm:$0xff] %v20481_v23  ;;  %3407 = vadd.xlane.f32.xlu0 %v3406_v12  ;;  %v3415_v4 = vsel %vm3192_vm2, %v20475_v10, 0.0  ;;  %v9561_v45 = vsub.f32 %v8830_v53, %v19593_v21  ;;  %v8854_v0 = vrot.slane %v7688_v14, %v17897_v48  ;;  %v7702_v9 = vrot.slane %v7674_v50, %v17868_v47 }
 0x33e   : > { %v20495_v23 = vpop.xlane.xlu0 %3275  ;;  %v20502_v46 = vpop.eup %16899  ;;  %16907 = vpow2.f32 %v3363_v60  ;;  %v3367_v12 = vmul.f32 1.442695, %v3312_v24  ;;  %v3300_v55 = vsub.f32 %v24427_v31, %v20427_v58  ;;  %v20507_v8 = vrot.slane %v7771_v49, %v17868_v47 }
 0x33f   : > { %24426 = vst [vmem:[#allocation200_spill] sm:$0xff] %v20502_v46  ;;  %3416 = vadd.xlane.f32.xlu1 %v3415_v4  ;;  %v3436_v53 = vsel %vm3192_vm2, %v20490_v7, 0.0  ;;  %v20514_v10 = vsel %vm406_vm0, %v10347_v59, 0.0  ;;  %v10085_v50 = vmax.f32 %v9829_v36, 0.0  ;;  %v7704_v37 = vcombine.high %v7688_v14, %v7688_v14 }
 0x340   : > { %v20509_v19 = vpop.xlane.xlu1 %10796  ;;  %v20516_v38 = vpop.eup %16901  ;;  %v20519_v60 = vsel %vm406_vm0, %v10342_v18, 0.0  ;;  %v10336_v58 = vmul.f32 %v20460_v17, %v10073_v52  ;;  %v8858_v24 = vrot.slane %v7702_v9, %v17897_v48  ;;  %v9562_v49 = vsub.f32 %v8834_v56, %v19593_v21  ;;  %v24431_v18 = vld [vmem:[#allocation147_spill] sm:$0xff] }
 0x341   : > { %24428 = vst [vmem:[#allocation116_spill] sm:$0xff] %v20509_v19  ;;  %24429 = vst [vmem:[#allocation201_spill] sm:$0xff] %v20516_v38  ;;  %3437 = vadd.xlane.f32.xlu0 %v3436_v53  ;;  %v3421_v4 = vsel %vm3192_vm2, %v20502_v46, 0.0  ;;  %v10098_v31 = vmax.f32 %v9842_v15, 0.0  ;;  %v9824_v59 = vadd.f32 %v20403_v2, %v9561_v45  ;;  %v9567_v36 = vsub.f32 %v8854_v0, %v19584_v35 }
 0x342   : > { %v20528_v14 = vpop.eup %16903  ;;  %16909 = vpow2.f32 %v3367_v12  ;;  %v3343_v53 = vmul.f32 1.442695, %v3300_v55  ;;  %v3314_v19 = vsub.f32 %v24431_v18, %v20469_v33  ;;  %v8906_v52 = vrot.slane %v20507_v8, %v17897_v48  ;;  %v3234_v21 = vpop.xlane.xlu0 %3233 }
 0x343   : > { %24430 = vst [vmem:[#allocation202_spill] sm:$0xff] %v20528_v14  ;;  %3422 = vadd.xlane.f32.xlu1 %v3421_v4  ;;  %v3442_v15 = vsel %vm3192_vm2, %v20516_v38, 0.0  ;;  %v10348_v45 = vmul.f32 %v20460_v17, %v10085_v50  ;;  %v8862_v0 = vrot.slane %v7704_v37, %v17897_v48  ;;  %v7801_v12 = vcombine.high %v20418_v22, %v20418_v22  ;;  %v20542_v55 = vpop.eup %16905 }
 0x344   : > { %v20534_v56 = vpop.xlane.xlu1 %10802  ;;  %24432 = vst [vmem:[#allocation147_spill] sm:$0xff] %v20542_v55  ;;  %v9568_v33 = vsub.f32 %v8858_v24, %v19584_v35  ;;  %v9825_v4 = vadd.f32 %v20403_v2, %v9562_v49  ;;  %v7706_v18 = vcombine.high %v7702_v9, %v7702_v9  ;;  %v20548_v7 = vrot.slane %v19597_v57, %v17868_v47  ;;  %v24433_v24 = vld [vmem:[#allocation12_spill] sm:$0xff] }
 0x345   : > { %3443 = vadd.xlane.f32.xlu0 %v3442_v15  ;;  %v3427_v50 = vsel %vm3192_vm2, %v20528_v14, 0.0  ;;  %v20553_v37 = vsel %vm406_vm0, %v10336_v58, 0.0  ;;  %v10080_v38 = vmax.f32 %v9824_v59, 0.0  ;;  %v9830_v22 = vadd.f32 %v20403_v2, %v9567_v36 }
 0x346   : > { %16911 = vpow2.f32 %v3343_v53  ;;  %v3371_v15 = vmul.f32 1.442695, %v3314_v19  ;;  %v3316_v46 = vsub.f32 %v24433_v24, %v20495_v23  ;;  %v9580_v9 = vsub.f32 %v8906_v52, %v19595_v6 }
 0x347   : > { %3428 = vadd.xlane.f32.xlu1 %v3427_v50  ;;  %v3412_v11 = vsel %vm3192_vm2, %v20542_v55, 0.0  ;;  %v10361_v14 = vmul.f32 %v20460_v17, %v10098_v31  ;;  %v9569_v58 = vsub.f32 %v8862_v0, %v19584_v35  ;;  %v8910_v59 = vrot.slane %v7801_v12, %v17897_v48  ;;  %v3282_v50 = vpop.xlane.xlu0 %3281 }
 0x348   : > { %v20559_v49 = vpop.xlane.xlu1 %10808  ;;  %v20566_v36 = vpop.eup %16907  ;;  %v9831_v19 = vadd.f32 %v20403_v2, %v9568_v33  ;;  %v10081_v23 = vmax.f32 %v9825_v4, 0.0  ;;  %v8866_v53 = vrot.slane %v7706_v18, %v17897_v48  ;;  %v20572_v52 = vrot.slane %v20548_v7, %v17868_v47 }
 0x349   : > { %24434 = vst [vmem:[#allocation12_spill] sm:$0xff] %v20566_v36  ;;  %3413 = vadd.xlane.f32.xlu0 %v3412_v11  ;;  %v20575_v24 = vsel %vm406_vm0, %v10348_v45, 0.0  ;;  %v10343_v31 = vmul.f32 %v20460_v17, %v10080_v38  ;;  %v10086_v0 = vmax.f32 %v9830_v22, 0.0  ;;  %v7803_v12 = vcombine.high %v20507_v8, %v20507_v8 }
 0x34a   : > { %16913 = vpow2.f32 %v3371_v15  ;;  %v3375_v11 = vmul.f32 1.442695, %v3316_v46  ;;  %v3302_v33 = vsub.f32 %v19326_v13, %v3234_v21  ;;  %v9843_v4 = vadd.f32 %v20403_v2, %v9580_v9 }
 0x34b   : > { %10859 = vadd.xlane.f32.xlu1 %v19976_v3  ;;  %v3448_v45 = vsel %vm3192_vm2, %v20566_v36, 0.0  ;;  %v20588_v55 = vsel %vm406_vm0, %v10361_v14, 0.0  ;;  %v9832_v38 = vadd.f32 %v20403_v2, %v9569_v58  ;;  %v9581_v8 = vsub.f32 %v8910_v59, %v19595_v6 }
 0x34c   : > { %v20583_v18 = vpop.xlane.xlu1 %10814  ;;  %v20592_v22 = vpop.eup %16909  ;;  %v10087_v13 = vmax.f32 %v9831_v19, 0.0  ;;  %v10344_v3 = vmul.f32 %v20460_v17, %v10081_v23  ;;  %v9570_v46 = vsub.f32 %v8866_v53, %v19584_v35  ;;  %v8966_v21 = vrot.slane %v20572_v52, %v17897_v48 }
 0x34d   : > { %24435 = vst [vmem:[#allocation203_spill] sm:$0xff] %v20592_v22  ;;  %3449 = vadd.xlane.f32.xlu0 %v3448_v45  ;;  %v20599_v9 = vsel %vm406_vm0, %v10343_v31, 0.0  ;;  %v10349_v14 = vmul.f32 %v20460_v17, %v10086_v0  ;;  %v8914_v58 = vrot.slane %v7803_v12, %v17897_v48  ;;  %v7756_v59 = vcombine.high %v19595_v6, %v19595_v6 }
 0x34e   : > { %v3288_v15 = vpop.xlane.xlu0 %3287  ;;  %16915 = vpow2.f32 %v3375_v11  ;;  %v3347_v19 = vmul.f32 1.442695, %v3302_v33  ;;  %v3318_v23 = vsub.f32 %v19599_v41, %v3282_v50  ;;  %v10099_v35 = vmax.f32 %v9843_v4, 0.0 }
 0x34f   : > { %10862 = vadd.xlane.f32.xlu1 %v20007_v61  ;;  %v3454_v31 = vsel %vm3192_vm2, %v20592_v22, 0.0  ;;  %v10088_v45 = vmax.f32 %v9832_v38, 0.0  ;;  %v9844_v0 = vadd.f32 %v20403_v2, %v9581_v8  ;;  %v7869_v12 = vcombine.high %v20548_v7, %v20548_v7 }
 0x350   : > { %v20607_v53 = vpop.xlane.xlu1 %10820  ;;  %v20614_v36 = vpop.eup %16911  ;;  %v10350_v11 = vmul.f32 %v20460_v17, %v10087_v13  ;;  %v20618_v41 = vsel %vm406_vm0, %v10344_v3, 0.0  ;;  %v9833_v61 = vadd.f32 %v20403_v2, %v9570_v46  ;;  %v9595_v50 = vsub.f32 %v8966_v21, %v19597_v57 }
 0x351   : > { %24436 = vst [vmem:[#allocation204_spill] sm:$0xff] %v20614_v36  ;;  %3455 = vadd.xlane.f32.xlu0 %v3454_v31  ;;  %24437 = vst [vmem:[#allocation205_spill] sm:$0xff] %v20618_v41  ;;  %v20623_v4 = vsel %vm406_vm0, %v10349_v14, 0.0  ;;  %v9582_v38 = vsub.f32 %v8914_v58, %v19595_v6  ;;  %v7770_v7 = vrot.slane %v7756_v59, %v17868_v47  ;;  %16917 = vpow2.f32 %v3347_v19 }
 0x352   : > { %v3240_v33 = vpop.xlane.xlu0 %3239  ;;  %24438 = vst [vmem:[#allocation206_spill] sm:$0xff] %v20623_v4  ;;  %v7899_v8 = vcombine.high %v20572_v52, %v20572_v52  ;;  %v3379_v13 = vmul.f32 1.442695, %v3318_v23  ;;  %v3320_v3 = vsub.f32 %v19653_v28, %v3288_v15  ;;  %v10362_v46 = vmul.f32 %v20460_v17, %v10099_v35 }
 0x353   : > { %10865 = vadd.xlane.f32.xlu1 %v20063_v63  ;;  %v3418_v14 = vsel %vm3192_vm2, %v20614_v36, 0.0  ;;  %v10351_v31 = vmul.f32 %v20460_v17, %v10088_v45  ;;  %v10100_v58 = vmax.f32 %v9844_v0, 0.0  ;;  %v20636_v59 = vrot.slane %v7869_v12, %v17868_v47 }
 0x354   : > { %v3243_v21 = vpop.xlane.xlu1 %3242  ;;  %v20638_v22 = vpop.eup %16913  ;;  %v20642_v28 = vsel %vm406_vm0, %v10350_v11, 0.0  ;;  %v10089_v63 = vmax.f32 %v9833_v61, 0.0  ;;  %v9858_v15 = vadd.f32 %v20403_v2, %v9595_v50  ;;  %v9845_v23 = vadd.f32 %v20403_v2, %v9582_v38 }
 0x355   : > { %24439 = vst [vmem:[#allocation207_spill] sm:$0xff] %v20638_v22  ;;  %v3305_v52 = vsub.f32 %v19377_v62, %v3243_v21  ;;  %3419 = vadd.xlane.f32.xlu0 %v3418_v14  ;;  %24440 = vst [vmem:[#allocation208_spill] sm:$0xff] %v20642_v28  ;;  %v7786_v35 = vrot.slane %v7770_v7, %v17868_v47  ;;  %v7772_v45 = vcombine.high %v7770_v7, %v7770_v7 }
 0x356   : > { %v20645_v19 = vpop.xlane.xlu0 %10751  ;;  %v8974_v0 = vrot.slane %v7899_v8, %v17897_v48  ;;  %16919 = vpow2.f32 %v3379_v13  ;;  %v3383_v12 = vmul.f32 1.442695, %v3320_v3  ;;  %v3304_v62 = vsub.f32 %v19356_v32, %v3240_v33  ;;  %v24445_v33 = vld [vmem:[#allocation47_spill] sm:$0xff] }
 0x357   : > { %24441 = vst [vmem:[#allocation209_spill] sm:$0xff] %v20645_v19  ;;  %v3353_v21 = vmul.f32 1.442695, %v3305_v52  ;;  %10898 = vadd.xlane.f32.xlu1 %v20028_v1  ;;  %v3460_v61 = vsel %vm3192_vm2, %v20638_v22, 0.0  ;;  %v20655_v50 = vsel %vm406_vm0, %v10362_v46, 0.0  ;;  %v20658_v38 = vsel %vm406_vm0, %v10351_v31, 0.0 }
 0x358   : > { %v3249_v11 = vpop.xlane.xlu1 %3248  ;;  %24442 = vst [vmem:[#allocation210_spill] sm:$0xff] %v20655_v50  ;;  %24443 = vst [vmem:[#allocation211_spill] sm:$0xff] %v20658_v38  ;;  %v8970_v7 = vrot.slane %v20636_v59, %v17897_v48  ;;  %v20662_v8 = vpop.eup %16915  ;;  %v10363_v1 = vmul.f32 %v20460_v17, %v10100_v58  ;;  %v20668_v13 = vrot.slane %v24445_v33, %v17868_v47  ;;  %v10114_v46 = vmax.f32 %v9858_v15, 0.0  ;;  %v24447_v19 = vld [vmem:[#allocation179_spill] sm:$0xff] }
 0x359   : > { %24444 = vst [vmem:[#allocation212_spill] sm:$0xff] %v20662_v8  ;;  %16921 = vpow2.f32 %v3353_v21  ;;  %v3307_v32 = vsub.f32 %v19394_v34, %v3249_v11  ;;  %3461 = vadd.xlane.f32.xlu0 %v3460_v61  ;;  %v10101_v14 = vmax.f32 %v9845_v23, 0.0  ;;  %v8918_v31 = vrot.slane %v7786_v35, %v17897_v48 }
 0x35a   : > { %v20670_v3 = vpop.xlane.xlu0 %10757  ;;  %v9597_v52 = vsub.f32 %v8974_v0, %v19597_v57  ;;  %16923 = vpow2.f32 %v3383_v12  ;;  %v3351_v22 = vmul.f32 1.442695, %v3304_v62  ;;  %v7800_v34 = vrot.slane %v7772_v45, %v17868_v47  ;;  %v24449_v0 = vld [vmem:[#allocation131_spill] sm:$0xff] }
 0x35b   : > { %24446 = vst [vmem:[#allocation47_spill] sm:$0xff] %v20670_v3  ;;  %v3357_v21 = vmul.f32 1.442695, %v3307_v32  ;;  %10922 = vadd.xlane.f32.xlu1 %v24447_v19  ;;  %v3466_v11 = vsel %vm3192_vm2, %v20662_v8, 0.0  ;;  %v10352_v61 = vmul.f32 %v20460_v17, %v10089_v63  ;;  %v9596_v15 = vsub.f32 %v8970_v7, %v19597_v57  ;;  %v20680_v36 = vpop.eup %16917 }
 0x35c   : > { %v3255_v58 = vpop.xlane.xlu1 %3254  ;;  %v7802_v23 = vcombine.high %v7786_v35, %v7786_v35  ;;  %24448 = vst [vmem:[#allocation179_spill] sm:$0xff] %v20680_v36  ;;  %v20685_v19 = vrot.slane %v20668_v13, %v17868_v47  ;;  %v7854_v45 = vcombine.high %v19597_v57, %v19597_v57  ;;  %v10377_v63 = vmul.f32 %v20460_v17, %v10114_v46 }
 0x35d   : > { %16925 = vpow2.f32 %v3357_v21  ;;  %v3309_v12 = vsub.f32 %v24449_v0, %v3255_v58  ;;  %3467 = vadd.xlane.f32.xlu0 %v3466_v11  ;;  %v10364_v7 = vmul.f32 %v20460_v17, %v10101_v14  ;;  %v9583_v35 = vsub.f32 %v8918_v31, %v19595_v6  ;;  %v24451_v58 = vld [vmem:[#allocation39_spill] sm:$0xff] }
 0x35e   : > { %v20689_v62 = vpop.xlane.xlu0 %10763  ;;  %v9860_v32 = vadd.f32 %v20403_v2, %v9597_v52  ;;  %16927 = vpow2.f32 %v3351_v22  ;;  %v8922_v11 = vrot.slane %v7800_v34, %v17897_v48  ;;  %v7804_v0 = vcombine.high %v7800_v34, %v7800_v34  ;;  %v24454_v22 = vld [vmem:[#allocation134_spill] sm:$0xff] }
 0x35f   : > { %24450 = vst [vmem:[#allocation131_spill] sm:$0xff] %v20689_v62  ;;  %v3361_v21 = vmul.f32 1.442695, %v3309_v12  ;;  %10868 = vadd.xlane.f32.xlu1 %v24451_v58  ;;  %v3424_v3 = vsel %vm3192_vm2, %v20680_v36, 0.0  ;;  %v20700_v62 = vsel %vm406_vm0, %v10363_v1, 0.0  ;;  %v9859_v46 = vadd.f32 %v20403_v2, %v9596_v15 }
 0x360   : > { %v3261_v8 = vpop.xlane.xlu1 %3260  ;;  %24452 = vst [vmem:[#allocation39_spill] sm:$0xff] %v20700_v62  ;;  %v8926_v14 = vrot.slane %v7802_v23, %v17897_v48  ;;  %v20704_v31 = vpop.eup %16919  ;;  %v20708_v12 = vsel %vm406_vm0, %v10352_v61, 0.0  ;;  %v7868_v34 = vrot.slane %v7854_v45, %v17868_v47  ;;  %v20714_v1 = vsel %vm406_vm0, %v10377_v63, 0.0 }
 0x361   : > { %24453 = vst [vmem:[#allocation213_spill] sm:$0xff] %v20704_v31  ;;  %16929 = vpow2.f32 %v3361_v21  ;;  %v3311_v52 = vsub.f32 %v24454_v22, %v3261_v8  ;;  %3425 = vadd.xlane.f32.xlu0 %v3424_v3  ;;  %24455 = vst [vmem:[#allocation134_spill] sm:$0xff] %v20708_v12  ;;  %v20717_v15 = vsel %vm406_vm0, %v10364_v7, 0.0  ;;  %v9846_v23 = vadd.f32 %v20403_v2, %v9583_v35 }
 0x362   : > { %v20711_v58 = vpop.xlane.xlu0 %10769  ;;  %24457 = vst [vmem:[#allocation215_spill] sm:$0xff] %v20714_v1  ;;  %24458 = vst [vmem:[#allocation216_spill] sm:$0xff] %v20717_v15  ;;  %v9030_v21 = vrot.slane %v20685_v19, %v17897_v48  ;;  %v9584_v61 = vsub.f32 %v8922_v11, %v19595_v6  ;;  %v10116_v22 = vmax.f32 %v9860_v32, 0.0  ;;  %v8930_v45 = vrot.slane %v7804_v0, %v17897_v48  ;;  %v24461_v15 = vld [vmem:[#allocation140_spill] sm:$0xff] }
 0x363   : > { %24456 = vst [vmem:[#allocation214_spill] sm:$0xff] %v20711_v58  ;;  %v20722_v8 = vpop.eup %16921  ;;  %v3365_v3 = vmul.f32 1.442695, %v3311_v52  ;;  %v3472_v7 = vsel %vm3192_vm2, %v20704_v31, 0.0  ;;  %v10115_v1 = vmax.f32 %v9859_v46, 0.0  ;;  %v9585_v35 = vsub.f32 %v8926_v14, %v19595_v6 }
 0x364   : > { %24459 = vst [vmem:[#allocation217_spill] sm:$0xff] %v20722_v8  ;;  %v3267_v36 = vpop.xlane.xlu1 %3266  ;;  %v3433_v63 = vsel %vm3192_vm2, %v20722_v8, 0.0  ;;  %v20731_v58 = vpop.eup %16923  ;;  %v7884_v32 = vrot.slane %v7868_v34, %v17868_v47  ;;  %v7967_v11 = vcombine.high %v20668_v13, %v20668_v13  ;;  %v10102_v8 = vmax.f32 %v9846_v23, 0.0 }
 0x365   : > { %24460 = vst [vmem:[#allocation218_spill] sm:$0xff] %v20731_v58  ;;  %16931 = vpow2.f32 %v3365_v3  ;;  %v3313_v52 = vsub.f32 %v24461_v15, %v3267_v36  ;;  %3434 = vadd.xlane.f32.xlu1 %v3433_v63  ;;  %3473 = vadd.xlane.f32.xlu0 %v3472_v7  ;;  %v9611_v31 = vsub.f32 %v9030_v21, %v24445_v33  ;;  %v3478_v21 = vsel %vm3192_vm2, %v20731_v58, 0.0 }
 0x366   : > { %v20737_v0 = vpop.xlane.xlu0 %10775  ;;  %v7901_v46 = vcombine.high %v20636_v59, %v20636_v59  ;;  %v7870_v14 = vcombine.high %v7868_v34, %v7868_v34  ;;  %v9847_v36 = vadd.f32 %v20403_v2, %v9584_v61  ;;  %v20746_v15 = vmul.f32 %v20460_v17, %v10116_v22  ;;  %v24465_v61 = vld [vmem:[#allocation146_spill] sm:$0xff] }
 0x367   : > { %24462 = vst [vmem:[#allocation140_spill] sm:$0xff] %v20737_v0  ;;  %v20742_v12 = vpop.eup %16925  ;;  %v3369_v3 = vmul.f32 1.442695, %v3313_v52  ;;  %v9586_v63 = vsub.f32 %v8930_v45, %v19595_v6  ;;  %v20754_v59 = vmul.f32 %v20460_v17, %v10115_v1  ;;  %v9848_v34 = vadd.f32 %v20403_v2, %v9585_v35 }
 0x368   : > { %24463 = vst [vmem:[#allocation219_spill] sm:$0xff] %v20742_v12  ;;  %v3273_v13 = vpop.xlane.xlu1 %3272  ;;  %v3439_v23 = vsel %vm3192_vm2, %v20742_v12, 0.0  ;;  %v20757_v7 = vpop.eup %16927  ;;  %v20761_v6 = vrot.slane %v7967_v11, %v17868_v47  ;;  %v7900_v45 = vcombine.high %v7884_v32, %v7884_v32  ;;  %v20766_v58 = vmul.f32 %v20460_v17, %v10102_v8 }
 0x369   : > { %24464 = vst [vmem:[#allocation220_spill] sm:$0xff] %v20757_v7  ;;  %16933 = vpow2.f32 %v3369_v3  ;;  %v3315_v22 = vsub.f32 %v24465_v61, %v3273_v13  ;;  %3440 = vadd.xlane.f32.xlu1 %v3439_v23  ;;  %3479 = vadd.xlane.f32.xlu0 %v3478_v21  ;;  %v9874_v1 = vadd.f32 %v20403_v2, %v9611_v31  ;;  %v10103_v23 = vmax.f32 %v9847_v36, 0.0 }
 0x36a   : > { %v20763_v52 = vpop.xlane.xlu0 %10781  ;;  %v8978_v35 = vrot.slane %v7901_v46, %v17897_v48  ;;  %v7898_v12 = vrot.slane %v7870_v14, %v17868_v47  ;;  %v20774_v21 = vadd.f32 %v20403_v2, %v9586_v63  ;;  %v8982_v11 = vrot.slane %v7884_v32, %v17897_v48  ;;  %v24468_v14 = vld [vmem:[#allocation11_spill] sm:$0xff] }
 0x36b   : > { %24466 = vst [vmem:[#allocation146_spill] sm:$0xff] %v20763_v52  ;;  %v20771_v3 = vpop.eup %16929  ;;  %v3373_v13 = vmul.f32 1.442695, %v3315_v22  ;;  %v3430_v31 = vsel %vm3192_vm2, %v20757_v7, 0.0  ;;  %v10104_v52 = vmax.f32 %v9848_v34, 0.0  ;;  %v7997_v46 = vcombine.high %v20685_v19, %v20685_v19  ;;  %v24470_v34 = vld [vmem:[#allocation53_spill] sm:$0xff] }
 0x36c   : > { %24467 = vst [vmem:[#allocation221_spill] sm:$0xff] %v20771_v3  ;;  %v3279_v61 = vpop.xlane.xlu1 %3278  ;;  %v3445_v8 = vsel %vm3192_vm2, %v20771_v3, 0.0  ;;  %v9034_v36 = vrot.slane %v20761_v6, %v17897_v48  ;;  %v8990_v32 = vrot.slane %v7900_v45, %v17897_v48  ;;  %v10130_v3 = vmax.f32 %v9874_v1, 0.0 }
 0x36d   : > { %16935 = vpow2.f32 %v3373_v13  ;;  %v3317_v22 = vsub.f32 %v24468_v14, %v3279_v61  ;;  %3446 = vadd.xlane.f32.xlu1 %v3445_v8  ;;  %3431 = vadd.xlane.f32.xlu0 %v3430_v31  ;;  %v9598_v0 = vsub.f32 %v8978_v35, %v19597_v57  ;;  %v7902_v7 = vcombine.high %v7898_v12, %v7898_v12 }
 0x36e   : > { %v20787_v63 = vpop.xlane.xlu0 %10787  ;;  %v8057_v62 = vrot.slane %v24470_v34, %v17868_v47  ;;  %v20795_v61 = vmul.f32 %v20460_v17, %v10103_v23  ;;  %v9599_v8 = vsub.f32 %v8982_v11, %v19597_v57  ;;  %v7952_v45 = vcombine.high %v24445_v33, %v24445_v33  ;;  %v24473_v23 = vld [vmem:[#allocation180_spill] sm:$0xff] }
 0x36f   : > { %24469 = vst [vmem:[#allocation11_spill] sm:$0xff] %v20787_v63  ;;  %v20792_v19 = vpop.eup %16931  ;;  %v3377_v13 = vmul.f32 1.442695, %v3317_v22  ;;  %v10105_v35 = vmax.f32 %v20774_v21, 0.0  ;;  %v8986_v14 = vrot.slane %v7898_v12, %v17897_v48  ;;  %v9038_v63 = vrot.slane %v7997_v46, %v17897_v48  ;;  %v24472_v22 = vld [vmem:[#allocation16_spill] sm:$0xff] }
 0x370   : > { %24471 = vst [vmem:[#allocation53_spill] sm:$0xff] %v20792_v19  ;;  %v3285_v31 = vpop.xlane.xlu1 %3284  ;;  %v3451_v1 = vsel %vm3192_vm2, %v20792_v19, 0.0  ;;  %v9612_v11 = vsub.f32 %v9034_v36, %v24445_v33  ;;  %v9601_v43 = vsub.f32 %v8990_v32, %v19597_v57  ;;  %v20812_v19 = vmul.f32 %v20460_v17, %v10104_v52 }
 0x371   : > { %16937 = vpow2.f32 %v3377_v13  ;;  %v3319_v38 = vsub.f32 %v24472_v22, %v3285_v31  ;;  %3452 = vadd.xlane.f32.xlu1 %v3451_v1  ;;  %10856 = vadd.xlane.f32.xlu0 %v24473_v23  ;;  %v9861_v21 = vadd.f32 %v20403_v2, %v9598_v0  ;;  %v8994_v12 = vrot.slane %v7902_v7, %v17897_v48 }
 0x372   : > { %v20809_v50 = vpop.xlane.xlu0 %10793  ;;  %v8073_v46 = vrot.slane %v8057_v62, %v17868_v47  ;;  %v9862_v1 = vadd.f32 %v20403_v2, %v9599_v8  ;;  %v7966_v36 = vrot.slane %v7952_v45, %v17868_v47  ;;  %v8065_v22 = vcombine.high %v8057_v62, %v8057_v62 }
 0x373   : > { %24474 = vst [vmem:[#allocation16_spill] sm:$0xff] %v20809_v50  ;;  %v20817_v13 = vpop.eup %16933  ;;  %v3381_v31 = vmul.f32 1.442695, %v3319_v38  ;;  %v20826_v23 = vmul.f32 %v20460_v17, %v10130_v3  ;;  %v9600_v0 = vsub.f32 %v8986_v14, %v19597_v57  ;;  %v8050_v7 = vcombine.high %v24470_v34, %v24470_v34  ;;  %v24477_v38 = vld [vmem:[#allocation182_spill] sm:$0xff] }
 0x374   : > { %24475 = vst [vmem:[#allocation180_spill] sm:$0xff] %v20817_v13  ;;  %v20821_v32 = vpop.permute.xlu1 %6228  ;;  %v3457_v52 = vsel %vm3192_vm2, %v20817_v13, 0.0  ;;  %v9875_v8 = vadd.f32 %v20403_v2, %v9612_v11  ;;  %v9864_v62 = vadd.f32 %v20403_v2, %v9601_v43  ;;  %v9613_v45 = vsub.f32 %v9038_v63, %v24445_v33 }
 0x375   : > { %24476 = vst [vmem:[#allocation222_spill] sm:$0xff] %v20826_v23  ;;  %16939 = vpow2.f32 %v3381_v31  ;;  %3458 = vadd.xlane.f32.xlu1 %v3457_v52  ;;  %10880 = vadd.xlane.f32.xlu0 %v24477_v38  ;;  %v10117_v13 = vmax.f32 %v9861_v21, 0.0  ;;  %v9602_v3 = vsub.f32 %v8994_v12, %v19597_v57  ;;  %v7999_v14 = vcombine.high %v20761_v6, %v20761_v6  ;;  %v24481_v12 = vld [vmem:[#allocation184_spill] sm:$0xff] }
 0x376   : > { %v20835_v50 = vpop.xlane.xlu0 %10799  ;;  %v8095_v23 = vcombine.high %v8073_v46, %v8073_v46  ;;  %v10118_v31 = vmax.f32 %v9862_v1, 0.0  ;;  %v7982_v52 = vrot.slane %v7966_v36, %v17868_v47  ;;  %v7968_v38 = vcombine.high %v7966_v36, %v7966_v36 }
 0x377   : > { %24478 = vst [vmem:[#allocation182_spill] sm:$0xff] %v20835_v50  ;;  %v20840_v25 = vpop.eup %16935  ;;  %v8087_v11 = vrot.slane %v8065_v22, %v17868_v47  ;;  %v20849_v21 = vmul.f32 %v20460_v17, %v10105_v35  ;;  %v9863_v57 = vadd.f32 %v20403_v2, %v9600_v0  ;;  %v8064_v6 = vrot.slane %v8050_v7, %v17868_v47 }
 0x378   : > { %24479 = vst [vmem:[#allocation223_spill] sm:$0xff] %v20840_v25  ;;  %v20844_v43 = vpop.permute.xlu1 %6238  ;;  %v3463_v63 = vsel %vm3192_vm2, %v20840_v25, 0.0  ;;  %v10131_v1 = vmax.f32 %v9875_v8, 0.0  ;;  %v10120_v50 = vmax.f32 %v9864_v62, 0.0  ;;  %v9876_v36 = vadd.f32 %v20403_v2, %v9613_v45 }
 0x379   : > { %24480 = vst [vmem:[#allocation224_spill] sm:$0xff] %v20849_v21  ;;  %3464 = vadd.xlane.f32.xlu1 %v3463_v63  ;;  %10847 = vadd.xlane.f32.xlu0 %v24481_v12  ;;  %v9094_v22 = vrot.slane %v8073_v46, %v17897_v48  ;;  %v20857_v30 = vmul.f32 %v20460_v17, %v10117_v13 }
 0x37a   : > { %v10806_v41 = vpop.xlane.xlu0 %10805  ;;  %v9865_v35 = vadd.f32 %v20403_v2, %v9602_v3  ;;  %v9042_v25 = vrot.slane %v7999_v14, %v17897_v48  ;;  %v9102_v0 = vrot.slane %v8095_v23, %v17897_v48  ;;  %v20865_v63 = vmul.f32 %v20460_v17, %v10118_v31  ;;  %v24485_v23 = vld [vmem:[#allocation185_spill] sm:$0xff] }
 0x37b   : > { %24482 = vst [vmem:[#allocation184_spill] sm:$0xff] %v20857_v30  ;;  %v20862_v7 = vpop.eup %16937  ;;  %v7996_v8 = vrot.slane %v7968_v38, %v17868_v47  ;;  %v9098_v62 = vrot.slane %v8087_v11, %v17897_v48  ;;  %v7998_v46 = vcombine.high %v7982_v52, %v7982_v52  ;;  %v10119_v3 = vmax.f32 %v9863_v57, 0.0 }
 0x37c   : > { %24483 = vst [vmem:[#allocation225_spill] sm:$0xff] %v20862_v7  ;;  %24484 = vst [vmem:[#allocation226_spill] sm:$0xff] %v20865_v63  ;;  %v20869_v45 = vpop.permute.xlu1 %6248  ;;  %v3469_v13 = vsel %vm3192_vm2, %v20862_v7, 0.0  ;;  %v8097_v12 = vcombine.high %v8087_v11, %v8087_v11  ;;  %v8066_v14 = vcombine.high %v8064_v6, %v8064_v6  ;;  %v20875_v30 = vmul.f32 %v20460_v17, %v10131_v1 }
 0x37d   : > { %3470 = vadd.xlane.f32.xlu1 %v3469_v13  ;;  %10883 = vadd.xlane.f32.xlu0 %v24485_v23  ;;  %v20878_v31 = vmul.f32 %v20460_v17, %v10120_v50  ;;  %v10132_v38 = vmax.f32 %v9876_v36, 0.0  ;;  %v9627_v63 = vsub.f32 %v9094_v22, %v24470_v34  ;;  %v10121_v28 = vmax.f32 %v9865_v35, 0.0 }
 0x37e   : > { %24486 = vst [vmem:[#allocation185_spill] sm:$0xff] %v20875_v30  ;;  %v10812_v21 = vpop.xlane.xlu0 %10811  ;;  %v9614_v4 = vsub.f32 %v9042_v25, %v24445_v33  ;;  %v9046_v57 = vrot.slane %v7982_v52, %v17897_v48  ;;  %v9629_v11 = vsub.f32 %v9102_v0, %v24470_v34  ;;  %v9050_v23 = vrot.slane %v7996_v8, %v17897_v48  ;;  %v24489_v0 = vld [vmem:[#allocation188_spill] sm:$0xff] }
 0x37f   : > { %24487 = vst [vmem:[#allocation227_spill] sm:$0xff] %v20878_v31  ;;  %v20884_v13 = vpop.eup %16939  ;;  %v9628_v1 = vsub.f32 %v9098_v62, %v24470_v34  ;;  %v20889_v50 = vrot.slane %v7998_v46, %v17897_v48  ;;  %v8000_v36 = vcombine.high %v7996_v8, %v7996_v8  ;;  %v20896_v25 = vrot.slane %v8097_v12, %v17897_v48 }
 0x380   : > { %24488 = vst [vmem:[#allocation228_spill] sm:$0xff] %v20884_v13  ;;  %v20891_v7 = vpop.permute.xlu1 %6258  ;;  %v3475_v22 = vsel %vm3192_vm2, %v20884_v13, 0.0  ;;  %v8080_v52 = vrot.slane %v8064_v6, %v17868_v47  ;;  %v20900_v35 = vrot.slane %v8066_v14, %v17868_v47  ;;  %v20905_v62 = vsel %vm406_vm0, %v20746_v15, 0.0  ;;  %v24494_v13 = vld [vmem:[#allocation186_spill] sm:$0xff] }
 0x381   : > { %3476 = vadd.xlane.f32.xlu1 %v3475_v22  ;;  %10886 = vadd.xlane.f32.xlu0 %v24489_v0  ;;  %24490 = vst [vmem:[#allocation188_spill] sm:$0xff] %v20905_v62  ;;  %v20908_v8 = vmul.f32 %v20460_v17, %v10119_v3  ;;  %v20911_v46 = vmul.f32 %v20460_v17, %v10132_v38  ;;  %v20955_v31 = vsel %vm406_vm0, %v20754_v59, 0.0 }
 0x382   : > { %v20914_v12 = vadd.f32 %v20403_v2, %v9627_v63  ;;  %v20917_v6 = vmul.f32 %v20460_v17, %v10121_v28  ;;  %v20920_v14 = vadd.f32 %v20403_v2, %v9614_v4  ;;  %v9615_v22 = vsub.f32 %v9046_v57, %v24445_v33  ;;  %v20936_v4 = vld [vmem:[%s23952_s4] ss:$0 sm:$0xff]  ;;  %v10818_v57 = vpop.xlane.xlu0 %10817  ;;  %24496 = vst [vmem:[#allocation186_spill] sm:$0xff] %v20955_v31 }
 0x383   : > { %24491 = vst [vmem:[#allocation229_spill] sm:$0xff] %v20908_v8  ;;  %24492 = vst [vmem:[#allocation230_spill] sm:$0xff] %v20911_v46  ;;  %v20924_v15 = vadd.f32 %v20403_v2, %v9629_v11  ;;  %v9616_v3 = vsub.f32 %v9050_v23, %v24445_v33  ;;  %v20928_v0 = vadd.f32 %v20403_v2, %v9628_v1 }
 0x384   : > { %24493 = vst [vmem:[#allocation231_spill] sm:$0xff] %v20917_v6  ;;  %v9617_v63 = vsub.f32 %v20889_v50, %v24445_v33  ;;  %v9058_v38 = vrot.slane %v8000_v36, %v17897_v48  ;;  %v6294_v28 = vmul.f32 %v20936_v4, %v20821_v32  ;;  %v20940_v11 = vpop.permute.xlu1 %11192  ;;  %v9630_v23 = vsub.f32 %v20896_v25, %v24470_v34  ;;  %v24495_v36 = vld [vmem:[#allocation88_spill] sm:$0xff] }
 0x385   : > { %v8096_v1 = vcombine.high %v8080_v52, %v8080_v52  ;;  %v8098_v50 = vcombine.high %v20900_v35, %v20900_v35  ;;  %10904 = vadd.xlane.f32.xlu1 %v24494_v13  ;;  %10889 = vadd.xlane.f32.xlu0 %v24495_v36  ;;  %v11323_v6 = vadd.f32 %v20940_v11, %v20534_v56  ;;  %v24497_v36 = vld [vmem:[#allocation55_spill] sm:$0xff] }
 0x386   : > { %v11324_v46 = vadd.f32 %v20940_v11, %v10806_v41  ;;  %v11325_v32 = vadd.f32 %v20940_v11, %v20559_v49  ;;  %v11326_v25 = vadd.f32 %v20940_v11, %v10812_v21  ;;  %v11327_v30 = vadd.f32 %v20940_v11, %v20583_v18  ;;  %v24498_v49 = vld [vmem:[#allocation46_spill] sm:$0xff] }
 0x387   : > { %v11328_v13 = vadd.f32 %v20940_v11, %v10818_v57  ;;  %v12224_v56 = vrot.slane %v11323_v6, %v24497_v36  ;;  %v20965_v62 = vadd.f32 %v24498_v49, %v6294_v28  ;;  %v9618_v59 = vsub.f32 %v9058_v38, %v24445_v33  ;;  %v24499_v57 = vld [vmem:[#allocation187_spill] sm:$0xff]  ;;  %v24500_v6 = vld [vmem:[#allocation189_spill] sm:$0xff]  ;;  %v20977_v33 = vpop.xlane.xlu0 %10823 }
 0x388   : > { %v12228_v41 = vrot.slane %v11324_v46, %v24497_v36  ;;  %v12232_v8 = vrot.slane %v11325_v32, %v24497_v36  ;;  %v9110_v21 = vrot.slane %v8080_v52, %v17897_v48  ;;  %v12236_v18 = vrot.slane %v11326_v25, %v24497_v36 }
 0x389   : > { %10871 = vadd.xlane.f32.xlu1 %v24499_v57  ;;  %10901 = vadd.xlane.f32.xlu0 %v24500_v6  ;;  %v9114_v46 = vrot.slane %v20900_v35, %v17897_v48  ;;  %v12240_v28 = vrot.slane %v11327_v30, %v24497_v36  ;;  %v9118_v52 = vrot.slane %v8096_v1, %v17897_v48  ;;  %v24501_v1 = vld [vmem:[#allocation191_spill] sm:$0xff] }
 0x38a   : > { %v12852_v31 = vsel %vm12733_vm3, %v12228_v41, %v12224_v56  ;;  %v12244_v38 = vrot.slane %v11328_v13, %v24497_v36  ;;  %v9878_v56 = vadd.f32 %v20403_v2, %v9615_v22  ;;  %v9122_v41 = vrot.slane %v8098_v50, %v17897_v48  ;;  %v24502_v13 = vld [vmem:[#allocation190_spill] sm:$0xff] }
 0x38b   : > { %v12853_v32 = vsel %vm12735_vm4, %v12232_v8, %v12852_v31  ;;  %v7714_v30 = vrot.slane %v20965_v62, %v17868_v47  ;;  %v9879_v35 = vadd.f32 %v20403_v2, %v9616_v3  ;;  %v9631_v31 = vsub.f32 %v9110_v21, %v24470_v34 }
 0x38c   : > { %v12854_v25 = vsel %vm12737_vm5, %v12236_v18, %v12853_v32  ;;  %v7707_v22 = vcombine.high %v20965_v62, %v20965_v62  ;;  %v10146_v50 = vmax.f32 %v20914_v12, 0.0  ;;  %v9880_v18 = vadd.f32 %v20403_v2, %v9617_v63 }
 0x38d   : > { %v12855_v49 = vsel %vm12739_vm6, %v12240_v28, %v12854_v25  ;;  %10907 = vadd.xlane.f32.xlu1 %v24501_v1  ;;  %10925 = vadd.xlane.f32.xlu0 %v24502_v13  ;;  %v9881_v57 = vadd.f32 %v20403_v2, %v9618_v59  ;;  %v9893_v3 = vadd.f32 %v20403_v2, %v9630_v23  ;;  %v10133_v28 = vmax.f32 %v20920_v14, 0.0  ;;  %v24503_v1 = vld [vmem:[#allocation85_spill] sm:$0xff] }
 0x38e   : > { %v20990_v8 = vsel %vm12741_vm7, %v12244_v38, %v12855_v49  ;;  %v9632_v21 = vsub.f32 %v9114_v46, %v24470_v34  ;;  %v9633_v6 = vsub.f32 %v9118_v52, %v24470_v34  ;;  %v10147_v32 = vmax.f32 %v20928_v0, 0.0  ;;  %v21006_v49 = vpop.xlane.xlu0 %10826  ;;  %v24504_v46 = vld [vmem:[#allocation192_spill] sm:$0xff] }
 0x38f   : > { %v10148_v38 = vmax.f32 %v20924_v15, 0.0  ;;  %v9634_v25 = vsub.f32 %v9122_v41, %v24470_v34  ;;  %v7730_v12 = vrot.slane %v7714_v30, %v17868_v47  ;;  %v7722_v63 = vcombine.high %v7714_v30, %v7714_v30 }
 0x390   : > { %v10134_v59 = vmax.f32 %v9878_v56, 0.0  ;;  %v9894_v23 = vadd.f32 %v20403_v2, %v9631_v31  ;;  %v7721_v14 = vrot.slane %v7707_v22, %v17868_v47  ;;  %v21014_v0 = vmul.f32 %v20460_v17, %v10146_v50  ;;  %v21020_v56 = vld [vmem:[%s23953_s5] ss:$0 sm:$0xff] }
 0x391   : > { %10910 = vadd.xlane.f32.xlu1 %v24503_v1  ;;  %10892 = vadd.xlane.f32.xlu0 %v24504_v46  ;;  %v10135_v15 = vmax.f32 %v9879_v35, 0.0  ;;  %v10136_v52 = vmax.f32 %v9880_v18, 0.0  ;;  %v10137_v34 = vmax.f32 %v9881_v57, 0.0  ;;  %v10149_v41 = vmax.f32 %v9893_v3, 0.0  ;;  %v24515_v1 = vld [vmem:[#allocation75_spill] sm:$0xff] }
 0x392   : > { %24505 = vst [vmem:[#allocation88_spill] sm:$0xff] %v21014_v0  ;;  %v9895_v13 = vadd.f32 %v20403_v2, %v9632_v21  ;;  %v9896_v30 = vadd.f32 %v21020_v56, %v9633_v6  ;;  %v21024_v31 = vmul.f32 %v20460_v17, %v10133_v28  ;;  %v21027_v22 = vmul.f32 %v20460_v17, %v10147_v32  ;;  %v24510_v21 = vld [vmem:[#allocation193_spill] sm:$0xff]  ;;  %v24594_v0 = vld [vmem:[#allocation120_spill] sm:$0xff] }
 0x393   : > { %v21030_v35 = vmul.f32 %v20460_v17, %v10148_v38  ;;  %v9897_v50 = vadd.f32 %v21020_v56, %v9634_v25  ;;  %v7752_v18 = vcombine.high %v7730_v12, %v7730_v12  ;;  %v7744_v2 = vrot.slane %v7722_v63, %v17868_v47  ;;  %v21052_v25 = vpop.xlane.xlu0 %10829 }
 0x394   : > { %24506 = vst [vmem:[#allocation55_spill] sm:$0xff] %v21024_v31  ;;  %24507 = vst [vmem:[#allocation46_spill] sm:$0xff] %v21027_v22  ;;  %v21035_v57 = vmul.f32 %v20460_v17, %v10134_v59  ;;  %v10150_v3 = vmax.f32 %v9894_v23, 0.0  ;;  %v21040_v6 = vrot.slane %v7721_v14, %v17868_v47  ;;  %v21044_v28 = vsel %vm406_vm0, %v20766_v58, 0.0  ;;  %v24558_v22 = vld [vmem:[#allocation92_spill] sm:$0xff] }
 0x395   : > { %24508 = vst [vmem:[#allocation187_spill] sm:$0xff] %v21030_v35  ;;  %10913 = vadd.xlane.f32.xlu1 %v20249_v44  ;;  %10928 = vadd.xlane.f32.xlu0 %v24510_v21  ;;  %v21047_v32 = vmul.f32 %v20460_v17, %v10135_v15  ;;  %v21050_v38 = vmul.f32 %v20460_v17, %v10136_v52  ;;  %v10151_v59 = vmax.f32 %v9895_v13, 0.0  ;;  %v10152_v23 = vmax.f32 %v9896_v30, 0.0  ;;  %v24516_v15 = vld [vmem:[#allocation72_spill] sm:$0xff] }
 0x396   : > { %24509 = vst [vmem:[#allocation189_spill] sm:$0xff] %v21035_v57  ;;  %v21055_v63 = vmul.f32 %v20460_v17, %v10137_v34  ;;  %v21058_v44 = vmul.f32 %v20460_v17, %v10149_v41  ;;  %v6296_v58 = vmul.f32 %v20936_v4, %v20844_v43  ;;  %v11203_v46 = vadd.f32 %v20940_v11, %v24515_v1  ;;  %v24596_v57 = vld [vmem:[#allocation122_spill] sm:$0xff] }
 0x397   : > { %24511 = vst [vmem:[#allocation191_spill] sm:$0xff] %v21047_v32  ;;  %24512 = vst [vmem:[#allocation190_spill] sm:$0xff] %v21050_v38  ;;  %v11204_v52 = vadd.f32 %v20940_v11, %v24516_v15  ;;  %v10153_v21 = vmax.f32 %v9897_v50, 0.0  ;;  %v8870_v35 = vrot.slane %v7730_v12, %v17897_v48  ;;  %v8878_v34 = vrot.slane %v7752_v18, %v17897_v48  ;;  %v24518_v18 = vld [vmem:[#allocation77_spill] sm:$0xff]  ;;  %v24595_v32 = vld [vmem:[#allocation115_spill] sm:$0xff] }
 0x398   : > { %24513 = vst [vmem:[#allocation85_spill] sm:$0xff] %v21055_v63  ;;  %24514 = vst [vmem:[#allocation192_spill] sm:$0xff] %v21058_v44  ;;  %v8874_v63 = vrot.slane %v7744_v2, %v17897_v48  ;;  %v21070_v41 = vmul.f32 %v20460_v17, %v10150_v3  ;;  %v7754_v43 = vcombine.high %v7744_v2, %v7744_v2  ;;  %v21078_v50 = vsel %vm406_vm0, %v20795_v61, 0.0  ;;  %v24546_v44 = vld [vmem:[#allocation73_spill] sm:$0xff] }
 0x399   : > { %10946 = vadd.xlane.f32.xlu1 %v20282_v20  ;;  %10895 = vadd.xlane.f32.xlu0 %v20275_v54  ;;  %v8886_v13 = vrot.slane %v21040_v6, %v17897_v48  ;;  %v7723_v30 = vcombine.high %v7721_v14, %v7721_v14  ;;  %v6298_v12 = vmul.f32 %v20936_v4, %v20869_v45  ;;  %v24521_v20 = vld [vmem:[#allocation49_spill] sm:$0xff] }
 0x39a   : > { %24517 = vst [vmem:[#allocation193_spill] sm:$0xff] %v21070_v41  ;;  %v11205_v3 = vadd.f32 %v20940_v11, %v24518_v18  ;;  %v21085_v1 = vmul.f32 %v20460_v17, %v10151_v59  ;;  %v21088_v54 = vmul.f32 %v20460_v17, %v10152_v23  ;;  %v21091_v2 = vadd.f32 %v24521_v20, %v6296_v58  ;;  %v10833_v18 = vpop.xlane.xlu0 %10832  ;;  %v24523_v58 = vld [vmem:[#allocation97_spill] sm:$0xff]  ;;  %v24529_v20 = vld [vmem:[#allocation7_spill] sm:$0xff]  ;;  %v24539_v41 = vld [vmem:[#allocation80_spill] sm:$0xff] }
 0x39b   : > { %v11744_v14 = vrot.slane %v11203_v46, %v24497_v36  ;;  %v11748_v61 = vrot.slane %v11204_v52, %v24497_v36  ;;  %v21096_v15 = vmul.f32 %v20460_v17, %v10153_v21  ;;  %v6300_v45 = vmul.f32 %v20936_v4, %v20891_v7  ;;  %v24525_v4 = vld [vmem:[#allocation50_spill] sm:$0xff] }
 0x39c   : > { %24519 = vst [vmem:[#allocation75_spill] sm:$0xff] %v21085_v1  ;;  %24520 = vst [vmem:[#allocation72_spill] sm:$0xff] %v21088_v54  ;;  %v9571_v59 = vsub.f32 %v8870_v35, %v20965_v62  ;;  %v9573_v1 = vsub.f32 %v8878_v34, %v20965_v62  ;;  %v9572_v23 = vsub.f32 %v8874_v63, %v20965_v62  ;;  %v21114_v7 = vsel %vm406_vm0, %v20812_v19, 0.0  ;;  %v24527_v34 = vld [vmem:[#allocation74_spill] sm:$0xff] }
 0x39d   : > { %24522 = vst [vmem:[#allocation77_spill] sm:$0xff] %v21096_v15  ;;  %10970 = vadd.xlane.f32.xlu1 %v20294_v40  ;;  %10931 = vadd.xlane.f32.xlu0 %v24523_v58  ;;  %v21106_v46 = vrot.slane %v7754_v43, %v17897_v48  ;;  %v9575_v17 = vsub.f32 %v8886_v13, %v20965_v62  ;;  %24524 = vst [vmem:[#allocation49_spill] sm:$0xff] %v21114_v7  ;;  %v24530_v58 = vld [vmem:[#allocation52_spill] sm:$0xff]  ;;  %v24599_v7 = vld [vmem:[#allocation211_spill] sm:$0xff] }
 0x39e   : > { %v21110_v52 = vrot.slane %v7723_v30, %v17868_v47  ;;  %v21117_v35 = vadd.f32 %v24525_v4, %v6298_v12  ;;  %v11329_v40 = vadd.f32 %v20940_v11, %v20607_v53  ;;  %v11330_v63 = vadd.f32 %v20940_v11, %v20977_v33  ;;  %v24528_v30 = vld [vmem:[#allocation31_spill] sm:$0xff] }
 0x39f   : > { %v11752_v21 = vrot.slane %v11205_v3, %v24497_v36  ;;  %v11206_v43 = vadd.f32 %v20940_v11, %v24527_v34  ;;  %v12747_v13 = vsel %vm12733_vm3, %v11748_v61, %v11744_v14  ;;  %v11195_v19 = vadd.f32 %v20940_v11, %v24528_v30  ;;  %v24533_v30 = vld [vmem:[#allocation33_spill] sm:$0xff] }
 0x3a0   : > { %24526 = vst [vmem:[#allocation97_spill] sm:$0xff] %v21117_v35  ;;  %v11196_v12 = vadd.f32 %v20940_v11, %v24529_v20  ;;  %v21132_v4 = vadd.f32 %v24530_v58, %v6300_v45  ;;  %v21135_v53 = vadd.f32 %v21020_v56, %v9571_v59  ;;  %v21138_v33 = vadd.f32 %v21020_v56, %v9573_v1  ;;  %v21153_v59 = vpop.xlane.xlu0 %10835 }
 0x3a1   : > { %v21141_v3 = vadd.f32 %v21020_v56, %v9572_v23  ;;  %10916 = vadd.xlane.f32.xlu1 %v20300_v16  ;;  %10934 = vadd.xlane.f32.xlu0 %v20341_v26  ;;  %v21148_v61 = vadd.f32 %v21020_v56, %v9575_v17  ;;  %v12248_v1 = vrot.slane %v11329_v40, %v24497_v36  ;;  %v24532_v23 = vld [vmem:[#allocation79_spill] sm:$0xff] }
 0x3a2   : > { %24531 = vst [vmem:[#allocation50_spill] sm:$0xff] %v21132_v4  ;;  %v11207_v34 = vadd.f32 %v20940_v11, %v24532_v23  ;;  %v12748_v16 = vsel %vm12735_vm4, %v11752_v21, %v12747_v13  ;;  %v11197_v26 = vadd.f32 %v20940_v11, %v24533_v30  ;;  %v12252_v20 = vrot.slane %v11330_v63, %v24497_v36  ;;  %v24534_v23 = vld [vmem:[#allocation76_spill] sm:$0xff]  ;;  %v24535_v13 = vld [vmem:[#allocation81_spill] sm:$0xff] }
 0x3a3   : > { %v11756_v17 = vrot.slane %v11206_v43, %v24497_v36  ;;  %v11712_v58 = vrot.slane %v11195_v19, %v24497_v36  ;;  %v11716_v45 = vrot.slane %v11196_v12, %v24497_v36  ;;  %v11331_v40 = vadd.f32 %v20940_v11, %v21006_v49  ;;  %v24536_v43 = vld [vmem:[#allocation103_spill] sm:$0xff]  ;;  %v24537_v19 = vld [vmem:[#allocation78_spill] sm:$0xff] }
 0x3a4   : > { %v11332_v14 = vadd.f32 %v20940_v11, %v21052_v25  ;;  %v11208_v21 = vadd.f32 %v20940_v11, %v24534_v23  ;;  %v11209_v30 = vadd.f32 %v20940_v11, %v24535_v13  ;;  %v12857_v63 = vsel %vm12743_vm8, %v12248_v1, %v20990_v8  ;;  %v24538_v13 = vld [vmem:[#allocation83_spill] sm:$0xff] }
 0x3a5   : > { %10952 = vadd.xlane.f32.xlu1 %v24536_v43  ;;  %10937 = vadd.xlane.f32.xlu0 %v20361_v29  ;;  %v21178_v49 = vadd.f32 %v20940_v11, %v24537_v19  ;;  %v12749_v25 = vsel %vm12737_vm5, %v11756_v17, %v12748_v16  ;;  %v11760_v12 = vrot.slane %v11207_v34, %v24497_v36  ;;  %v24540_v29 = vld [vmem:[#allocation57_spill] sm:$0xff] }
 0x3a6   : > { %v3390_v23 = vpop.xlane.xlu0 %3389  ;;  %v11720_v15 = vrot.slane %v11197_v26, %v24497_v36  ;;  %v11211_v54 = vadd.f32 %v20940_v11, %v24538_v13  ;;  %v11212_v8 = vadd.f32 %v20940_v11, %v24539_v41  ;;  %v11333_v1 = vadd.f32 %v20940_v11, %v10833_v18  ;;  %v24542_v18 = vld [vmem:[#allocation194_spill] sm:$0xff] }
 0x3a7   : > { %16941 = vrcp.f32 %v3390_v23  ;;  %v11198_v43 = vadd.f32 %v20940_v11, %v24540_v29  ;;  %v12734_v19 = vsel %vm12733_vm3, %v11716_v45, %v11712_v58  ;;  %v21192_v16 = vsel %vm12745_vm9, %v12252_v20, %v12857_v63  ;;  %v24543_v45 = vld [vmem:[#allocation86_spill] sm:$0xff] }
 0x3a8   : > { %24541 = vst [vmem:[#allocation74_spill] sm:$0xff] %v21192_v16  ;;  %v12256_v34 = vrot.slane %v11331_v40, %v24497_v36  ;;  %v12260_v26 = vrot.slane %v11332_v14, %v24497_v36  ;;  %v12750_v17 = vsel %vm12739_vm6, %v11760_v12, %v12749_v25  ;;  %v11764_v13 = vrot.slane %v11208_v21, %v24497_v36  ;;  %v24544_v40 = vld [vmem:[#allocation71_spill] sm:$0xff]  ;;  %v24545_v12 = vld [vmem:[#allocation58_spill] sm:$0xff] }
 0x3a9   : > { %v11768_v41 = vrot.slane %v11209_v30, %v24497_v36  ;;  %10919 = vadd.xlane.f32.xlu1 %v24542_v18  ;;  %10949 = vadd.xlane.f32.xlu0 %v20378_v5  ;;  %v10090_v29 = vmax.f32 %v21135_v53, 0.0  ;;  %v11213_v20 = vadd.f32 %v20940_v11, %v24543_v45  ;;  %v11199_v14 = vadd.f32 %v20940_v11, %v24544_v40 }
 0x3aa   : > { %v21204_v58 = vpop.xlane.xlu0 %10841  ;;  %v12736_v63 = vsel %vm12735_vm4, %v11720_v15, %v12734_v19  ;;  %v11776_v21 = vrot.slane %v11211_v54, %v24497_v36  ;;  %v11780_v30 = vrot.slane %v11212_v8, %v24497_v36  ;;  %v12264_v25 = vrot.slane %v11333_v1, %v24497_v36  ;;  %v24547_v54 = vld [vmem:[#allocation37_spill] sm:$0xff]  ;;  %v24548_v19 = vld [vmem:[#allocation107_spill] sm:$0xff] }
 0x3ab   : > { %v12751_v5 = vsel %vm12741_vm7, %v11764_v13, %v12750_v17  ;;  %v11200_v53 = vadd.f32 %v20940_v11, %v24545_v12  ;;  %v11724_v18 = vrot.slane %v11198_v43, %v24497_v36  ;;  %v12859_v45 = vsel %vm12733_vm3, %v12260_v26, %v12256_v34  ;;  %v24549_v12 = vld [vmem:[#allocation102_spill] sm:$0xff] }
 0x3ac   : > { %v11201_v15 = vadd.f32 %v20940_v11, %v24546_v44  ;;  %v21223_v8 = vadd.f32 %v20940_v11, %v24547_v54  ;;  %v11784_v43 = vrot.slane %v11213_v20, %v24497_v36  ;;  %v11227_v34 = vadd.f32 %v20940_v11, %v24548_v19 }
 0x3ad   : > { %10955 = vadd.xlane.f32.xlu1 %v20398_v39  ;;  %10973 = vadd.xlane.f32.xlu0 %v20381_v27  ;;  %v12738_v1 = vsel %vm12737_vm5, %v11724_v18, %v12736_v63  ;;  %v21233_v17 = vsel %vm12743_vm8, %v11768_v41, %v12751_v5  ;;  %v11728_v13 = vrot.slane %v11199_v14, %v24497_v36  ;;  %v24550_v41 = vld [vmem:[#allocation82_spill] sm:$0xff] }
 0x3ae   : > { %v21235_v44 = vpop.xlane.xlu0 %10850  ;;  %v12754_v39 = vsel %vm12733_vm3, %v11780_v30, %v11776_v21  ;;  %v11228_v27 = vadd.f32 %v20940_v11, %v24549_v12  ;;  %v21242_v63 = vsel %vm12735_vm4, %v12264_v25, %v12859_v45  ;;  %v21246_v20 = vadd.f32 %v20940_v11, %v21153_v59  ;;  %v24551_v30 = vld [vmem:[#allocation89_spill] sm:$0xff] }
 0x3af   : > { %v11732_v18 = vrot.slane %v11200_v53, %v24497_v36  ;;  %v11214_v5 = vadd.f32 %v20940_v11, %v24550_v41  ;;  %v11736_v54 = vrot.slane %v11201_v15, %v24497_v36  ;;  %v12740_v21 = vsel %vm12739_vm6, %v11728_v13, %v12738_v1  ;;  %v24552_v53 = vld [vmem:[#allocation110_spill] sm:$0xff]  ;;  %v24553_v13 = vld [vmem:[#allocation95_spill] sm:$0xff] }
 0x3b0   : > { %v11215_v25 = vadd.f32 %v20940_v11, %v24551_v30  ;;  %v12755_v59 = vsel %vm12735_vm4, %v11784_v43, %v12754_v39  ;;  %v11229_v19 = vadd.f32 %v20940_v11, %v24552_v53  ;;  %v11840_v15 = vrot.slane %v11227_v34, %v24497_v36  ;;  %v21276_v34 = vld [vmem:[%s23954_s6] ss:$0 sm:$0xff]  ;;  %v24555_v39 = vld [vmem:[#allocation84_spill] sm:$0xff] }
 0x3b1   : > { %v16942_v45 = vpop.eup %16941  ;;  %10958 = vadd.xlane.f32.xlu1 %v20455_v42  ;;  %10940 = vadd.xlane.f32.xlu0 %v20486_v51  ;;  %v11844_v1 = vrot.slane %v11228_v27, %v24497_v36  ;;  %v11219_v30 = vadd.f32 %v20940_v11, %v24553_v13  ;;  %v24554_v42 = vld [vmem:[#allocation90_spill] sm:$0xff]  ;;  %v12268_v43 = vrot.slane %v21246_v20, %v24497_v36  ;;  %v24556_v20 = vld [vmem:[#allocation105_spill] sm:$0xff] }
 0x3b2   : > { %v3514_v41 = vmul.f32 %v16942_v45, %v3390_v23  ;;  %v21264_v26 = vpop.xlane.xlu0 %10853  ;;  %v11220_v51 = vadd.f32 %v20940_v11, %v24554_v42  ;;  %v10353_v23 = vmul.f32 %v21276_v34, %v10090_v29  ;;  %v11216_v53 = vadd.f32 %v20940_v11, %v24555_v39 }
 0x3b3   : > { %v11788_v27 = vrot.slane %v11214_v5, %v24497_v36  ;;  %v12742_v13 = vsel %vm12741_vm7, %v11732_v18, %v12740_v21  ;;  %v11792_v42 = vrot.slane %v11215_v25, %v24497_v36  ;;  %v11230_v40 = vadd.f32 %v20940_v11, %v24556_v20 }
 0x3b4   : > { %v3546_v12 = vsub.f32 2.0, %v3514_v41  ;;  %v21283_v14 = vpop.xlane.xlu1 %3386  ;;  %v11848_v5 = vrot.slane %v11229_v19, %v24497_v36  ;;  %v24557_v41 = vld [vmem:[#allocation98_spill] sm:$0xff]  ;;  %v12768_v25 = vsel %vm12733_vm3, %v11844_v1, %v11840_v15  ;;  %v11808_v20 = vrot.slane %v11219_v30, %v24497_v36  ;;  %v24559_v19 = vld [vmem:[#allocation87_spill] sm:$0xff]  ;;  %v24561_v30 = vld [vmem:[#allocation8_spill] sm:$0xff] }
 0x3b5   : > { %16943 = vrcp.f32 %v21283_v14  ;;  %10961 = vadd.xlane.f32.xlu1 %v20519_v60  ;;  %10976 = vadd.xlane.f32.xlu0 %v20514_v10  ;;  %v12756_v29 = vsel %vm12737_vm5, %v11788_v27, %v12755_v59  ;;  %v11221_v18 = vadd.f32 %v20940_v11, %v24557_v41  ;;  %v11812_v38 = vrot.slane %v11220_v51, %v24497_v36  ;;  %v24560_v41 = vld [vmem:[#allocation91_spill] sm:$0xff] }
 0x3b6   : > { %v3578_v21 = vmul.f32 %v16942_v45, %v3546_v12  ;;  %v21295_v39 = vpop.xlane.xlu0 %10874  ;;  %v12744_v60 = vsel %vm12743_vm8, %v11736_v54, %v12742_v13  ;;  %v10993_v10 = vsel %vm406_vm0, %v10353_v23, 0.0  ;;  %v11217_v59 = vadd.f32 %v20940_v11, %v24558_v22  ;;  %v24562_v22 = vld [vmem:[#allocation108_spill] sm:$0xff] }
 0x3b7   : > { %v11218_v27 = vadd.f32 %v20940_v11, %v24559_v19  ;;  %v11796_v12 = vrot.slane %v11216_v53, %v24497_v36  ;;  %v12757_v15 = vsel %vm12739_vm6, %v11792_v42, %v12756_v29  ;;  %v11231_v54 = vadd.f32 %v20940_v11, %v24561_v30  ;;  %v24563_v42 = vld [vmem:[#allocation114_spill] sm:$0xff]  ;;  %v24566_v30 = vld [vmem:[#allocation59_spill] sm:$0xff] }
 0x3b8   : > { %v21307_v45 = vmul.f32 %v24560_v41, %v3578_v21  ;;  %v21311_v1 = vpop.xlane.xlu1 %3392  ;;  %v11232_v51 = vadd.f32 %v20940_v11, %v24562_v22  ;;  %v12769_v23 = vsel %vm12735_vm4, %v11848_v5, %v12768_v25  ;;  %v11816_v13 = vrot.slane %v11221_v18, %v24497_v36 }
 0x3b9   : > { %10994 = vadd.xlane.f32.xlu1 %v10993_v10  ;;  %16945 = vrcp.f32 %v21311_v1  ;;  %10943 = vadd.xlane.f32.xlu0 %v20553_v37  ;;  %v11233_v29 = vadd.f32 %v20940_v11, %v24563_v42  ;;  %v11852_v21 = vrot.slane %v11230_v40, %v24497_v36  ;;  %v24564_v10 = vld [vmem:[#allocation93_spill] sm:$0xff]  ;;  %v12761_v19 = vsel %vm12733_vm3, %v11812_v38, %v11808_v20  ;;  %v24567_v40 = vld [vmem:[#allocation111_spill] sm:$0xff] }
 0x3ba   : > { %16502 = vmatmul.mubr.msk.f32.vlgmr.msra.gmra.mrb[48].mxu0 %vm3192_vm2, %v21307_v45  ;;  %v21323_v53 = vpop.xlane.xlu0 %10877  ;;  %v11222_v37 = vadd.f32 %v20940_v11, %v24564_v10  ;;  %v21333_v5 = vsel %vm12737_vm5, %v12268_v43, %v21242_v63  ;;  %v24565_v18 = vrot.slane %v21178_v49, %v24497_v36  ;;  %v12758_v41 = vsel %vm12741_vm7, %v11796_v12, %v12757_v15  ;;  %v24570_v15 = vld [vmem:[#allocation101_spill] sm:$0xff] }
 0x3bb   : > { %16510 = vmatpush3.msra.mxu0 %v24566_v30  ;;  %v21346_v22 = vadd.f32 %v20940_v11, %v24567_v40  ;;  %v24568_v38 = vrot.slane %v21223_v8, %v24497_v36  ;;  %v11800_v43 = vrot.slane %v11217_v59, %v24497_v36  ;;  %v11804_v49 = vrot.slane %v11218_v27, %v24497_v36 }
 0x3bc   : > { %v21340_v25 = vsel %vm12745_vm9, %v24565_v18, %v21233_v17  ;;  %v21356_v17 = vpop.xlane.xlu1 %10838  ;;  %v12770_v20 = vsel %vm12737_vm5, %v11852_v21, %v12769_v23  ;;  %v24569_v12 = vmov 0.0   ;;  %v11856_v8 = vrot.slane %v11231_v54, %v24497_v36 }
 0x3bd   : > { %v21352_v63 = vsel %vm12745_vm9, %v24568_v38, %v12744_v60  ;;  %16511 = vmatprep.mubr.msk.f32.mxu0 %vm17186_vm1, %v24569_v12  ;;  %11018 = vadd.xlane.f32.xlu1 %v20588_v55  ;;  %v11223_v60 = vadd.f32 %v20940_v11, %v24570_v15  ;;  %v12762_v59 = vsel %vm12735_vm4, %v11816_v13, %v12761_v19  ;;  %v24571_v19 = vld [vmem:[#allocation126_spill] sm:$0xff] }
 0x3be   : > { %10979 = vadd.xlane.f32.xlu0 %v20575_v24  ;;  %v12759_v42 = vsel %vm12743_vm8, %v11800_v43, %v12758_v41  ;;  %v21369_v10 = vpop.xlane.xlu0 %10844  ;;  %v11860_v23 = vrot.slane %v11232_v51, %v24497_v36  ;;  %v11864_v21 = vrot.slane %v11233_v29, %v24497_v36  ;;  %v11820_v55 = vrot.slane %v11222_v37, %v24497_v36  ;;  %v24572_v41 = vld [vmem:[#allocation123_spill] sm:$0xff]  ;;  %v24573_v29 = vld [vmem:[#allocation96_spill] sm:$0xff] }
 0x3bf   : > { %16519 = vmatprep.subr.mxu0 %v24569_v12  ;;  %v16944_v24 = vpop.eup %16943  ;;  %v11868_v54 = vrot.slane %v21346_v22, %v24497_v36  ;;  %v12771_v13 = vsel %vm12739_vm6, %v11856_v8, %v12770_v20  ;;  %v11243_v18 = vadd.f32 %v20940_v11, %v24571_v19  ;;  %v11244_v30 = vadd.f32 %v20940_v11, %v24572_v41  ;;  %v24575_v8 = vld [vmem:[#allocation206_spill] sm:$0xff] }
 0x3c0   : > { %v3513_v51 = vmul.f32 %v16944_v24, %v21283_v14  ;;  %v21383_v40 = vpop.xlane.xlu1 %3398  ;;  %v11224_v37 = vadd.f32 %v20940_v11, %v24573_v29  ;;  %v12763_v38 = vsel %vm12737_vm5, %v11820_v55, %v12762_v59  ;;  %v24574_v43 = vmax.f32 %v21138_v33, 0.0  ;;  %v24576_v14 = vld [vmem:[#allocation104_spill] sm:$0xff]  ;;  %v24577_v33 = vld [vmem:[#allocation99_spill] sm:$0xff] }
 0x3c1   : > { %v21392_v20 = vsel %vm12745_vm9, %v11804_v49, %v12759_v42  ;;  %10964 = vadd.xlane.f32.xlu1 %v20599_v9  ;;  %16947 = vrcp.f32 %v21383_v40  ;;  %v11225_v19 = vadd.f32 %v20940_v11, %v24576_v14  ;;  %v11824_v41 = vrot.slane %v11223_v60, %v24497_v36  ;;  %v24578_v49 = vld [vmem:[#allocation128_spill] sm:$0xff] }
 0x3c2   : > { %v10355_v15 = vmul.f32 %v21276_v34, %v24574_v43  ;;  %10982 = vadd.xlane.f32.xlu0 %v24575_v8  ;;  %v3545_v29 = vsub.f32 2.0, %v3513_v51  ;;  %v12772_v59 = vsel %vm12741_vm7, %v11860_v23, %v12771_v13  ;;  %v11226_v55 = vadd.f32 %v20940_v11, %v24577_v33  ;;  %v21403_v43 = vpop.xlane.xlu0 %3395 }
 0x3c3   : > { %v11245_v9 = vadd.f32 %v20940_v11, %v24578_v49  ;;  %v16946_v42 = vpop.eup %16945  ;;  %v12764_v27 = vsel %vm12739_vm6, %v11824_v41, %v12763_v38  ;;  %16949 = vrcp.f32 %v21403_v43  ;;  %v11904_v8 = vrot.slane %v11243_v18, %v24497_v36 }
 0x3c4   : > { %v11908_v60 = vrot.slane %v11244_v30, %v24497_v36  ;;  %v3577_v51 = vmul.f32 %v16944_v24, %v3545_v29  ;;  %v3515_v23 = vmul.f32 %v16946_v42, %v21311_v1  ;;  %v11828_v13 = vrot.slane %v11224_v37, %v24497_v36  ;;  %v21414_v33 = vpop.xlane.xlu1 %3404  ;;  %v24579_v24 = vld [vmem:[#allocation208_spill] sm:$0xff]  ;;  %v24580_v1 = vld [vmem:[#allocation94_spill] sm:$0xff] }
 0x3c5   : > { %v10999_v14 = vsel %vm406_vm0, %v10355_v15, 0.0  ;;  %v21418_v49 = vadd.f32 %v20940_v11, %v21204_v58  ;;  %v12773_v38 = vsel %vm12743_vm8, %v11864_v21, %v12772_v59  ;;  %v11832_v41 = vrot.slane %v11225_v19, %v24497_v36  ;;  %v24581_v58 = vld [vmem:[#allocation6_spill] sm:$0xff] }
 0x3c6   : > { %11000 = vadd.xlane.f32.xlu1 %v10999_v14  ;;  %16951 = vrcp.f32 %v21414_v33  ;;  %10985 = vadd.xlane.f32.xlu0 %v24579_v24  ;;  %v21425_v18 = vmul.f32 %v24580_v1, %v3577_v51  ;;  %v3547_v30 = vsub.f32 2.0, %v3515_v23  ;;  %v12765_v37 = vsel %vm12741_vm7, %v11828_v13, %v12764_v27  ;;  %v21429_v29 = vpop.xlane.xlu0 %3401  ;;  %v24583_v23 = vld [vmem:[#allocation42_spill] sm:$0xff]  ;;  %v24585_v1 = vld [vmem:[#allocation61_spill] sm:$0xff] }
 0x3c7   : > { %v11912_v15 = vrot.slane %v11245_v9, %v24497_v36  ;;  %v11246_v21 = vadd.f32 %v20940_v11, %v24581_v58  ;;  %v12782_v19 = vsel %vm12733_vm3, %v11908_v60, %v11904_v8  ;;  %16953 = vrcp.f32 %v21429_v29  ;;  %v24588_v58 = vld [vmem:[#allocation132_spill] sm:$0xff] }
 0x3c8   : > { %v24582_v59 = vmax.f32 %v21141_v3, 0.0  ;;  %v21440_v51 = vadd.f32 %v20940_v11, %v21235_v44  ;;  %v3579_v27 = vmul.f32 %v16946_v42, %v3547_v30  ;;  %v11836_v9 = vrot.slane %v11226_v55, %v24497_v36  ;;  %16497 = vmatmul.mubr.msk.f32.vlgmr.msra.gmra.mrb[48].mxu1 %vm3192_vm2, %v21425_v18  ;;  %v21447_v8 = vpop.xlane.xlu1 %3410  ;;  %v24584_v3 = vld [vmem:[#allocation127_spill] sm:$0xff]  ;;  %v24586_v44 = vld [vmem:[#allocation205_spill] sm:$0xff] }
 0x3c9   : > { %v11247_v13 = vadd.f32 %v20940_v11, %v24583_v23  ;;  %v12766_v60 = vsel %vm12743_vm8, %v11832_v41, %v12765_v37  ;;  %v21452_v24 = vadd.f32 %v20940_v11, %v24584_v3  ;;  %16505 = vmatpush3.msra.mxu1 %v24585_v1  ;;  %16955 = vrcp.f32 %v21447_v8  ;;  %v24587_v42 = vld [vmem:[#allocation109_spill] sm:$0xff]  ;;  %16506 = vmatprep.mubr.msk.f32.mxu1 %vm17186_vm1, %v24569_v12 }
 0x3ca   : > { %v10354_v14 = vmul.f32 %v21276_v34, %v24582_v59  ;;  %10967 = vadd.xlane.f32.xlu1 %v24586_v44  ;;  %v21459_v30 = vmul.f32 %v24587_v42, %v3579_v27  ;;  %v21463_v59 = vadd.f32 %v20940_v11, %v24588_v58  ;;  %v24589_v41 = vld [vmem:[#allocation129_spill] sm:$0xff]  ;;  %v12783_v23 = vsel %vm12735_vm4, %v11912_v15, %v12782_v19  ;;  %v21470_v3 = vpop.xlane.xlu0 %3407 }
 0x3cb   : > { %v21467_v37 = vadd.f32 %v20940_v11, %v24589_v41  ;;  %v16948_v1 = vpop.eup %16947  ;;  %v11340_v27 = vadd.f32 %v20940_v11, %v21264_v26  ;;  %v21480_v44 = vsel %vm12745_vm9, %v11868_v54, %v12773_v38  ;;  %v11916_v42 = vrot.slane %v11246_v21, %v24497_v36  ;;  %16514 = vmatprep.subr.mxu1 %v24569_v12  ;;  %v24590_v58 = vld [vmem:[#allocation117_spill] sm:$0xff] }
 0x3cc   : > { %v10996_v55 = vsel %vm406_vm0, %v10354_v14, 0.0  ;;  %v12288_v15 = vrot.slane %v21440_v51, %v24497_v36  ;;  %v3517_v19 = vmul.f32 %v16948_v1, %v21383_v40  ;;  %v11920_v26 = vrot.slane %v11247_v13, %v24497_v36  ;;  %v21493_v22 = vpop.xlane.xlu1 %3416  ;;  %v24591_v41 = vld [vmem:[#allocation41_spill] sm:$0xff]  ;;  %16507 = vmatmul.mubr.msk.f32.vlgmr.msra.gmra.mrb[50].mxu1 %vm3192_vm2, %v21459_v30  ;;  %v24592_v14 = vld [vmem:[#allocation60_spill] sm:$0xff] }
 0x3cd   : > { %10997 = vadd.xlane.f32.xlu0 %v10996_v55  ;;  %v21489_v55 = vsel %vm12745_vm9, %v11836_v9, %v12766_v60  ;;  %v16950_v54 = vpop.eup %16949  ;;  %v11924_v38 = vrot.slane %v21452_v24, %v24497_v36  ;;  %v12784_v21 = vsel %vm12737_vm5, %v11916_v42, %v12783_v23  ;;  %v11235_v51 = vadd.f32 %v20940_v11, %v24590_v58  ;;  %v24593_v23 = vld [vmem:[#allocation210_spill] sm:$0xff] }
 0x3ce   : > { %v11236_v40 = vadd.f32 %v20940_v11, %v24591_v41  ;;  %v3549_v9 = vsub.f32 2.0, %v3517_v19  ;;  %v3516_v13 = vmul.f32 %v16950_v54, %v21403_v43  ;;  %v11928_v60 = vrot.slane %v21463_v59, %v24497_v36  ;;  %16515 = vmatpush3.msra.mxu1 %v24592_v14  ;;  %v21511_v42 = vpop.xlane.xlu0 %3437  ;;  %16516 = vmatprep.mubr.msk.f32.mxu1 %vm17186_vm1, %v24569_v12 }
 0x3cf   : > { %v12292_v41 = vrot.slane %v11340_v27, %v24497_v36  ;;  %v11237_v19 = vadd.f32 %v20940_v11, %v24594_v0  ;;  %v21518_v43 = vadd.f32 %v20940_v11, %v24595_v32  ;;  %16957 = vrcp.f32 %v21470_v3  ;;  %16524 = vmatprep.subr.mxu1 %v24569_v12 }
 0x3d0   : > { %v16952_v58 = vpop.eup %16951  ;;  %v3581_v59 = vmul.f32 %v16948_v1, %v3549_v9  ;;  %v3548_v14 = vsub.f32 2.0, %v3516_v13  ;;  %v21526_v24 = vpop.xlane.xlu1 %3422  ;;  %v21530_v32 = vadd.f32 %v20940_v11, %v24596_v57  ;;  %v11872_v31 = vrot.slane %v11235_v51, %v24497_v36  ;;  %v24598_v9 = vld [vmem:[#allocation40_spill] sm:$0xff] }
 0x3d1   : > { %11021 = vadd.xlane.f32.xlu0 %v24593_v23  ;;  %v12785_v23 = vsel %vm12739_vm6, %v11920_v26, %v12784_v21  ;;  %v3519_v27 = vmul.f32 %v16952_v58, %v21414_v33  ;;  %v16954_v0 = vpop.eup %16953  ;;  %v11876_v4 = vrot.slane %v11236_v40, %v24497_v36  ;;  %v24597_v16 = vsub.f32 %v21106_v46, %v20965_v62 }
 0x3d2   : > { %v21539_v26 = vmul.f32 %v24598_v9, %v3581_v59  ;;  %v3580_v33 = vmul.f32 %v16950_v54, %v3548_v14  ;;  %v3518_v13 = vmul.f32 %v16954_v0, %v21429_v29  ;;  %v21543_v57 = vpop.xlane.xlu0 %3443  ;;  %v21546_v51 = vsel %vm12733_vm3, %v12292_v41, %v12288_v15  ;;  %v24601_v59 = vld [vmem:[#allocation9_spill] sm:$0xff]  ;;  %v24602_v41 = vld [vmem:[#allocation148_spill] sm:$0xff] }
 0x3d3   : > { %v9837_v1 = vadd.f32 %v21020_v56, %v24597_v16  ;;  %v3551_v21 = vsub.f32 2.0, %v3519_v27  ;;  %v16956_v35 = vpop.eup %16955  ;;  %24600 = vst [vmem:[#allocation31_spill] sm:$0xff] %v21546_v51  ;;  %v21550_v46 = vadd.f32 %v20940_v11, %v21295_v39  ;;  %v12786_v16 = vsel %vm12741_vm7, %v11924_v38, %v12785_v23  ;;  %v24605_v9 = vld [vmem:[#allocation125_spill] sm:$0xff] }
 0x3d4   : > { %v21554_v54 = vmul.f32 %v24601_v59, %v3580_v33  ;;  %v11880_v29 = vrot.slane %v11237_v19, %v24497_v36  ;;  %16517 = vmatmul.mubr.msk.f32.vlgmr.msra.gmra.mrb[52].mxu1 %vm3192_vm2, %v21539_v26  ;;  %v21559_v27 = vpop.xlane.xlu1 %3428  ;;  %v12775_v15 = vsel %vm12733_vm3, %v11876_v4, %v11872_v31  ;;  %v11259_v39 = vadd.f32 %v20940_v11, %v24602_v41  ;;  %v24607_v4 = vld [vmem:[#allocation39_spill] sm:$0xff] }
 0x3d5   : > { %10988 = vadd.xlane.f32.xlu0 %v24599_v7  ;;  %v10093_v40 = vmax.f32 %v9837_v1, 0.0  ;;  %v3583_v14 = vmul.f32 %v16952_v58, %v3551_v21  ;;  %v3550_v7 = vsub.f32 2.0, %v3518_v13  ;;  %v3521_v38 = vmul.f32 %v16956_v35, %v21447_v8  ;;  %v24603_v1 = vld [vmem:[#allocation62_spill] sm:$0xff]  ;;  %v24606_v13 = vld [vmem:[#allocation143_spill] sm:$0xff]  ;;  %16526 = vmatprep.mubr.msk.f32.mxu1 %vm17186_vm1, %v24569_v12 }
 0x3d6   : > { %16525 = vmatpush3.msra.mxu1 %v24603_v1  ;;  %v24604_v58 = vld [vmem:[#allocation118_spill] sm:$0xff]  ;;  %v21573_v33 = vadd.f32 %v20940_v11, %v24605_v9  ;;  %v11260_v31 = vadd.f32 %v20940_v11, %v24606_v13  ;;  %v21578_v59 = vpop.xlane.xlu0 %3413  ;;  %v21582_v8 = vadd.f32 %v20940_v11, %v21323_v53  ;;  %16512 = vmatmul.mubr.msk.f32.vlgmr.msra.gmra.mrb[50].mxu0 %vm3192_vm2, %v21554_v54  ;;  %v24609_v9 = vld [vmem:[#allocation121_spill] sm:$0xff]  ;;  %16959 = vrcp.f32 %v21493_v22 }
 0x3d7   : > { %v10356_v23 = vmul.f32 %v21276_v34, %v10093_v40  ;;  %v21569_v19 = vadd.f32 %v20940_v11, %v24604_v58  ;;  %v3582_v21 = vmul.f32 %v16954_v0, %v3550_v7  ;;  %v24608_v40 = vld [vmem:[#allocation124_spill] sm:$0xff]  ;;  %v3553_v1 = vsub.f32 2.0, %v3521_v38  ;;  %16534 = vmatprep.subr.mxu1 %v24569_v12  ;;  %16521 = vmatprep.mubr.msk.f32.mxu0 %vm17186_vm1, %v24569_v12 }
 0x3d8   : > { %v21585_v41 = vmul.f32 %v24608_v40, %v3583_v14  ;;  %v12320_v0 = vrot.slane %v21550_v46, %v24497_v36  ;;  %v12787_v7 = vsel %vm12743_vm8, %v11928_v60, %v12786_v16  ;;  %v21597_v53 = vadd.f32 %v20940_v11, %v24609_v9  ;;  %v21600_v38 = vpop.xlane.xlu1 %10859  ;;  %v24611_v46 = vld [vmem:[#allocation150_spill] sm:$0xff]  ;;  %v24612_v40 = vld [vmem:[#allocation63_spill] sm:$0xff] }
 0x3d9   : > { %11024 = vadd.xlane.f32.xlu0 %v24607_v4  ;;  %v11002_v58 = vsel %vm406_vm0, %v10356_v23, 0.0  ;;  %v12776_v14 = vsel %vm12735_vm4, %v11880_v29, %v12775_v15  ;;  %v16958_v23 = vpop.eup %16957  ;;  %v21604_v13 = vmul.f32 %v21340_v25, %v21307_v45  ;;  %v11884_v4 = vrot.slane %v21518_v43, %v24497_v36  ;;  %16520 = vmatpush3.msra.mxu0 %v24612_v40  ;;  %v24613_v9 = vld [vmem:[#allocation195_spill] sm:$0xff] }
 0x3da   : > { %11003 = vadd.xlane.f32.xlu1 %v11002_v58  ;;  %v11261_v60 = vadd.f32 %v20940_v11, %v24611_v46  ;;  %v11968_v16 = vrot.slane %v11259_v39, %v24497_v36  ;;  %v21613_v29 = vmul.f32 %v24613_v9, %v3582_v21  ;;  %v11972_v15 = vrot.slane %v11260_v31, %v24497_v36  ;;  %v21618_v45 = vpop.xlane.xlu0 %3449  ;;  %v24616_v46 = vld [vmem:[#allocation64_spill] sm:$0xff]  ;;  %v24619_v9 = vld [vmem:[#allocation130_spill] sm:$0xff] }
 0x3db   : > { %24610 = vst [vmem:[#allocation7_spill] sm:$0xff] %v21604_v13  ;;  %v3585_v58 = vmul.f32 %v16956_v35, %v3553_v1  ;;  %v3520_v51 = vmul.f32 %v16958_v23, %v21470_v3  ;;  %v12324_v25 = vrot.slane %v21582_v8, %v24497_v36  ;;  %v11335_v43 = vadd.f32 %v20940_v11, %v21356_v17  ;;  %v24614_v35 = vld [vmem:[#allocation145_spill] sm:$0xff]  ;;  %v24617_v17 = vld [vmem:[#allocation134_spill] sm:$0xff] }
 0x3dc   : > { %v11888_v39 = vrot.slane %v21530_v32, %v24497_v36  ;;  %v12777_v21 = vsel %vm12737_vm5, %v11884_v4, %v12776_v14  ;;  %16527 = vmatmul.mubr.msk.f32.vlgmr.msra.gmra.mrb[54].mxu1 %vm3192_vm2, %v21585_v41  ;;  %v11262_v3 = vadd.f32 %v20940_v11, %v24614_v35  ;;  %v24615_v1 = vmax.f32 %v21148_v61, 0.0  ;;  %v21637_v32 = vpop.xlane.xlu1 %10862  ;;  %v24618_v4 = vld [vmem:[#allocation136_spill] sm:$0xff]  ;;  %16529 = vmatprep.subr.mxu0 %v24569_v12  ;;  %v24620_v61 = vld [vmem:[#allocation222_spill] sm:$0xff] }
 0x3dd   : > { %v3552_v31 = vsub.f32 2.0, %v3520_v51  ;;  %16535 = vmatpush3.msra.mxu1 %v24616_v46  ;;  %10991 = vadd.xlane.f32.xlu0 %v24617_v17  ;;  %v11976_v14 = vrot.slane %v11261_v60, %v24497_v36  ;;  %v11251_v40 = vadd.f32 %v20940_v11, %v24618_v4  ;;  %v11252_v51 = vadd.f32 %v20940_v11, %v24619_v9  ;;  %v24622_v46 = vld [vmem:[#allocation196_spill] sm:$0xff] }
 0x3de   : > { %v10357_v8 = vmul.f32 %v21276_v34, %v24615_v1  ;;  %v21649_v35 = vsel %vm406_vm0, %v24620_v61, 0.0  ;;  %v12796_v1 = vsel %vm12733_vm3, %v11972_v15, %v11968_v16  ;;  %v21653_v17 = vmul.f32 %v24622_v46, %v3585_v58  ;;  %16522 = vmatmul.mubr.msk.f32.vlgmr.msra.gmra.mrb[52].mxu0 %vm3192_vm2, %v21613_v29  ;;  %16536 = vmatprep.mubr.msk.f32.mxu1 %vm17186_vm1, %v24569_v12  ;;  %v21660_v9 = vpop.xlane.xlu0 %3455 }
 0x3df   : > { %24621 = vst [vmem:[#allocation52_spill] sm:$0xff] %v21649_v35  ;;  %v3584_v60 = vmul.f32 %v16958_v23, %v3552_v31  ;;  %v12272_v13 = vrot.slane %v11335_v43, %v24497_v36  ;;  %v21665_v61 = vadd.f32 %v20940_v11, %v21369_v10  ;;  %v24623_v16 = vrot.slane %v21467_v37, %v24497_v36  ;;  %v24624_v43 = vld [vmem:[#allocation13_spill] sm:$0xff]  ;;  %v24625_v10 = vld [vmem:[#allocation138_spill] sm:$0xff] }
 0x3e0   : > { %v11005_v4 = vsel %vm406_vm0, %v10357_v8, 0.0  ;;  %v12778_v15 = vsel %vm12739_vm6, %v11888_v39, %v12777_v21  ;;  %v11892_v58 = vrot.slane %v21569_v19, %v24497_v36  ;;  %v11896_v31 = vrot.slane %v21573_v33, %v24497_v36  ;;  %v24626_v35 = vld [vmem:[#allocation65_spill] sm:$0xff]  ;;  %v21683_v37 = vpop.xlane.xlu1 %10865  ;;  %16544 = vmatprep.subr.mxu1 %v24569_v12  ;;  %16537 = vmatmul.mubr.msk.f32.vlgmr.msra.gmra.mrb[56].mxu1 %vm3192_vm2, %v21653_v17 }
 0x3e1   : > { %v21671_v23 = vsel %vm12745_vm9, %v24623_v16, %v12787_v7  ;;  %11006 = vadd.xlane.f32.xlu1 %v11005_v4  ;;  %v11263_v8 = vadd.f32 %v20940_v11, %v24624_v43  ;;  %v11253_v46 = vadd.f32 %v20940_v11, %v24625_v10  ;;  %16530 = vmatpush3.msra.mxu0 %v24626_v35  ;;  %v24628_v19 = vld [vmem:[#allocation197_spill] sm:$0xff]  ;;  %16961 = vrcp.f32 %v21526_v24 }
 0x3e2   : > { %24627 = vst [vmem:[#allocation79_spill] sm:$0xff] %v21683_v37  ;;  %v12797_v7 = vsel %vm12735_vm4, %v11976_v14, %v12796_v1  ;;  %v11936_v39 = vrot.slane %v11251_v40, %v24497_v36  ;;  %v11940_v21 = vrot.slane %v11252_v51, %v24497_v36  ;;  %v21689_v4 = vmul.f32 %v24628_v19, %v3584_v60  ;;  %v21701_v14 = vpop.xlane.xlu0 %3419  ;;  %v24631_v1 = vld [vmem:[#allocation14_spill] sm:$0xff]  ;;  %v24641_v51 = vld [vmem:[#allocation67_spill] sm:$0xff] }
 0x3e3   : > { %v21693_v33 = vsel %vm12733_vm3, %v12324_v25, %v12320_v0  ;;  %v11900_v16 = vrot.slane %v21597_v53, %v24497_v36  ;;  %v12779_v35 = vsel %vm12741_vm7, %v11892_v58, %v12778_v15  ;;  %v11980_v43 = vrot.slane %v11262_v3, %v24497_v36  ;;  %v24630_v0 = vld [vmem:[#allocation149_spill] sm:$0xff]  ;;  %v24632_v60 = vld [vmem:[#allocation66_spill] sm:$0xff]  ;;  %v24634_v58 = vld [vmem:[#allocation216_spill] sm:$0xff]  ;;  %16531 = vmatprep.mubr.msk.f32.mxu0 %vm17186_vm1, %v24569_v12 }
 0x3e4   : > { %24629 = vst [vmem:[#allocation33_spill] sm:$0xff] %v21693_v33  ;;  %v12862_v40 = vsel %vm12739_vm6, %v12272_v13, %v21333_v5  ;;  %v11264_v25 = vadd.f32 %v20940_v11, %v24630_v0  ;;  %v11265_v53 = vadd.f32 %v20940_v11, %v24631_v1  ;;  %16545 = vmatpush3.msra.mxu1 %v24632_v60  ;;  %v21722_v10 = vpop.xlane.xlu1 %10898  ;;  %v24636_v0 = vld [vmem:[#allocation133_spill] sm:$0xff]  ;;  %v16960_v60 = vpop.eup %16959  ;;  %v24643_v37 = vld [vmem:[#allocation54_spill] sm:$0xff]  ;;  %16963 = vrcp.f32 %v21559_v27 }
 0x3e5   : > { %v12798_v3 = vsel %vm12737_vm5, %v11980_v43, %v12797_v7  ;;  %v11944_v15 = vrot.slane %v11253_v46, %v24497_v36  ;;  %v24633_v5 = vrot.slane %v21110_v52, %v17897_v48  ;;  %11027 = vadd.xlane.f32.xlu0 %v24634_v58  ;;  %24635 = vst [vmem:[#allocation76_spill] sm:$0xff] %v21722_v10  ;;  %v24637_v43 = vld [vmem:[#allocation224_spill] sm:$0xff]  ;;  %v24642_v10 = vld [vmem:[#allocation153_spill] sm:$0xff]  ;;  %16965 = vrcp.f32 %v21511_v42 }
 0x3e6   : > { %v11984_v19 = vrot.slane %v11263_v8, %v24497_v36  ;;  %v11254_v7 = vadd.f32 %v20940_v11, %v24636_v0  ;;  %v12789_v46 = vsel %vm12733_vm3, %v11940_v21, %v11936_v39  ;;  %16539 = vmatprep.subr.mxu0 %v24569_v12  ;;  %16532 = vmatmul.mubr.msk.f32.vlgmr.msra.gmra.mrb[54].mxu0 %vm3192_vm2, %v21689_v4  ;;  %v21733_v1 = vsel %vm406_vm0, %v24637_v43, 0.0  ;;  %v24640_v0 = vld [vmem:[#allocation10_spill] sm:$0xff]  ;;  %v21744_v33 = vpop.xlane.xlu0 %3461 }
 0x3e7   : > { %v9576_v13 = vsub.f32 %v24633_v5, %v20965_v62  ;;  %24638 = vst [vmem:[#allocation81_spill] sm:$0xff] %v21733_v1  ;;  %v24639_v5 = vrot.slane %v21418_v49, %v24497_v36  ;;  %v12780_v58 = vsel %vm12743_vm8, %v11896_v31, %v12779_v35  ;;  %v11266_v39 = vadd.f32 %v20940_v11, %v24640_v0 }
 0x3e8   : > { %16540 = vmatpush3.msra.mxu0 %v24641_v51  ;;  %v12799_v43 = vsel %vm12739_vm6, %v11984_v19, %v12798_v3  ;;  %v11275_v1 = vadd.f32 %v20940_v11, %v24642_v10  ;;  %v11276_v49 = vadd.f32 %v20940_v11, %v24643_v37  ;;  %16546 = vmatprep.mubr.msk.f32.mxu1 %vm17186_vm1, %v24569_v12  ;;  %v21760_v3 = vpop.xlane.xlu1 %10922  ;;  %16967 = vrcp.f32 %v21578_v59 }
 0x3e9   : > { %v12863_v8 = vsel %vm12741_vm7, %v24639_v5, %v12862_v40  ;;  %v9839_v21 = vadd.f32 %v21020_v56, %v9576_v13  ;;  %v3523_v40 = vmul.f32 %v16960_v60, %v21493_v22  ;;  %v11988_v31 = vrot.slane %v11264_v25, %v24497_v36  ;;  %v24644_v56 = vld [vmem:[#allocation142_spill] sm:$0xff]  ;;  %16554 = vmatprep.subr.mxu1 %v24569_v12 }
 0x3ea   : > { %v11255_v35 = vadd.f32 %v20940_v11, %v24644_v56  ;;  %v12790_v51 = vsel %vm12735_vm4, %v11944_v15, %v12789_v46  ;;  %11030 = vadd.xlane.f32.xlu0 %v21044_v28  ;;  %v11992_v37 = vrot.slane %v11265_v53, %v24497_v36  ;;  %v11948_v22 = vrot.slane %v11254_v7, %v24497_v36  ;;  %v24645_v15 = vld [vmem:[#allocation137_spill] sm:$0xff]  ;;  %v24646_v28 = vld [vmem:[#allocation155_spill] sm:$0xff]  ;;  %v21774_v5 = vpop.xlane.xlu0 %3467 }
 0x3eb   : > { %v10095_v13 = vmax.f32 %v9839_v21, 0.0  ;;  %v3555_v10 = vsub.f32 2.0, %v3523_v40  ;;  %16541 = vmatprep.mubr.msk.f32.mxu0 %vm17186_vm1, %v24569_v12  ;;  %16549 = vmatprep.subr.mxu0 %v24569_v12  ;;  %v12800_v25 = vsel %vm12741_vm7, %v11988_v31, %v12799_v43  ;;  %v11256_v19 = vadd.f32 %v20940_v11, %v24645_v15 }
 0x3ec   : > { %v11277_v46 = vadd.f32 %v20940_v11, %v24646_v28  ;;  %v12791_v7 = vsel %vm12737_vm5, %v11948_v22, %v12790_v51  ;;  %v12032_v0 = vrot.slane %v11275_v1, %v24497_v36  ;;  %v12036_v21 = vrot.slane %v11276_v49, %v24497_v36  ;;  %v24647_v22 = vld [vmem:[#allocation144_spill] sm:$0xff]  ;;  %v24648_v49 = vld [vmem:[#allocation139_spill] sm:$0xff] }
 0x3ed   : > { %v10358_v53 = vmul.f32 %v21276_v34, %v10095_v13  ;;  %v3587_v40 = vmul.f32 %v16960_v60, %v3555_v10  ;;  %v21780_v56 = vsel %vm12745_vm9, %v11900_v16, %v12780_v58  ;;  %v11996_v43 = vrot.slane %v11266_v39, %v24497_v36  ;;  %v21786_v13 = vpop.xlane.xlu1 %10868  ;;  %v24649_v16 = vld [vmem:[#allocation198_spill] sm:$0xff]  ;;  %v16962_v39 = vpop.eup %16961 }
 0x3ee   : > { %v11952_v31 = vrot.slane %v11255_v35, %v24497_v36  ;;  %11033 = vadd.xlane.f32.xlu0 %v21078_v50  ;;  %v12801_v51 = vsel %vm12743_vm8, %v11992_v37, %v12800_v25  ;;  %v11257_v1 = vadd.f32 %v20940_v11, %v24647_v22  ;;  %v11258_v60 = vadd.f32 %v20940_v11, %v24648_v49  ;;  %v24650_v50 = vld [vmem:[#allocation169_spill] sm:$0xff]  ;;  %v21802_v25 = vpop.xlane.xlu0 %3425  ;;  %v24652_v49 = vld [vmem:[#allocation152_spill] sm:$0xff] }
 0x3ef   : > { %v11008_v15 = vsel %vm406_vm0, %v10358_v53, 0.0  ;;  %v21794_v58 = vmul.f32 %v24649_v16, %v3587_v40  ;;  %v12040_v10 = vrot.slane %v11277_v46, %v24497_v36  ;;  %v11291_v28 = vadd.f32 %v20940_v11, %v24650_v50  ;;  %v24651_v53 = vld [vmem:[#allocation166_spill] sm:$0xff] }
 0x3f0   : > { %11009 = vadd.xlane.f32.xlu1 %v11008_v15  ;;  %v12792_v35 = vsel %vm12739_vm6, %v11952_v31, %v12791_v7  ;;  %v11292_v37 = vadd.f32 %v20940_v11, %v24651_v53  ;;  %v11956_v22 = vrot.slane %v11256_v19, %v24497_v36  ;;  %v11278_v40 = vadd.f32 %v20940_v11, %v24652_v49 }
 0x3f1   : > { %v12810_v15 = vsel %vm12733_vm3, %v12036_v21, %v12032_v0  ;;  %v3525_v16 = vmul.f32 %v16962_v39, %v21526_v24  ;;  %16547 = vmatmul.mubr.msk.f32.vlgmr.msra.gmra.mrb[58].mxu1 %vm3192_vm2, %v21794_v58  ;;  %v21813_v46 = vmul.f32 %v21352_v63, %v21425_v18  ;;  %v21817_v7 = vmul.f32 %v21392_v20, %v21459_v30  ;;  %v24656_v0 = vld [vmem:[#allocation157_spill] sm:$0xff]  ;;  %v24657_v21 = vld [vmem:[#allocation68_spill] sm:$0xff]  ;;  %v24658_v18 = vld [vmem:[#allocation171_spill] sm:$0xff] }
 0x3f2   : > { %v24655_v19 = vrot.slane %v21665_v61, %v24497_v36  ;;  %v11279_v24 = vadd.f32 %v20940_v11, %v24656_v0  ;;  %16555 = vmatpush3.msra.mxu1 %v24657_v21  ;;  %v21829_v50 = vsel %vm12745_vm9, %v11996_v43, %v12801_v51  ;;  %v12793_v63 = vsel %vm12741_vm7, %v11956_v22, %v12792_v35  ;;  %v21841_v51 = vpop.xlane.xlu1 %3434  ;;  %v21843_v35 = vpop.xlane.xlu0 %3473 }
 0x3f3   : > { %24653 = vst [vmem:[#allocation103_spill] sm:$0xff] %v21813_v46  ;;  %24654 = vst [vmem:[#allocation78_spill] sm:$0xff] %v21817_v7  ;;  %v11293_v20 = vadd.f32 %v20940_v11, %v24658_v18  ;;  %v3557_v30 = vsub.f32 2.0, %v3525_v16  ;;  %16556 = vmatprep.mubr.msk.f32.mxu1 %vm17186_vm1, %v24569_v12  ;;  %16564 = vmatprep.subr.mxu1 %v24569_v12  ;;  %v11960_v61 = vrot.slane %v11257_v1, %v24497_v36  ;;  %v16964_v22 = vpop.eup %16963  ;;  %v24685_v7 = vld [vmem:[#allocation119_spill] sm:$0xff] }
 0x3f4   : > { %v21823_v31 = vsel %vm12743_vm8, %v24655_v19, %v12863_v8  ;;  %v12811_v8 = vsel %vm12735_vm4, %v12040_v10, %v12810_v15  ;;  %v12096_v53 = vrot.slane %v11291_v28, %v24497_v36  ;;  %v12100_v43 = vrot.slane %v11292_v37, %v24497_v36  ;;  %24659 = vst [vmem:[#allocation83_spill] sm:$0xff] %v21843_v35  ;;  %v24661_v15 = vld [vmem:[#allocation154_spill] sm:$0xff] }
 0x3f5   : > { %v21847_v49 = vmul.f32 %v21480_v44, %v21539_v26  ;;  %v11964_v16 = vrot.slane %v11258_v60, %v24497_v36  ;;  %v12044_v19 = vrot.slane %v11278_v40, %v24497_v36  ;;  %v3589_v1 = vmul.f32 %v16962_v39, %v3557_v30  ;;  %v24662_v26 = vld [vmem:[#allocation200_spill] sm:$0xff] }
 0x3f6   : > { %v12794_v10 = vsel %vm12743_vm8, %v11960_v61, %v12793_v63  ;;  %v11280_v28 = vadd.f32 %v20940_v11, %v24661_v15  ;;  %v12048_v37 = vrot.slane %v11279_v24, %v24497_v36  ;;  %v3527_v0 = vmul.f32 %v16964_v22, %v21559_v27  ;;  %v24663_v40 = vld [vmem:[#allocation168_spill] sm:$0xff]  ;;  %v21866_v24 = vpop.xlane.xlu1 %3440  ;;  %v21868_v27 = vpop.xlane.xlu0 %3479  ;;  %v24666_v61 = vld [vmem:[#allocation159_spill] sm:$0xff] }
 0x3f7   : > { %24660 = vst [vmem:[#allocation80_spill] sm:$0xff] %v21847_v49  ;;  %v12812_v21 = vsel %vm12737_vm5, %v12044_v19, %v12811_v8  ;;  %v12104_v44 = vrot.slane %v11293_v20, %v24497_v36  ;;  %v21860_v60 = vmul.f32 %v24662_v26, %v3589_v1  ;;  %v11294_v39 = vadd.f32 %v20940_v11, %v24663_v40 }
 0x3f8   : > { %v12824_v63 = vsel %vm12733_vm3, %v12100_v43, %v12096_v53  ;;  %v3559_v18 = vsub.f32 2.0, %v3527_v0  ;;  %24664 = vst [vmem:[#allocation57_spill] sm:$0xff] %v21868_v27  ;;  %v21872_v30 = vmul.f32 %v21489_v55, %v21554_v54  ;;  %v12795_v20 = vsel %vm12745_vm9, %v11964_v16, %v12794_v10  ;;  %v24667_v53 = vld [vmem:[#allocation156_spill] sm:$0xff]  ;;  %v24670_v0 = vld [vmem:[#allocation173_spill] sm:$0xff] }
 0x3f9   : > { %v11281_v8 = vadd.f32 %v20940_v11, %v24666_v61  ;;  %v21879_v19 = vrot.slane %v21091_v2, %v17868_v47  ;;  %16557 = vmatmul.mubr.msk.f32.vlgmr.msra.gmra.mrb[60].mxu1 %vm3192_vm2, %v21860_v60  ;;  %v21885_v43 = vadd.f32 %v20940_v11, %v24667_v53  ;;  %v12813_v1 = vsel %vm12739_vm6, %v12048_v37, %v12812_v21  ;;  %v24668_v54 = vld [vmem:[#allocation24_spill] sm:$0xff] }
 0x3fa   : > { %24665 = vst [vmem:[#allocation194_spill] sm:$0xff] %v21872_v30  ;;  %v3591_v55 = vmul.f32 %v16964_v22, %v3559_v18  ;;  %16565 = vmatpush3.msra.mxu1 %v24668_v54  ;;  %16566 = vmatprep.mubr.msk.f32.mxu1 %vm17186_vm1, %v24569_v12  ;;  %v24669_v16 = vld [vmem:[#allocation184_spill] sm:$0xff]  ;;  %v12052_v15 = vrot.slane %v11280_v28, %v24497_v36  ;;  %v24672_v18 = vld [vmem:[#allocation202_spill] sm:$0xff]  ;;  %v21912_v53 = vpop.xlane.xlu1 %3446  ;;  %16969 = vrcp.f32 %v21701_v14 }
 0x3fb   : > { %v21893_v10 = vsel %vm406_vm0, %v24669_v16, 0.0  ;;  %v11295_v26 = vadd.f32 %v20940_v11, %v24670_v0  ;;  %v12825_v40 = vsel %vm12735_vm4, %v12104_v44, %v12824_v63  ;;  %v7828_v37 = vrot.slane %v21879_v19, %v17868_v47  ;;  %16574 = vmatprep.subr.mxu1 %v24569_v12  ;;  %v21914_v44 = vpop.xlane.xlu0 %3431  ;;  %v24675_v16 = vld [vmem:[#allocation175_spill] sm:$0xff] }
 0x3fc   : > { %v21904_v22 = vmul.f32 %v21671_v23, %v21585_v41  ;;  %v12108_v21 = vrot.slane %v11294_v39, %v24497_v36  ;;  %v21908_v61 = vmul.f32 %v24672_v18, %v3591_v55  ;;  %v7753_v28 = vcombine.high %v21040_v6, %v21040_v6  ;;  %v24674_v39 = vld [vmem:[#allocation170_spill] sm:$0xff] }
 0x3fd   : > { %v21918_v63 = vmul.f32 %v21780_v56, %v21613_v29  ;;  %v12056_v54 = vrot.slane %v11281_v8, %v24497_v36  ;;  %v12814_v41 = vsel %vm12741_vm7, %v12052_v15, %v12813_v1  ;;  %v8934_v23 = vrot.slane %v7828_v37, %v17897_v48  ;;  %v24676_v8 = vld [vmem:[#allocation100_spill] sm:$0xff] }
 0x3fe   : > { %24671 = vst [vmem:[#allocation86_spill] sm:$0xff] %v21904_v22  ;;  %v11296_v55 = vadd.f32 %v20940_v11, %v24674_v39  ;;  %v11297_v6 = vadd.f32 %v20940_v11, %v24675_v16  ;;  %v12826_v0 = vsel %vm12737_vm5, %v12108_v21, %v12825_v40  ;;  %v8894_v18 = vrot.slane %v7753_v28, %v17897_v48  ;;  %v24677_v39 = vld [vmem:[#allocation43_spill] sm:$0xff] }
 0x3ff   : > { %24673 = vst [vmem:[#allocation71_spill] sm:$0xff] %v21918_v63  ;;  %16567 = vmatmul.mubr.msk.f32.vlgmr.msra.gmra.mrb[62].mxu1 %vm3192_vm2, %v21908_v61  ;;  %v12060_v29 = vrot.slane %v21885_v43, %v24497_v36  ;;  %v12112_v56 = vrot.slane %v11295_v26, %v24497_v36  ;;  %v11307_v1 = vadd.f32 %v20940_v11, %v24676_v8  ;;  %v24679_v28 = vld [vmem:[#allocation47_spill] sm:$0xff]  ;;  %v21946_v63 = vpop.xlane.xlu1 %3452  ;;  %v21948_v26 = vpop.xlane.xlu0 %10856  ;;  %16971 = vrcp.f32 %v21543_v57 }
 0x400   : > { %v9587_v15 = vsub.f32 %v8934_v23, %v21091_v2  ;;  %16575 = vmatpush3.msra.mxu1 %v24677_v39  ;;  %v21940_v40 = vmul.f32 %v21829_v50, %v21653_v17  ;;  %v12815_v21 = vsel %vm12743_vm8, %v12056_v54, %v12814_v41  ;;  %v11308_v16 = vadd.f32 %v20940_v11, %v24679_v28  ;;  %v16966_v23 = vpop.eup %16965  ;;  %v24681_v17 = vld [vmem:[#allocation172_spill] sm:$0xff]  ;;  %v21961_v41 = vld [vmem:[%s23953_s5] ss:$0 sm:$0xff] }
 0x401   : > { %v9577_v43 = vsub.f32 %v8894_v18, %v20965_v62  ;;  %16576 = vmatprep.mubr.msk.f32.mxu1 %vm17186_vm1, %v24569_v12  ;;  %v21953_v8 = vmul.f32 %v12795_v20, %v21689_v4  ;;  %v11298_v50 = vadd.f32 %v20940_v11, %v24681_v17  ;;  %v12827_v54 = vsel %vm12739_vm6, %v12112_v56, %v12826_v0  ;;  %v16968_v39 = vpop.eup %16967  ;;  %v24682_v20 = vld [vmem:[#allocation106_spill] sm:$0xff]  ;;  %v24683_v17 = vld [vmem:[#allocation113_spill] sm:$0xff] }
 0x402   : > { %24678 = vst [vmem:[#allocation58_spill] sm:$0xff] %v21940_v40  ;;  %v9850_v18 = vadd.f32 %v21961_v41, %v9587_v15  ;;  %16584 = vmatprep.subr.mxu1 %v24569_v12  ;;  %v12116_v28 = vrot.slane %v11296_v55, %v24497_v36  ;;  %v12120_v4 = vrot.slane %v11297_v6, %v24497_v36  ;;  %16973 = vrcp.f32 %v21802_v25 }
 0x403   : > { %24680 = vst [vmem:[#allocation73_spill] sm:$0xff] %v21953_v8  ;;  %v11309_v8 = vadd.f32 %v20940_v11, %v24682_v20  ;;  %v21971_v0 = vadd.f32 %v20940_v11, %v24683_v17  ;;  %v12160_v56 = vrot.slane %v11307_v1, %v24497_v36  ;;  %v3522_v30 = vmul.f32 %v16968_v39, %v21578_v59  ;;  %v21979_v49 = vpop.xlane.xlu1 %3458  ;;  %v21981_v20 = vpop.xlane.xlu0 %10880 }
 0x404   : > { %v10106_v40 = vmax.f32 %v9850_v18, 0.0  ;;  %v9840_v15 = vadd.f32 %v21961_v41, %v9577_v43  ;;  %v12828_v22 = vsel %vm12741_vm7, %v12116_v28, %v12827_v54  ;;  %v12164_v55 = vrot.slane %v11308_v16, %v24497_v36  ;;  %24684 = vst [vmem:[#allocation37_spill] sm:$0xff] %v21981_v20 }
 0x405   : > { %v7850_v6 = vcombine.high %v7828_v37, %v7828_v37  ;;  %v3530_v17 = vmul.f32 %v16966_v23, %v21511_v42  ;;  %v21986_v1 = vadd.f32 %v20940_v11, %v24685_v7  ;;  %v3554_v59 = vsub.f32 2.0, %v3522_v30  ;;  %v24686_v30 = vld [vmem:[#allocation131_spill] sm:$0xff] }
 0x406   : > { %v10369_v43 = vmul.f32 %v21276_v34, %v10106_v40  ;;  %v21990_v54 = vsel %vm12745_vm9, %v12060_v29, %v12815_v21  ;;  %v12168_v37 = vrot.slane %v11309_v8, %v24497_v36  ;;  %v12829_v18 = vsel %vm12743_vm8, %v12120_v4, %v12828_v22 }
 0x407   : > { %v8942_v16 = vrot.slane %v7850_v6, %v17897_v48  ;;  %v3586_v28 = vmul.f32 %v16968_v39, %v3554_v59  ;;  %v10096_v20 = vmax.f32 %v9840_v15, 0.0  ;;  %v12124_v7 = vrot.slane %v11298_v50, %v24497_v36  ;;  %v22002_v46 = vpop.xlane.xlu1 %3464  ;;  %v22004_v8 = vpop.xlane.xlu0 %10847  ;;  %v24687_v50 = vld [vmem:[#allocation147_spill] sm:$0xff] }
 0x408   : > { %v11041_v42 = vsel %vm406_vm0, %v10369_v43, 0.0  ;;  %v11310_v40 = vadd.f32 %v20940_v11, %v24686_v30  ;;  %v12838_v29 = vsel %vm12733_vm3, %v12164_v55, %v12160_v56  ;;  %v3562_v6 = vsub.f32 2.0, %v3530_v17  ;;  %v24688_v56 = vld [vmem:[#allocation17_spill] sm:$0xff]  ;;  %v24689_v59 = vld [vmem:[#allocation15_spill] sm:$0xff] }
 0x409   : > { %11042 = vadd.xlane.f32.xlu1 %v11041_v42  ;;  %v9589_v21 = vsub.f32 %v8942_v16, %v21091_v2  ;;  %v12176_v22 = vrot.slane %v21971_v0, %v24497_v36  ;;  %v22011_v4 = vmul.f32 %v24687_v50, %v3586_v28  ;;  %v22014_v15 = vsel %vm12745_vm9, %v12124_v7, %v12829_v18  ;;  %v24690_v16 = vld [vmem:[#allocation214_spill] sm:$0xff]  ;;  %v24691_v18 = vld [vmem:[#allocation140_spill] sm:$0xff] }
 0x40a   : > { %v11267_v55 = vadd.f32 %v20940_v11, %v24688_v56  ;;  %v11268_v43 = vadd.f32 %v20940_v11, %v24689_v59  ;;  %v11312_v0 = vadd.f32 %v20940_v11, %v24690_v16  ;;  %v12839_v42 = vsel %vm12735_vm4, %v12168_v37, %v12838_v29  ;;  %v24693_v29 = vld [vmem:[#allocation69_spill] sm:$0xff]  ;;  %v24695_v16 = vld [vmem:[#allocation51_spill] sm:$0xff] }
 0x40b   : > { %v9852_v17 = vadd.f32 %v21961_v41, %v9589_v21  ;;  %v10359_v30 = vmul.f32 %v21276_v34, %v10096_v20  ;;  %v7755_v28 = vcombine.high %v21110_v52, %v21110_v52  ;;  %16542 = vmatmul.mubr.msk.f32.vlgmr.msra.gmra.mrb[56].mxu0 %vm3192_vm2, %v22011_v4  ;;  %v22031_v7 = vadd.f32 %v20940_v11, %v24691_v18  ;;  %v24692_v21 = vld [vmem:[#allocation215_spill] sm:$0xff]  ;;  %v22038_v20 = vpop.xlane.xlu1 %3470  ;;  %v22040_v52 = vpop.xlane.xlu0 %10883 }
 0x40c   : > { %v12172_v50 = vrot.slane %v11310_v40, %v24497_v36  ;;  %v7820_v37 = vcombine.high %v21879_v19, %v21879_v19  ;;  %16550 = vmatpush3.msra.mxu0 %v24693_v29  ;;  %24694 = vst [vmem:[#allocation107_spill] sm:$0xff] %v22040_v52  ;;  %v3594_v59 = vmul.f32 %v16966_v23, %v3562_v6  ;;  %v24696_v40 = vld [vmem:[#allocation226_spill] sm:$0xff]  ;;  %16975 = vrcp.f32 %v21841_v51 }
 0x40d   : > { %11066 = vadd.xlane.f32.xlu1 %v24692_v21  ;;  %v10108_v56 = vmax.f32 %v9852_v17, 0.0  ;;  %v11269_v39 = vadd.f32 %v20940_v11, %v24695_v16  ;;  %v8898_v18 = vrot.slane %v7755_v28, %v17897_v48  ;;  %16551 = vmatprep.mubr.msk.f32.mxu0 %vm17186_vm1, %v24569_v12  ;;  %v22050_v19 = vsel %vm406_vm0, %v24696_v40, 0.0  ;;  %v16970_v17 = vpop.eup %16969 }
 0x40e   : > { %16559 = vmatprep.subr.mxu0 %v24569_v12  ;;  %v12840_v21 = vsel %vm12737_vm5, %v12172_v50, %v12839_v42  ;;  %v12000_v29 = vrot.slane %v11267_v55, %v24497_v36  ;;  %v12004_v23 = vrot.slane %v11268_v43, %v24497_v36  ;;  %v7842_v6 = vrot.slane %v7820_v37, %v17868_v47  ;;  %v22060_v35 = vpop.eup %16971  ;;  %v24698_v37 = vld [vmem:[#allocation44_spill] sm:$0xff] }
 0x40f   : > { %v11011_v28 = vsel %vm406_vm0, %v10359_v30, 0.0  ;;  %v3524_v16 = vmul.f32 %v16970_v17, %v21701_v14  ;;  %v10371_v52 = vmul.f32 %v21276_v34, %v10108_v56  ;;  %v9578_v27 = vsub.f32 %v8898_v18, %v20965_v62  ;;  %v22066_v50 = vpop.xlane.xlu0 %10886  ;;  %v22071_v56 = vpop.xlane.xlu1 %3476 }
 0x410   : > { %v12180_v40 = vrot.slane %v11312_v0, %v24497_v36  ;;  %v12188_v42 = vrot.slane %v22031_v7, %v24497_v36  ;;  %v8938_v55 = vrot.slane %v7842_v6, %v17897_v48  ;;  %v7852_v43 = vcombine.high %v7842_v6, %v7842_v6  ;;  %24697 = vst [vmem:[#allocation102_spill] sm:$0xff] %v22066_v50 }
 0x411   : > { %11012 = vadd.xlane.f32.xlu1 %v11011_v28  ;;  %v12841_v30 = vsel %vm12739_vm6, %v12176_v22, %v12840_v21  ;;  %v12008_v14 = vrot.slane %v11269_v39, %v24497_v36  ;;  %v3556_v34 = vsub.f32 2.0, %v3524_v16  ;;  %v9841_v62 = vadd.f32 %v21961_v41, %v9578_v27  ;;  %v24699_v28 = vld [vmem:[#allocation199_spill] sm:$0xff] }
 0x412   : > { %v11270_v0 = vadd.f32 %v20940_v11, %v24698_v37  ;;  %v12803_v7 = vsel %vm12733_vm3, %v12004_v23, %v12000_v29  ;;  %v9588_v18 = vsub.f32 %v8938_v55, %v21091_v2  ;;  %v8946_v6 = vrot.slane %v7852_v43, %v17897_v48  ;;  %v24701_v55 = vld [vmem:[#allocation56_spill] sm:$0xff] }
 0x413   : > { %v22079_v50 = vmul.f32 %v24699_v28, %v3594_v59  ;;  %v3588_v22 = vmul.f32 %v16970_v17, %v3556_v34  ;;  %v11047_v39 = vsel %vm406_vm0, %v10371_v52, 0.0  ;;  %v10097_v21 = vmax.f32 %v9841_v62, 0.0  ;;  %v22087_v23 = vpop.xlane.xlu0 %10889  ;;  %v24702_v43 = vld [vmem:[#allocation204_spill] sm:$0xff] }
 0x414   : > { %v3532_v27 = vmul.f32 %v22060_v35, %v21543_v57  ;;  %v12842_v16 = vsel %vm12741_vm7, %v12180_v40, %v12841_v30  ;;  %v9851_v37 = vadd.f32 %v21961_v41, %v9588_v18  ;;  %v9590_v29 = vsub.f32 %v8946_v6, %v21091_v2  ;;  %24700 = vst [vmem:[#allocation82_spill] sm:$0xff] %v22087_v23  ;;  %v22098_v57 = vld [vmem:[%s23954_s6] ss:$0 sm:$0xff] }
 0x415   : > { %11048 = vadd.xlane.f32.xlu1 %v11047_v39  ;;  %v11271_v59 = vadd.f32 %v20940_v11, %v24701_v55  ;;  %v12804_v17 = vsel %vm12735_vm4, %v12008_v14, %v12803_v7  ;;  %v22093_v52 = vmul.f32 %v24702_v43, %v3588_v22  ;;  %v10360_v40 = vmul.f32 %v22098_v57, %v10097_v21  ;;  %v24706_v6 = vld [vmem:[#allocation45_spill] sm:$0xff]  ;;  %v24707_v22 = vld [vmem:[#allocation151_spill] sm:$0xff]  ;;  %v24711_v55 = vld [vmem:[#allocation48_spill] sm:$0xff] }
 0x416   : > { %v22103_v30 = vmul.f32 %v21990_v54, %v21794_v58  ;;  %v12012_v34 = vrot.slane %v11270_v0, %v24497_v36  ;;  %v10107_v62 = vmax.f32 %v9851_v37, 0.0  ;;  %v9853_v18 = vadd.f32 %v21961_v41, %v9590_v29  ;;  %v22118_v58 = vpop.xlane.xlu1 %10904  ;;  %v24709_v37 = vld [vmem:[#allocation70_spill] sm:$0xff]  ;;  %v24724_v23 = vld [vmem:[#allocation49_spill] sm:$0xff] }
 0x417   : > { %24703 = vst [vmem:[#allocation89_spill] sm:$0xff] %v22093_v52  ;;  %v24705_v14 = vrot.slane %v21986_v1, %v24497_v36  ;;  %v11272_v28 = vadd.f32 %v20940_v11, %v24706_v6  ;;  %v11273_v39 = vadd.f32 %v20940_v11, %v24707_v22  ;;  %v11014_v21 = vsel %vm406_vm0, %v10360_v40, 0.0  ;;  %16552 = vmatmul.mubr.msk.f32.vlgmr.msra.gmra.mrb[58].mxu0 %vm3192_vm2, %v22093_v52  ;;  %v22123_v29 = vpop.xlane.xlu0 %10901  ;;  %v24713_v6 = vld [vmem:[#allocation158_spill] sm:$0xff] }
 0x418   : > { %24704 = vst [vmem:[#allocation110_spill] sm:$0xff] %v22103_v30  ;;  %24708 = vst [vmem:[#allocation95_spill] sm:$0xff] %v22118_v58  ;;  %v3564_v54 = vsub.f32 2.0, %v3532_v27  ;;  %v12805_v0 = vsel %vm12737_vm5, %v12012_v34, %v12804_v17  ;;  %v10370_v1 = vmul.f32 %v22098_v57, %v10107_v62  ;;  %16560 = vmatpush3.msra.mxu0 %v24709_v37  ;;  %16561 = vmatprep.mubr.msk.f32.mxu0 %vm17186_vm1, %v24569_v12  ;;  %v24712_v34 = vld [vmem:[#allocation161_spill] sm:$0xff]  ;;  %v24723_v30 = vld [vmem:[#allocation160_spill] sm:$0xff] }
 0x419   : > { %v12843_v7 = vsel %vm12743_vm8, %v24705_v14, %v12842_v16  ;;  %11015 = vadd.xlane.f32.xlu1 %v11014_v21  ;;  %v10109_v16 = vmax.f32 %v9853_v18, 0.0  ;;  %24710 = vst [vmem:[#allocation90_spill] sm:$0xff] %v22123_v29  ;;  %v11274_v43 = vadd.f32 %v20940_v11, %v24711_v55  ;;  %v12016_v40 = vrot.slane %v11271_v59, %v24497_v36  ;;  %v24728_v52 = vld [vmem:[#allocation162_spill] sm:$0xff] }
 0x41a   : > { %v7805_v27 = vcombine.high %v21091_v2, %v21091_v2  ;;  %16569 = vmatprep.subr.mxu0 %v24569_v12  ;;  %v22135_v17 = vsel %vm12745_vm9, %v12188_v42, %v12843_v7  ;;  %v11283_v62 = vadd.f32 %v20940_v11, %v24712_v34  ;;  %v11044_v18 = vsel %vm406_vm0, %v10370_v1, 0.0  ;;  %v22155_v55 = vpop.xlane.xlu1 %10871 }
 0x41b   : > { %v10372_v59 = vmul.f32 %v22098_v57, %v10109_v16  ;;  %v12806_v14 = vsel %vm12739_vm6, %v12016_v40, %v12805_v0  ;;  %v11284_v22 = vadd.f32 %v20940_v11, %v24713_v6  ;;  %11045 = vadd.xlane.f32.xlu0 %v11044_v18  ;;  %v3596_v42 = vmul.f32 %v22060_v35, %v3564_v54  ;;  %v24715_v35 = vld [vmem:[#allocation163_spill] sm:$0xff] }
 0x41c   : > { %v7819_v21 = vrot.slane %v7805_v27, %v17868_v47  ;;  %v12020_v7 = vrot.slane %v11272_v28, %v24497_v36  ;;  %16977 = vrcp.f32 %v21618_v45  ;;  %v12024_v16 = vrot.slane %v11273_v39, %v24497_v36  ;;  %24714 = vst [vmem:[#allocation84_spill] sm:$0xff] %v22155_v55  ;;  %v24716_v27 = vld [vmem:[#allocation97_spill] sm:$0xff]  ;;  %v22165_v39 = vpop.xlane.xlu0 %10925 }
 0x41d   : > { %v11050_v1 = vsel %vm406_vm0, %v10372_v59, 0.0  ;;  %16979 = vrcp.f32 %v21866_v24  ;;  %v11285_v28 = vadd.f32 %v20940_v11, %v24715_v35  ;;  %v12064_v54 = vrot.slane %v11283_v62, %v24497_v36  ;;  %24717 = vst [vmem:[#allocation105_spill] sm:$0xff] %v22165_v39  ;;  %v24718_v59 = vld [vmem:[#allocation186_spill] sm:$0xff] }
 0x41e   : > { %11051 = vadd.xlane.f32.xlu1 %v11050_v1  ;;  %v22152_v0 = vrot.slane %v7819_v21, %v17868_v47  ;;  %v7821_v37 = vcombine.high %v7819_v21, %v7819_v21  ;;  %v12807_v40 = vsel %vm12741_vm7, %v12020_v7, %v12806_v14  ;;  %v22163_v34 = vrot.slane %v24716_v27, %v17868_v47  ;;  %v24719_v7 = vld [vmem:[#allocation201_spill] sm:$0xff] }
 0x41f   : > { %v12068_v18 = vrot.slane %v11284_v22, %v24497_v36  ;;  %11069 = vadd.xlane.f32.xlu0 %v24718_v59  ;;  %16981 = vrcp.f32 %v21912_v53  ;;  %v12028_v62 = vrot.slane %v11274_v43, %v24497_v36  ;;  %v22178_v21 = vadd.f32 %v20940_v11, %v21600_v38 }
 0x420   : > { %v8950_v6 = vrot.slane %v22152_v0, %v17897_v48  ;;  %v22172_v14 = vrot.slane %v7821_v37, %v17868_v47  ;;  %16983 = vrcp.f32 %v21660_v9  ;;  %v22183_v22 = vrot.slane %v22163_v34, %v17868_v47  ;;  %v22217_v29 = vpop.xlane.xlu0 %10892 }
 0x421   : > { %v22186_v1 = vmul.f32 %v24719_v7, %v3596_v42  ;;  %v22190_v37 = vadd.f32 %v20940_v11, %v21637_v32  ;;  %v22197_v38 = vmul.f32 %v22014_v15, %v21860_v60  ;;  %v12808_v59 = vsel %vm12743_vm8, %v12024_v16, %v12807_v40  ;;  %v16974_v7 = vpop.eup %16973  ;;  %v22209_v15 = vpop.xlane.xlu1 %10907  ;;  %v24726_v40 = vld [vmem:[#allocation165_spill] sm:$0xff]  ;;  %24727 = vst [vmem:[#allocation8_spill] sm:$0xff] %v22217_v29 }
 0x422   : > { %v9591_v35 = vsub.f32 %v8950_v6, %v21091_v2  ;;  %v8954_v43 = vrot.slane %v22172_v14, %v17897_v48  ;;  %v12072_v39 = vrot.slane %v11285_v28, %v24497_v36  ;;  %v8998_v42 = vrot.slane %v22183_v22, %v17897_v48  ;;  %24725 = vst [vmem:[#allocation91_spill] sm:$0xff] %v22209_v15 }
 0x423   : > { %24720 = vst [vmem:[#allocation98_spill] sm:$0xff] %v22186_v1  ;;  %24721 = vst [vmem:[#allocation92_spill] sm:$0xff] %v22190_v37  ;;  %v11286_v32 = vadd.f32 %v20940_v11, %v24723_v30  ;;  %v12817_v6 = vsel %vm12733_vm3, %v12068_v18, %v12064_v54  ;;  %11036 = vadd.xlane.f32.xlu0 %v24724_v23  ;;  %v11287_v28 = vadd.f32 %v20940_v11, %v24726_v40  ;;  %v16976_v54 = vpop.eup %16975  ;;  %v24729_v1 = vld [vmem:[#allocation188_spill] sm:$0xff] }
 0x424   : > { %24722 = vst [vmem:[#allocation87_spill] sm:$0xff] %v22197_v38  ;;  %v9854_v58 = vadd.f32 %v21961_v41, %v9591_v35  ;;  %v9592_v60 = vsub.f32 %v8954_v43, %v21091_v2  ;;  %v3526_v38 = vmul.f32 %v16974_v7, %v21802_v25  ;;  %v9603_v30 = vsub.f32 %v8998_v42, %v24716_v27 }
 0x425   : > { %v22220_v18 = vsel %vm12745_vm9, %v12028_v62, %v12808_v59  ;;  %v12818_v40 = vsel %vm12735_vm4, %v12072_v39, %v12817_v6  ;;  %v3529_v25 = vmul.f32 %v16976_v54, %v21841_v51  ;;  %v11288_v62 = vadd.f32 %v20940_v11, %v24728_v52 }
 0x426   : > { %v10110_v35 = vmax.f32 %v9854_v58, 0.0  ;;  %v9855_v43 = vadd.f32 %v21961_v41, %v9592_v60  ;;  %v22225_v16 = vpop.eup %16977  ;;  %v3558_v15 = vsub.f32 2.0, %v3526_v38  ;;  %v9866_v42 = vadd.f32 %v21961_v41, %v9603_v30 }
 0x427   : > { %v16980_v29 = vpop.eup %16979  ;;  %v12076_v59 = vrot.slane %v11286_v32, %v24497_v36  ;;  %11072 = vadd.xlane.f32.xlu0 %v24729_v1  ;;  %v12080_v60 = vrot.slane %v11287_v28, %v24497_v36  ;;  %v3561_v39 = vsub.f32 2.0, %v3529_v25  ;;  %v22240_v32 = vpop.xlane.xlu1 %10910  ;;  %v3534_v1 = vmul.f32 %v22225_v16, %v21618_v45  ;;  %v24730_v28 = vld [vmem:[#allocation179_spill] sm:$0xff]  ;;  %v24735_v45 = vld [vmem:[#allocation81_spill] sm:$0xff] }
 0x428   : > { %v10373_v23 = vmul.f32 %v22098_v57, %v10110_v35  ;;  %v10111_v58 = vmax.f32 %v9855_v43, 0.0  ;;  %v3590_v55 = vmul.f32 %v16974_v7, %v3558_v15  ;;  %v3531_v38 = vmul.f32 %v16980_v29, %v21866_v24  ;;  %v22249_v43 = vpop.xlane.xlu0 %10928  ;;  %v24733_v25 = vld [vmem:[#allocation167_spill] sm:$0xff] }
 0x429   : > { %v16982_v51 = vpop.eup %16981  ;;  %v12819_v6 = vsel %vm12737_vm5, %v12076_v59, %v12818_v40  ;;  %v10122_v37 = vmax.f32 %v9866_v42, 0.0  ;;  %v3593_v24 = vmul.f32 %v16976_v54, %v3561_v39  ;;  %24731 = vst [vmem:[#allocation108_spill] sm:$0xff] %v22249_v43  ;;  %v24732_v40 = vld [vmem:[#allocation79_spill] sm:$0xff]  ;;  %v11289_v42 = vadd.f32 %v20940_v11, %v24733_v25  ;;  %v24734_v59 = vld [vmem:[#allocation164_spill] sm:$0xff] }
 0x42a   : > { %v11053_v30 = vsel %vm406_vm0, %v10373_v23, 0.0  ;;  %v10374_v52 = vmul.f32 %v22098_v57, %v10111_v58  ;;  %v22242_v35 = vpop.eup %16983  ;;  %v22247_v7 = vmul.f32 %v24730_v28, %v3590_v55  ;;  %v3563_v15 = vsub.f32 2.0, %v3531_v38  ;;  %v24736_v38 = vld [vmem:[#allocation217_spill] sm:$0xff]  ;;  %v24737_v43 = vld [vmem:[#allocation23_spill] sm:$0xff] }
 0x42b   : > { %11054 = vadd.xlane.f32.xlu1 %v11053_v30  ;;  %v22253_v23 = vadd.f32 %v20940_v11, %v24732_v40  ;;  %v22259_v58 = vadd.f32 %v20940_v11, %v24734_v59  ;;  %11039 = vadd.xlane.f32.xlu0 %v24735_v45  ;;  %v3533_v55 = vmul.f32 %v16982_v51, %v21912_v53  ;;  %v3566_v53 = vsub.f32 2.0, %v3534_v1  ;;  %v24741_v1 = vld [vmem:[#allocation30_spill] sm:$0xff] }
 0x42c   : > { %v12084_v54 = vrot.slane %v11288_v62, %v24497_v36  ;;  %v12820_v39 = vsel %vm12739_vm6, %v12080_v60, %v12819_v6  ;;  %v3625_v30 = vmul.f32 %v24736_v38, %v3593_v24  ;;  %v3595_v28 = vmul.f32 %v16980_v29, %v3563_v15  ;;  %16562 = vmatmul.mubr.msk.f32.vlgmr.msra.gmra.mrb[60].mxu0 %vm3192_vm2, %v22247_v7  ;;  %v24738_v62 = vld [vmem:[#allocation74_spill] sm:$0xff]  ;;  %v24740_v29 = vld [vmem:[#allocation219_spill] sm:$0xff]  ;;  %v22291_v24 = vpop.xlane.xlu1 %10913 }
 0x42d   : > { %v3536_v40 = vmul.f32 %v22242_v35, %v21660_v9  ;;  %v11056_v25 = vsel %vm406_vm0, %v10374_v52, 0.0  ;;  %v10385_v59 = vmul.f32 %v22098_v57, %v10122_v37  ;;  %v3565_v45 = vsub.f32 2.0, %v3533_v55  ;;  %16570 = vmatpush3.msra.mxu0 %v24737_v43  ;;  %16571 = vmatprep.mubr.msk.f32.mxu0 %vm17186_vm1, %v24569_v12 }
 0x42e   : > { %v22276_v60 = vmul.f32 %v24738_v62, %v3625_v30  ;;  %v22279_v6 = vmul.f32 %v24740_v29, %v3595_v28  ;;  %16985 = vrcp.f32 %v21914_v44  ;;  %16577 = vmatmul.mubr.msk.f32.vlgmr.msra.gmra.mrb[64].mxu1 %vm3192_vm2, %v3625_v30  ;;  %v22285_v9 = vmul.f32 %v22135_v17, %v21908_v61  ;;  %16579 = vmatprep.subr.mxu0 %v24569_v12  ;;  %v24744_v28 = vld [vmem:[#allocation76_spill] sm:$0xff] }
 0x42f   : > { %11057 = vadd.xlane.f32.xlu1 %v11056_v25  ;;  %v12821_v37 = vsel %vm12741_vm7, %v12084_v54, %v12820_v39  ;;  %v3597_v52 = vmul.f32 %v16982_v51, %v3565_v45  ;;  %11075 = vadd.xlane.f32.xlu0 %v21893_v10  ;;  %16987 = vrcp.f32 %v21946_v63  ;;  %v12308_v15 = vrot.slane %v22253_v23, %v24497_v36  ;;  %v22302_v10 = vpop.xlane.xlu0 %10895 }
 0x430   : > { %24739 = vst [vmem:[#allocation114_spill] sm:$0xff] %v22276_v60  ;;  %16585 = vmatpush3.msra.mxu1 %v24741_v1  ;;  %v12088_v43 = vrot.slane %v11289_v42, %v24497_v36  ;;  %v7851_v61 = vcombine.high %v22152_v0, %v22152_v0  ;;  %16989 = vrcp.f32 %v21979_v49  ;;  %16586 = vmatprep.mubr.msk.f32.mxu1 %vm17186_vm1, %v24569_v12  ;;  %v3568_v17 = vsub.f32 2.0, %v3536_v40  ;;  %v24788_v60 = vld [vmem:[#allocation22_spill] sm:$0xff] }
 0x431   : > { %16594 = vmatprep.subr.mxu1 %v24569_v12  ;;  %v12092_v51 = vrot.slane %v22259_v58, %v24497_v36  ;;  %v11089_v55 = vsel %vm406_vm0, %v10385_v59, 0.0  ;;  %v7948_v42 = vcombine.high %v22183_v22, %v22183_v22  ;;  %v22311_v0 = vmul.f32 %v22225_v16, %v3566_v53  ;;  %v24742_v58 = vld [vmem:[#allocation221_spill] sm:$0xff]  ;;  %v24746_v53 = vld [vmem:[#allocation36_spill] sm:$0xff] }
 0x432   : > { %v12822_v54 = vsel %vm12743_vm8, %v12088_v43, %v12821_v37  ;;  %v8958_v39 = vrot.slane %v7851_v61, %v17897_v48  ;;  %16991 = vrcp.f32 %v22002_v46  ;;  %16587 = vmatmul.mubr.msk.f32.vlgmr.msra.gmra.mrb[66].mxu1 %vm3192_vm2, %v22279_v6  ;;  %v22319_v38 = vmul.f32 %v24742_v58, %v3597_v52  ;;  %v24745_v59 = vld [vmem:[#allocation229_spill] sm:$0xff]  ;;  %v22347_v37 = vpop.xlane.xlu1 %10946 }
 0x433   : > { %11090 = vadd.xlane.f32.xlu1 %v11089_v55  ;;  %11078 = vadd.xlane.f32.xlu0 %v22050_v19  ;;  %v9006_v22 = vrot.slane %v7948_v42, %v17897_v48  ;;  %v11338_v16 = vadd.f32 %v20940_v11, %v22004_v8  ;;  %v7853_v30 = vcombine.high %v22172_v14, %v22172_v14  ;;  %v11080_v45 = vsel %vm406_vm0, %v24745_v59, 0.0  ;;  %v22354_v43 = vpop.xlane.xlu0 %10931 }
 0x434   : > { %24743 = vst [vmem:[#allocation93_spill] sm:$0xff] %v22319_v38  ;;  %v22329_v40 = vadd.f32 %v20940_v11, %v24744_v28  ;;  %v9593_v25 = vsub.f32 %v8958_v39, %v21091_v2  ;;  %v7918_v19 = vcombine.high %v22163_v34, %v22163_v34  ;;  %16595 = vmatpush3.msra.mxu1 %v24746_v53  ;;  %v24747_v34 = vld [vmem:[#allocation52_spill] sm:$0xff]  ;;  %16993 = vrcp.f32 %v22038_v20 }
 0x435   : > { %16596 = vmatprep.mubr.msk.f32.mxu1 %vm17186_vm1, %v24569_v12  ;;  %v22340_v8 = vmul.f32 %v22242_v35, %v3568_v17  ;;  %v11341_v14 = vadd.f32 %v20940_v11, %v21948_v26  ;;  %v9605_v62 = vsub.f32 %v9006_v22, %v24716_v27  ;;  %v12284_v29 = vrot.slane %v11338_v16, %v24497_v36 }
 0x436   : > { %16604 = vmatprep.subr.mxu1 %v24569_v12  ;;  %v9856_v52 = vadd.f32 %v21961_v41, %v9593_v25  ;;  %v8962_v1 = vrot.slane %v7853_v30, %v17897_v48  ;;  %v7940_v35 = vrot.slane %v7918_v19, %v17868_v47  ;;  %v22357_v26 = vsel %vm12745_vm9, %v12092_v51, %v12822_v54  ;;  %v24749_v51 = vld [vmem:[#allocation35_spill] sm:$0xff] }
 0x437   : > { %11114 = vadd.xlane.f32.xlu1 %v24747_v34  ;;  %v9868_v61 = vadd.f32 %v21961_v41, %v9605_v62  ;;  %11081 = vadd.xlane.f32.xlu0 %v11080_v45  ;;  %v12865_v17 = vsel %vm12745_vm9, %v12284_v29, %v21823_v31  ;;  %v12296_v16 = vrot.slane %v11341_v14, %v24497_v36  ;;  %16995 = vrcp.f32 %v22071_v56  ;;  %v22382_v14 = vpop.xlane.xlu1 %10970 }
 0x438   : > { %16597 = vmatmul.mubr.msk.f32.vlgmr.msra.gmra.mrb[68].mxu1 %vm3192_vm2, %v22319_v38  ;;  %v16986_v55 = vpop.eup %16985  ;;  %v10112_v42 = vmax.f32 %v9856_v52, 0.0  ;;  %v22365_v39 = vmul.f32 %v12865_v17, %v22079_v50  ;;  %v9594_v58 = vsub.f32 %v8962_v1, %v21091_v2  ;;  %v9002_v22 = vrot.slane %v7940_v35, %v17897_v48 }
 0x439   : > { %16605 = vmatpush3.msra.mxu1 %v24749_v51  ;;  %16606 = vmatprep.mubr.msk.f32.mxu1 %vm17186_vm1, %v24569_v12  ;;  %v16988_v54 = vpop.eup %16987  ;;  %v3528_v31 = vmul.f32 %v16986_v55, %v21914_v44  ;;  %v10124_v30 = vmax.f32 %v9868_v61, 0.0  ;;  %v7950_v28 = vcombine.high %v7940_v35, %v7940_v35  ;;  %v22386_v35 = vpop.xlane.xlu0 %10934  ;;  %v22390_v61 = vmul.f32 %v22220_v18, %v22011_v4 }
 0x43a   : > { %24748 = vst [vmem:[#allocation59_spill] sm:$0xff] %v22365_v39  ;;  %16614 = vmatprep.subr.mxu1 %v24569_v12  ;;  %v16990_v25 = vpop.eup %16989  ;;  %v3535_v59 = vmul.f32 %v16988_v54, %v21946_v63  ;;  %v10375_v2 = vmul.f32 %v22098_v57, %v10112_v42  ;;  %v9857_v45 = vadd.f32 %v21961_v41, %v9594_v58  ;;  %16997 = vrcp.f32 %v21744_v33 }
 0x43b   : > { %v9604_v19 = vsub.f32 %v9002_v22, %v24716_v27  ;;  %v3560_v53 = vsub.f32 2.0, %v3528_v31  ;;  %v3537_v62 = vmul.f32 %v16990_v25, %v21979_v49  ;;  %v10387_v44 = vmul.f32 %v22098_v57, %v10124_v30  ;;  %v24750_v31 = vld [vmem:[#allocation220_spill] sm:$0xff] }
 0x43c   : > { %v16992_v29 = vpop.eup %16991  ;;  %v3567_v34 = vsub.f32 2.0, %v3535_v59  ;;  %v11059_v52 = vsel %vm406_vm0, %v10375_v2, 0.0  ;;  %v10113_v63 = vmax.f32 %v9857_v45, 0.0  ;;  %v22395_v49 = vadd.f32 %v20940_v11, %v21760_v3  ;;  %v24751_v59 = vld [vmem:[#allocation31_spill] sm:$0xff]  ;;  %v24752_v3 = vld [vmem:[#allocation53_spill] sm:$0xff] }
 0x43d   : > { %v9867_v1 = vadd.f32 %v21961_v41, %v9604_v19  ;;  %v3592_v17 = vmul.f32 %v16986_v55, %v3560_v53  ;;  %11060 = vadd.xlane.f32.xlu1 %v11059_v52  ;;  %v3569_v58 = vsub.f32 2.0, %v3537_v62  ;;  %v9010_v51 = vrot.slane %v7950_v28, %v17897_v48  ;;  %v24754_v53 = vld [vmem:[#allocation12_spill] sm:$0xff] }
 0x43e   : > { %v3599_v42 = vmul.f32 %v16988_v54, %v3567_v34  ;;  %v12867_v4 = vsel %vm12735_vm4, %v12296_v16, %v24751_v59  ;;  %v11095_v18 = vsel %vm406_vm0, %v10387_v44, 0.0  ;;  %v3539_v2 = vmul.f32 %v16992_v29, %v22002_v46  ;;  %v22405_v45 = vpop.eup %16993  ;;  %v22424_v44 = vpop.xlane.xlu1 %10916 }
 0x43f   : > { %v10123_v22 = vmax.f32 %v9867_v1, 0.0  ;;  %v22399_v30 = vmul.f32 %v24750_v31, %v3592_v17  ;;  %v10376_v54 = vmul.f32 %v22098_v57, %v10113_v63  ;;  %v9606_v28 = vsub.f32 %v9010_v51, %v24716_v27  ;;  %v24757_v17 = vld [vmem:[#allocation29_spill] sm:$0xff] }
 0x440   : > { %v22408_v55 = vmul.f32 %v24752_v3, %v3599_v42  ;;  %v22415_v62 = vmul.f32 %v24754_v53, %v22311_v0  ;;  %16999 = vrcp.f32 %v21774_v5  ;;  %v11345_v46 = vadd.f32 %v20940_v11, %v21786_v13  ;;  %v22435_v13 = vpop.xlane.xlu0 %10937  ;;  %v24758_v42 = vld [vmem:[#allocation203_spill] sm:$0xff]  ;;  %v24760_v31 = vld [vmem:[#allocation177_spill] sm:$0xff]  ;;  %v24762_v3 = vld [vmem:[#allocation92_spill] sm:$0xff] }
 0x441   : > { %v10386_v19 = vmul.f32 %v22098_v57, %v10123_v22  ;;  %11096 = vadd.xlane.f32.xlu1 %v11095_v18  ;;  %16572 = vmatmul.mubr.msk.f32.vlgmr.msra.gmra.mrb[62].mxu0 %vm3192_vm2, %v22399_v30  ;;  %v24756_v34 = vrot.slane %v22178_v21, %v24497_v36  ;;  %v3601_v52 = vmul.f32 %v16990_v25, %v3569_v58  ;;  %v3571_v51 = vsub.f32 2.0, %v3539_v2  ;;  %v22455_v18 = vpop.eup %16995  ;;  %v24764_v53 = vld [vmem:[#allocation185_spill] sm:$0xff]  ;;  %v24776_v58 = vld [vmem:[#allocation223_spill] sm:$0xff] }
 0x442   : > { %24753 = vst [vmem:[#allocation111_spill] sm:$0xff] %v22408_v55  ;;  %24755 = vst [vmem:[#allocation101_spill] sm:$0xff] %v22415_v62  ;;  %v9869_v1 = vadd.f32 %v21961_v41, %v9606_v28  ;;  %16580 = vmatpush3.msra.mxu0 %v24757_v17  ;;  %16581 = vmatprep.mubr.msk.f32.mxu0 %vm17186_vm1, %v24569_v12  ;;  %v22439_v22 = vmul.f32 %v24758_v42, %v22340_v8  ;;  %v11062_v8 = vsel %vm406_vm0, %v10376_v54, 0.0  ;;  %v24766_v17 = vld [vmem:[#allocation83_spill] sm:$0xff]  ;;  %v24767_v42 = vld [vmem:[#allocation180_spill] sm:$0xff] }
 0x443   : > { %v12868_v0 = vsel %vm12737_vm5, %v24756_v34, %v12867_v4  ;;  %v11092_v63 = vsel %vm406_vm0, %v10386_v19, 0.0  ;;  %v3541_v21 = vmul.f32 %v22405_v45, %v22038_v20  ;;  %v7903_v25 = vcombine.high %v24716_v27, %v24716_v27  ;;  %16589 = vmatprep.subr.mxu0 %v24569_v12  ;;  %16607 = vmatmul.mubr.msk.f32.vlgmr.msra.gmra.mrb[70].mxu1 %vm3192_vm2, %v22408_v55  ;;  %v24761_v20 = vld [vmem:[#allocation174_spill] sm:$0xff] }
 0x444   : > { %24759 = vst [vmem:[#allocation126_spill] sm:$0xff] %v22439_v22  ;;  %11093 = vadd.xlane.f32.xlu0 %v11092_v63  ;;  %v22450_v59 = vadd.f32 %v20940_v11, %v24760_v31  ;;  %v10125_v4 = vmax.f32 %v9869_v1, 0.0  ;;  %v22459_v2 = vadd.f32 %v20940_v11, %v24761_v20  ;;  %v24763_v19 = vrot.slane %v24762_v3, %v24497_v36  ;;  %v24765_v63 = vld [vmem:[#allocation19_spill] sm:$0xff] }
 0x445   : > { %11063 = vadd.xlane.f32.xlu1 %v11062_v8  ;;  %v11116_v34 = vsel %vm406_vm0, %v24764_v53, 0.0  ;;  %v7917_v54 = vrot.slane %v7903_v25, %v17868_v47  ;;  %16615 = vmatpush3.msra.mxu1 %v24765_v63  ;;  %v12312_v1 = vrot.slane %v11345_v46, %v24497_v36  ;;  %17001 = vrcp.f32 %v24766_v17  ;;  %v22483_v53 = vpop.xlane.xlu1 %10952 }
 0x446   : > { %v12869_v28 = vsel %vm12739_vm6, %v24763_v19, %v12868_v0  ;;  %v22472_v31 = vmul.f32 %v24767_v42, %v3601_v52  ;;  %v10388_v20 = vmul.f32 %v22098_v57, %v10125_v4  ;;  %16582 = vmatmul.mubr.msk.f32.vlgmr.msra.gmra.mrb[64].mxu0 %vm3192_vm2, %v22079_v50  ;;  %v22477_v0 = vpop.eup %16997  ;;  %v3603_v8 = vmul.f32 %v16992_v29, %v3571_v51  ;;  %v24769_v19 = vld [vmem:[#allocation18_spill] sm:$0xff]  ;;  %v24770_v50 = vld [vmem:[#allocation84_spill] sm:$0xff] }
 0x447   : > { %v3573_v3 = vsub.f32 2.0, %v3541_v21  ;;  %v22480_v25 = vrot.slane %v7917_v54, %v17868_v47  ;;  %16590 = vmatpush3.msra.mxu0 %v24769_v19  ;;  %v7919_v46 = vcombine.high %v7917_v54, %v7917_v54  ;;  %v3543_v4 = vmul.f32 %v22455_v18, %v22071_v56  ;;  %16616 = vmatprep.mubr.msk.f32.mxu1 %vm17186_vm1, %v24569_v12  ;;  %v22497_v21 = vpop.xlane.xlu0 %10949 }
 0x448   : > { %24768 = vst [vmem:[#allocation123_spill] sm:$0xff] %v22472_v31  ;;  %11117 = vadd.xlane.f32.xlu0 %v11116_v34  ;;  %v11098_v52 = vsel %vm406_vm0, %v10388_v20, 0.0  ;;  %16624 = vmatprep.subr.mxu1 %v24569_v12  ;;  %v11346_v29 = vadd.f32 %v20940_v11, %v24770_v50  ;;  %v12870_v51 = vsel %vm12741_vm7, %v12308_v15, %v12869_v28  ;;  %v24771_v34 = vld [vmem:[#allocation178_spill] sm:$0xff]  ;;  %v24772_v15 = vld [vmem:[#allocation227_spill] sm:$0xff] }
 0x449   : > { %v22501_v54 = vadd.f32 %v20940_v11, %v24771_v34  ;;  %11099 = vadd.xlane.f32.xlu1 %v11098_v52  ;;  %v9014_v56 = vrot.slane %v22480_v25, %v17897_v48  ;;  %v22506_v63 = vrot.slane %v7919_v46, %v17868_v47  ;;  %16591 = vmatprep.mubr.msk.f32.mxu0 %vm17186_vm1, %v24569_v12  ;;  %v11083_v28 = vsel %vm406_vm0, %v24772_v15, 0.0  ;;  %v24773_v46 = vld [vmem:[#allocation57_spill] sm:$0xff]  ;;  %v24774_v50 = vld [vmem:[#allocation26_spill] sm:$0xff] }
 0x44a   : > { %v22512_v23 = vmul.f32 %v22477_v0, %v21744_v33  ;;  %16599 = vmatprep.subr.mxu0 %v24569_v12  ;;  %16617 = vmatmul.mubr.msk.f32.vlgmr.msra.gmra.mrb[72].mxu1 %vm3192_vm2, %v22472_v31  ;;  %v12316_v42 = vrot.slane %v11346_v29, %v24497_v36  ;;  %v12871_v20 = vsel %vm12743_vm8, %v12312_v1, %v12870_v51  ;;  %v22521_v19 = vpop.eup %16999  ;;  %17003 = vrcp.f32 %v24773_v46  ;;  %v24775_v34 = vld [vmem:[#allocation50_spill] sm:$0xff] }
 0x44b   : > { %v9607_v52 = vsub.f32 %v9014_v56, %v24716_v27  ;;  %v9018_v33 = vrot.slane %v22506_v63, %v17897_v48  ;;  %16625 = vmatpush3.msra.mxu1 %v24774_v50  ;;  %v22530_v15 = vrot.slane %v24775_v34, %v17868_v47  ;;  %v22533_v29 = vmul.f32 %v24776_v58, %v3603_v8  ;;  %v24778_v31 = vld [vmem:[#allocation98_spill] sm:$0xff]  ;;  %v24780_v58 = vld [vmem:[#allocation20_spill] sm:$0xff]  ;;  %v22551_v8 = vpop.xlane.xlu1 %10919 }
 0x44c   : > { %11084 = vadd.xlane.f32.xlu0 %v11083_v28  ;;  %v3605_v1 = vmul.f32 %v22405_v45, %v3573_v3  ;;  %v3575_v51 = vsub.f32 2.0, %v3543_v4  ;;  %v12872_v16 = vsel %vm12745_vm9, %v12316_v42, %v12871_v20  ;;  %16592 = vmatmul.mubr.msk.f32.vlgmr.msra.gmra.mrb[66].mxu0 %vm3192_vm2, %v24778_v31  ;;  %v24781_v3 = vld [vmem:[#allocation176_spill] sm:$0xff]  ;;  %v24782_v42 = vld [vmem:[#allocation181_spill] sm:$0xff]  ;;  %v3570_v39 = vsub.f32 2.0, %v22512_v23 }
 0x44d   : > { %24777 = vst [vmem:[#allocation96_spill] sm:$0xff] %v22533_v29  ;;  %16626 = vmatprep.mubr.msk.f32.mxu1 %vm17186_vm1, %v24569_v12  ;;  %v9870_v56 = vadd.f32 %v21961_v41, %v9607_v52  ;;  %v9608_v28 = vsub.f32 %v9018_v33, %v24716_v27  ;;  %v22544_v50 = vmul.f32 %v12872_v16, %v22279_v6  ;;  %v24783_v52 = vld [vmem:[#allocation27_spill] sm:$0xff]  ;;  %v24784_v16 = vld [vmem:[#allocation230_spill] sm:$0xff] }
 0x44e   : > { %16600 = vmatpush3.msra.mxu0 %v24780_v58  ;;  %v22549_v45 = vrot.slane %v22530_v15, %v17868_v47  ;;  %v22555_v4 = vadd.f32 %v20940_v11, %v24781_v3  ;;  %v22559_v20 = vadd.f32 %v20940_v11, %v24782_v42  ;;  %v22563_v6 = vadd.f32 %v20940_v11, %v24783_v52  ;;  %v22570_v58 = vpop.xlane.xlu0 %10973 }
 0x44f   : > { %24779 = vst [vmem:[#allocation206_spill] sm:$0xff] %v22544_v50  ;;  %v11119_v33 = vsel %vm406_vm0, %v24784_v16, 0.0  ;;  %16634 = vmatprep.subr.mxu1 %v24569_v12  ;;  %16601 = vmatprep.mubr.msk.f32.mxu0 %vm17186_vm1, %v24569_v12  ;;  %v3540_v3 = vmul.f32 %v22521_v19, %v21774_v5  ;;  %v10126_v55 = vmax.f32 %v9870_v56, 0.0  ;;  %v9871_v42 = vadd.f32 %v21961_v41, %v9608_v28  ;;  %v22578_v16 = vpop.eup %17001  ;;  %v24785_v5 = vld [vmem:[#allocation225_spill] sm:$0xff] }
 0x450   : > { %11120 = vadd.xlane.f32.xlu0 %v11119_v33  ;;  %v9062_v52 = vrot.slane %v22549_v45, %v17897_v48  ;;  %16609 = vmatprep.subr.mxu0 %v24569_v12  ;;  %v12128_v50 = vrot.slane %v22450_v59, %v24497_v36  ;;  %v12132_v38 = vrot.slane %v22459_v2, %v24497_v36  ;;  %v24787_v59 = vld [vmem:[#allocation28_spill] sm:$0xff]  ;;  %v24789_v2 = vld [vmem:[#allocation183_spill] sm:$0xff] }
 0x451   : > { %v22586_v56 = vmul.f32 %v24785_v5, %v3605_v1  ;;  %16627 = vmatmul.mubr.msk.f32.vlgmr.msra.gmra.mrb[74].mxu1 %vm3192_vm2, %v22533_v29  ;;  %16602 = vmatmul.mubr.msk.f32.vlgmr.msra.gmra.mrb[68].mxu0 %vm3192_vm2, %v22415_v62  ;;  %v3607_v28 = vmul.f32 %v22455_v18, %v3575_v51  ;;  %v10389_v33 = vmul.f32 %v22098_v57, %v10126_v55  ;;  %v10127_v23 = vmax.f32 %v9871_v42, 0.0  ;;  %v24790_v29 = vld [vmem:[#allocation231_spill] sm:$0xff] }
 0x452   : > { %v9619_v31 = vsub.f32 %v9062_v52, %v24775_v34  ;;  %16635 = vmatpush3.msra.mxu1 %v24787_v59  ;;  %16610 = vmatpush3.msra.mxu0 %v24788_v60  ;;  %v22599_v1 = vadd.f32 %v20940_v11, %v24789_v2  ;;  %v12136_v5 = vrot.slane %v22501_v54, %v24497_v36  ;;  %v11086_v62 = vsel %vm406_vm0, %v24790_v29, 0.0  ;;  %v22615_v54 = vpop.xlane.xlu1 %10955  ;;  %v24792_v59 = vld [vmem:[#allocation228_spill] sm:$0xff] }
 0x453   : > { %24786 = vst [vmem:[#allocation104_spill] sm:$0xff] %v22586_v56  ;;  %16636 = vmatprep.mubr.msk.f32.mxu1 %vm17186_vm1, %v24569_v12  ;;  %16644 = vmatprep.subr.mxu1 %v24569_v12  ;;  %v7949_v55 = vcombine.high %v22480_v25, %v22480_v25  ;;  %v3572_v18 = vsub.f32 2.0, %v3540_v3  ;;  %v11101_v60 = vsel %vm406_vm0, %v10389_v33, 0.0  ;;  %v10390_v51 = vmul.f32 %v22098_v57, %v10127_v23  ;;  %v22621_v3 = vpop.xlane.xlu0 %10940 }
 0x454   : > { %v9882_v42 = vadd.f32 %v21961_v41, %v9619_v31  ;;  %11087 = vadd.xlane.f32.xlu0 %v11086_v62  ;;  %16611 = vmatprep.mubr.msk.f32.mxu0 %vm17186_vm1, %v24569_v12  ;;  %v3602_v29 = vmul.f32 %v22477_v0, %v3570_v39  ;;  %v12831_v52 = vsel %vm12733_vm3, %v12132_v38, %v12128_v50  ;;  %v22623_v33 = vpop.eup %17003  ;;  %v24791_v31 = vld [vmem:[#allocation209_spill] sm:$0xff]  ;;  %v24794_v50 = vld [vmem:[#allocation55_spill] sm:$0xff] }
 0x455   : > { %11102 = vadd.xlane.f32.xlu1 %v11101_v60  ;;  %16619 = vmatprep.subr.mxu0 %v24569_v12  ;;  %v9022_v25 = vrot.slane %v7949_v55, %v17897_v48  ;;  %v22627_v62 = vadd.f32 %v20940_v11, %v24791_v31  ;;  %v3542_v23 = vmul.f32 %v22578_v16, %v24766_v17  ;;  %v11122_v2 = vsel %vm406_vm0, %v24794_v50, 0.0  ;;  %v24795_v55 = vld [vmem:[#allocation34_spill] sm:$0xff]  ;;  %v24796_v60 = vld [vmem:[#allocation21_spill] sm:$0xff]  ;;  %v24797_v50 = vld [vmem:[#allocation207_spill] sm:$0xff] }
 0x456   : > { %v22632_v39 = vmul.f32 %v24792_v59, %v3607_v28  ;;  %v10138_v38 = vmax.f32 %v9882_v42, 0.0  ;;  %16637 = vmatmul.mubr.msk.f32.vlgmr.msra.gmra.mrb[76].mxu1 %vm3192_vm2, %v22586_v56  ;;  %16612 = vmatmul.mubr.msk.f32.vlgmr.msra.gmra.mrb[70].mxu0 %vm3192_vm2, %v22439_v22  ;;  %v12140_v0 = vrot.slane %v22555_v4, %v24497_v36  ;;  %v8046_v28 = vcombine.high %v22549_v45, %v22549_v45  ;;  %v24835_v22 = vld [vmem:[#allocation58_spill] sm:$0xff] }
 0x457   : > { %16645 = vmatpush3.msra.mxu1 %v24795_v55  ;;  %16620 = vmatpush3.msra.mxu0 %v24796_v60  ;;  %v9609_v17 = vsub.f32 %v9022_v25, %v24716_v27  ;;  %v3604_v42 = vmul.f32 %v22521_v19, %v3572_v18  ;;  %v12832_v31 = vsel %vm12735_vm4, %v12136_v5, %v12831_v52  ;;  %v11104_v59 = vsel %vm406_vm0, %v10390_v51, 0.0  ;;  %v24799_v60 = vld [vmem:[#allocation189_spill] sm:$0xff]  ;;  %v22671_v52 = vpop.xlane.xlu1 %10958 }
 0x458   : > { %24793 = vst [vmem:[#allocation99_spill] sm:$0xff] %v22632_v39  ;;  %v10401_v4 = vmul.f32 %v22098_v57, %v10138_v38  ;;  %11123 = vadd.xlane.f32.xlu0 %v11122_v2  ;;  %16646 = vmatprep.mubr.msk.f32.mxu1 %vm17186_vm1, %v24569_v12  ;;  %v22654_v55 = vmul.f32 %v24797_v50, %v3602_v29  ;;  %v11125_v45 = vsel %vm406_vm0, %v24799_v60, 0.0  ;;  %v3574_v51 = vsub.f32 2.0, %v3542_v23  ;;  %v22681_v2 = vpop.xlane.xlu0 %10976  ;;  %v24802_v60 = vld [vmem:[#allocation25_spill] sm:$0xff] }
 0x459   : > { %11105 = vadd.xlane.f32.xlu1 %v11104_v59  ;;  %v9872_v25 = vadd.f32 %v21961_v41, %v9609_v17  ;;  %16621 = vmatprep.mubr.msk.f32.mxu0 %vm17186_vm1, %v24569_v12  ;;  %v9070_v19 = vrot.slane %v8046_v28, %v17897_v48  ;;  %v12144_v5 = vrot.slane %v22559_v20, %v24497_v36  ;;  %v24800_v17 = vld [vmem:[#allocation212_spill] sm:$0xff]  ;;  %v17026_v18 = vld [vmem:[%s17308_s13] sm:$0xff] }
 0x45a   : > { %24798 = vst [vmem:[#allocation128_spill] sm:$0xff] %v22654_v55  ;;  %v3544_v29 = vmul.f32 %v22623_v33, %v24773_v46  ;;  %16629 = vmatprep.subr.mxu0 %v24569_v12  ;;  %16647 = vmatmul.mubr.msk.f32.vlgmr.msra.gmra.mrb[78].mxu1 %vm3192_vm2, %v22632_v39  ;;  %v7951_v23 = vcombine.high %v22506_v63, %v22506_v63  ;;  %v24804_v59 = vld [vmem:[#allocation146_spill] sm:$0xff] }
 0x45b   : > { %v10128_v38 = vmax.f32 %v9872_v25, 0.0  ;;  %16622 = vmatmul.mubr.msk.f32.vlgmr.msra.gmra.mrb[72].mxu0 %vm3192_vm2, %v22654_v55  ;;  %16654 = vmatprep.subr.mxu1 %v24569_v12  ;;  %v9621_v20 = vsub.f32 %v9070_v19, %v24775_v34  ;;  %v8016_v46 = vcombine.high %v22530_v15, %v22530_v15  ;;  %v22684_v28 = vmul.f32 %v24800_v17, %v3604_v42  ;;  %v24803_v19 = vld [vmem:[#allocation112_spill] sm:$0xff] }
 0x45c   : > { %v12833_v50 = vsel %vm12737_vm5, %v12140_v0, %v12832_v31  ;;  %v11137_v25 = vsel %vm406_vm0, %v10401_v4, 0.0  ;;  %11126 = vadd.xlane.f32.xlu0 %v11125_v45  ;;  %16630 = vmatpush3.msra.mxu0 %v24802_v60  ;;  %v11315_v63 = vadd.f32 %v20940_v11, %v24803_v19  ;;  %v9026_v42 = vrot.slane %v7951_v23, %v17897_v48  ;;  %v24805_v31 = vld [vmem:[#allocation191_spill] sm:$0xff] }
 0x45d   : > { %24801 = vst [vmem:[#allocation208_spill] sm:$0xff] %v22684_v28  ;;  %11138 = vadd.xlane.f32.xlu1 %v11137_v25  ;;  %v9884_v15 = vadd.f32 %v21961_v41, %v9621_v20  ;;  %16655 = vmatpush3.msra.mxu1 %v17026_v18  ;;  %v3606_v17 = vmul.f32 %v22578_v16, %v3574_v51  ;;  %v11128_v4 = vsel %vm406_vm0, %v24805_v31, 0.0  ;;  %v3576_v45 = vsub.f32 2.0, %v3544_v29  ;;  %v24806_v16 = vld [vmem:[#allocation103_spill] sm:$0xff] }
 0x45e   : > { %v11316_v0 = vadd.f32 %v20940_v11, %v24804_v59  ;;  %16656 = vmatprep.mubr.msk.f32.mxu1 %vm17186_vm1, %v24569_v12  ;;  %16631 = vmatprep.mubr.msk.f32.mxu0 %vm17186_vm1, %v24569_v12  ;;  %v8038_v41 = vrot.slane %v8016_v46, %v17868_v47  ;;  %v10391_v18 = vmul.f32 %v22098_v57, %v10128_v38  ;;  %v24807_v59 = vld [vmem:[#allocation88_spill] sm:$0xff]  ;;  %v22717_v46 = vpop.xlane.xlu1 %10961  ;;  %v24808_v60 = vld [vmem:[#allocation135_spill] sm:$0xff] }
 0x45f   : > { %v10140_v20 = vmax.f32 %v9884_v15, 0.0  ;;  %16639 = vmatprep.subr.mxu0 %v24569_v12  ;;  %16657 = vmatmul.mubr.msk.f32.vlgmr.msra.gmra.mrb[80].mxu1 %vm3192_vm2, %v24806_v16  ;;  %v9610_v51 = vsub.f32 %v9026_v42, %v24716_v27  ;;  %v12834_v23 = vsel %vm12739_vm6, %v12144_v5, %v12833_v50  ;;  %v11161_v25 = vsel %vm406_vm0, %v24807_v59, 0.0  ;;  %v24809_v5 = vld [vmem:[#allocation32_spill] sm:$0xff]  ;;  %v22726_v50 = vld [vmem:[%s23953_s5] ss:$0 sm:$0xff]  ;;  %v22729_v42 = vpop.xlane.xlu0 %10943 }
 0x460   : > { %11129 = vadd.xlane.f32.xlu0 %v11128_v4  ;;  %16632 = vmatmul.mubr.msk.f32.vlgmr.msra.gmra.mrb[74].mxu0 %vm3192_vm2, %v22684_v28  ;;  %v9066_v29 = vrot.slane %v8038_v41, %v17897_v48  ;;  %v8048_v38 = vcombine.high %v8038_v41, %v8038_v41  ;;  %v11317_v19 = vadd.f32 %v20940_v11, %v24808_v60  ;;  %v24810_v41 = vld [vmem:[#allocation213_spill] sm:$0xff] }
 0x461   : > { %v12192_v27 = vrot.slane %v11315_v63, %v24497_v36  ;;  %11162 = vadd.xlane.f32.xlu1 %v11161_v25  ;;  %16640 = vmatpush3.msra.mxu0 %v24809_v5  ;;  %v9873_v15 = vadd.f32 %v22726_v50, %v9610_v51  ;;  %v12196_v31 = vrot.slane %v11316_v0, %v24497_v36  ;;  %v11107_v51 = vsel %vm406_vm0, %v10391_v18, 0.0  ;;  %v17028_v5 = vld [vmem:[%s17308_s13 + $0x10] sm:$0xff]  ;;  %v17032_v28 = vld [vmem:[%s17308_s13 + $0x18] sm:$0xff] }
 0x462   : > { %16664 = vmatprep.subr.mxu1 %v24569_v12  ;;  %16666 = vmatprep.mubr.msk.f32.mxu1 %vm17186_vm1, %v24569_v12  ;;  %v9620_v63 = vsub.f32 %v9066_v29, %v24775_v34  ;;  %v9074_v4 = vrot.slane %v8048_v38, %v17897_v48  ;;  %v22738_v59 = vmul.f32 %v24810_v41, %v3606_v17  ;;  %v24812_v29 = vld [vmem:[#allocation78_spill] sm:$0xff] }
 0x463   : > { %v3608_v25 = vmul.f32 %v22623_v33, %v3576_v45  ;;  %v10403_v60 = vmul.f32 %v22098_v57, %v10140_v20  ;;  %16665 = vmatpush3.msra.mxu1 %v17028_v5  ;;  %16641 = vmatprep.mubr.msk.f32.mxu0 %vm17186_vm1, %v24569_v12  ;;  %v10129_v0 = vmax.f32 %v9873_v15, 0.0  ;;  %v8001_v33 = vcombine.high %v24775_v34, %v24775_v34  ;;  %v24813_v45 = vld [vmem:[#allocation89_spill] sm:$0xff]  ;;  %v24814_v20 = vld [vmem:[#allocation11_spill] sm:$0xff]  ;;  %v24815_v41 = vld [vmem:[#allocation38_spill] sm:$0xff] }
 0x464   : > { %24811 = vst [vmem:[#allocation94_spill] sm:$0xff] %v22738_v59  ;;  %v9883_v39 = vadd.f32 %v22726_v50, %v9620_v63  ;;  %16649 = vmatprep.subr.mxu0 %v24569_v12  ;;  %16667 = vmatmul.mubr.msk.f32.vlgmr.msra.gmra.mrb[82].mxu1 %vm3192_vm2, %v24812_v29  ;;  %v9622_v17 = vsub.f32 %v9074_v4, %v24775_v34 }
 0x465   : > { %v22755_v18 = vmul.f32 %v22357_v26, %v24813_v45  ;;  %v11318_v38 = vadd.f32 %v20940_v11, %v24814_v20  ;;  %v12200_v15 = vrot.slane %v11317_v19, %v24497_v36  ;;  %11108 = vadd.xlane.f32.xlu1 %v11107_v51  ;;  %16642 = vmatmul.mubr.msk.f32.vlgmr.msra.gmra.mrb[76].mxu0 %vm3192_vm2, %v22738_v59  ;;  %v22767_v45 = vpop.xlane.xlu1 %10994 }
 0x466   : > { %v12845_v63 = vsel %vm12733_vm3, %v12196_v31, %v12192_v27  ;;  %v10139_v4 = vmax.f32 %v9883_v39, 0.0  ;;  %16650 = vmatpush3.msra.mxu0 %v24815_v41  ;;  %16674 = vmatprep.subr.mxu1 %v24569_v12  ;;  %v9885_v26 = vadd.f32 %v22726_v50, %v9622_v17  ;;  %v8015_v5 = vrot.slane %v8001_v33, %v17868_v47  ;;  %v24818_v27 = vld [vmem:[#allocation218_spill] sm:$0xff]  ;;  %v22782_v17 = vpop.xlane.xlu0 %10979 }
 0x467   : > { %24816 = vst [vmem:[#allocation6_spill] sm:$0xff] %v22767_v45  ;;  %v24817_v51 = vrot.slane %v22563_v6, %v24497_v36  ;;  %v22776_v39 = vmul.f32 %v24818_v27, %v3608_v25  ;;  %v11143_v31 = vsel %vm406_vm0, %v10403_v60, 0.0  ;;  %v17029_v41 = vld [vmem:[%s17308_s13 + $0x20] sm:$0xff]  ;;  %16676 = vmatprep.mubr.msk.f32.mxu1 %vm17186_vm1, %v24569_v12  ;;  %v10392_v33 = vmul.f32 %v22098_v57, %v10129_v0  ;;  %v24820_v6 = vld [vmem:[#allocation80_spill] sm:$0xff] }
 0x468   : > { %16675 = vmatpush3.msra.mxu1 %v17029_v41  ;;  %v10402_v19 = vmul.f32 %v22098_v57, %v10139_v4  ;;  %v10141_v59 = vmax.f32 %v9885_v26, 0.0  ;;  %16651 = vmatprep.mubr.msk.f32.mxu0 %vm17186_vm1, %v24569_v12  ;;  %v24821_v25 = vld [vmem:[#allocation141_spill] sm:$0xff]  ;;  %v8017_v0 = vcombine.high %v8015_v5, %v8015_v5  ;;  %v24822_v4 = vld [vmem:[#allocation16_spill] sm:$0xff]  ;;  %v12204_v27 = vrot.slane %v11318_v38, %v24497_v36  ;;  %v17030_v38 = vld [vmem:[%s17308_s13 + $0x8] sm:$0xff] }
 0x469   : > { %v12835_v20 = vsel %vm12741_vm7, %v24817_v51, %v12834_v23  ;;  %24819 = vst [vmem:[#allocation42_spill] sm:$0xff] %v22776_v39  ;;  %16677 = vmatmul.mubr.msk.f32.vlgmr.msra.gmra.mrb[84].mxu1 %vm3192_vm2, %v24820_v6  ;;  %v8031_v23 = vrot.slane %v8015_v5, %v17868_v47  ;;  %v11319_v60 = vadd.f32 %v20940_v11, %v24821_v25 }
 0x46a   : > { %v12846_v51 = vsel %vm12735_vm4, %v12200_v15, %v12845_v63  ;;  %11144 = vadd.xlane.f32.xlu1 %v11143_v31  ;;  %16652 = vmatmul.mubr.msk.f32.vlgmr.msra.gmra.mrb[78].mxu0 %vm3192_vm2, %v22776_v39  ;;  %v22798_v26 = vadd.f32 %v20940_v11, %v24822_v4  ;;  %v11140_v41 = vsel %vm406_vm0, %v10402_v19, 0.0  ;;  %v24823_v63 = vrot.slane %v22599_v1, %v24497_v36  ;;  %v24824_v31 = vld [vmem:[#allocation116_spill] sm:$0xff] }
 0x46b   : > { %16659 = vmatprep.subr.mxu0 %v24569_v12  ;;  %16684 = vmatprep.subr.mxu1 %v24569_v12  ;;  %v9078_v15 = vrot.slane %v8031_v23, %v17897_v48  ;;  %v22813_v25 = vadd.f32 %v20940_v11, %v24824_v31  ;;  %v8045_v19 = vrot.slane %v8017_v0, %v17868_v47  ;;  %v11110_v39 = vsel %vm406_vm0, %v10392_v33, 0.0  ;;  %v24829_v31 = vld [vmem:[#allocation7_spill] sm:$0xff] }
 0x46c   : > { %v22809_v5 = vsel %vm12743_vm8, %v24823_v63, %v12835_v20  ;;  %11141 = vadd.xlane.f32.xlu0 %v11140_v41  ;;  %16660 = vmatpush3.msra.mxu0 %v17030_v38  ;;  %v12847_v4 = vsel %vm12737_vm5, %v12204_v27, %v12846_v51  ;;  %v10404_v56 = vmul.f32 %v22098_v57, %v10141_v59  ;;  %v17031_v20 = vld [vmem:[%s17308_s13 + $0x30] sm:$0xff]  ;;  %v22824_v63 = vpop.xlane.xlu1 %11018  ;;  %v22830_v51 = vpop.xlane.xlu0 %10982  ;;  %v24826_v57 = vld [vmem:[#allocation182_spill] sm:$0xff] }
 0x46d   : > { %v9623_v1 = vsub.f32 %v9078_v15, %v24775_v34  ;;  %16661 = vmatprep.mubr.msk.f32.mxu0 %vm17186_vm1, %v24569_v12  ;;  %16685 = vmatpush3.msra.mxu1 %v17031_v20  ;;  %24825 = vst [vmem:[#allocation127_spill] sm:$0xff] %v22824_v63  ;;  %v12208_v41 = vrot.slane %v11319_v60, %v24497_v36  ;;  %v24827_v27 = vld [vmem:[#allocation46_spill] sm:$0xff]  ;;  %v24830_v20 = vld [vmem:[#allocation37_spill] sm:$0xff] }
 0x46e   : > { %11111 = vadd.xlane.f32.xlu1 %v11110_v39  ;;  %16686 = vmatprep.mubr.msk.f32.mxu1 %vm17186_vm1, %v24569_v12  ;;  %v9082_v47 = vrot.slane %v8045_v19, %v17897_v48  ;;  %v8047_v33 = vcombine.high %v8031_v23, %v8031_v23  ;;  %v22834_v59 = vadd.f32 %v20940_v11, %v24826_v57  ;;  %v11164_v60 = vsel %vm406_vm0, %v24827_v27, 0.0  ;;  %v24828_v15 = vld [vmem:[#allocation86_spill] sm:$0xff] }
 0x46f   : > { %v12212_v0 = vrot.slane %v22798_v26, %v24497_v36  ;;  %v9886_v39 = vadd.f32 %v22726_v50, %v9623_v1  ;;  %16687 = vmatmul.mubr.msk.f32.vlgmr.msra.gmra.mrb[86].mxu1 %vm3192_vm2, %v24828_v15  ;;  %16662 = vmatmul.mubr.msk.f32.vlgmr.msra.gmra.mrb[80].mxu0 %vm3192_vm2, %v24829_v31  ;;  %v12848_v23 = vsel %vm12739_vm6, %v12208_v41, %v12847_v4  ;;  %v11146_v1 = vsel %vm406_vm0, %v10404_v56, 0.0  ;;  %v24831_v4 = vld [vmem:[#allocation107_spill] sm:$0xff] }
 0x470   : > { %11165 = vadd.xlane.f32.xlu0 %v11164_v60  ;;  %16669 = vmatprep.subr.mxu0 %v24569_v12  ;;  %v9624_v38 = vsub.f32 %v9082_v47, %v24775_v34  ;;  %v9086_v26 = vrot.slane %v8047_v33, %v17897_v48  ;;  %v11349_v57 = vadd.f32 %v20940_v11, %v24830_v20  ;;  %v24832_v60 = vld [vmem:[#allocation102_spill] sm:$0xff] }
 0x471   : > { %v10142_v27 = vmax.f32 %v9886_v39, 0.0  ;;  %16694 = vmatprep.subr.mxu1 %v24569_v12  ;;  %16670 = vmatpush3.msra.mxu0 %v17032_v28  ;;  %v8049_v55 = vcombine.high %v8045_v19, %v8045_v19  ;;  %v11350_v41 = vadd.f32 %v20940_v11, %v24831_v4  ;;  %v11351_v56 = vadd.f32 %v20940_v11, %v24832_v60  ;;  %v22865_v39 = vld [vmem:[%s23954_s6] ss:$0 sm:$0xff]  ;;  %v24833_v19 = vld [vmem:[#allocation190_spill] sm:$0xff] }
 0x472   : > { %11147 = vadd.xlane.f32.xlu1 %v11146_v1  ;;  %v9887_v47 = vadd.f32 %v22726_v50, %v9624_v38  ;;  %16671 = vmatprep.mubr.msk.f32.mxu0 %vm17186_vm1, %v24569_v12  ;;  %v9625_v33 = vsub.f32 %v9086_v26, %v24775_v34  ;;  %v11131_v20 = vsel %vm406_vm0, %v24833_v19, 0.0  ;;  %v17034_v1 = vld [vmem:[%s17308_s13 + $0x40] sm:$0xff]  ;;  %v22874_v26 = vpop.xlane.xlu1 %10964  ;;  %v12216_v4 = vrot.slane %v22813_v25, %v24497_v36 }
 0x473   : > { %v10405_v28 = vmul.f32 %v22865_v39, %v10142_v27  ;;  %16695 = vmatpush3.msra.mxu1 %v17034_v1  ;;  %16696 = vmatprep.mubr.msk.f32.mxu1 %vm17186_vm1, %v24569_v12  ;;  %v9090_v38 = vrot.slane %v8049_v55, %v17897_v48  ;;  %v24834_v60 = vld [vmem:[#allocation90_spill] sm:$0xff]  ;;  %v22883_v1 = vpop.xlane.xlu0 %10985  ;;  %v12849_v48 = vsel %vm12741_vm7, %v12212_v0, %v12848_v23 }
 0x474   : > { %v11356_v63 = vadd.f32 %v20940_v11, %v24834_v60  ;;  %11132 = vadd.xlane.f32.xlu0 %v11131_v20  ;;  %v10143_v27 = vmax.f32 %v9887_v47, 0.0  ;;  %16697 = vmatmul.mubr.msk.f32.vlgmr.msra.gmra.mrb[88].mxu1 %vm3192_vm2, %v24835_v22  ;;  %v9888_v19 = vadd.f32 %v22726_v50, %v9625_v33  ;;  %v12328_v55 = vrot.slane %v11349_v57, %v24497_v36  ;;  %v24836_v25 = vld [vmem:[#allocation194_spill] sm:$0xff] }
 0x475   : > { %v11149_v45 = vsel %vm406_vm0, %v10405_v28, 0.0  ;;  %16672 = vmatmul.mubr.msk.f32.vlgmr.msra.gmra.mrb[82].mxu0 %vm3192_vm2, %v24836_v25  ;;  %16679 = vmatprep.subr.mxu0 %v24569_v12  ;;  %v9626_v47 = vsub.f32 %v9090_v38, %v24775_v34  ;;  %v12220_v20 = vrot.slane %v22834_v59, %v24497_v36  ;;  %v12332_v33 = vrot.slane %v11350_v41, %v24497_v36  ;;  %v24837_v28 = vld [vmem:[#allocation82_spill] sm:$0xff]  ;;  %v24838_v25 = vld [vmem:[#allocation187_spill] sm:$0xff] }
 0x476   : > { %11150 = vadd.xlane.f32.xlu1 %v11149_v45  ;;  %v10406_v0 = vmul.f32 %v22865_v39, %v10143_v27  ;;  %16704 = vmatprep.subr.mxu1 %v24569_v12  ;;  %v10144_v23 = vmax.f32 %v9888_v19, 0.0  ;;  %v12336_v57 = vrot.slane %v11351_v56, %v24497_v36  ;;  %v11352_v60 = vadd.f32 %v20940_v11, %v24837_v28  ;;  %v17035_v38 = vld [vmem:[%s17308_s13 + $0x28] sm:$0xff]  ;;  %v17036_v19 = vld [vmem:[%s17308_s13 + $0x50] sm:$0xff]  ;;  %v24840_v28 = vld [vmem:[#allocation33_spill] sm:$0xff] }
 0x477   : > { %v11167_v34 = vsel %vm406_vm0, %v24838_v25, 0.0  ;;  %16680 = vmatpush3.msra.mxu0 %v17035_v38  ;;  %16681 = vmatprep.mubr.msk.f32.mxu0 %vm17186_vm1, %v24569_v12  ;;  %v9889_v45 = vadd.f32 %v22726_v50, %v9626_v47  ;;  %v12850_v59 = vsel %vm12743_vm8, %v12216_v4, %v12849_v48  ;;  %v12356_v41 = vrot.slane %v11356_v63, %v24497_v36  ;;  %v24839_v27 = vld [vmem:[#allocation91_spill] sm:$0xff]  ;;  %v22919_v4 = vpop.xlane.xlu1 %11000 }
 0x478   : > { %v11358_v56 = vadd.f32 %v20940_v11, %v24839_v27  ;;  %11168 = vadd.xlane.f32.xlu0 %v11167_v34  ;;  %16705 = vmatpush3.msra.mxu1 %v17036_v19  ;;  %v12874_v25 = vsel %vm12735_vm4, %v12328_v55, %v24840_v28  ;;  %v11152_v38 = vsel %vm406_vm0, %v10406_v0, 0.0  ;;  %v10407_v31 = vmul.f32 %v22865_v39, %v10144_v23  ;;  %v24841_v50 = vld [vmem:[#allocation71_spill] sm:$0xff]  ;;  %v24844_v34 = vld [vmem:[#allocation110_spill] sm:$0xff]  ;;  %v22931_v27 = vpop.xlane.xlu0 %10997 }
 0x479   : > { %16706 = vmatprep.mubr.msk.f32.mxu1 %vm17186_vm1, %v24569_v12  ;;  %16682 = vmatmul.mubr.msk.f32.vlgmr.msra.gmra.mrb[84].mxu0 %vm3192_vm2, %v24841_v50  ;;  %v10145_v63 = vmax.f32 %v9889_v45, 0.0  ;;  %v24842_v48 = vrot.slane %v22627_v62, %v24497_v36  ;;  %v12875_v55 = vsel %vm12737_vm5, %v12332_v33, %v12874_v25  ;;  %v24843_v0 = vld [vmem:[#allocation95_spill] sm:$0xff]  ;;  %v12851_v45 = vsel %vm12745_vm9, %v12220_v20, %v12850_v59  ;;  %v24847_v20 = vld [vmem:[#allocation105_spill] sm:$0xff] }
 0x47a   : > { %v11357_v23 = vadd.f32 %v20940_v11, %v24843_v0  ;;  %11153 = vadd.xlane.f32.xlu1 %v11152_v38  ;;  %16707 = vmatmul.mubr.msk.f32.vlgmr.msra.gmra.mrb[90].mxu1 %vm3192_vm2, %v24844_v34  ;;  %v12876_v19 = vsel %vm12739_vm6, %v12336_v57, %v12875_v55  ;;  %v12340_v62 = vrot.slane %v11352_v60, %v24497_v36  ;;  %v17037_v59 = vld [vmem:[%s17308_s13 + $0x38] sm:$0xff]  ;;  %v11155_v0 = vsel %vm406_vm0, %v10407_v31, 0.0 }
 0x47b   : > { %v12837_v47 = vsel %vm12745_vm9, %v24842_v48, %v22809_v5  ;;  %v24845_v5 = vld [vmem:[#allocation85_spill] sm:$0xff]  ;;  %16689 = vmatprep.subr.mxu0 %v24569_v12  ;;  %16714 = vmatprep.subr.mxu1 %v24569_v12  ;;  %v24846_v33 = vrot.slane %v22329_v40, %v24497_v36  ;;  %v12364_v38 = vrot.slane %v11358_v56, %v24497_v36  ;;  %v24848_v48 = vld [vmem:[#allocation8_spill] sm:$0xff] }
 0x47c   : > { %v11134_v28 = vsel %vm406_vm0, %v24845_v5, 0.0  ;;  %v11364_v57 = vadd.f32 %v20940_v11, %v24847_v20  ;;  %16690 = vmatpush3.msra.mxu0 %v17037_v59  ;;  %v11359_v60 = vadd.f32 %v20940_v11, %v22240_v32  ;;  %v11353_v55 = vadd.f32 %v20940_v11, %v24848_v48  ;;  %16691 = vmatprep.mubr.msk.f32.mxu0 %vm17186_vm1, %v24569_v12  ;;  %v24852_v20 = vld [vmem:[#allocation73_spill] sm:$0xff]  ;;  %v22977_v59 = vpop.xlane.xlu1 %10967 }
 0x47d   : > { %v12880_v25 = vsel %vm12733_vm3, %v12356_v41, %v24846_v33  ;;  %11135 = vadd.xlane.f32.xlu0 %v11134_v28  ;;  %v10408_v40 = vmul.f32 %v22865_v39, %v10145_v63  ;;  %v17038_v41 = vld [vmem:[%s17308_s13 + $0x60] sm:$0xff]  ;;  %v12360_v56 = vrot.slane %v11357_v23, %v24497_v36  ;;  %v11360_v5 = vadd.f32 %v20940_v11, %v22291_v24  ;;  %v24849_v28 = vld [vmem:[#allocation108_spill] sm:$0xff]  ;;  %v24851_v24 = vld [vmem:[#allocation87_spill] sm:$0xff] }
 0x47e   : > { %16715 = vmatpush3.msra.mxu1 %v17038_v41  ;;  %v11365_v32 = vadd.f32 %v20940_v11, %v24849_v28  ;;  %11156 = vadd.xlane.f32.xlu1 %v11155_v0  ;;  %v22965_v31 = vmul.f32 %v12837_v47, %v22247_v7  ;;  %v22968_v39 = vmul.f32 %v12851_v45, %v22399_v30  ;;  %v24850_v33 = vld [vmem:[#allocation192_spill] sm:$0xff]  ;;  %v22984_v45 = vpop.xlane.xlu0 %11021 }
 0x47f   : > { %16716 = vmatprep.mubr.msk.f32.mxu1 %vm17186_vm1, %v24569_v12  ;;  %v12877_v63 = vsel %vm12741_vm7, %v12340_v62, %v12876_v19  ;;  %v11170_v23 = vsel %vm406_vm0, %v24850_v33, 0.0  ;;  %16692 = vmatmul.mubr.msk.f32.vlgmr.msra.gmra.mrb[86].mxu0 %vm3192_vm2, %v24852_v20  ;;  %v12881_v7 = vsel %vm12735_vm4, %v12360_v56, %v12880_v25  ;;  %v12388_v47 = vrot.slane %v11364_v57, %v24497_v36  ;;  %v17039_v25 = vld [vmem:[%s17308_s13 + $0x48] sm:$0xff]  ;;  %v24853_v56 = vld [vmem:[#allocation193_spill] sm:$0xff] }
 0x480   : > { %16717 = vmatmul.mubr.msk.f32.vlgmr.msra.gmra.mrb[92].mxu1 %vm3192_vm2, %v24851_v24  ;;  %v11354_v30 = vadd.f32 %v20940_v11, %v22302_v10  ;;  %16699 = vmatprep.subr.mxu0 %v24569_v12  ;;  %v12882_v19 = vsel %vm12737_vm5, %v12364_v38, %v12881_v7  ;;  %v12368_v62 = vrot.slane %v11359_v60, %v24497_v36  ;;  %v11158_v0 = vsel %vm406_vm0, %v10408_v40, 0.0  ;;  %v17040_v40 = vld [vmem:[%s17308_s13 + $0x70] sm:$0xff] }
 0x481   : > { %11171 = vadd.xlane.f32.xlu0 %v11170_v23  ;;  %v12344_v48 = vrot.slane %v11353_v55, %v24497_v36  ;;  %16724 = vmatprep.subr.mxu1 %v24569_v12  ;;  %v12372_v10 = vrot.slane %v11360_v5, %v24497_v36  ;;  %v12392_v57 = vrot.slane %v11365_v32, %v24497_v36 }
 0x482   : > { %16700 = vmatpush3.msra.mxu0 %v17039_v25  ;;  %v11361_v41 = vadd.f32 %v20940_v11, %v22424_v44  ;;  %11159 = vadd.xlane.f32.xlu1 %v11158_v0  ;;  %v11371_v38 = vadd.f32 %v20940_v11, %v22347_v37  ;;  %v11366_v60 = vadd.f32 %v20940_v11, %v22354_v43  ;;  %v11173_v44 = vsel %vm406_vm0, %v24853_v56, 0.0  ;;  %v17042_v25 = vld [vmem:[%s17308_s13 + $0x80] sm:$0xff] }
 0x483   : > { %16701 = vmatprep.mubr.msk.f32.mxu0 %vm17186_vm1, %v24569_v12  ;;  %v11362_v55 = vadd.f32 %v20940_v11, %v22551_v8  ;;  %16725 = vmatpush3.msra.mxu1 %v17040_v40  ;;  %v24854_v5 = vrot.slane %v22395_v49, %v24497_v36  ;;  %v12348_v37 = vrot.slane %v11354_v30, %v24497_v36  ;;  %v13028_v49 = vsel %vm3192_vm2, %v24806_v16, 0.0 }
 0x484   : > { %16726 = vmatprep.mubr.msk.f32.mxu1 %vm17186_vm1, %v24569_v12  ;;  %v11372_v43 = vadd.f32 %v20940_v11, %v22497_v21  ;;  %16702 = vmatmul.mubr.msk.f32.vlgmr.msra.gmra.mrb[88].mxu0 %vm3192_vm2, %v22390_v61  ;;  %v12883_v8 = vsel %vm12739_vm6, %v12368_v62, %v12882_v19  ;;  %v12878_v32 = vsel %vm12743_vm8, %v12344_v48, %v12877_v63  ;;  %v23029_v21 = vpop.xlane.xlu1 %11003  ;;  %v17041_v19 = vld [vmem:[%s17308_s13 + $0x58] sm:$0xff] }
 0x485   : > { %v12887_v28 = vsel %vm12733_vm3, %v12388_v47, %v24854_v5  ;;  %11174 = vadd.xlane.f32.xlu0 %v11173_v44  ;;  %v23022_v33 = vadd.f32 %v20940_v11, %v22382_v14  ;;  %16727 = vmatmul.mubr.msk.f32.vlgmr.msra.gmra.mrb[94].mxu1 %vm3192_vm2, %v22285_v9  ;;  %v12884_v23 = vsel %vm12741_vm7, %v12372_v10, %v12883_v8  ;;  %v23035_v14 = vpop.xlane.xlu0 %10988  ;;  %v24855_v10 = vld [vmem:[#allocation75_spill] sm:$0xff]  ;;  %v24858_v8 = vld [vmem:[#allocation72_spill] sm:$0xff] }
 0x486   : > { %16709 = vmatprep.subr.mxu0 %v24569_v12  ;;  %v12888_v7 = vsel %vm12735_vm4, %v12392_v57, %v12887_v28  ;;  %v12376_v63 = vrot.slane %v11361_v41, %v24497_v36  ;;  %13029 = vadd.xlane.f32.xlu1 %v13028_v49  ;;  %v12416_v16 = vrot.slane %v11371_v38, %v24497_v36  ;;  %v11176_v57 = vsel %vm406_vm0, %v24855_v10, 0.0 }
 0x487   : > { %16734 = vmatprep.subr.mxu1 %v24569_v12  ;;  %v12396_v47 = vrot.slane %v11366_v60, %v24497_v36  ;;  %v12380_v30 = vrot.slane %v11362_v55, %v24497_v36  ;;  %16710 = vmatpush3.msra.mxu0 %v17041_v19  ;;  %v12879_v62 = vsel %vm12745_vm9, %v12348_v37, %v12878_v32  ;;  %v11179_v32 = vsel %vm406_vm0, %v24858_v8, 0.0 }
 0x488   : > { %16711 = vmatprep.mubr.msk.f32.mxu0 %vm17186_vm1, %v24569_v12  ;;  %v12420_v48 = vrot.slane %v11372_v43, %v24497_v36  ;;  %v11374_v0 = vadd.f32 %v20940_v11, %v22615_v54  ;;  %16735 = vmatpush3.msra.mxu1 %v17042_v25  ;;  %v12448_v41 = vrot.slane %v23022_v33, %v24497_v36  ;;  %v13034_v54 = vsel %vm3192_vm2, %v24812_v29, 0.0  ;;  %v24857_v29 = vld [vmem:[#allocation98_spill] sm:$0xff] }
 0x489   : > { %16736 = vmatprep.mubr.msk.f32.mxu1 %vm17186_vm1, %v24569_v12  ;;  %v11373_v38 = vadd.f32 %v20940_v11, %v22483_v53  ;;  %v11380_v60 = vadd.f32 %v20940_v11, %v22570_v58  ;;  %11177 = vadd.xlane.f32.xlu0 %v11176_v57  ;;  %v12885_v55 = vsel %vm12743_vm8, %v12376_v63, %v12884_v23  ;;  %v24856_v58 = vld [vmem:[#allocation114_spill] sm:$0xff]  ;;  %v23093_v33 = vpop.xlane.xlu0 %11024  ;;  %v17044_v63 = vld [vmem:[%s17308_s13 + $0x90] sm:$0xff] }
 0x48a   : > { %16712 = vmatmul.mubr.msk.f32.vlgmr.msra.gmra.mrb[90].mxu0 %vm3192_vm2, %v22755_v18  ;;  %v23065_v40 = vadd.f32 %v20940_v11, %v22386_v35  ;;  %v23069_v53 = vadd.f32 %v20940_v11, %v22435_v13  ;;  %13035 = vadd.xlane.f32.xlu1 %v13034_v54  ;;  %v23074_v56 = vmul.f32 %v12879_v62, %v24857_v29  ;;  %v23082_v35 = vpop.xlane.xlu1 %11006  ;;  %v17043_v43 = vld [vmem:[%s17308_s13 + $0x68] sm:$0xff]  ;;  %v24861_v29 = vld [vmem:[#allocation77_spill] sm:$0xff] }
 0x48b   : > { %16737 = vmatmul.mubr.msk.f32.vlgmr.msra.gmra.mrb[96].mxu1 %vm3192_vm2, %v24856_v58  ;;  %v23077_v44 = vsel %vm12737_vm5, %v12396_v47, %v12888_v7  ;;  %v12886_v5 = vsel %vm12745_vm9, %v12380_v30, %v12885_v55  ;;  %16719 = vmatprep.subr.mxu0 %v24569_v12  ;;  %v12894_v13 = vsel %vm12733_vm3, %v12420_v48, %v12416_v16  ;;  %v24859_v30 = vld [vmem:[#allocation93_spill] sm:$0xff]  ;;  %v24860_v62 = vld [vmem:[#allocation206_spill] sm:$0xff] }
 0x48c   : > { %16744 = vmatprep.subr.mxu1 %v24569_v12  ;;  %v12428_v28 = vrot.slane %v11374_v0, %v24497_v36  ;;  %v11375_v37 = vadd.f32 %v20940_v11, %v22671_v52  ;;  %16720 = vmatpush3.msra.mxu0 %v17043_v43  ;;  %v12424_v49 = vrot.slane %v11373_v38, %v24497_v36  ;;  %v13040_v52 = vsel %vm3192_vm2, %v24820_v6, 0.0  ;;  %v17046_v55 = vld [vmem:[%s17308_s13 + $0xa0] sm:$0xff] }
 0x48d   : > { %16721 = vmatprep.mubr.msk.f32.mxu0 %vm17186_vm1, %v24569_v12  ;;  %v12452_v23 = vrot.slane %v11380_v60, %v24497_v36  ;;  %v11376_v7 = vadd.f32 %v20940_v11, %v22717_v46  ;;  %16745 = vmatpush3.msra.mxu1 %v17044_v63  ;;  %v12400_v16 = vrot.slane %v23065_v40, %v24497_v36  ;;  %v17045_v60 = vld [vmem:[%s17308_s13 + $0x78] sm:$0xff]  ;;  %v23137_v54 = vpop.f32.mrb[48].mxu0  ;;  %v17047_v63 = vld [vmem:[%s17308_s13 + $0x88] sm:$0xff] }
 0x48e   : > { %16746 = vmatprep.mubr.msk.f32.mxu1 %vm17186_vm1, %v24569_v12  ;;  %v12404_v47 = vrot.slane %v23069_v53, %v24497_v36  ;;  %13041 = vadd.xlane.f32.xlu1 %v13040_v52  ;;  %v11377_v46 = vadd.f32 %v20940_v11, %v22874_v26  ;;  %v23111_v19 = vmul.f32 %v12886_v5, %v24859_v30  ;;  %v24864_v53 = vld [vmem:[#allocation194_spill] sm:$0xff] }
 0x48f   : > { %11180 = vadd.xlane.f32.xlu0 %v11179_v32  ;;  %v12895_v6 = vsel %vm12735_vm4, %v12424_v49, %v12894_v13  ;;  %16722 = vmatmul.mubr.msk.f32.vlgmr.msra.gmra.mrb[92].mxu0 %vm3192_vm2, %v22965_v31  ;;  %v11378_v48 = vadd.f32 %v20940_v11, %v22977_v59  ;;  %v12432_v25 = vrot.slane %v11375_v37, %v24497_v36  ;;  %v13046_v59 = vsel %vm3192_vm2, %v24828_v15, 0.0  ;;  %v10992_v13 = vpop.xlane.xlu0 %10991 }
 0x490   : > { %16747 = vmatmul.mubr.msk.f32.vlgmr.msra.gmra.mrb[98].mxu1 %vm3192_vm2, %v24860_v62  ;;  %v12896_v0 = vsel %vm12737_vm5, %v12428_v28, %v12895_v6  ;;  %v11381_v26 = vadd.f32 %v20940_v11, %v22681_v2  ;;  %16729 = vmatprep.subr.mxu0 %v24569_v12  ;;  %v12901_v10 = vsel %vm12733_vm3, %v12452_v23, %v12448_v41  ;;  %v23135_v2 = vpop.xlane.xlu1 %11009  ;;  %v16503_v28 = vpop.f32.mrb[49].mxu0  ;;  %v13052_v49 = vsel %vm3192_vm2, %v24835_v22, 0.0 }
 0x491   : > { %16754 = vmatprep.subr.mxu1 %v24569_v12  ;;  %v12436_v57 = vrot.slane %v11376_v7, %v24497_v36  ;;  %v11382_v38 = vadd.f32 %v20940_v11, %v22782_v17  ;;  %16730 = vmatpush3.msra.mxu0 %v17045_v60  ;;  %v11369_v41 = vadd.f32 %v20940_v11, %v22621_v3  ;;  %v11182_v17 = vsel %vm406_vm0, %v24861_v29, 0.0  ;;  %v24865_v29 = vld [vmem:[#allocation111_spill] sm:$0xff] }
 0x492   : > { %16731 = vmatprep.mubr.msk.f32.mxu0 %vm17186_vm1, %v24569_v12  ;;  %13047 = vadd.xlane.f32.xlu1 %v13046_v59  ;;  %v12440_v15 = vrot.slane %v11377_v46, %v24497_v36  ;;  %v11383_v5 = vadd.f32 %v20940_v11, %v22830_v51  ;;  %v11370_v37 = vadd.f32 %v20940_v11, %v22729_v42  ;;  %v24862_v46 = vld [vmem:[#allocation7_spill] sm:$0xff] }
 0x493   : > { %16755 = vmatpush3.msra.mxu1 %v17046_v55  ;;  %16756 = vmatprep.mubr.msk.f32.mxu1 %vm17186_vm1, %v24569_v12  ;;  %v11384_v3 = vadd.f32 %v20940_v11, %v22883_v1  ;;  %v12444_v43 = vrot.slane %v11378_v48, %v24497_v36  ;;  %v12897_v8 = vsel %vm12739_vm6, %v12432_v25, %v12896_v0  ;;  %v13031_v30 = vsel %vm3192_vm2, %v24862_v46, 0.0  ;;  %v23192_v59 = vpop.xlane.xlu0 %11027 }
 0x494   : > { %11183 = vadd.xlane.f32.xlu0 %v11182_v17  ;;  %v12456_v32 = vrot.slane %v11381_v26, %v24497_v36  ;;  %16732 = vmatmul.mubr.msk.f32.vlgmr.msra.gmra.mrb[94].mxu0 %vm3192_vm2, %v22968_v39  ;;  %v11385_v42 = vadd.f32 %v20940_v11, %v23035_v14  ;;  %v12898_v51 = vsel %vm12741_vm7, %v12436_v57, %v12897_v8  ;;  %v24863_v57 = vld [vmem:[#allocation59_spill] sm:$0xff] }
 0x495   : > { %16757 = vmatmul.mubr.msk.f32.vlgmr.msra.gmra.mrb[100].mxu1 %vm3192_vm2, %v23111_v19  ;;  %v12460_v1 = vrot.slane %v11382_v38, %v24497_v36  ;;  %16739 = vmatprep.subr.mxu0 %v24569_v12  ;;  %v11386_v23 = vadd.f32 %v20940_v11, %v10992_v13  ;;  %v12408_v7 = vrot.slane %v11369_v41, %v24497_v36 }
 0x496   : > { %16741 = vmatprep.mubr.msk.f32.mxu0 %vm17186_vm1, %v24569_v12  ;;  %v12899_v52 = vsel %vm12743_vm8, %v12440_v15, %v12898_v51  ;;  %v12464_v14 = vrot.slane %v11383_v5, %v24497_v36  ;;  %13053 = vadd.xlane.f32.xlu1 %v13052_v49  ;;  %v12412_v22 = vrot.slane %v11370_v37, %v24497_v36  ;;  %v23180_v0 = vpop.xlane.xlu1 %11042  ;;  %v17049_v5 = vld [vmem:[%s17308_s13 + $0xb0] sm:$0xff]  ;;  %v24867_v51 = vld [vmem:[#allocation101_spill] sm:$0xff] }
 0x497   : > { %16740 = vmatpush3.msra.mxu0 %v17047_v63  ;;  %v12468_v6 = vrot.slane %v11384_v3, %v24497_v36  ;;  %v12900_v48 = vsel %vm12745_vm9, %v12444_v43, %v12899_v52  ;;  %v12890_v25 = vsel %vm12739_vm6, %v12400_v16, %v23077_v44  ;;  %v12902_v26 = vsel %vm12735_vm4, %v12456_v32, %v12901_v10  ;;  %v17048_v16 = vld [vmem:[%s17308_s13 + $0x98] sm:$0xff]  ;;  %v17050_v43 = vld [vmem:[%s17308_s13 + $0xa8] sm:$0xff] }
 0x498   : > { %13032 = vadd.xlane.f32.xlu0 %v13031_v30  ;;  %16749 = vmatprep.subr.mxu0 %v24569_v12  ;;  %v12472_v38 = vrot.slane %v11385_v42, %v24497_v36  ;;  %v12891_v60 = vsel %vm12741_vm7, %v12404_v47, %v12890_v25  ;;  %v12903_v40 = vsel %vm12737_vm5, %v12460_v1, %v12902_v26  ;;  %v13058_v44 = vsel %vm3192_vm2, %v24844_v34, 0.0  ;;  %v24866_v32 = vld [vmem:[#allocation6_spill] sm:$0xff] }
 0x499   : > { %16742 = vmatmul.mubr.msk.f32.vlgmr.msra.gmra.mrb[96].mxu0 %vm3192_vm2, %v24863_v57  ;;  %16764 = vmatprep.subr.mxu1 %v24569_v12  ;;  %v12476_v10 = vrot.slane %v11386_v23, %v24497_v36  ;;  %v12892_v41 = vsel %vm12743_vm8, %v12408_v7, %v12891_v60  ;;  %v12904_v55 = vsel %vm12739_vm6, %v12464_v14, %v12903_v40  ;;  %v13037_v47 = vsel %vm3192_vm2, %v24864_v53, 0.0  ;;  %v17052_v25 = vld [vmem:[%s17308_s13 + $0xc0] sm:$0xff] }
 0x49a   : > { %16750 = vmatpush3.msra.mxu0 %v17048_v16  ;;  %16751 = vmatprep.mubr.msk.f32.mxu0 %vm17186_vm1, %v24569_v12  ;;  %v23210_v17 = vmul.f32 %v12900_v48, %v24865_v29  ;;  %v12893_v34 = vsel %vm12745_vm9, %v12412_v22, %v12892_v41  ;;  %v12905_v15 = vsel %vm12741_vm7, %v12468_v6, %v12904_v55  ;;  %v23216_v13 = vpop.xlane.xlu1 %11066  ;;  %v13064_v3 = vsel %vm3192_vm2, %v24851_v24, 0.0  ;;  %v23240_v24 = vpop.xlane.xlu0 %11030  ;;  %v17051_v6 = vld [vmem:[%s17308_s13 + $0xb8] sm:$0xff]  ;;  %v17053_v16 = vld [vmem:[%s17308_s13 + $0xc8] sm:$0xff] }
 0x49b   : > { %13059 = vadd.xlane.f32.xlu1 %v13058_v44  ;;  %16759 = vmatprep.subr.mxu0 %v24569_v12  ;;  %v11388_v28 = vadd.f32 %v20940_v11, %v22931_v27  ;;  %v12906_v37 = vsel %vm12743_vm8, %v12472_v38, %v12905_v15  ;;  %v11387_v42 = vadd.f32 %v20940_v11, %v24866_v32  ;;  %v13043_v1 = vsel %vm3192_vm2, %v24841_v50, 0.0  ;;  %v23243_v23 = vpop.f32.mrb[48].mxu1  ;;  %v24868_v50 = vld [vmem:[#allocation126_spill] sm:$0xff] }
 0x49c   : > { %13038 = vadd.xlane.f32.xlu0 %v13037_v47  ;;  %16765 = vmatpush3.msra.mxu1 %v17049_v5  ;;  %v12907_v8 = vsel %vm12745_vm9, %v12476_v10, %v12906_v37  ;;  %v23234_v27 = vmul.f32 %v12893_v34, %v24867_v51  ;;  %v11390_v52 = vadd.f32 %v20940_v11, %v23029_v21  ;;  %v16498_v63 = vpop.f32.mrb[49].mxu1  ;;  %v13070_v30 = vsel %vm3192_vm2, %v22285_v9, 0.0  ;;  %v24869_v51 = vld [vmem:[#allocation123_spill] sm:$0xff] }
 0x49d   : > { %16752 = vmatmul.mubr.msk.f32.vlgmr.msra.gmra.mrb[98].mxu0 %vm3192_vm2, %v23074_v56  ;;  %16766 = vmatprep.mubr.msk.f32.mxu1 %vm17186_vm1, %v24569_v12  ;;  %v12484_v7 = vrot.slane %v11388_v28, %v24497_v36  ;;  %v23251_v14 = vmul.f32 %v12907_v8, %v24868_v50  ;;  %v11389_v46 = vadd.f32 %v20940_v11, %v22919_v4  ;;  %v13049_v48 = vsel %vm3192_vm2, %v24852_v20, 0.0  ;;  %v23321_v50 = vld [vmem:[%s17308_s13 + $0xd0] sm:$0xff] }
 0x49e   : > { %16760 = vmatpush3.msra.mxu0 %v17050_v43  ;;  %16761 = vmatprep.mubr.msk.f32.mxu0 %vm17186_vm1, %v24569_v12  ;;  %v11013_v49 = vpop.xlane.xlu1 %11012  ;;  %v11391_v22 = vadd.f32 %v20940_v11, %v23082_v35  ;;  %v12480_v21 = vrot.slane %v11387_v42, %v24497_v36  ;;  %v11392_v4 = vadd.f32 %v20940_v11, %v23135_v2  ;;  %v11034_v20 = vpop.xlane.xlu0 %11033  ;;  %v13076_v44 = vsel %vm3192_vm2, %v24856_v58, 0.0 }
 0x49f   : > { %13065 = vadd.xlane.f32.xlu1 %v13064_v3  ;;  %16767 = vmatmul.mubr.msk.f32.vlgmr.msra.gmra.mrb[102].mxu1 %vm3192_vm2, %v23210_v17  ;;  %v11393_v9 = vadd.f32 %v20940_v11, %v11013_v49  ;;  %v12492_v38 = vrot.slane %v11390_v52, %v24497_v36  ;;  %v23279_v2 = vpop.f32.mrb[50].mxu1  ;;  %v12488_v60 = vrot.slane %v11389_v46, %v24497_v36  ;;  %v13055_v41 = vsel %vm3192_vm2, %v22390_v61, 0.0 }
 0x4a0   : > { %13044 = vadd.xlane.f32.xlu0 %v13043_v1  ;;  %16769 = vmatprep.subr.mxu0 %v24569_v12  ;;  %v12908_v26 = vsel %vm12733_vm3, %v12484_v7, %v12480_v21  ;;  %v12496_v40 = vrot.slane %v11391_v22, %v24497_v36  ;;  %v16508_v10 = vpop.f32.mrb[51].mxu1  ;;  %v12500_v55 = vrot.slane %v11392_v4, %v24497_v36  ;;  %v13082_v61 = vsel %vm3192_vm2, %v24860_v62, 0.0 }
 0x4a1   : > { %16762 = vmatmul.mubr.msk.f32.vlgmr.msra.gmra.mrb[100].mxu0 %vm3192_vm2, %v23234_v27  ;;  %16774 = vmatprep.subr.mxu1 %v24569_v12  ;;  %v12909_v53 = vsel %vm12735_vm4, %v12488_v60, %v12908_v26  ;;  %v12504_v47 = vrot.slane %v11393_v9, %v24497_v36  ;;  %v13061_v28 = vsel %vm3192_vm2, %v22755_v18, 0.0  ;;  %v13088_v62 = vsel %vm3192_vm2, %v23111_v19, 0.0 }
 0x4a2   : > { %16770 = vmatpush3.msra.mxu0 %v17051_v6  ;;  %16771 = vmatprep.mubr.msk.f32.mxu0 %vm17186_vm1, %v24569_v12  ;;  %v23270_v35 = vpop.xlane.xlu1 %11048  ;;  %v12910_v29 = vsel %vm12737_vm5, %v12492_v38, %v12909_v53  ;;  %v13067_v18 = vsel %vm3192_vm2, %v22965_v31, 0.0  ;;  %v11396_v19 = vadd.f32 %v20940_v11, %v22984_v45  ;;  %v13094_v31 = vsel %vm3192_vm2, %v23210_v17, 0.0  ;;  %v24870_v6 = vld [vmem:[#allocation127_spill] sm:$0xff] }
 0x4a3   : > { %13071 = vadd.xlane.f32.xlu1 %v13070_v30  ;;  %16775 = vmatpush3.msra.mxu1 %v17052_v25  ;;  %v12911_v15 = vsel %vm12739_vm6, %v12496_v40, %v12910_v29  ;;  %v11397_v63 = vadd.f32 %v20940_v11, %v23093_v33  ;;  %v13073_v46 = vsel %vm3192_vm2, %v22968_v39, 0.0  ;;  %v11395_v21 = vadd.f32 %v20940_v11, %v24870_v6 }
 0x4a4   : > { %13050 = vadd.xlane.f32.xlu0 %v13049_v48  ;;  %16776 = vmatprep.mubr.msk.f32.mxu1 %vm17186_vm1, %v24569_v12  ;;  %v12912_v5 = vsel %vm12741_vm7, %v12500_v55, %v12911_v15  ;;  %v11398_v45 = vadd.f32 %v20940_v11, %v23192_v59  ;;  %v11399_v33 = vadd.f32 %v20940_v11, %v23240_v24  ;;  %v13079_v38 = vsel %vm3192_vm2, %v24863_v57, 0.0 }
 0x4a5   : > { %16772 = vmatmul.mubr.msk.f32.vlgmr.msra.gmra.mrb[102].mxu0 %vm3192_vm2, %v23251_v14  ;;  %16779 = vmatprep.subr.mxu0 %v24569_v12  ;;  %v12913_v43 = vsel %vm12743_vm8, %v12504_v47, %v12912_v5  ;;  %v12516_v25 = vrot.slane %v11396_v19, %v24497_v36  ;;  %v11400_v39 = vadd.f32 %v20940_v11, %v11034_v20  ;;  %v13085_v53 = vsel %vm3192_vm2, %v23074_v56, 0.0 }
 0x4a6   : > { %16780 = vmatpush3.msra.mxu0 %v17053_v16  ;;  %16781 = vmatprep.mubr.msk.f32.mxu0 %vm17186_vm1, %v24569_v12  ;;  %v11016_v58 = vpop.xlane.xlu1 %11015  ;;  %v12520_v26 = vrot.slane %v11397_v63, %v24497_v36  ;;  %v12524_v24 = vrot.slane %v11398_v45, %v24497_v36  ;;  %v12528_v20 = vrot.slane %v11399_v33, %v24497_v36  ;;  %v13097_v19 = vsel %vm3192_vm2, %v23251_v14, 0.0 }
 0x4a7   : > { %13077 = vadd.xlane.f32.xlu1 %v13076_v44  ;;  %16784 = vmatprep.subr.mxu1 %v24569_v12  ;;  %v11394_v34 = vadd.f32 %v20940_v11, %v11016_v58  ;;  %v23307_v8 = vpop.f32.mrb[52].mxu1  ;;  %v12512_v44 = vrot.slane %v11395_v21, %v24497_v36  ;;  %v12532_v10 = vrot.slane %v11400_v39, %v24497_v36 }
 0x4a8   : > { %13056 = vadd.xlane.f32.xlu0 %v13055_v41  ;;  %16789 = vmatprep.subr.mxu0 %v24569_v12  ;;  %v23304_v3 = vpop.xlane.xlu0 %11045  ;;  %v16518_v42 = vpop.f32.mrb[53].mxu1  ;;  %v11403_v21 = vadd.f32 %v20940_v11, %v23180_v0 }
 0x4a9   : > { %v12508_v37 = vrot.slane %v11394_v34, %v24497_v36  ;;  %v23317_v7 = vpop.f32.mrb[50].mxu0  ;;  %v12915_v16 = vsel %vm12733_vm3, %v12516_v25, %v12512_v44  ;;  %v11404_v6 = vadd.f32 %v20940_v11, %v23304_v3  ;;  %v11405_v25 = vadd.f32 %v20940_v11, %v23270_v35 }
 0x4aa   : > { %v16513_v52 = vpop.f32.mrb[51].mxu0  ;;  %v12916_v57 = vsel %vm12735_vm4, %v12520_v26, %v12915_v16 }
 0x4ab   : > { %13083 = vadd.xlane.f32.xlu1 %v13082_v61  ;;  %v12914_v32 = vsel %vm12745_vm9, %v12508_v37, %v12913_v43  ;;  %v11052_v17 = vpop.xlane.xlu1 %11051  ;;  %v12917_v34 = vsel %vm12737_vm5, %v12524_v24, %v12916_v57  ;;  %v12552_v24 = vrot.slane %v11405_v25, %v24497_v36 }
 0x4ac   : > { %13062 = vadd.xlane.f32.xlu0 %v13061_v28  ;;  %v13020_v1 = vmul.f32 %v12914_v32, %v24869_v51  ;;  %v23315_v49 = vpop.xlane.xlu0 %11069  ;;  %v12918_v61 = vsel %vm12739_vm6, %v12528_v20, %v12917_v34  ;;  %v13091_v32 = vsel %vm3192_vm2, %v23234_v27, 0.0  ;;  %v11406_v33 = vadd.f32 %v20940_v11, %v11052_v17 }
 0x4ad   : > { %v12919_v28 = vsel %vm12741_vm7, %v12532_v10, %v12918_v61 }
 0x4ae   : > { %16777 = vmatmul.mubr.msk.f32.vlgmr.msra.gmra.mrb[104].mxu1 %vm3192_vm2, %v13020_v1  ;;  %v13100_v48 = vsel %vm3192_vm2, %v13020_v1, 0.0  ;;  %v24871_v1 = vld [vmem:[#allocation128_spill] sm:$0xff]  ;;  %v12556_v17 = vrot.slane %v11406_v33, %v24497_v36 }
 0x4af   : > { %13089 = vadd.xlane.f32.xlu1 %v13088_v62  ;;  %16785 = vmatpush3.msra.mxu1 %v23321_v50  ;;  %v23335_v22 = vpop.f32.mrb[54].mxu1 }
 0x4b0   : > { %13068 = vadd.xlane.f32.xlu0 %v13067_v18  ;;  %16786 = vmatprep.mubr.msk.f32.mxu1 %vm17186_vm1, %v24569_v12  ;;  %v11037_v30 = vpop.xlane.xlu0 %11036  ;;  %v16528_v4 = vpop.f32.mrb[55].mxu1 }
 0x4b1   : > { %16794 = vmatprep.subr.mxu1 %v24569_v12  ;;  %v23346_v9 = vpop.f32.mrb[52].mxu0  ;;  %v11401_v59 = vadd.f32 %v20940_v11, %v11037_v30  ;;  %v12548_v4 = vrot.slane %v11404_v6, %v24497_v36 }
 0x4b2   : > { %v16523_v40 = vpop.f32.mrb[53].mxu0 }
 0x4b3   : > { %13095 = vadd.xlane.f32.xlu1 %v13094_v31  ;;  %v23359_v55 = vpop.f32.mrb[56].mxu1  ;;  %v12536_v47 = vrot.slane %v11401_v59, %v24497_v36  ;;  %v23383_v31 = vld [vmem:[%s17308_s13 + $0xd8] sm:$0xff] }
 0x4b4   : > { %13074 = vadd.xlane.f32.xlu0 %v13073_v46  ;;  %v23352_v60 = vpop.xlane.xlu0 %11072  ;;  %v16538_v29 = vpop.f32.mrb[57].mxu1 }
 0x4b5   : > { %v12920_v42 = vsel %vm12743_vm8, %v12536_v47, %v12919_v28 }
 0x4b7   : > { %13101 = vadd.xlane.f32.xlu1 %v13100_v48 }
 0x4b8   : > { %13080 = vadd.xlane.f32.xlu0 %v13079_v38  ;;  %v11055_v41 = vpop.xlane.xlu1 %11054  ;;  %v11040_v58 = vpop.xlane.xlu0 %11039  ;;  %v12544_v38 = vrot.slane %v11403_v21, %v24497_v36 }
 0x4b9   : > { %v11402_v15 = vadd.f32 %v20940_v11, %v11040_v58  ;;  %v23368_v5 = vpop.f32.mrb[54].mxu0  ;;  %v11407_v39 = vadd.f32 %v20940_v11, %v11055_v41 }
 0x4ba   : > { %v16533_v56 = vpop.f32.mrb[55].mxu0  ;;  %v12922_v44 = vsel %vm12733_vm3, %v12548_v4, %v12544_v38 }
 0x4bb   : > { %v12540_v43 = vrot.slane %v11402_v15, %v24497_v36  ;;  %v12560_v35 = vrot.slane %v11407_v39, %v24497_v36  ;;  %v12923_v41 = vsel %vm12735_vm4, %v12552_v24, %v12922_v44 }
 0x4bc   : > { %13086 = vadd.xlane.f32.xlu0 %v13085_v53  ;;  %v11058_v37 = vpop.xlane.xlu1 %11057  ;;  %v11076_v51 = vpop.xlane.xlu0 %11075  ;;  %v12924_v58 = vsel %vm12737_vm5, %v12556_v17, %v12923_v41 }
 0x4bd   : > { %v12921_v62 = vsel %vm12745_vm9, %v12540_v43, %v12920_v42  ;;  %v11408_v3 = vadd.f32 %v20940_v11, %v11058_v37  ;;  %v12925_v34 = vsel %vm12739_vm6, %v12560_v35, %v12924_v58  ;;  %v11412_v43 = vadd.f32 %v20940_v11, %v23315_v49  ;;  %v24872_v42 = vld [vmem:[#allocation96_spill] sm:$0xff] }
 0x4be   : > { %v13021_v18 = vmul.f32 %v12921_v62, %v24871_v1 }
 0x4bf   : > { %v12564_v16 = vrot.slane %v11408_v3, %v24497_v36  ;;  %v12580_v49 = vrot.slane %v11412_v43, %v24497_v36 }
 0x4c0   : > { %13092 = vadd.xlane.f32.xlu0 %v13091_v32  ;;  %v23377_v52 = vpop.xlane.xlu1 %11090  ;;  %16782 = vmatmul.mubr.msk.f32.vlgmr.msra.gmra.mrb[104].mxu0 %vm3192_vm2, %v13021_v18  ;;  %v13103_v27 = vsel %vm3192_vm2, %v13021_v18, 0.0  ;;  %v11079_v63 = vpop.xlane.xlu0 %11078  ;;  %v11413_v32 = vadd.f32 %v20940_v11, %v23352_v60  ;;  %v11411_v18 = vadd.f32 %v20940_v11, %v23216_v13  ;;  %v23444_v60 = vld [vmem:[%s17308_s13 + $0xe0] sm:$0xff] }
 0x4c1   : > { %16790 = vmatpush3.msra.mxu0 %v23383_v31  ;;  %16791 = vmatprep.mubr.msk.f32.mxu0 %vm17186_vm1, %v24569_v12  ;;  %v12926_v61 = vsel %vm12741_vm7, %v12564_v16, %v12925_v34 }
 0x4c2   : > { %16799 = vmatprep.subr.mxu0 %v24569_v12  ;;  %v12584_v13 = vrot.slane %v11413_v32, %v24497_v36 }
 0x4c4   : > { %13098 = vadd.xlane.f32.xlu0 %v13097_v19  ;;  %v23390_v46 = vpop.xlane.xlu1 %11114  ;;  %v23392_v30 = vpop.f32.mrb[58].mxu1  ;;  %v11414_v19 = vadd.f32 %v20940_v11, %v11076_v51 }
 0x4c5   : > { %v16548_v14 = vpop.f32.mrb[59].mxu1  ;;  %v11082_v48 = vpop.xlane.xlu0 %11081 }
 0x4c6   : > { %v11416_v6 = vadd.f32 %v20940_v11, %v11082_v48  ;;  %v12588_v48 = vrot.slane %v11414_v19, %v24497_v36 }
 0x4c8   : > { %13104 = vadd.xlane.f32.xlu0 %v13103_v27  ;;  %v11415_v27 = vadd.f32 %v20940_v11, %v11079_v63  ;;  %v12576_v63 = vrot.slane %v11411_v18, %v24497_v36  ;;  %v12596_v39 = vrot.slane %v11416_v6, %v24497_v36 }
 0x4ca   : > { %v11061_v45 = vpop.xlane.xlu1 %11060  ;;  %v12592_v4 = vrot.slane %v11415_v27, %v24497_v36  ;;  %v12929_v25 = vsel %vm12733_vm3, %v12580_v49, %v12576_v63 }
 0x4cb   : > { %v11409_v0 = vadd.f32 %v20940_v11, %v11061_v45  ;;  %v12930_v3 = vsel %vm12735_vm4, %v12584_v13, %v12929_v25 }
 0x4cc   : > { %v23403_v26 = vpop.f32.mrb[60].mxu1  ;;  %v12931_v44 = vsel %vm12737_vm5, %v12588_v48, %v12930_v3 }
 0x4cd   : > { %v16558_v59 = vpop.f32.mrb[61].mxu1  ;;  %v12568_v57 = vrot.slane %v11409_v0, %v24497_v36  ;;  %v12932_v35 = vsel %vm12739_vm6, %v12592_v4, %v12931_v44 }
 0x4ce   : > { %v23408_v40 = vpop.xlane.xlu1 %11096  ;;  %v12933_v16 = vsel %vm12741_vm7, %v12596_v39, %v12932_v35 }
 0x4cf   : > { %v12927_v37 = vsel %vm12743_vm8, %v12568_v57, %v12926_v61  ;;  %v11421_v49 = vadd.f32 %v20940_v11, %v23408_v40 }
 0x4d1   : > { %v23414_v20 = vpop.xlane.xlu0 %11093  ;;  %v12616_v4 = vrot.slane %v11421_v49, %v24497_v36 }
 0x4d2   : > { %v23417_v10 = vpop.f32.mrb[62].mxu1  ;;  %v11064_v53 = vpop.xlane.xlu1 %11063 }
 0x4d3   : > { %v16568_v47 = vpop.f32.mrb[63].mxu1  ;;  %v11410_v29 = vadd.f32 %v20940_v11, %v11064_v53 }
 0x4d5   : > { %v23424_v15 = vpop.xlane.xlu0 %11117  ;;  %v12572_v28 = vrot.slane %v11410_v29, %v24497_v36  ;;  %v24873_v29 = vld [vmem:[#allocation208_spill] sm:$0xff] }
 0x4d6   : > { %v11100_v21 = vpop.xlane.xlu1 %11099 }
 0x4d7   : > { %v12928_v56 = vsel %vm12745_vm9, %v12572_v28, %v12927_v37  ;;  %v23476_v37 = vld [vmem:[%s17308_s13 + $0xe8] sm:$0xff] }
 0x4d8   : > { %v13022_v62 = vmul.f32 %v12928_v56, %v24872_v42 }
 0x4d9   : > { %v11085_v1 = vpop.xlane.xlu0 %11084 }
 0x4da   : > { %16787 = vmatmul.mubr.msk.f32.vlgmr.msra.gmra.mrb[106].mxu1 %vm3192_vm2, %v13022_v62  ;;  %v13106_v14 = vsel %vm3192_vm2, %v13022_v62, 0.0  ;;  %v11417_v51 = vadd.f32 %v20940_v11, %v11085_v1  ;;  %v11420_v62 = vadd.f32 %v20940_v11, %v23414_v20  ;;  %v11419_v1 = vadd.f32 %v20940_v11, %v23377_v52 }
 0x4db   : > { %13107 = vadd.xlane.f32.xlu1 %v13106_v14  ;;  %16795 = vmatpush3.msra.mxu1 %v23444_v60  ;;  %v11422_v14 = vadd.f32 %v20940_v11, %v11100_v21 }
 0x4dc   : > { %16796 = vmatprep.mubr.msk.f32.mxu1 %vm17186_vm1, %v24569_v12  ;;  %16804 = vmatprep.subr.mxu1 %v24569_v12  ;;  %v12600_v59 = vrot.slane %v11417_v51, %v24497_v36  ;;  %v12612_v27 = vrot.slane %v11420_v62, %v24497_v36  ;;  %v12608_v13 = vrot.slane %v11419_v1, %v24497_v36 }
 0x4dd   : > { %v23449_v45 = vpop.xlane.xlu0 %11120  ;;  %v12620_v48 = vrot.slane %v11422_v14, %v24497_v36 }
 0x4de   : > { %v23457_v33 = vpop.f32.mrb[56].mxu0  ;;  %v12934_v57 = vsel %vm12743_vm8, %v12600_v59, %v12933_v16  ;;  %v12936_v52 = vsel %vm12733_vm3, %v12612_v27, %v12608_v13  ;;  %v11428_v16 = vadd.f32 %v20940_v11, %v23424_v15  ;;  %v23534_v13 = vld [vmem:[%s17308_s13 + $0xf0] sm:$0xff] }
 0x4df   : > { %v16543_v38 = vpop.f32.mrb[57].mxu0  ;;  %v12937_v39 = vsel %vm12735_vm4, %v12616_v4, %v12936_v52 }
 0x4e0   : > { %v12938_v59 = vsel %vm12737_vm5, %v12620_v48, %v12937_v39  ;;  %v12644_v27 = vrot.slane %v11428_v16, %v24497_v36 }
 0x4e1   : > { %v11088_v0 = vpop.xlane.xlu0 %11087 }
 0x4e2   : > { %v11103_v17 = vpop.xlane.xlu1 %11102  ;;  %v11418_v24 = vadd.f32 %v20940_v11, %v11088_v0 }
 0x4e3   : > { %v11423_v6 = vadd.f32 %v20940_v11, %v11103_v17 }
 0x4e4   : > { %v12604_v41 = vrot.slane %v11418_v24, %v24497_v36 }
 0x4e5   : > { %v11124_v58 = vpop.xlane.xlu0 %11123  ;;  %v12624_v21 = vrot.slane %v11423_v6, %v24497_v36 }
 0x4e6   : > { %v11106_v53 = vpop.xlane.xlu1 %11105  ;;  %v12935_v47 = vsel %vm12745_vm9, %v12604_v41, %v12934_v57 }
 0x4e7   : > { %v13023_v34 = vmul.f32 %v12935_v47, %v24873_v29  ;;  %v11424_v51 = vadd.f32 %v20940_v11, %v11106_v53  ;;  %v12939_v44 = vsel %vm12739_vm6, %v12624_v21, %v12938_v59  ;;  %v11429_v53 = vadd.f32 %v20940_v11, %v23449_v45 }
 0x4e8   : > { %v11427_v29 = vadd.f32 %v20940_v11, %v23390_v46 }
 0x4e9   : > { %16792 = vmatmul.mubr.msk.f32.vlgmr.msra.gmra.mrb[106].mxu0 %vm3192_vm2, %v13023_v34  ;;  %v13109_v61 = vsel %vm3192_vm2, %v13023_v34, 0.0  ;;  %v11127_v56 = vpop.xlane.xlu0 %11126  ;;  %v12628_v40 = vrot.slane %v11424_v51, %v24497_v36  ;;  %v11430_v34 = vadd.f32 %v20940_v11, %v11124_v58  ;;  %v12648_v58 = vrot.slane %v11429_v53, %v24497_v36 }
 0x4ea   : > { %v23473_v28 = vpop.xlane.xlu1 %11138  ;;  %13110 = vadd.xlane.f32.xlu0 %v13109_v61  ;;  %16800 = vmatpush3.msra.mxu0 %v23476_v37  ;;  %v23479_v43 = vpop.f32.mrb[58].mxu0  ;;  %v24874_v61 = vld [vmem:[#allocation104_spill] sm:$0xff]  ;;  %v11431_v15 = vadd.f32 %v20940_v11, %v11127_v56  ;;  %v12640_v51 = vrot.slane %v11427_v29, %v24497_v36 }
 0x4eb   : > { %16801 = vmatprep.mubr.msk.f32.mxu0 %vm17186_vm1, %v24569_v12  ;;  %16809 = vmatprep.subr.mxu0 %v24569_v12  ;;  %v16553_v32 = vpop.f32.mrb[59].mxu0  ;;  %v12940_v24 = vsel %vm12741_vm7, %v12628_v40, %v12939_v44  ;;  %v11435_v48 = vadd.f32 %v20940_v11, %v23473_v28 }
 0x4ec   : > { %v12656_v4 = vrot.slane %v11431_v15, %v24497_v36  ;;  %v12943_v21 = vsel %vm12733_vm3, %v12644_v27, %v12640_v51 }
 0x4ed   : > { %v11130_v19 = vpop.xlane.xlu0 %11129 }
 0x4ee   : > { %v23484_v42 = vpop.xlane.xlu1 %11162  ;;  %v11432_v45 = vadd.f32 %v20940_v11, %v11130_v19  ;;  %v12652_v19 = vrot.slane %v11430_v34, %v24497_v36 }
 0x4f2   : > { %v11109_v18 = vpop.xlane.xlu1 %11108 }
 0x4f3   : > { %v11425_v20 = vadd.f32 %v20940_v11, %v11109_v18 }
 0x4f5   : > { %v12632_v38 = vrot.slane %v11425_v20, %v24497_v36 }
 0x4f7   : > { %v11145_v63 = vpop.xlane.xlu1 %11144  ;;  %v12941_v41 = vsel %vm12743_vm8, %v12632_v38, %v12940_v24  ;;  %v12944_v38 = vsel %vm12735_vm4, %v12648_v58, %v12943_v21 }
 0x4f8   : > { %v12945_v44 = vsel %vm12737_vm5, %v12652_v19, %v12944_v38  ;;  %v11437_v28 = vadd.f32 %v20940_v11, %v11145_v63  ;;  %v24875_v19 = vld [vmem:[#allocation94_spill] sm:$0xff] }
 0x4f9   : > { %v11142_v25 = vpop.xlane.xlu0 %11141  ;;  %v12946_v53 = vsel %vm12739_vm6, %v12656_v4, %v12945_v44 }
 0x4fa   : > { %v11436_v6 = vadd.f32 %v20940_v11, %v11142_v25  ;;  %v12660_v25 = vrot.slane %v11432_v45, %v24497_v36 }
 0x4fb   : > { %v11112_v3 = vpop.xlane.xlu1 %11111 }
 0x4fc   : > { %v11426_v0 = vadd.f32 %v20940_v11, %v11112_v3  ;;  %v12676_v3 = vrot.slane %v11436_v6, %v24497_v36 }
 0x4fd   : > { %v23508_v17 = vpop.xlane.xlu0 %11165 }
 0x4fe   : > { %v12636_v35 = vrot.slane %v11426_v0, %v24497_v36 }
 0x4ff   : > { %v11148_v57 = vpop.xlane.xlu1 %11147  ;;  %v23522_v1 = vpop.f32.mrb[60].mxu0 }
 0x500   : > { %v12942_v47 = vsel %vm12745_vm9, %v12636_v35, %v12941_v41  ;;  %v16563_v18 = vpop.f32.mrb[61].mxu0  ;;  %v11438_v59 = vadd.f32 %v20940_v11, %v11148_v57  ;;  %v12672_v41 = vrot.slane %v11435_v48, %v24497_v36  ;;  %v12947_v57 = vsel %vm12741_vm7, %v12660_v25, %v12946_v53 }
 0x501   : > { %v13024_v32 = vmul.f32 %v12942_v47, %v24874_v61  ;;  %v11133_v62 = vpop.xlane.xlu0 %11132  ;;  %v23529_v49 = vpop.f32.mrb[64].mxu1  ;;  %v12680_v18 = vrot.slane %v11437_v28, %v24497_v36  ;;  %v11444_v53 = vadd.f32 %v20940_v11, %v23508_v17 }
 0x502   : > { %v16578_v56 = vpop.f32.mrb[65].mxu1  ;;  %v11433_v20 = vadd.f32 %v20940_v11, %v11133_v62  ;;  %v12950_v61 = vsel %vm12733_vm3, %v12676_v3, %v12672_v41  ;;  %v12684_v63 = vrot.slane %v11438_v59, %v24497_v36 }
 0x503   : > { %v11151_v14 = vpop.xlane.xlu1 %11150  ;;  %16797 = vmatmul.mubr.msk.f32.vlgmr.msra.gmra.mrb[108].mxu1 %vm3192_vm2, %v13024_v32  ;;  %v13112_v46 = vsel %vm3192_vm2, %v13024_v32, 0.0  ;;  %v12951_v56 = vsel %vm12735_vm4, %v12680_v18, %v12950_v61  ;;  %v12708_v17 = vrot.slane %v11444_v53, %v24497_v36 }
 0x504   : > { %13113 = vadd.xlane.f32.xlu1 %v13112_v46  ;;  %16805 = vmatpush3.msra.mxu1 %v23534_v13  ;;  %v11439_v24 = vadd.f32 %v20940_v11, %v11151_v14  ;;  %v12664_v35 = vrot.slane %v11433_v20, %v24497_v36  ;;  %v12952_v4 = vsel %vm12737_vm5, %v12684_v63, %v12951_v56 }
 0x505   : > { %v11169_v52 = vpop.xlane.xlu0 %11168  ;;  %16806 = vmatprep.mubr.msk.f32.mxu1 %vm17186_vm1, %v24569_v12  ;;  %v23547_v39 = vpop.f32.mrb[66].mxu1 }
 0x506   : > { %v16588_v0 = vpop.f32.mrb[67].mxu1  ;;  %v12688_v27 = vrot.slane %v11439_v24, %v24497_v36  ;;  %v12948_v45 = vsel %vm12743_vm8, %v12664_v35, %v12947_v57  ;;  %v24876_v24 = vld [vmem:[#allocation99_spill] sm:$0xff]  ;;  %v11445_v57 = vadd.f32 %v20940_v11, %v11169_v52 }
 0x507   : > { %v11154_v40 = vpop.xlane.xlu1 %11153  ;;  %v23583_v0 = vld [vmem:[%s17308_s13 + $0xf8] sm:$0xff] }
 0x508   : > { %v11440_v47 = vadd.f32 %v20940_v11, %v11154_v40  ;;  %v12953_v25 = vsel %vm12739_vm6, %v12688_v27, %v12952_v4  ;;  %v12712_v27 = vrot.slane %v11445_v57, %v24497_v36 }
 0x50a   : > { %v11136_v16 = vpop.xlane.xlu0 %11135  ;;  %v12692_v58 = vrot.slane %v11440_v47, %v24497_v36 }
 0x50b   : > { %v11434_v29 = vadd.f32 %v20940_v11, %v11136_v16  ;;  %v11157_v34 = vpop.xlane.xlu1 %11156  ;;  %v23565_v15 = vpop.f32.mrb[68].mxu1 }
 0x50c   : > { %v11441_v32 = vadd.f32 %v20940_v11, %v11157_v34  ;;  %v16598_v46 = vpop.f32.mrb[69].mxu1  ;;  %v12954_v3 = vsel %vm12741_vm7, %v12692_v58, %v12953_v25 }
 0x50d   : > { %v12668_v62 = vrot.slane %v11434_v29, %v24497_v36 }
 0x50e   : > { %v11172_v14 = vpop.xlane.xlu0 %11171  ;;  %v12696_v51 = vrot.slane %v11441_v32, %v24497_v36 }
 0x50f   : > { %v12949_v6 = vsel %vm12745_vm9, %v12668_v62, %v12948_v45  ;;  %v11160_v48 = vpop.xlane.xlu1 %11159  ;;  %v11446_v34 = vadd.f32 %v20940_v11, %v11172_v14 }
 0x510   : > { %v13025_v20 = vmul.f32 %v12949_v6, %v24875_v19  ;;  %v11442_v21 = vadd.f32 %v20940_v11, %v11160_v48  ;;  %v12955_v44 = vsel %vm12743_vm8, %v12696_v51, %v12954_v3 }
 0x511   : > { %v12716_v14 = vrot.slane %v11446_v34, %v24497_v36 }
 0x512   : > { %16802 = vmatmul.mubr.msk.f32.vlgmr.msra.gmra.mrb[108].mxu0 %vm3192_vm2, %v13025_v20  ;;  %v11175_v40 = vpop.xlane.xlu0 %11174  ;;  %v13115_v38 = vsel %vm3192_vm2, %v13025_v20, 0.0  ;;  %v12700_v59 = vrot.slane %v11442_v21, %v24497_v36 }
 0x513   : > { %13116 = vadd.xlane.f32.xlu0 %v13115_v38  ;;  %16810 = vmatpush3.msra.mxu0 %v23583_v0  ;;  %v11447_v63 = vadd.f32 %v20940_v11, %v11175_v40  ;;  %v13030_v58 = vpop.xlane.xlu1 %13029 }
 0x514   : > { %16811 = vmatprep.mubr.msk.f32.mxu0 %vm17186_vm1, %v24569_v12  ;;  %v12956_v28 = vsel %vm12745_vm9, %v12700_v59, %v12955_v44  ;;  %v23591_v41 = vpop.f32.mrb[62].mxu0  ;;  %v11443_v12 = vadd.f32 %v20940_v11, %v23484_v42 }
 0x515   : > { %v13026_v35 = vmul.f32 %v12956_v28, %v24876_v24  ;;  %v16573_v29 = vpop.f32.mrb[63].mxu0  ;;  %v12720_v6 = vrot.slane %v11447_v63, %v24497_v36 }
 0x516   : > { %v11178_v16 = vpop.xlane.xlu0 %11177  ;;  %v23601_v61 = vpop.f32.mrb[70].mxu1  ;;  %v12704_v42 = vrot.slane %v11443_v12, %v24497_v36 }
 0x517   : > { %16807 = vmatmul.mubr.msk.f32.vlgmr.msra.gmra.mrb[110].mxu1 %vm3192_vm2, %v13026_v35  ;;  %v13118_v47 = vsel %vm3192_vm2, %v13026_v35, 0.0  ;;  %v16608_v32 = vpop.f32.mrb[71].mxu1  ;;  %v11448_v62 = vadd.f32 %v20940_v11, %v11178_v16  ;;  %v13036_v24 = vpop.xlane.xlu1 %13035 }
 0x518   : > { %13119 = vadd.xlane.f32.xlu1 %v13118_v47  ;;  %v12957_v56 = vsel %vm12733_vm3, %v12708_v17, %v12704_v42 }
 0x519   : > { %v23608_v45 = vpop.f32.mrb[64].mxu0  ;;  %v12724_v51 = vrot.slane %v11448_v62, %v24497_v36  ;;  %v12958_v20 = vsel %vm12735_vm4, %v12712_v27, %v12957_v56  ;;  %v17060_v27 = vld [vmem:[%s17308_s13] sm:$0xff] }
 0x51a   : > { %v16583_v46 = vpop.f32.mrb[65].mxu0  ;;  %v12959_v25 = vsel %vm12737_vm5, %v12716_v14, %v12958_v20 }
 0x51b   : > { %v12960_v3 = vsel %vm12739_vm6, %v12720_v6, %v12959_v25  ;;  %v13042_v62 = vpop.xlane.xlu1 %13041 }
 0x51c   : > { %v11181_v18 = vpop.xlane.xlu0 %11180  ;;  %v12961_v44 = vsel %vm12741_vm7, %v12724_v51, %v12960_v3 }
 0x51d   : > { %v11449_v52 = vadd.f32 %v20940_v11, %v11181_v18  ;;  %v23615_v19 = vpop.f32.mrb[72].mxu1 }
 0x51e   : > { %v16618_v21 = vpop.f32.mrb[73].mxu1 }
 0x51f   : > { %v12728_v48 = vrot.slane %v11449_v52, %v24497_v36  ;;  %v23621_v38 = vpop.f32.mrb[66].mxu0  ;;  %v15460_v52 = vmul.f32 %v17060_v27, %v13030_v58  ;;  %v13048_v51 = vpop.xlane.xlu1 %13047 }
 0x520   : > { %v16593_v59 = vpop.f32.mrb[67].mxu0 }
 0x521   : > { %v11184_v4 = vpop.xlane.xlu0 %11183  ;;  %v12962_v35 = vsel %vm12743_vm8, %v12728_v48, %v12961_v44  ;;  %v15492_v20 = vadd.f32 %v17060_v27, %v15460_v52  ;;  %v17061_v48 = vld [vmem:[%s17308_s13 + $0x10] sm:$0xff] }
 0x522   : > { %v11450_v40 = vadd.f32 %v20940_v11, %v11184_v4  ;;  %v24877_v11 = vld [vmem:[#allocation42_spill] sm:$0xff]  ;;  %v15462_v4 = vmul.f32 %v17061_v48, %v13036_v24 }
 0x524   : > { %v12732_v28 = vrot.slane %v11450_v40, %v24497_v36  ;;  %v23628_v53 = vpop.f32.mrb[68].mxu0  ;;  %v23630_v47 = vpop.f32.mrb[74].mxu1  ;;  %v15494_v58 = vadd.f32 %v17061_v48, %v15462_v4 }
 0x525   : > { %v16628_v57 = vpop.f32.mrb[75].mxu1  ;;  %v16603_v12 = vpop.f32.mrb[69].mxu0 }
 0x526   : > { %v12963_v16 = vsel %vm12745_vm9, %v12732_v28, %v12962_v35  ;;  %v13033_v34 = vpop.xlane.xlu0 %13032  ;;  %v13054_v28 = vpop.xlane.xlu1 %13053 }
 0x527   : > { %v13027_v29 = vmul.f32 %v12963_v16, %v24877_v11 }
 0x529   : > { %16812 = vmatmul.mubr.msk.f32.vlgmr.msra.gmra.mrb[110].mxu0 %vm3192_vm2, %v13027_v29  ;;  %v13121_v63 = vsel %vm3192_vm2, %v13027_v29, 0.0  ;;  %v23635_v36 = vpop.f32.mrb[70].mxu0  ;;  %v23637_v32 = vpop.f32.mrb[76].mxu1 }
 0x52a   : > { %13122 = vadd.xlane.f32.xlu0 %v13121_v63  ;;  %24878 = vst [vmem:[#allocation61_spill] sm:$0xff] %v23637_v32  ;;  %v16613_v17 = vpop.f32.mrb[71].mxu0  ;;  %v16638_v18 = vpop.f32.mrb[77].mxu1  ;;  %v17062_v63 = vld [vmem:[%s17308_s13 + $0x8] sm:$0xff] }
 0x52b   : > { %v13039_v42 = vpop.xlane.xlu0 %13038  ;;  %v15461_v17 = vmul.f32 %v17062_v63, %v13033_v34  ;;  %v17065_v34 = vld [vmem:[%s17308_s13 + $0x30] sm:$0xff] }
 0x52d   : > { %v23640_v14 = vpop.f32.mrb[78].mxu1  ;;  %v15493_v4 = vadd.f32 %v17062_v63, %v15461_v17 }
 0x52e   : > { %24879 = vst [vmem:[#allocation205_spill] sm:$0xff] %v23640_v14  ;;  %v23642_v46 = vpop.f32.mrb[72].mxu0  ;;  %v16648_v56 = vpop.f32.mrb[79].mxu1 }
 0x52f   : > { %v16623_v6 = vpop.f32.mrb[73].mxu0  ;;  %v13045_v25 = vpop.xlane.xlu0 %13044  ;;  %v17063_v56 = vld [vmem:[%s17308_s13 + $0x20] sm:$0xff] }
 0x530   : > { %v13060_v6 = vpop.xlane.xlu1 %13059 }
 0x532   : > { %v13193_v21 = vpop.f32.mrb[80].mxu1 }
 0x533   : > { %v23645_v40 = vpop.f32.mrb[74].mxu0  ;;  %v15524_v3 = vsub.f32 %v15492_v20, %v13193_v21  ;;  %v16658_v44 = vpop.f32.mrb[81].mxu1  ;;  %v15464_v20 = vmul.f32 %v17063_v56, %v13042_v62 }
 0x534   : > { %v16633_v59 = vpop.f32.mrb[75].mxu0  ;;  %v13051_v57 = vpop.xlane.xlu0 %13050 }
 0x535   : > { %15588 = vrot.lane.b32.xlu1 %v15524_v3, %s17190_s22  ;;  %v17064_v59 = vld [vmem:[%s17308_s13 + $0x18] sm:$0xff] }
 0x536   : > { %v15463_v44 = vmul.f32 %v17064_v59, %v13039_v42  ;;  %v17067_v42 = vld [vmem:[%s17308_s13 + $0x40] sm:$0xff] }
 0x537   : > { %v13339_v35 = vpop.f32.mrb[82].mxu1  ;;  %v15468_v32 = vmul.f32 %v17067_v42, %v13054_v28 }
 0x538   : > { %v23648_v16 = vpop.f32.mrb[76].mxu0  ;;  %v15526_v11 = vsub.f32 %v15494_v58, %v13339_v35  ;;  %v16668_v29 = vpop.f32.mrb[83].mxu1  ;;  %v15495_v62 = vadd.f32 %v17064_v59, %v15463_v44  ;;  %v17069_v59 = vld [vmem:[%s17308_s13 + $0x38] sm:$0xff] }
 0x539   : > { %24880 = vst [vmem:[#allocation109_spill] sm:$0xff] %v23648_v16  ;;  %v16643_v24 = vpop.f32.mrb[77].mxu0  ;;  %v13057_v48 = vpop.xlane.xlu0 %13056  ;;  %v15466_v29 = vmul.f32 %v17065_v34, %v13048_v51  ;;  %v15467_v44 = vmul.f32 %v17069_v59, %v13051_v57 }
 0x53a   : > { %15592 = vrot.lane.b32.xlu1 %v15526_v11, %s17190_s22  ;;  %v13066_v24 = vpop.xlane.xlu1 %13065 }
 0x53c   : > { %v13485_v12 = vpop.f32.mrb[84].mxu1 }
 0x53d   : > { %v23652_v18 = vpop.f32.mrb[78].mxu0  ;;  %v16678_v27 = vpop.f32.mrb[85].mxu1 }
 0x53e   : > { %24881 = vst [vmem:[#allocation132_spill] sm:$0xff] %v23652_v18  ;;  %v16653_v52 = vpop.f32.mrb[79].mxu0  ;;  %v15496_v18 = vadd.f32 %v17063_v56, %v15464_v20  ;;  %v17066_v27 = vld [vmem:[%s17308_s13 + $0x28] sm:$0xff]  ;;  %v13063_v17 = vpop.xlane.xlu0 %13062 }
 0x53f   : > { %v15465_v52 = vmul.f32 %v17066_v27, %v13045_v25  ;;  %v13072_v51 = vpop.xlane.xlu1 %13071 }
 0x540   : > { %v15528_v14 = vsub.f32 %v15496_v18, %v13485_v12  ;;  %v17068_v18 = vld [vmem:[%s17308_s13 + $0x50] sm:$0xff] }
 0x541   : > { %v15497_v25 = vadd.f32 %v17066_v27, %v15465_v52  ;;  %v15470_v20 = vmul.f32 %v17068_v18, %v13060_v6  ;;  %v15499_v6 = vadd.f32 %v17069_v59, %v15467_v44 }
 0x542   : > { %v13266_v21 = vpop.f32.mrb[80].mxu0  ;;  %v13631_v3 = vpop.f32.mrb[86].mxu1 }
 0x543   : > { %v15525_v58 = vsub.f32 %v15493_v4, %v13266_v21  ;;  %v16663_v35 = vpop.f32.mrb[81].mxu0  ;;  %v16688_v11 = vpop.f32.mrb[87].mxu1  ;;  %v15498_v4 = vadd.f32 %v17065_v34, %v15466_v29 }
 0x544   : > { %v13078_v52 = vpop.xlane.xlu1 %13077 }
 0x545   : > { %15590 = vrot.lane.b32.xlu0 %v15525_v58, %s17190_s22  ;;  %v15530_v56 = vsub.f32 %v15498_v4, %v13631_v3  ;;  %v15500_v58 = vadd.f32 %v17067_v42, %v15468_v32  ;;  %v17070_v3 = vld [vmem:[%s17308_s13 + $0x60] sm:$0xff]  ;;  %v15502_v4 = vadd.f32 %v17068_v18, %v15470_v20  ;;  %v17071_v32 = vld [vmem:[%s17308_s13 + $0x48] sm:$0xff]  ;;  %v17073_v18 = vld [vmem:[%s17308_s13 + $0x58] sm:$0xff] }
 0x546   : > { %v15472_v27 = vmul.f32 %v17070_v3, %v13066_v24  ;;  %v15469_v57 = vmul.f32 %v17071_v32, %v13057_v48  ;;  %v15471_v20 = vmul.f32 %v17073_v18, %v13063_v17 }
 0x547   : > { %v13777_v63 = vpop.f32.mrb[88].mxu1 }
 0x548   : > { %v13412_v16 = vpop.f32.mrb[82].mxu0  ;;  %v16698_v11 = vpop.f32.mrb[89].mxu1  ;;  %v15501_v24 = vadd.f32 %v17071_v32, %v15469_v57  ;;  %v15503_v32 = vadd.f32 %v17073_v18, %v15471_v20  ;;  %v17075_v57 = vld [vmem:[%s17308_s13 + $0x90] sm:$0xff] }
 0x549   : > { %v15527_v21 = vsub.f32 %v15495_v62, %v13412_v16  ;;  %v16673_v35 = vpop.f32.mrb[83].mxu0  ;;  %15596 = vrot.lane.b32.xlu0 %v15528_v14, %s17190_s22  ;;  %v13069_v14 = vpop.xlane.xlu0 %13068  ;;  %v15532_v62 = vsub.f32 %v15500_v58, %v13777_v63 }
 0x54b   : > { %15594 = vrot.lane.b32.xlu1 %v15527_v21, %s17190_s22 }
 0x54c   : > { %v13558_v12 = vpop.f32.mrb[84].mxu0 }
 0x54d   : > { %v15529_v28 = vsub.f32 %v15497_v25, %v13558_v12  ;;  %v13923_v34 = vpop.f32.mrb[90].mxu1  ;;  %v16683_v16 = vpop.f32.mrb[85].mxu0  ;;  %15600 = vrot.lane.b32.xlu0 %v15530_v56, %s17190_s22  ;;  %v17072_v25 = vld [vmem:[%s17308_s13 + $0x70] sm:$0xff] }
 0x54e   : > { %v16708_v29 = vpop.f32.mrb[91].mxu1  ;;  %v15534_v35 = vsub.f32 %v15502_v4, %v13923_v34  ;;  %v15474_v12 = vmul.f32 %v17072_v25, %v13072_v51  ;;  %v13075_v58 = vpop.xlane.xlu0 %13074 }
 0x54f   : > { %15598 = vrot.lane.b32.xlu1 %v15529_v28, %s17190_s22  ;;  %v15504_v28 = vadd.f32 %v17070_v3, %v15472_v27  ;;  %v17074_v29 = vld [vmem:[%s17308_s13 + $0x80] sm:$0xff]  ;;  %v13084_v4 = vpop.xlane.xlu1 %13083 }
 0x550   : > { %v15506_v51 = vadd.f32 %v17072_v25, %v15474_v12 }
 0x551   : > { %15604 = vrot.lane.b32.xlu0 %v15532_v62, %s17190_s22  ;;  %v15476_v62 = vmul.f32 %v17074_v29, %v13078_v52 }
 0x552   : > { %v13704_v42 = vpop.f32.mrb[86].mxu0  ;;  %v13081_v3 = vpop.xlane.xlu0 %13080 }
 0x553   : > { %v14069_v21 = vpop.f32.mrb[92].mxu1  ;;  %v15531_v11 = vsub.f32 %v15499_v6, %v13704_v42  ;;  %v16693_v56 = vpop.f32.mrb[87].mxu0  ;;  %v15478_v42 = vmul.f32 %v17075_v57, %v13084_v4  ;;  %v15508_v52 = vadd.f32 %v17074_v29, %v15476_v62 }
 0x554   : > { %v16718_v63 = vpop.f32.mrb[93].mxu1  ;;  %v15536_v59 = vsub.f32 %v15504_v28, %v14069_v21  ;;  %v17076_v21 = vld [vmem:[%s17308_s13 + $0x68] sm:$0xff]  ;;  %v13090_v12 = vpop.xlane.xlu1 %13089 }
 0x555   : > { %15602 = vrot.lane.b32.xlu1 %v15531_v11, %s17190_s22  ;;  %15608 = vrot.lane.b32.xlu0 %v15534_v35, %s17190_s22  ;;  %v15473_v35 = vmul.f32 %v17076_v21, %v13069_v14  ;;  %v15510_v20 = vadd.f32 %v17075_v57, %v15478_v42 }
 0x557   : > { %v13850_v48 = vpop.f32.mrb[88].mxu0  ;;  %v15505_v18 = vadd.f32 %v17076_v21, %v15473_v35 }
 0x558   : > { %v15533_v44 = vsub.f32 %v15501_v24, %v13850_v48  ;;  %v14215_v34 = vpop.f32.mrb[94].mxu1  ;;  %v16703_v16 = vpop.f32.mrb[89].mxu0  ;;  %v17078_v48 = vld [vmem:[%s17308_s13 + $0x78] sm:$0xff] }
 0x559   : > { %v16728_v6 = vpop.f32.mrb[95].mxu1  ;;  %15612 = vrot.lane.b32.xlu0 %v15536_v59, %s17190_s22  ;;  %v15538_v27 = vsub.f32 %v15506_v51, %v14215_v34  ;;  %v13087_v24 = vpop.xlane.xlu0 %13086  ;;  %v17077_v59 = vld [vmem:[%s17308_s13 + $0xa0] sm:$0xff] }
 0x55a   : > { %15606 = vrot.lane.b32.xlu1 %v15533_v44, %s17190_s22  ;;  %v15480_v14 = vmul.f32 %v17077_v59, %v13090_v12  ;;  %v15475_v44 = vmul.f32 %v17078_v48, %v13075_v58  ;;  %v17079_v6 = vld [vmem:[%s17308_s13 + $0x88] sm:$0xff] }
 0x55d   : > { %v13996_v17 = vpop.f32.mrb[90].mxu0  ;;  %15616 = vrot.lane.b32.xlu0 %v15538_v27, %s17190_s22  ;;  %v15477_v27 = vmul.f32 %v17079_v6, %v13081_v3 }
 0x55e   : > { %v15535_v11 = vsub.f32 %v15503_v32, %v13996_v17  ;;  %v14361_v56 = vpop.f32.mrb[96].mxu1  ;;  %v16713_v63 = vpop.f32.mrb[91].mxu0  ;;  %v15507_v32 = vadd.f32 %v17078_v48, %v15475_v44  ;;  %v15512_v17 = vadd.f32 %v17077_v59, %v15480_v14  ;;  %v17082_v14 = vld [vmem:[%s17308_s13 + $0xa8] sm:$0xff] }
 0x55f   : > { %v16738_v25 = vpop.f32.mrb[97].mxu1  ;;  %v15540_v28 = vsub.f32 %v15508_v52, %v14361_v56  ;;  %v13096_v56 = vpop.xlane.xlu1 %13095  ;;  %v17080_v63 = vld [vmem:[%s17308_s13 + $0x98] sm:$0xff]  ;;  %v15509_v12 = vadd.f32 %v17079_v6, %v15477_v27 }
 0x560   : > { %15610 = vrot.lane.b32.xlu1 %v15535_v11, %s17190_s22  ;;  %v13093_v52 = vpop.xlane.xlu0 %13092  ;;  %v15479_v25 = vmul.f32 %v17080_v63, %v13087_v24 }
 0x561   : > { %15620 = vrot.lane.b32.xlu0 %v15540_v28, %s17190_s22  ;;  %v17081_v28 = vld [vmem:[%s17308_s13 + $0xb0] sm:$0xff]  ;;  %v15481_v48 = vmul.f32 %v17082_v14, %v13093_v52 }
 0x562   : > { %v14142_v34 = vpop.f32.mrb[92].mxu0  ;;  %v15511_v44 = vadd.f32 %v17080_v63, %v15479_v25  ;;  %v17084_v63 = vld [vmem:[%s17308_s13 + $0xc0] sm:$0xff] }
 0x563   : > { %v14507_v16 = vpop.f32.mrb[98].mxu1  ;;  %v15537_v29 = vsub.f32 %v15505_v18, %v14142_v34  ;;  %v16723_v4 = vpop.f32.mrb[93].mxu0  ;;  %v15482_v18 = vmul.f32 %v17081_v28, %v13096_v56  ;;  %v15513_v27 = vadd.f32 %v17082_v14, %v15481_v48 }
 0x564   : > { %v15542_v62 = vsub.f32 %v15510_v20, %v14507_v16  ;;  %v16748_v51 = vpop.f32.mrb[99].mxu1  ;;  %v13099_v34 = vpop.xlane.xlu0 %13098 }
 0x565   : > { %15614 = vrot.lane.b32.xlu1 %v15537_v29, %s17190_s22  ;;  %v17083_v51 = vld [vmem:[%s17308_s13 + $0xb8] sm:$0xff]  ;;  %v13102_v52 = vpop.xlane.xlu1 %13101 }
 0x566   : > { %15624 = vrot.lane.b32.xlu0 %v15542_v62, %s17190_s22  ;;  %v15514_v62 = vadd.f32 %v17081_v28, %v15482_v18  ;;  %v15483_v6 = vmul.f32 %v17083_v51, %v13099_v34  ;;  %v15484_v25 = vmul.f32 %v17084_v63, %v13102_v52 }
 0x567   : > { %v14288_v57 = vpop.f32.mrb[94].mxu0 }
 0x568   : > { %v14653_v42 = vpop.f32.mrb[100].mxu1  ;;  %v15539_v21 = vsub.f32 %v15507_v32, %v14288_v57  ;;  %v16733_v35 = vpop.f32.mrb[95].mxu0 }
 0x569   : > { %v15544_v58 = vsub.f32 %v15512_v17, %v14653_v42  ;;  %v16758_v11 = vpop.f32.mrb[101].mxu1 }
 0x56a   : > { %15618 = vrot.lane.b32.xlu1 %v15539_v21, %s17190_s22 }
 0x56b   : > { %15628 = vrot.lane.b32.xlu0 %v15544_v58, %s17190_s22  ;;  %v15515_v58 = vadd.f32 %v17083_v51, %v15483_v6 }
 0x56c   : > { %v14434_v3 = vpop.f32.mrb[96].mxu0 }
 0x56d   : > { %v15541_v20 = vsub.f32 %v15509_v12, %v14434_v3  ;;  %v16743_v59 = vpop.f32.mrb[97].mxu0  ;;  %v15516_v12 = vadd.f32 %v17084_v63, %v15484_v25 }
 0x56e   : > { %v17085_v59 = vld [vmem:[%s17308_s13 + $0xc8] sm:$0xff] }
 0x56f   : > { %15622 = vrot.lane.b32.xlu1 %v15541_v20, %s17190_s22  ;;  %v13105_v20 = vpop.xlane.xlu0 %13104 }
 0x570   : > { %v14580_v16 = vpop.f32.mrb[98].mxu0  ;;  %v15485_v14 = vmul.f32 %v17085_v59, %v13105_v20 }
 0x571   : > { %v15543_v29 = vsub.f32 %v15511_v44, %v14580_v16  ;;  %v16753_v24 = vpop.f32.mrb[99].mxu0 }
 0x572   : > { %v14799_v4 = vpop.f32.mrb[102].mxu1  ;;  %v15517_v48 = vadd.f32 %v17085_v59, %v15485_v14  ;;  %v17090_v59 = vld [vmem:[%s17313_s19 + $0x18] sm:$0xff] }
 0x573   : > { %15626 = vrot.lane.b32.xlu1 %v15543_v29, %s17190_s22  ;;  %v15546_v32 = vsub.f32 %v15514_v62, %v14799_v4  ;;  %v16768_v17 = vpop.f32.mrb[103].mxu1  ;;  %v13108_v29 = vpop.xlane.xlu1 %13107  ;;  %v17086_v4 = vld [vmem:[%s17313_s19] sm:$0xff]  ;;  %v6076_v14 = vadd.f32 %v17090_v59, %v23317_v7 }
 0x574   : > { %v14726_v57 = vpop.f32.mrb[100].mxu0  ;;  %v6073_v51 = vadd.f32 %v17086_v4, %v23243_v23  ;;  %v17088_v23 = vld [vmem:[%s17308_s13 + $0xd0] sm:$0xff]  ;;  %s16049_s13 = sshll.u32 %s17263_s7, 12  ;;  %s23907_s7 = scalar_lea.sflag [#allocation4], %s315_s23 }
 0x575   : > { %v15545_v42 = vsub.f32 %v15513_v27, %v14726_v57  ;;  %v16763_v21 = vpop.f32.mrb[101].mxu0  ;;  %15632 = vrot.lane.b32.xlu0 %v15546_v32, %s17190_s22  ;;  %v15486_v27 = vmul.f32 %v23321_v50, %v13108_v29  ;;  %v17087_v57 = vld [vmem:[%s17313_s19 + $0x10] sm:$0xff]  ;;  %s23898_s11 = scalar_lea.hbm %s23956_s8, %s16049_s13 }
 0x577   : > { %15630 = vrot.lane.b32.xlu1 %v15545_v42, %s17190_s22  ;;  %v6075_v42 = vadd.f32 %v17087_v57, %v23279_v2  ;;  %v17093_v57 = vld [vmem:[%s17313_s19 + $0x30] sm:$0xff] }
 0x578   : > { %v14872_v35 = vpop.f32.mrb[102].mxu0 }
 0x579   : > { %v15547_v11 = vsub.f32 %v15515_v58, %v14872_v35  ;;  %v16773_v56 = vpop.f32.mrb[103].mxu0  ;;  %v13111_v58 = vpop.xlane.xlu0 %13110  ;;  %v15518_v35 = vadd.f32 %v17088_v23, %v15486_v27 }
 0x57b   : > { %15634 = vrot.lane.b32.xlu1 %v15547_v11, %s17190_s22 }
 0x581   : > { %v14945_v3 = vpop.f32.mrb[104].mxu1 }
 0x582   : > { %v15548_v28 = vsub.f32 %v15516_v12, %v14945_v3  ;;  %v16778_v18 = vpop.f32.mrb[105].mxu1  ;;  %v15487_v12 = vmul.f32 %v23383_v31, %v13111_v58  ;;  %v17089_v3 = vld [vmem:[%s17313_s19 + $0x8] sm:$0xff] }
 0x584   : > { %15636 = vrot.lane.b32.xlu0 %v15548_v28, %s17190_s22  ;;  %v6074_v28 = vadd.f32 %v17089_v3, %v23137_v54 }
 0x591   : > { %v23701_v24 = vpop.xlane.xlu1 %13113 }
 0x593   : > { %v15018_v44 = vpop.f32.mrb[104].mxu0 }
 0x594   : > { %v15549_v34 = vsub.f32 %v15517_v48, %v15018_v44  ;;  %v16783_v16 = vpop.f32.mrb[105].mxu0  ;;  %v15519_v44 = vadd.f32 %v23383_v31, %v15487_v12  ;;  %v17092_v31 = vld [vmem:[%s17313_s19 + $0x28] sm:$0xff] }
 0x596   : > { %15638 = vrot.lane.b32.xlu1 %v15549_v34, %s17190_s22  ;;  %v17091_v34 = vld [vmem:[%s17313_s19 + $0x20] sm:$0xff] }
 0x597   : > { %v6077_v16 = vadd.f32 %v17091_v34, %v23307_v8 }
 0x5a0   : > { %v23722_v2 = vpop.xlane.xlu0 %13116 }
 0x5a5   : > { %v23704_v62 = vpop.xlane.xlu1 %13119 }
 0x5a9   : > { %v15589_v6 = vpop.permute.xlu1 %15588 }
 0x5aa   : > { %v15684_v32 = vsel %vm406_vm0, %v6073_v51, %v15589_v6 }
 0x5ab   : > { %v15717_v17 = vsel %vm15716_vm10, %v15684_v32, 0.0 }
 0x5ac   : > { %15749 = vst [vmem:[%s23715_s25] sm:$0xff] %v15717_v17  ;;  %v6078_v17 = vadd.f32 %v17092_v31, %v23346_v9  ;;  %v15488_v31 = vmul.f32 %v23444_v60, %v23701_v24  ;;  %v17102_v24 = vld [vmem:[%s17313_s19 + $0x68] sm:$0xff] }
 0x5ad   : > { %v15593_v21 = vpop.permute.xlu1 %15592  ;;  %v15091_v11 = vpop.f32.mrb[106].mxu1 }
 0x5ae   : > { %v15686_v50 = vsel %vm406_vm0, %v6075_v42, %v15593_v21  ;;  %v15550_v52 = vsub.f32 %v15518_v35, %v15091_v11  ;;  %v16788_v63 = vpop.f32.mrb[107].mxu1  ;;  %v6079_v42 = vadd.f32 %v17093_v57, %v23335_v22  ;;  %v17094_v11 = vld [vmem:[%s17313_s19 + $0x40] sm:$0xff]  ;;  %v17095_v22 = vld [vmem:[%s17313_s19 + $0x38] sm:$0xff] }
 0x5af   : > { %v15719_v56 = vsel %vm15716_vm10, %v15686_v50, 0.0 }
 0x5b0   : > { %15751 = vst [vmem:[%s23715_s25 + $0x10] sm:$0xff] %v15719_v56  ;;  %15640 = vrot.lane.b32.xlu0 %v15550_v52, %s17190_s22  ;;  %v6081_v56 = vadd.f32 %v17094_v11, %v23359_v55  ;;  %v6080_v52 = vadd.f32 %v17095_v22, %v23368_v5 }
 0x5b7   : > { %v23725_v25 = vpop.xlane.xlu0 %13122 }
 0x5bb   : > { %v15591_v18 = vpop.permute.xlu0 %15590 }
 0x5bc   : > { %v15685_v20 = vsel %vm406_vm0, %v6074_v28, %v15591_v18  ;;  %v15164_v54 = vpop.f32.mrb[106].mxu0 }
 0x5bd   : > { %v15718_v48 = vsel %vm15716_vm10, %v15685_v20, 0.0  ;;  %v15595_v29 = vpop.permute.xlu1 %15594  ;;  %v15551_v6 = vsub.f32 %v15519_v44, %v15164_v54  ;;  %v16793_v27 = vpop.f32.mrb[107].mxu0  ;;  %v17096_v20 = vld [vmem:[%s17313_s19 + $0x50] sm:$0xff] }
 0x5be   : > { %15750 = vst [vmem:[%s23715_s25 + $0x8] sm:$0xff] %v15718_v48  ;;  %v15687_v4 = vsel %vm406_vm0, %v6076_v14, %v15595_v29  ;;  %v6083_v59 = vadd.f32 %v17096_v20, %v23392_v30  ;;  %v17097_v14 = vld [vmem:[%s17313_s19 + $0x48] sm:$0xff]  ;;  %v17098_v29 = vld [vmem:[%s17313_s19 + $0x60] sm:$0xff] }
 0x5bf   : > { %v15597_v51 = vpop.permute.xlu0 %15596  ;;  %v15720_v7 = vsel %vm15716_vm10, %v15687_v4, 0.0  ;;  %15642 = vrot.lane.b32.xlu1 %v15551_v6, %s17190_s22  ;;  %v6082_v48 = vadd.f32 %v17097_v14, %v23457_v33  ;;  %v6085_v30 = vadd.f32 %v17098_v29, %v23403_v26  ;;  %v17099_v6 = vld [vmem:[%s17313_s19 + $0x58] sm:$0xff] }
 0x5c0   : > { %v15688_v32 = vsel %vm406_vm0, %v6077_v16, %v15597_v51  ;;  %15752 = vst [vmem:[%s23715_s25 + $0x18] sm:$0xff] %v15720_v7  ;;  %v6084_v27 = vadd.f32 %v17099_v6, %v23479_v43 }
 0x5c1   : > { %v15721_v8 = vsel %vm15716_vm10, %v15688_v32, 0.0  ;;  %v15599_v21 = vpop.permute.xlu1 %15598  ;;  %v17100_v32 = vld [vmem:[%s17313_s19 + $0x70] sm:$0xff] }
 0x5c2   : > { %15753 = vst [vmem:[%s23715_s25 + $0x20] sm:$0xff] %v15721_v8  ;;  %v15689_v58 = vsel %vm406_vm0, %v6078_v17, %v15599_v21  ;;  %v6087_v26 = vadd.f32 %v17100_v32, %v23417_v10  ;;  %v15520_v10 = vadd.f32 %v23444_v60, %v15488_v31  ;;  %v17103_v60 = vld [vmem:[%s17313_s19 + $0x90] sm:$0xff]  ;;  %v15490_v32 = vmul.f32 %v23534_v13, %v23704_v62 }
 0x5c3   : > { %v15601_v23 = vpop.permute.xlu0 %15600  ;;  %v15722_v35 = vsel %vm15716_vm10, %v15689_v58, 0.0  ;;  %v17101_v58 = vld [vmem:[%s17313_s19 + $0x80] sm:$0xff] }
 0x5c4   : > { %v15690_v9 = vsel %vm406_vm0, %v6079_v42, %v15601_v23  ;;  %15754 = vst [vmem:[%s23715_s25 + $0x28] sm:$0xff] %v15722_v35  ;;  %v6089_v23 = vadd.f32 %v17101_v58, %v23529_v49  ;;  %v6086_v35 = vadd.f32 %v17102_v24, %v23522_v1 }
 0x5c5   : > { %v15723_v50 = vsel %vm15716_vm10, %v15690_v9, 0.0 }
 0x5c6   : > { %15755 = vst [vmem:[%s23715_s25 + $0x30] sm:$0xff] %v15723_v50 }
 0x5c7   : > { %v15605_v63 = vpop.permute.xlu0 %15604  ;;  %v15603_v12 = vpop.permute.xlu1 %15602 }
 0x5c8   : > { %v15692_v3 = vsel %vm406_vm0, %v6081_v56, %v15605_v63  ;;  %v15691_v28 = vsel %vm406_vm0, %v6080_v52, %v15603_v12  ;;  %v6091_v12 = vadd.f32 %v17103_v60, %v23547_v39 }
 0x5c9   : > { %v15725_v18 = vsel %vm15716_vm10, %v15692_v3, 0.0  ;;  %v15724_v55 = vsel %vm15716_vm10, %v15691_v28, 0.0  ;;  %v17104_v28 = vld [vmem:[%s17313_s19 + $0x78] sm:$0xff] }
 0x5ca   : > { %15757 = vst [vmem:[%s23715_s25 + $0x40] sm:$0xff] %v15725_v18  ;;  %15756 = vst [vmem:[%s23715_s25 + $0x38] sm:$0xff] %v15724_v55  ;;  %v6088_v18 = vadd.f32 %v17104_v28, %v23591_v41 }
 0x5cb   : > { %v15609_v5 = vpop.permute.xlu0 %15608 }
 0x5cc   : > { %v15694_v44 = vsel %vm406_vm0, %v6083_v59, %v15609_v5  ;;  %v15607_v34 = vpop.permute.xlu1 %15606  ;;  %v17105_v5 = vld [vmem:[%s17313_s19 + $0xa0] sm:$0xff] }
 0x5cd   : > { %v15727_v16 = vsel %vm15716_vm10, %v15694_v44, 0.0  ;;  %v15693_v54 = vsel %vm406_vm0, %v6082_v48, %v15607_v34  ;;  %v6093_v39 = vadd.f32 %v17105_v5, %v23565_v15  ;;  %v17106_v34 = vld [vmem:[%s17313_s19 + $0x88] sm:$0xff] }
 0x5ce   : > { %15759 = vst [vmem:[%s23715_s25 + $0x50] sm:$0xff] %v15727_v16  ;;  %v15726_v4 = vsel %vm15716_vm10, %v15693_v54, 0.0  ;;  %v6090_v41 = vadd.f32 %v17106_v34, %v23608_v45  ;;  %v15489_v16 = vmul.f32 %v23476_v37, %v23722_v2  ;;  %v24882_v34 = vld [vmem:[#allocation61_spill] sm:$0xff] }
 0x5cf   : > { %v15613_v51 = vpop.permute.xlu0 %15612  ;;  %15758 = vst [vmem:[%s23715_s25 + $0x48] sm:$0xff] %v15726_v4 }
 0x5d0   : > { %v15696_v33 = vsel %vm406_vm0, %v6085_v30, %v15613_v51  ;;  %v17107_v51 = vld [vmem:[%s17313_s19 + $0x98] sm:$0xff]  ;;  %v15521_v45 = vadd.f32 %v23476_v37, %v15489_v16 }
 0x5d1   : > { %v15729_v7 = vsel %vm15716_vm10, %v15696_v33, 0.0  ;;  %v6092_v33 = vadd.f32 %v17107_v51, %v23621_v38 }
 0x5d2   : > { %v15611_v17 = vpop.permute.xlu1 %15610  ;;  %15761 = vst [vmem:[%s23715_s25 + $0x60] sm:$0xff] %v15729_v7 }
 0x5d3   : > { %v15695_v8 = vsel %vm406_vm0, %v6084_v27, %v15611_v17  ;;  %v15617_v57 = vpop.permute.xlu0 %15616  ;;  %v17108_v27 = vld [vmem:[%s17313_s19 + $0xb0] sm:$0xff] }
 0x5d4   : > { %v15728_v42 = vsel %vm15716_vm10, %v15695_v8, 0.0  ;;  %v15698_v21 = vsel %vm406_vm0, %v6087_v26, %v15617_v57  ;;  %v6095_v7 = vadd.f32 %v17108_v27, %v23601_v61  ;;  %v17109_v57 = vld [vmem:[%s17313_s19 + $0xa8] sm:$0xff] }
 0x5d5   : > { %15760 = vst [vmem:[%s23715_s25 + $0x58] sm:$0xff] %v15728_v42  ;;  %v15731_v43 = vsel %vm15716_vm10, %v15698_v21, 0.0  ;;  %v6094_v37 = vadd.f32 %v17109_v57, %v23628_v53 }
 0x5d6   : > { %15763 = vst [vmem:[%s23715_s25 + $0x70] sm:$0xff] %v15731_v43  ;;  %v15237_v9 = vpop.f32.mrb[108].mxu1  ;;  %v15522_v43 = vadd.f32 %v23534_v13, %v15490_v32  ;;  %v17111_v13 = vld [vmem:[%s17313_s19 + $0xc0] sm:$0xff] }
 0x5d7   : > { %v15621_v50 = vpop.permute.xlu0 %15620  ;;  %v15552_v11 = vsub.f32 %v15520_v10, %v15237_v9  ;;  %v16798_v56 = vpop.f32.mrb[109].mxu1  ;;  %v17110_v10 = vld [vmem:[%s17313_s19 + $0xb8] sm:$0xff] }
 0x5d8   : > { %v15615_v22 = vpop.permute.xlu1 %15614  ;;  %v15700_v52 = vsel %vm406_vm0, %v6089_v23, %v15621_v50  ;;  %v6096_v53 = vadd.f32 %v17110_v10, %v23635_v36  ;;  %v6097_v56 = vadd.f32 %v17111_v13, %v23615_v19  ;;  %v15491_v36 = vmul.f32 %v23583_v0, %v23725_v25  ;;  %v17112_v19 = vld [vmem:[%s17313_s19 + $0xc8] sm:$0xff] }
 0x5d9   : > { %v15697_v63 = vsel %vm406_vm0, %v6086_v35, %v15615_v22  ;;  %v15733_v49 = vsel %vm15716_vm10, %v15700_v52, 0.0  ;;  %15644 = vrot.lane.b32.xlu0 %v15552_v11, %s17190_s22 }
 0x5da   : > { %v15730_v3 = vsel %vm15716_vm10, %v15697_v63, 0.0  ;;  %15765 = vst [vmem:[%s23715_s25 + $0x80] sm:$0xff] %v15733_v49  ;;  %v15523_v49 = vadd.f32 %v23583_v0, %v15491_v36  ;;  %v17113_v0 = vld [vmem:[%s17313_s19 + $0xd0] sm:$0xff] }
 0x5db   : > { %15762 = vst [vmem:[%s23715_s25 + $0x68] sm:$0xff] %v15730_v3  ;;  %v15625_v1 = vpop.permute.xlu0 %15624 }
 0x5dc   : > { %v15702_v20 = vsel %vm406_vm0, %v6091_v12, %v15625_v1  ;;  %v15619_v59 = vpop.permute.xlu1 %15618  ;;  %v6098_v1 = vadd.f32 %v17112_v19, %v23642_v46  ;;  %v17114_v46 = vld [vmem:[%s17313_s19 + $0xd8] sm:$0xff] }
 0x5dd   : > { %v15735_v55 = vsel %vm15716_vm10, %v15702_v20, 0.0  ;;  %v15699_v14 = vsel %vm406_vm0, %v6088_v18, %v15619_v59  ;;  %v6099_v20 = vadd.f32 %v17113_v0, %v23630_v47  ;;  %v17115_v47 = vld [vmem:[%s17313_s19 + $0xe0] sm:$0xff] }
 0x5de   : > { %15767 = vst [vmem:[%s23715_s25 + $0x90] sm:$0xff] %v15735_v55  ;;  %v15732_v48 = vsel %vm15716_vm10, %v15699_v14, 0.0 }
 0x5df   : > { %v15629_v44 = vpop.permute.xlu0 %15628  ;;  %15764 = vst [vmem:[%s23715_s25 + $0x78] sm:$0xff] %v15732_v48 }
 0x5e0   : > { %v15704_v29 = vsel %vm406_vm0, %v6093_v39, %v15629_v44  ;;  %v6100_v39 = vadd.f32 %v17114_v46, %v23645_v40  ;;  %v17116_v40 = vld [vmem:[%s17313_s19 + $0xe8] sm:$0xff] }
 0x5e1   : > { %v15623_v30 = vpop.permute.xlu1 %15622  ;;  %v15737_v15 = vsel %vm15716_vm10, %v15704_v29, 0.0 }
 0x5e2   : > { %v15701_v54 = vsel %vm406_vm0, %v6090_v41, %v15623_v30  ;;  %15769 = vst [vmem:[%s23715_s25 + $0xa0] sm:$0xff] %v15737_v15  ;;  %v6101_v41 = vadd.f32 %v17115_v47, %v24882_v34  ;;  %v24883_v15 = vld [vmem:[#allocation109_spill] sm:$0xff] }
 0x5e3   : > { %v15734_v4 = vsel %vm15716_vm10, %v15701_v54, 0.0  ;;  %v6102_v54 = vadd.f32 %v17116_v40, %v24883_v15 }
 0x5e4   : > { %15766 = vst [vmem:[%s23715_s25 + $0x88] sm:$0xff] %v15734_v4 }
 0x5e5   : > { %v15627_v2 = vpop.permute.xlu1 %15626  ;;  %v15310_v6 = vpop.f32.mrb[108].mxu0 }
 0x5e6   : > { %v15703_v26 = vsel %vm406_vm0, %v6092_v33, %v15627_v2  ;;  %v15553_v31 = vsub.f32 %v15521_v45, %v15310_v6  ;;  %v16803_v17 = vpop.f32.mrb[109].mxu0  ;;  %v17117_v45 = vld [vmem:[%s17313_s19 + $0xf0] sm:$0xff]  ;;  %v24884_v2 = vld [vmem:[#allocation205_spill] sm:$0xff] }
 0x5e7   : > { %v15736_v8 = vsel %vm15716_vm10, %v15703_v26, 0.0  ;;  %v15633_v38 = vpop.permute.xlu0 %15632  ;;  %v6103_v6 = vadd.f32 %v17117_v45, %v24884_v2  ;;  %v17118_v26 = vld [vmem:[%s17313_s19 + $0xf8] sm:$0xff]  ;;  %s17119_s19 = scalar_lea.vmem %s23900_s26, 4096 }
 0x5e8   : > { %15768 = vst [vmem:[%s23715_s25 + $0x98] sm:$0xff] %v15736_v8  ;;  %15646 = vrot.lane.b32.xlu1 %v15553_v31, %s17190_s22  ;;  %v15706_v61 = vsel %vm406_vm0, %v6095_v7, %v15633_v38  ;;  %v24885_v31 = vld [vmem:[#allocation132_spill] sm:$0xff]  ;;  %p17120_p11 = scmp.ne.s32.totalorder %s23900_s26, %s17119_s19  ;;  %p17127_p1 = scmp.lt.s32.totalorder %s17125_s20, %s17119_s19 }
 0x5e9   : > { %v15631_v42 = vpop.permute.xlu1 %15630  ;;  %v15739_v62 = vsel %vm15716_vm10, %v15706_v61, 0.0  ;;  %v6104_v17 = vadd.f32 %v17118_v26, %v24885_v31 }
 0x5ea   : > { %v15705_v21 = vsel %vm406_vm0, %v6094_v37, %v15631_v42  ;;  %15771 = vst [vmem:[%s23715_s25 + $0xb0] sm:$0xff] %v15739_v62  ;;  %v15383_v23 = vpop.f32.mrb[110].mxu1  ;;  %p17121_p12 = pnand %p17120_p11, %p17280_p5  ;;  %p17128_p2 = por %p17127_p1, %p17126_p0 }
 0x5eb   : > { %v15738_v58 = vsel %vm15716_vm10, %v15705_v21, 0.0  ;;  %v15554_v24 = vsub.f32 %v15522_v43, %v15383_v23  ;;  %v16808_v35 = vpop.f32.mrb[111].mxu1 }
 0x5ec   : > { %15770 = vst [vmem:[%s23715_s25 + $0xa8] sm:$0xff] %v15738_v58  ;;  %p17122_p13 = pneg %p17121_p12 }
 0x5ed   : > { %v15635_v9 = vpop.permute.xlu1 %15634  ;;  %15648 = vrot.lane.b32.xlu0 %v15554_v24, %s17190_s22 }
 0x5ee   : > { %v15707_v50 = vsel %vm406_vm0, %v6096_v53, %v15635_v9  ;;  %p17129_p3 = pnand %p17128_p2, %p17122_p13 }
 0x5ef   : > { %v15740_v11 = vsel %vm15716_vm10, %v15707_v50, 0.0 }
 0x5f0   : > { %15772 = vst [vmem:[%s23715_s25 + $0xb8] sm:$0xff] %v15740_v11 }
 0x5f6   : > { %v15637_v22 = vpop.permute.xlu0 %15636 }
 0x5f7   : > { %v15708_v52 = vsel %vm406_vm0, %v6097_v56, %v15637_v22 }
 0x5f8   : > { %v15741_v63 = vsel %vm15716_vm10, %v15708_v52, 0.0 }
 0x5f9   : > { %15773 = vst [vmem:[%s23715_s25 + $0xc0] sm:$0xff] %v15741_v63 }
 0x5fc   : > { %v15456_v60 = vpop.f32.mrb[110].mxu0 }
 0x5fd   : > { %v15555_v12 = vsub.f32 %v15523_v49, %v15456_v60  ;;  %v16813_v3 = vpop.f32.mrb[111].mxu0 }
 0x5ff   : > { %15650 = vrot.lane.b32.xlu1 %v15555_v12, %s17190_s22 }
 0x608   : > { %v15639_v25 = vpop.permute.xlu1 %15638 }
 0x609   : > { %v15709_v28 = vsel %vm406_vm0, %v6098_v1, %v15639_v25 }
 0x60a   : > { %v15742_v18 = vsel %vm15716_vm10, %v15709_v28, 0.0 }
 0x60b   : > { %15774 = vst [vmem:[%s23715_s25 + $0xc8] sm:$0xff] %v15742_v18 }
 0x622   : > { %v15641_v59 = vpop.permute.xlu0 %15640 }
 0x623   : > { %v15710_v55 = vsel %vm406_vm0, %v6099_v20, %v15641_v59 }
 0x624   : > { %v15743_v5 = vsel %vm15716_vm10, %v15710_v55, 0.0 }
 0x625   : > { %15775 = vst [vmem:[%s23715_s25 + $0xd0] sm:$0xff] %v15743_v5 }
 0x631   : > { %v15643_v14 = vpop.permute.xlu1 %15642 }
 0x632   : > { %v15711_v48 = vsel %vm406_vm0, %v6100_v39, %v15643_v14 }
 0x633   : > { %v15744_v44 = vsel %vm15716_vm10, %v15711_v48, 0.0 }
 0x634   : > { %15776 = vst [vmem:[%s23715_s25 + $0xd8] sm:$0xff] %v15744_v44 }
 0x64b   : > { %v15645_v16 = vpop.permute.xlu0 %15644 }
 0x64c   : > { %v15712_v29 = vsel %vm406_vm0, %v6101_v41, %v15645_v16 }
 0x64d   : > { %v15745_v30 = vsel %vm15716_vm10, %v15712_v29, 0.0 }
 0x64e   : > { %15777 = vst [vmem:[%s23715_s25 + $0xe0] sm:$0xff] %v15745_v30 }
 0x65a   : > { %v15647_v4 = vpop.permute.xlu1 %15646 }
 0x65b   : > { %v15713_v51 = vsel %vm406_vm0, %v6102_v54, %v15647_v4 }
 0x65c   : > { %v15746_v33 = vsel %vm15716_vm10, %v15713_v51, 0.0 }
 0x65d   : > { %15778 = vst [vmem:[%s23715_s25 + $0xe8] sm:$0xff] %v15746_v33 }
 0x65f   : > { %v15649_v27 = vpop.permute.xlu0 %15648 }
 0x660   : > { %v15714_v7 = vsel %vm406_vm0, %v6103_v6, %v15649_v27 }
 0x661   : > { %v15747_v32 = vsel %vm15716_vm10, %v15714_v7, 0.0 }
 0x662   : > { %15779 = vst [vmem:[%s23715_s25 + $0xf0] sm:$0xff] %v15747_v32 }
 0x671   : > { %v15651_v8 = vpop.permute.xlu1 %15650 }
 0x672   : > { %v15715_v38 = vsel %vm406_vm0, %v6104_v17, %v15651_v8 }
 0x673   : > { %v15748_v57 = vsel %vm15716_vm10, %v15715_v38, 0.0 }
 0x674   : > { %15780 = vst [vmem:[%s23715_s25 + $0xf8] sm:$0xff] %v15748_v57 }
 0x675   : > { %17132 = shalt.err (!%p17129_p3)
}
 0x676   : > { %s17133_s21 = scalar_lea.hbm %s23898_s11, 4096  ;;  %s17137_s24 = scalar_lea.hbm %s23956_s8, 32768 }
 0x677   : > { %p17134_p4 = scmp.ne.s32.totalorder %s23898_s11, %s17133_s21  ;;  %p17138_p9 = scmp.lt.u32.totalorder %s23898_s11, %s23956_s8 }
 0x678   : > { %p17139_p10 = scmp.lt.u32.totalorder %s17137_s24, %s17133_s21  ;;  %p17141_p12 = scmp.lt.u32.totalorder %s17133_s21, %s23898_s11 }
 0x679   : > { %p17135_p7 = pnand %p17134_p4, %p17280_p5 }
 0x67a   : > { %p17140_p11 = por %p17139_p10, %p17138_p9 }
 0x67b   : > { %p17136_p8 = pneg %p17135_p7 }
 0x67c   : > { %p17142_p13 = por %p17141_p12, %p17140_p11 }
 0x67e   : > { %p17143_p0 = pnand %p17142_p13, %p17136_p8 }
 0x680   : > { %17146 = shalt.err (!%p17143_p0)
}
 0x681   : > { %s17192_s27 = smov 128   ;;  %s17193_s28 = smov 8  }
 0x682   : > { %16822 = dma.vmem_to_hbm [thread:$0]  (%p17280_p5), %s23900_s26, 4096, %s23898_s11, %s23907_s7, %s17192_s27, %s17192_s27, %s17193_s28  }
 0x683 PF: > { %p16828_p1 = scmp.ge.s32.totalorder %s17181_s10, 2  ;;  %s15810_s19 = sand.u32 1, %s17169_s29  }
 0x684   : > { %s15811_s14 = scalar_lea.sflag [#allocation4], %s15810_s19 }
 0x685   : > { %p16825_p2 = pnand %p16828_p1, %p17284_p6 }
 0x687   : > { %17164 = dma.done.wait (!%p16825_p2), %s15811_s14, 4096  }
 0x688   : > { %17166 = vsyncadd (!%p16825_p2), %s15811_s14, 4294963200  ;;  %p20_p3 = scmp.ge.s32.totalorder %s17267_s12, 10   ;;  %s24886_s29 = smov %s17173_s30 }
 0x689   : > { %s24887_s30 = smov %s17177_s9  ;;  %s24888_s9 = smov %s17278_s15 }
 0x68a   : > { %s24889_s10 = smov %s17267_s12  ;;  %22 = sbr.rel (!%p20_p3) target bundleno = 6 (0x6), region = 90 }
 0x691   :  { %15816 = vsyncpa [#allocation4], 1 }
 0x692   :  { %15818 = vsyncpa [#allocation4 + $0x1], 1 }

</bundles_post_ra>
